<compile_context>
chip_gen: v7x
topology: tpu7x:2x2x1
jax: 0.10.0
libtpu: 0.0.40
codegen_flags: <defaults>
</compile_context>

<pallas_src>
import jax
import jax.numpy as jnp
from jax import lax
from jax.experimental import pallas as pl
from jax.experimental.pallas import tpu as pltpu

N = 16          # number of nodes in the (single) graph
IN_DIM = 31     # GNN_model._calculate_input_dim()
HID = 32        # hidden width of the EGNN
OUT_DIM = 20    # GNN_model._calculate_output_dim() with all flags False
N_LAYERS = 3    # gnn_config['n_layers']


def _silu(v):
    return v * jax.nn.sigmoid(v)


# ------------------------------ fused forward kernel ------------------------------
def fused_gnn_kernel(h_aug_ref, x_ref, wsq_ref, wedge_ref, bias_ref, wout_ref,
                     out_ref, x_out_ref):
    n = h_aug_ref.shape[0]

    # embedding: h_aug = [h_in | 1], wsq rows 0:HID = [w_embed ; b_embed]
    h = jnp.dot(h_aug_ref[...], wsq_ref[0:HID, :],
                preferred_element_type=jnp.float32)                    # [N, H]
    x = x_ref[...]                                                     # [N, 3]

    for l in range(N_LAYERS):                                          # unrolled at trace time
        sq0 = HID + l * 5 * HID                                        # sublane-aligned offsets
        we2 = wsq_ref[sq0 + 0 * HID:sq0 + 1 * HID, :]                  # [H, H]
        wc1 = wsq_ref[sq0 + 1 * HID:sq0 + 2 * HID, :]                  # [H, H]
        wn1 = wsq_ref[sq0 + 2 * HID:sq0 + 4 * HID, :]                  # [2H, H] = [wn1a ; wn1b]
        wn2 = wsq_ref[sq0 + 4 * HID:sq0 + 5 * HID, :]                  # [H, H]
        we1ab = wedge_ref[l * HID:(l + 1) * HID, :]                    # [H, 2H] = [we1a | we1b]

        b0 = l * 8
        we1c = bias_ref[b0 + 0:b0 + 1, :]                              # [1, H]
        be1 = bias_ref[b0 + 1:b0 + 2, :]
        be2 = bias_ref[b0 + 2:b0 + 3, :]
        bc1 = bias_ref[b0 + 3:b0 + 4, :]
        wc2 = bias_ref[b0 + 4:b0 + 5, :]
        bn1 = bias_ref[b0 + 5:b0 + 6, :]
        bn2 = bias_ref[b0 + 6:b0 + 7, :]
        bc2 = bias_ref[b0 + 7, 0]                                      # scalar

        # squared pairwise distances on the VPU (matches sum((xi - xj)^2) of the reference)
        diff = x[:, None, :] - x[None, :, :]                           # [N, N, 3]
        d2 = jnp.sum(diff * diff, axis=-1)                             # [N, N]

        # edge MLP layer 1: one wide matmul gives both i- and j- projections
        u = jnp.dot(h, we1ab, preferred_element_type=jnp.float32)      # [N, 2H]
        a = u[:, :HID]
        b = u[:, HID:]
        pre = a[:, None, :] + b[None, :, :] + d2[:, :, None] * we1c + be1   # [N, N, H]
        m1 = _silu(pre).reshape(n * n, HID)                            # [E, H]
        m2 = _silu(jnp.dot(m1, we2, preferred_element_type=jnp.float32) + be2)  # [E, H]

        # self messages (d2 == 0) -- used to subtract the diagonal instead of masking
        m1s = _silu(a + b + be1)                                       # [N, H]
        m2s = _silu(jnp.dot(m1s, we2, preferred_element_type=jnp.float32) + be2)  # [N, H]

        # coordinate update: per-edge scalar weight via an MXU dot (no lane reduce)
        c = _silu(jnp.dot(m2, wc1, preferred_element_type=jnp.float32) + bc1)    # [E, H]
        w2 = lax.dot_general(c, wc2, (((1,), (1,)), ((), ())),
                             preferred_element_type=jnp.float32).reshape(n, n) + bc2  # [N, N]
        # self term cancels exactly in (x * rowsum - w2 @ x), so no mask is needed here
        rsum = jnp.sum(w2, axis=1, keepdims=True)                      # [N, 1]
        x = x + (x * rsum
                 - jnp.dot(w2, x, preferred_element_type=jnp.float32)) / (n - 1)

        # node update: dense aggregation minus the self message, single stacked matmul
        agg = jnp.sum(m2.reshape(n, n, HID), axis=1) - m2s             # [N, H]
        hin = jnp.concatenate([h, agg], axis=-1)                       # [N, 2H]
        n1 = _silu(jnp.dot(hin, wn1, preferred_element_type=jnp.float32) + bn1)  # [N, H]
        h = h + jnp.dot(n1, wn2, preferred_element_type=jnp.float32) + bn2

    # output projection (bias kept as the last row of the packed wout slab)
    out_ref[...] = (jnp.dot(h, wout_ref[0:HID, :], preferred_element_type=jnp.float32)
                    + wout_ref[HID:HID + 1, :])
    x_out_ref[...] = x


def _full_spec(shape):
    return pl.BlockSpec(shape, lambda i: (0,) * len(shape))


def gnn_forward(h_in, x_in, packed):
    n = h_in.shape[0]
    # fold the embedding bias into an augmented weight row: h_aug = [h_in | 1]
    h_aug = jnp.concatenate([h_in, jnp.ones((n, 1), jnp.float32)], axis=1)   # [N, IN_DIM+1]
    args = (h_aug, x_in, packed["wsq"], packed["wedge"], packed["bias"], packed["wout"])
    out, x_out = pl.pallas_call(
        fused_gnn_kernel,
        out_shape=(jax.ShapeDtypeStruct((n, OUT_DIM), jnp.float32),
                   jax.ShapeDtypeStruct((n, 3), jnp.float32)),
        grid=(1,),
        in_specs=[_full_spec(a.shape) for a in args],
        out_specs=(_full_spec((n, OUT_DIM)), _full_spec((n, 3))),
        compiler_params=pltpu.CompilerParams(
            dimension_semantics=("arbitrary",),
            vmem_limit_bytes=16 * 1024 * 1024),
    )(*args)
    return out, x_out


# --------------------------------- parameters -------------------------------------
def _uniform(key, shape, fan_in):
    bound = 1.0 / float(fan_in) ** 0.5
    return jax.random.uniform(key, shape, jnp.float32, -bound, bound)


def init_params(key):
    keys = jax.random.split(key, 4 + N_LAYERS)
    params = {
        "w_embed": _uniform(keys[0], (IN_DIM, HID), IN_DIM),
        "b_embed": _uniform(keys[1], (1, HID), IN_DIM),
        "w_out": _uniform(keys[2], (HID, OUT_DIM), HID),
        "b_out": _uniform(keys[3], (1, OUT_DIM), HID),
        "layers": [],
    }
    for l in range(N_LAYERS):
        ks = jax.random.split(keys[4 + l], 15)
        fe = 2 * HID + 1    # edge MLP fan-in (h_i || h_j || d2)
        fn = 2 * HID        # node MLP fan-in (h_i || agg)
        layer = (
            _uniform(ks[0], (HID, HID), fe),   # we1a
            _uniform(ks[1], (HID, HID), fe),   # we1b
            _uniform(ks[2], (1, HID), fe),     # we1c (distance column of edge weight)
            _uniform(ks[3], (1, HID), fe),     # be1
            _uniform(ks[4], (HID, HID), HID),  # we2
            _uniform(ks[5], (1, HID), HID),    # be2
            _uniform(ks[6], (HID, HID), HID),  # wc1
            _uniform(ks[7], (1, HID), HID),    # bc1
            _uniform(ks[8], (1, HID), HID),    # wc2 (-> scalar per edge)
            _uniform(ks[9], (1, 1), HID),      # bc2
            _uniform(ks[10], (HID, HID), fn),  # wn1a
            _uniform(ks[11], (HID, HID), fn),  # wn1b
            _uniform(ks[12], (1, HID), fn),    # bn1
            _uniform(ks[13], (HID, HID), HID), # wn2
            _uniform(ks[14], (1, HID), HID),   # bn2
        )
        params["layers"].append(layer)
    return params


def pack_params(p):
    """Pack all weights into 4 sublane-aligned slabs (one DMA each)."""
    sq_blocks = [jnp.concatenate([p["w_embed"], p["b_embed"]], axis=0)]   # [H, H] augmented
    edge_blocks = []
    bias_blocks = []
    for (we1a, we1b, we1c, be1, we2, be2, wc1, bc1, wc2, bc2,
         wn1a, wn1b, bn1, wn2, bn2) in p["layers"]:
        edge_blocks.append(jnp.concatenate([we1a, we1b], axis=1))         # [H, 2H]
        sq_blocks += [we2, wc1, wn1a, wn1b, wn2]                          # 5 x [H, H]
        bc2_row = jnp.zeros((1, HID), jnp.float32).at[0, 0].set(bc2[0, 0])
        bias_blocks.append(jnp.concatenate(
            [we1c, be1, be2, bc1, wc2, bn1, bn2, bc2_row], axis=0))       # [8, H]
    return {
        "wsq": jnp.concatenate(sq_blocks, axis=0),      # [H + 3*5H, H] = [512, 32]
        "wedge": jnp.concatenate(edge_blocks, axis=0),  # [3H, 2H]      = [96, 64]
        "bias": jnp.concatenate(bias_blocks, axis=0),   # [24, 32]
        "wout": jnp.concatenate([p["w_out"], p["b_out"]], axis=0),        # [33, 20]
    }


# ------------------------------ pure-JAX reference --------------------------------
def _egcl_reference(h, x, p):
    (we1a, we1b, we1c, be1, we2, be2, wc1, bc1, wc2, bc2,
     wn1a, wn1b, bn1, wn2, bn2) = p
    n = h.shape[0]
    diff = x[:, None, :] - x[None, :, :]
    d2 = jnp.sum(diff * diff, axis=-1)
    pre = ((h @ we1a)[:, None, :] + (h @ we1b)[None, :, :]
           + d2[:, :, None] * we1c + be1)
    m = jax.nn.silu(pre)
    m = jax.nn.silu(m @ we2 + be2)
    mask = 1.0 - jnp.eye(n, dtype=jnp.float32)
    c = jax.nn.silu(m @ wc1 + bc1)
    w = (jnp.sum(c * wc2, axis=-1) + bc2[0, 0]) * mask
    x_new = x + jnp.sum(diff * w[:, :, None], axis=1) / (n - 1)
    agg = jnp.sum(m * mask[:, :, None], axis=1)
    n1 = jax.nn.silu(h @ wn1a + agg @ wn1b + bn1)
    h_new = h + n1 @ wn2 + bn2
    return h_new, x_new


def gnn_reference(h_in, x_in, params):
    h = h_in @ params["w_embed"] + params["b_embed"]
    x = x_in
    for layer in params["layers"]:
        h, x = _egcl_reference(h, x, layer)
    return h @ params["w_out"] + params["b_out"], x


# ------------------------------------ main -----------------------------------------
if __name__ == "__main__":
    key = jax.random.PRNGKey(0)
    k_feat, k_coord, k_param = jax.random.split(key, 3)
    h_in = jax.random.normal(k_feat, (N, IN_DIM), jnp.float32)
    x_in = jax.random.normal(k_coord, (N, 3), jnp.float32)
    params = init_params(k_param)
    packed = pack_params(params)

    out, coords = gnn_forward(h_in, x_in, packed)
    out, coords = jax.block_until_ready((out, coords))

    ref_out, ref_coords = gnn_reference(h_in, x_in, params)
    assert out.shape == (N, OUT_DIM) and coords.shape == (N, 3)
    assert bool(jnp.all(jnp.isfinite(out))) and bool(jnp.all(jnp.isfinite(coords)))
    assert bool(jnp.allclose(out, ref_out, rtol=5e-2, atol=5e-2))
    assert bool(jnp.allclose(coords, ref_coords, rtol=5e-2, atol=5e-2))

    print("KERNEL_OK")
</pallas_src>

<mosaic_0001>
module attributes {stable_mosaic.version = 11 : i64} {
  func.func @fused_gnn_kernel(%arg0: i32, %arg1: memref<16x32xf32, #tpu.memory_space<vmem>>, %arg2: memref<16x3xf32, #tpu.memory_space<vmem>>, %arg3: memref<512x32xf32, #tpu.memory_space<vmem>>, %arg4: memref<96x64xf32, #tpu.memory_space<vmem>>, %arg5: memref<24x32xf32, #tpu.memory_space<vmem>>, %arg6: memref<33x20xf32, #tpu.memory_space<vmem>>, %arg7: memref<16x20xf32, #tpu.memory_space<vmem>>, %arg8: memref<16x3xf32, #tpu.memory_space<vmem>>) attributes {dimension_semantics = [#tpu.dimension_semantics<arbitrary>], iteration_bounds = array<i64: 1>, scalar_prefetch = 0 : i64, scratch_operands = 0 : i64, tpu.core_type = #tpu.core_type<tc>, window_params = [{pipeline_mode = #tpu.pipeline_mode<synchronous>, transform_indices = @transform_0, window_bounds = array<i64: 16, 32>}, {pipeline_mode = #tpu.pipeline_mode<synchronous>, transform_indices = @transform_1, window_bounds = array<i64: 16, 3>}, {pipeline_mode = #tpu.pipeline_mode<synchronous>, transform_indices = @transform_2, window_bounds = array<i64: 512, 32>}, {pipeline_mode = #tpu.pipeline_mode<synchronous>, transform_indices = @transform_3, window_bounds = array<i64: 96, 64>}, {pipeline_mode = #tpu.pipeline_mode<synchronous>, transform_indices = @transform_4, window_bounds = array<i64: 24, 32>}, {pipeline_mode = #tpu.pipeline_mode<synchronous>, transform_indices = @transform_5, window_bounds = array<i64: 33, 20>}, {pipeline_mode = #tpu.pipeline_mode<synchronous>, transform_indices = @transform_6, window_bounds = array<i64: 16, 20>}, {pipeline_mode = #tpu.pipeline_mode<synchronous>, transform_indices = @transform_7, window_bounds = array<i64: 16, 3>}]} {
    %c0 = arith.constant 0 : index
    %c0_0 = arith.constant 0 : index
    %0 = vector.load %arg1[%c0, %c0_0] : memref<16x32xf32, #tpu.memory_space<vmem>>, vector<16x32xf32>
    %c0_1 = arith.constant 0 : index
    %c0_2 = arith.constant 0 : index
    %1 = vector.load %arg3[%c0_1, %c0_2] : memref<512x32xf32, #tpu.memory_space<vmem>>, vector<32x32xf32>
    %cst = arith.constant dense<0.000000e+00> : vector<16x32xf32>
    %2 = tpu.matmul %0, %1, %cst {dimension_numbers = #tpu.dot_dimension_numbers<[1], [0], [0], [1], [0, 0, 1, 1], [], []>} : vector<16x32xf32>, vector<32x32xf32>, vector<16x32xf32> -> vector<16x32xf32>
    %c0_3 = arith.constant 0 : index
    %c0_4 = arith.constant 0 : index
    %3 = vector.load %arg2[%c0_3, %c0_4] : memref<16x3xf32, #tpu.memory_space<vmem>>, vector<16x3xf32>
    %c32 = arith.constant 32 : index
    %c0_5 = arith.constant 0 : index
    %4 = vector.load %arg3[%c32, %c0_5] : memref<512x32xf32, #tpu.memory_space<vmem>>, vector<32x32xf32>
    %c64 = arith.constant 64 : index
    %c0_6 = arith.constant 0 : index
    %5 = vector.load %arg3[%c64, %c0_6] : memref<512x32xf32, #tpu.memory_space<vmem>>, vector<32x32xf32>
    %c96 = arith.constant 96 : index
    %c0_7 = arith.constant 0 : index
    %6 = vector.load %arg3[%c96, %c0_7] : memref<512x32xf32, #tpu.memory_space<vmem>>, vector<64x32xf32>
    %c160 = arith.constant 160 : index
    %c0_8 = arith.constant 0 : index
    %7 = vector.load %arg3[%c160, %c0_8] : memref<512x32xf32, #tpu.memory_space<vmem>>, vector<32x32xf32>
    %c0_9 = arith.constant 0 : index
    %c0_10 = arith.constant 0 : index
    %8 = vector.load %arg4[%c0_9, %c0_10] : memref<96x64xf32, #tpu.memory_space<vmem>>, vector<32x64xf32>
    %c0_11 = arith.constant 0 : index
    %c0_12 = arith.constant 0 : index
    %9 = vector.load %arg5[%c0_11, %c0_12] : memref<24x32xf32, #tpu.memory_space<vmem>>, vector<1x32xf32>
    %c1 = arith.constant 1 : index
    %c0_13 = arith.constant 0 : index
    %10 = vector.load %arg5[%c1, %c0_13] : memref<24x32xf32, #tpu.memory_space<vmem>>, vector<1x32xf32>
    %c2 = arith.constant 2 : index
    %c0_14 = arith.constant 0 : index
    %11 = vector.load %arg5[%c2, %c0_14] : memref<24x32xf32, #tpu.memory_space<vmem>>, vector<1x32xf32>
    %c3 = arith.constant 3 : index
    %c0_15 = arith.constant 0 : index
    %12 = vector.load %arg5[%c3, %c0_15] : memref<24x32xf32, #tpu.memory_space<vmem>>, vector<1x32xf32>
    %c4 = arith.constant 4 : index
    %c0_16 = arith.constant 0 : index
    %13 = vector.load %arg5[%c4, %c0_16] : memref<24x32xf32, #tpu.memory_space<vmem>>, vector<1x32xf32>
    %c5 = arith.constant 5 : index
    %c0_17 = arith.constant 0 : index
    %14 = vector.load %arg5[%c5, %c0_17] : memref<24x32xf32, #tpu.memory_space<vmem>>, vector<1x32xf32>
    %c6 = arith.constant 6 : index
    %c0_18 = arith.constant 0 : index
    %15 = vector.load %arg5[%c6, %c0_18] : memref<24x32xf32, #tpu.memory_space<vmem>>, vector<1x32xf32>
    %c7 = arith.constant 7 : index
    %c0_19 = arith.constant 0 : index
    %16 = vector.load %arg5[%c7, %c0_19] : memref<24x32xf32, #tpu.memory_space<vmem>>, vector<1x1xf32>
    %17 = vector.extract %16[0, 0] : f32 from vector<1x1xf32>
    %18 = vector.shape_cast %3 : vector<16x3xf32> to vector<16x1x3xf32>
    %19 = vector.shape_cast %3 : vector<16x3xf32> to vector<1x16x3xf32>
    %20 = vector.broadcast %18 : vector<16x1x3xf32> to vector<16x16x3xf32>
    %21 = vector.broadcast %19 : vector<1x16x3xf32> to vector<16x16x3xf32>
    %22 = arith.subf %20, %21 : vector<16x16x3xf32>
    %23 = arith.mulf %22, %22 : vector<16x16x3xf32>
    %cst_20 = arith.constant dense<0.000000e+00> : vector<16x16xf32>
    %24 = vector.multi_reduction <add>, %23, %cst_20 [2] : vector<16x16x3xf32> to vector<16x16xf32>
    %cst_21 = arith.constant dense<0.000000e+00> : vector<16x64xf32>
    %25 = tpu.matmul %2, %8, %cst_21 {dimension_numbers = #tpu.dot_dimension_numbers<[1], [0], [0], [1], [0, 0, 1, 1], [], []>} : vector<16x32xf32>, vector<32x64xf32>, vector<16x64xf32> -> vector<16x64xf32>
    %26 = vector.extract_strided_slice %25 {offsets = [0, 0], sizes = [16, 32], strides = [1, 1]} : vector<16x64xf32> to vector<16x32xf32>
    %27 = vector.extract_strided_slice %25 {offsets = [0, 32], sizes = [16, 32], strides = [1, 1]} : vector<16x64xf32> to vector<16x32xf32>
    %28 = vector.shape_cast %26 : vector<16x32xf32> to vector<16x1x32xf32>
    %29 = vector.shape_cast %27 : vector<16x32xf32> to vector<1x16x32xf32>
    %30 = vector.broadcast %28 : vector<16x1x32xf32> to vector<16x16x32xf32>
    %31 = vector.broadcast %29 : vector<1x16x32xf32> to vector<16x16x32xf32>
    %32 = arith.addf %30, %31 : vector<16x16x32xf32>
    %33 = vector.shape_cast %24 : vector<16x16xf32> to vector<16x16x1xf32>
    %34 = vector.shape_cast %9 : vector<1x32xf32> to vector<1x1x32xf32>
    %35 = vector.broadcast %33 : vector<16x16x1xf32> to vector<16x16x32xf32>
    %36 = vector.broadcast %34 : vector<1x1x32xf32> to vector<16x16x32xf32>
    %37 = arith.mulf %35, %36 : vector<16x16x32xf32>
    %38 = arith.addf %32, %37 : vector<16x16x32xf32>
    %39 = vector.shape_cast %10 : vector<1x32xf32> to vector<1x1x32xf32>
    %40 = vector.broadcast %39 : vector<1x1x32xf32> to vector<16x16x32xf32>
    %41 = arith.addf %38, %40 : vector<16x16x32xf32>
    %42 = arith.negf %41 : vector<16x16x32xf32>
    %43 = math.exp %42 : vector<16x16x32xf32>
    %cst_22 = arith.constant 1.000000e+00 : f32
    %44 = vector.broadcast %cst_22 : f32 to vector<16x16x32xf32>
    %45 = arith.addf %44, %43 : vector<16x16x32xf32>
    %46 = arith.divf %44, %45 : vector<16x16x32xf32>
    %47 = arith.mulf %41, %46 : vector<16x16x32xf32>
    %48 = vector.shape_cast %47 : vector<16x16x32xf32> to vector<256x32xf32>
    %cst_23 = arith.constant dense<0.000000e+00> : vector<256x32xf32>
    %49 = tpu.matmul %48, %4, %cst_23 {dimension_numbers = #tpu.dot_dimension_numbers<[1], [0], [0], [1], [0, 0, 1, 1], [], []>} : vector<256x32xf32>, vector<32x32xf32>, vector<256x32xf32> -> vector<256x32xf32>
    %50 = vector.broadcast %11 : vector<1x32xf32> to vector<256x32xf32>
    %51 = arith.addf %49, %50 : vector<256x32xf32>
    %52 = arith.negf %51 : vector<256x32xf32>
    %53 = math.exp %52 : vector<256x32xf32>
    %cst_24 = arith.constant 1.000000e+00 : f32
    %54 = vector.broadcast %cst_24 : f32 to vector<256x32xf32>
    %55 = arith.addf %54, %53 : vector<256x32xf32>
    %56 = arith.divf %54, %55 : vector<256x32xf32>
    %57 = arith.mulf %51, %56 : vector<256x32xf32>
    %58 = arith.addf %26, %27 : vector<16x32xf32>
    %59 = vector.broadcast %10 : vector<1x32xf32> to vector<16x32xf32>
    %60 = arith.addf %58, %59 : vector<16x32xf32>
    %61 = arith.negf %60 : vector<16x32xf32>
    %62 = math.exp %61 : vector<16x32xf32>
    %cst_25 = arith.constant 1.000000e+00 : f32
    %63 = vector.broadcast %cst_25 : f32 to vector<16x32xf32>
    %64 = arith.addf %63, %62 : vector<16x32xf32>
    %65 = arith.divf %63, %64 : vector<16x32xf32>
    %66 = arith.mulf %60, %65 : vector<16x32xf32>
    %cst_26 = arith.constant dense<0.000000e+00> : vector<16x32xf32>
    %67 = tpu.matmul %66, %4, %cst_26 {dimension_numbers = #tpu.dot_dimension_numbers<[1], [0], [0], [1], [0, 0, 1, 1], [], []>} : vector<16x32xf32>, vector<32x32xf32>, vector<16x32xf32> -> vector<16x32xf32>
    %68 = vector.broadcast %11 : vector<1x32xf32> to vector<16x32xf32>
    %69 = arith.addf %67, %68 : vector<16x32xf32>
    %70 = arith.negf %69 : vector<16x32xf32>
    %71 = math.exp %70 : vector<16x32xf32>
    %cst_27 = arith.constant 1.000000e+00 : f32
    %72 = vector.broadcast %cst_27 : f32 to vector<16x32xf32>
    %73 = arith.addf %72, %71 : vector<16x32xf32>
    %74 = arith.divf %72, %73 : vector<16x32xf32>
    %75 = arith.mulf %69, %74 : vector<16x32xf32>
    %cst_28 = arith.constant dense<0.000000e+00> : vector<256x32xf32>
    %76 = tpu.matmul %57, %5, %cst_28 {dimension_numbers = #tpu.dot_dimension_numbers<[1], [0], [0], [1], [0, 0, 1, 1], [], []>} : vector<256x32xf32>, vector<32x32xf32>, vector<256x32xf32> -> vector<256x32xf32>
    %77 = vector.broadcast %12 : vector<1x32xf32> to vector<256x32xf32>
    %78 = arith.addf %76, %77 : vector<256x32xf32>
    %79 = arith.negf %78 : vector<256x32xf32>
    %80 = math.exp %79 : vector<256x32xf32>
    %cst_29 = arith.constant 1.000000e+00 : f32
    %81 = vector.broadcast %cst_29 : f32 to vector<256x32xf32>
    %82 = arith.addf %81, %80 : vector<256x32xf32>
    %83 = arith.divf %81, %82 : vector<256x32xf32>
    %84 = arith.mulf %78, %83 : vector<256x32xf32>
    %cst_30 = arith.constant dense<0.000000e+00> : vector<256x1xf32>
    %85 = tpu.matmul %84, %13, %cst_30 {dimension_numbers = #tpu.dot_dimension_numbers<[1], [1], [0], [0], [0, 0, 1, 0], [], []>} : vector<256x32xf32>, vector<1x32xf32>, vector<256x1xf32> -> vector<256x1xf32>
    %86 = vector.shape_cast %85 : vector<256x1xf32> to vector<16x16xf32>
    %87 = vector.broadcast %17 : f32 to vector<16x16xf32>
    %88 = arith.addf %86, %87 : vector<16x16xf32>
    %cst_31 = arith.constant dense<0.000000e+00> : vector<16xf32>
    %89 = vector.multi_reduction <add>, %88, %cst_31 [1] : vector<16x16xf32> to vector<16xf32>
    %90 = vector.shape_cast %89 : vector<16xf32> to vector<16x1xf32>
    %91 = vector.broadcast %90 : vector<16x1xf32> to vector<16x3xf32>
    %92 = arith.mulf %3, %91 : vector<16x3xf32>
    %cst_32 = arith.constant dense<0.000000e+00> : vector<16x3xf32>
    %93 = tpu.matmul %88, %3, %cst_32 {dimension_numbers = #tpu.dot_dimension_numbers<[1], [0], [0], [1], [0, 0, 1, 1], [], []>} : vector<16x16xf32>, vector<16x3xf32>, vector<16x3xf32> -> vector<16x3xf32>
    %94 = arith.subf %92, %93 : vector<16x3xf32>
    %cst_33 = arith.constant 1.500000e+01 : f32
    %95 = vector.broadcast %cst_33 : f32 to vector<16x3xf32>
    %96 = arith.divf %94, %95 : vector<16x3xf32>
    %97 = arith.addf %3, %96 : vector<16x3xf32>
    %98 = vector.shape_cast %57 : vector<256x32xf32> to vector<16x16x32xf32>
    %cst_34 = arith.constant dense<0.000000e+00> : vector<16x32xf32>
    %99 = vector.multi_reduction <add>, %98, %cst_34 [1] : vector<16x16x32xf32> to vector<16x32xf32>
    %100 = arith.subf %99, %75 : vector<16x32xf32>
    %101 = tpu.concatenate %2, %100 in 1 : vector<16x32xf32>, vector<16x32xf32> -> vector<16x64xf32>
    %cst_35 = arith.constant dense<0.000000e+00> : vector<16x32xf32>
    %102 = tpu.matmul %101, %6, %cst_35 {dimension_numbers = #tpu.dot_dimension_numbers<[1], [0], [0], [1], [0, 0, 1, 1], [], []>} : vector<16x64xf32>, vector<64x32xf32>, vector<16x32xf32> -> vector<16x32xf32>
    %103 = vector.broadcast %14 : vector<1x32xf32> to vector<16x32xf32>
    %104 = arith.addf %102, %103 : vector<16x32xf32>
    %105 = arith.negf %104 : vector<16x32xf32>
    %106 = math.exp %105 : vector<16x32xf32>
    %cst_36 = arith.constant 1.000000e+00 : f32
    %107 = vector.broadcast %cst_36 : f32 to vector<16x32xf32>
    %108 = arith.addf %107, %106 : vector<16x32xf32>
    %109 = arith.divf %107, %108 : vector<16x32xf32>
    %110 = arith.mulf %104, %109 : vector<16x32xf32>
    %cst_37 = arith.constant dense<0.000000e+00> : vector<16x32xf32>
    %111 = tpu.matmul %110, %7, %cst_37 {dimension_numbers = #tpu.dot_dimension_numbers<[1], [0], [0], [1], [0, 0, 1, 1], [], []>} : vector<16x32xf32>, vector<32x32xf32>, vector<16x32xf32> -> vector<16x32xf32>
    %112 = arith.addf %2, %111 : vector<16x32xf32>
    %113 = vector.broadcast %15 : vector<1x32xf32> to vector<16x32xf32>
    %114 = arith.addf %112, %113 : vector<16x32xf32>
    %c192 = arith.constant 192 : index
    %c0_38 = arith.constant 0 : index
    %115 = vector.load %arg3[%c192, %c0_38] : memref<512x32xf32, #tpu.memory_space<vmem>>, vector<32x32xf32>
    %c224 = arith.constant 224 : index
    %c0_39 = arith.constant 0 : index
    %116 = vector.load %arg3[%c224, %c0_39] : memref<512x32xf32, #tpu.memory_space<vmem>>, vector<32x32xf32>
    %c256 = arith.constant 256 : index
    %c0_40 = arith.constant 0 : index
    %117 = vector.load %arg3[%c256, %c0_40] : memref<512x32xf32, #tpu.memory_space<vmem>>, vector<64x32xf32>
    %c320 = arith.constant 320 : index
    %c0_41 = arith.constant 0 : index
    %118 = vector.load %arg3[%c320, %c0_41] : memref<512x32xf32, #tpu.memory_space<vmem>>, vector<32x32xf32>
    %c32_42 = arith.constant 32 : index
    %c0_43 = arith.constant 0 : index
    %119 = vector.load %arg4[%c32_42, %c0_43] : memref<96x64xf32, #tpu.memory_space<vmem>>, vector<32x64xf32>
    %c8 = arith.constant 8 : index
    %c0_44 = arith.constant 0 : index
    %120 = vector.load %arg5[%c8, %c0_44] : memref<24x32xf32, #tpu.memory_space<vmem>>, vector<1x32xf32>
    %c9 = arith.constant 9 : index
    %c0_45 = arith.constant 0 : index
    %121 = vector.load %arg5[%c9, %c0_45] : memref<24x32xf32, #tpu.memory_space<vmem>>, vector<1x32xf32>
    %c10 = arith.constant 10 : index
    %c0_46 = arith.constant 0 : index
    %122 = vector.load %arg5[%c10, %c0_46] : memref<24x32xf32, #tpu.memory_space<vmem>>, vector<1x32xf32>
    %c11 = arith.constant 11 : index
    %c0_47 = arith.constant 0 : index
    %123 = vector.load %arg5[%c11, %c0_47] : memref<24x32xf32, #tpu.memory_space<vmem>>, vector<1x32xf32>
    %c12 = arith.constant 12 : index
    %c0_48 = arith.constant 0 : index
    %124 = vector.load %arg5[%c12, %c0_48] : memref<24x32xf32, #tpu.memory_space<vmem>>, vector<1x32xf32>
    %c13 = arith.constant 13 : index
    %c0_49 = arith.constant 0 : index
    %125 = vector.load %arg5[%c13, %c0_49] : memref<24x32xf32, #tpu.memory_space<vmem>>, vector<1x32xf32>
    %c14 = arith.constant 14 : index
    %c0_50 = arith.constant 0 : index
    %126 = vector.load %arg5[%c14, %c0_50] : memref<24x32xf32, #tpu.memory_space<vmem>>, vector<1x32xf32>
    %c15 = arith.constant 15 : index
    %c0_51 = arith.constant 0 : index
    %127 = vector.load %arg5[%c15, %c0_51] : memref<24x32xf32, #tpu.memory_space<vmem>>, vector<1x1xf32>
    %128 = vector.extract %127[0, 0] : f32 from vector<1x1xf32>
    %129 = vector.shape_cast %97 : vector<16x3xf32> to vector<16x1x3xf32>
    %130 = vector.shape_cast %97 : vector<16x3xf32> to vector<1x16x3xf32>
    %131 = vector.broadcast %129 : vector<16x1x3xf32> to vector<16x16x3xf32>
    %132 = vector.broadcast %130 : vector<1x16x3xf32> to vector<16x16x3xf32>
    %133 = arith.subf %131, %132 : vector<16x16x3xf32>
    %134 = arith.mulf %133, %133 : vector<16x16x3xf32>
    %cst_52 = arith.constant dense<0.000000e+00> : vector<16x16xf32>
    %135 = vector.multi_reduction <add>, %134, %cst_52 [2] : vector<16x16x3xf32> to vector<16x16xf32>
    %cst_53 = arith.constant dense<0.000000e+00> : vector<16x64xf32>
    %136 = tpu.matmul %114, %119, %cst_53 {dimension_numbers = #tpu.dot_dimension_numbers<[1], [0], [0], [1], [0, 0, 1, 1], [], []>} : vector<16x32xf32>, vector<32x64xf32>, vector<16x64xf32> -> vector<16x64xf32>
    %137 = vector.extract_strided_slice %136 {offsets = [0, 0], sizes = [16, 32], strides = [1, 1]} : vector<16x64xf32> to vector<16x32xf32>
    %138 = vector.extract_strided_slice %136 {offsets = [0, 32], sizes = [16, 32], strides = [1, 1]} : vector<16x64xf32> to vector<16x32xf32>
    %139 = vector.shape_cast %137 : vector<16x32xf32> to vector<16x1x32xf32>
    %140 = vector.shape_cast %138 : vector<16x32xf32> to vector<1x16x32xf32>
    %141 = vector.broadcast %139 : vector<16x1x32xf32> to vector<16x16x32xf32>
    %142 = vector.broadcast %140 : vector<1x16x32xf32> to vector<16x16x32xf32>
    %143 = arith.addf %141, %142 : vector<16x16x32xf32>
    %144 = vector.shape_cast %135 : vector<16x16xf32> to vector<16x16x1xf32>
    %145 = vector.shape_cast %120 : vector<1x32xf32> to vector<1x1x32xf32>
    %146 = vector.broadcast %144 : vector<16x16x1xf32> to vector<16x16x32xf32>
    %147 = vector.broadcast %145 : vector<1x1x32xf32> to vector<16x16x32xf32>
    %148 = arith.mulf %146, %147 : vector<16x16x32xf32>
    %149 = arith.addf %143, %148 : vector<16x16x32xf32>
    %150 = vector.shape_cast %121 : vector<1x32xf32> to vector<1x1x32xf32>
    %151 = vector.broadcast %150 : vector<1x1x32xf32> to vector<16x16x32xf32>
    %152 = arith.addf %149, %151 : vector<16x16x32xf32>
    %153 = arith.negf %152 : vector<16x16x32xf32>
    %154 = math.exp %153 : vector<16x16x32xf32>
    %cst_54 = arith.constant 1.000000e+00 : f32
    %155 = vector.broadcast %cst_54 : f32 to vector<16x16x32xf32>
    %156 = arith.addf %155, %154 : vector<16x16x32xf32>
    %157 = arith.divf %155, %156 : vector<16x16x32xf32>
    %158 = arith.mulf %152, %157 : vector<16x16x32xf32>
    %159 = vector.shape_cast %158 : vector<16x16x32xf32> to vector<256x32xf32>
    %cst_55 = arith.constant dense<0.000000e+00> : vector<256x32xf32>
    %160 = tpu.matmul %159, %115, %cst_55 {dimension_numbers = #tpu.dot_dimension_numbers<[1], [0], [0], [1], [0, 0, 1, 1], [], []>} : vector<256x32xf32>, vector<32x32xf32>, vector<256x32xf32> -> vector<256x32xf32>
    %161 = vector.broadcast %122 : vector<1x32xf32> to vector<256x32xf32>
    %162 = arith.addf %160, %161 : vector<256x32xf32>
    %163 = arith.negf %162 : vector<256x32xf32>
    %164 = math.exp %163 : vector<256x32xf32>
    %cst_56 = arith.constant 1.000000e+00 : f32
    %165 = vector.broadcast %cst_56 : f32 to vector<256x32xf32>
    %166 = arith.addf %165, %164 : vector<256x32xf32>
    %167 = arith.divf %165, %166 : vector<256x32xf32>
    %168 = arith.mulf %162, %167 : vector<256x32xf32>
    %169 = arith.addf %137, %138 : vector<16x32xf32>
    %170 = vector.broadcast %121 : vector<1x32xf32> to vector<16x32xf32>
    %171 = arith.addf %169, %170 : vector<16x32xf32>
    %172 = arith.negf %171 : vector<16x32xf32>
    %173 = math.exp %172 : vector<16x32xf32>
    %cst_57 = arith.constant 1.000000e+00 : f32
    %174 = vector.broadcast %cst_57 : f32 to vector<16x32xf32>
    %175 = arith.addf %174, %173 : vector<16x32xf32>
    %176 = arith.divf %174, %175 : vector<16x32xf32>
    %177 = arith.mulf %171, %176 : vector<16x32xf32>
    %cst_58 = arith.constant dense<0.000000e+00> : vector<16x32xf32>
    %178 = tpu.matmul %177, %115, %cst_58 {dimension_numbers = #tpu.dot_dimension_numbers<[1], [0], [0], [1], [0, 0, 1, 1], [], []>} : vector<16x32xf32>, vector<32x32xf32>, vector<16x32xf32> -> vector<16x32xf32>
    %179 = vector.broadcast %122 : vector<1x32xf32> to vector<16x32xf32>
    %180 = arith.addf %178, %179 : vector<16x32xf32>
    %181 = arith.negf %180 : vector<16x32xf32>
    %182 = math.exp %181 : vector<16x32xf32>
    %cst_59 = arith.constant 1.000000e+00 : f32
    %183 = vector.broadcast %cst_59 : f32 to vector<16x32xf32>
    %184 = arith.addf %183, %182 : vector<16x32xf32>
    %185 = arith.divf %183, %184 : vector<16x32xf32>
    %186 = arith.mulf %180, %185 : vector<16x32xf32>
    %cst_60 = arith.constant dense<0.000000e+00> : vector<256x32xf32>
    %187 = tpu.matmul %168, %116, %cst_60 {dimension_numbers = #tpu.dot_dimension_numbers<[1], [0], [0], [1], [0, 0, 1, 1], [], []>} : vector<256x32xf32>, vector<32x32xf32>, vector<256x32xf32> -> vector<256x32xf32>
    %188 = vector.broadcast %123 : vector<1x32xf32> to vector<256x32xf32>
    %189 = arith.addf %187, %188 : vector<256x32xf32>
    %190 = arith.negf %189 : vector<256x32xf32>
    %191 = math.exp %190 : vector<256x32xf32>
    %cst_61 = arith.constant 1.000000e+00 : f32
    %192 = vector.broadcast %cst_61 : f32 to vector<256x32xf32>
    %193 = arith.addf %192, %191 : vector<256x32xf32>
    %194 = arith.divf %192, %193 : vector<256x32xf32>
    %195 = arith.mulf %189, %194 : vector<256x32xf32>
    %cst_62 = arith.constant dense<0.000000e+00> : vector<256x1xf32>
    %196 = tpu.matmul %195, %124, %cst_62 {dimension_numbers = #tpu.dot_dimension_numbers<[1], [1], [0], [0], [0, 0, 1, 0], [], []>} : vector<256x32xf32>, vector<1x32xf32>, vector<256x1xf32> -> vector<256x1xf32>
    %197 = vector.shape_cast %196 : vector<256x1xf32> to vector<16x16xf32>
    %198 = vector.broadcast %128 : f32 to vector<16x16xf32>
    %199 = arith.addf %197, %198 : vector<16x16xf32>
    %cst_63 = arith.constant dense<0.000000e+00> : vector<16xf32>
    %200 = vector.multi_reduction <add>, %199, %cst_63 [1] : vector<16x16xf32> to vector<16xf32>
    %201 = vector.shape_cast %200 : vector<16xf32> to vector<16x1xf32>
    %202 = vector.broadcast %201 : vector<16x1xf32> to vector<16x3xf32>
    %203 = arith.mulf %97, %202 : vector<16x3xf32>
    %cst_64 = arith.constant dense<0.000000e+00> : vector<16x3xf32>
    %204 = tpu.matmul %199, %97, %cst_64 {dimension_numbers = #tpu.dot_dimension_numbers<[1], [0], [0], [1], [0, 0, 1, 1], [], []>} : vector<16x16xf32>, vector<16x3xf32>, vector<16x3xf32> -> vector<16x3xf32>
    %205 = arith.subf %203, %204 : vector<16x3xf32>
    %cst_65 = arith.constant 1.500000e+01 : f32
    %206 = vector.broadcast %cst_65 : f32 to vector<16x3xf32>
    %207 = arith.divf %205, %206 : vector<16x3xf32>
    %208 = arith.addf %97, %207 : vector<16x3xf32>
    %209 = vector.shape_cast %168 : vector<256x32xf32> to vector<16x16x32xf32>
    %cst_66 = arith.constant dense<0.000000e+00> : vector<16x32xf32>
    %210 = vector.multi_reduction <add>, %209, %cst_66 [1] : vector<16x16x32xf32> to vector<16x32xf32>
    %211 = arith.subf %210, %186 : vector<16x32xf32>
    %212 = tpu.concatenate %114, %211 in 1 : vector<16x32xf32>, vector<16x32xf32> -> vector<16x64xf32>
    %cst_67 = arith.constant dense<0.000000e+00> : vector<16x32xf32>
    %213 = tpu.matmul %212, %117, %cst_67 {dimension_numbers = #tpu.dot_dimension_numbers<[1], [0], [0], [1], [0, 0, 1, 1], [], []>} : vector<16x64xf32>, vector<64x32xf32>, vector<16x32xf32> -> vector<16x32xf32>
    %214 = vector.broadcast %125 : vector<1x32xf32> to vector<16x32xf32>
    %215 = arith.addf %213, %214 : vector<16x32xf32>
    %216 = arith.negf %215 : vector<16x32xf32>
    %217 = math.exp %216 : vector<16x32xf32>
    %cst_68 = arith.constant 1.000000e+00 : f32
    %218 = vector.broadcast %cst_68 : f32 to vector<16x32xf32>
    %219 = arith.addf %218, %217 : vector<16x32xf32>
    %220 = arith.divf %218, %219 : vector<16x32xf32>
    %221 = arith.mulf %215, %220 : vector<16x32xf32>
    %cst_69 = arith.constant dense<0.000000e+00> : vector<16x32xf32>
    %222 = tpu.matmul %221, %118, %cst_69 {dimension_numbers = #tpu.dot_dimension_numbers<[1], [0], [0], [1], [0, 0, 1, 1], [], []>} : vector<16x32xf32>, vector<32x32xf32>, vector<16x32xf32> -> vector<16x32xf32>
    %223 = arith.addf %114, %222 : vector<16x32xf32>
    %224 = vector.broadcast %126 : vector<1x32xf32> to vector<16x32xf32>
    %225 = arith.addf %223, %224 : vector<16x32xf32>
    %c352 = arith.constant 352 : index
    %c0_70 = arith.constant 0 : index
    %226 = vector.load %arg3[%c352, %c0_70] : memref<512x32xf32, #tpu.memory_space<vmem>>, vector<32x32xf32>
    %c384 = arith.constant 384 : index
    %c0_71 = arith.constant 0 : index
    %227 = vector.load %arg3[%c384, %c0_71] : memref<512x32xf32, #tpu.memory_space<vmem>>, vector<32x32xf32>
    %c416 = arith.constant 416 : index
    %c0_72 = arith.constant 0 : index
    %228 = vector.load %arg3[%c416, %c0_72] : memref<512x32xf32, #tpu.memory_space<vmem>>, vector<64x32xf32>
    %c480 = arith.constant 480 : index
    %c0_73 = arith.constant 0 : index
    %229 = vector.load %arg3[%c480, %c0_73] : memref<512x32xf32, #tpu.memory_space<vmem>>, vector<32x32xf32>
    %c64_74 = arith.constant 64 : index
    %c0_75 = arith.constant 0 : index
    %230 = vector.load %arg4[%c64_74, %c0_75] : memref<96x64xf32, #tpu.memory_space<vmem>>, vector<32x64xf32>
    %c16 = arith.constant 16 : index
    %c0_76 = arith.constant 0 : index
    %231 = vector.load %arg5[%c16, %c0_76] : memref<24x32xf32, #tpu.memory_space<vmem>>, vector<1x32xf32>
    %c17 = arith.constant 17 : index
    %c0_77 = arith.constant 0 : index
    %232 = vector.load %arg5[%c17, %c0_77] : memref<24x32xf32, #tpu.memory_space<vmem>>, vector<1x32xf32>
    %c18 = arith.constant 18 : index
    %c0_78 = arith.constant 0 : index
    %233 = vector.load %arg5[%c18, %c0_78] : memref<24x32xf32, #tpu.memory_space<vmem>>, vector<1x32xf32>
    %c19 = arith.constant 19 : index
    %c0_79 = arith.constant 0 : index
    %234 = vector.load %arg5[%c19, %c0_79] : memref<24x32xf32, #tpu.memory_space<vmem>>, vector<1x32xf32>
    %c20 = arith.constant 20 : index
    %c0_80 = arith.constant 0 : index
    %235 = vector.load %arg5[%c20, %c0_80] : memref<24x32xf32, #tpu.memory_space<vmem>>, vector<1x32xf32>
    %c21 = arith.constant 21 : index
    %c0_81 = arith.constant 0 : index
    %236 = vector.load %arg5[%c21, %c0_81] : memref<24x32xf32, #tpu.memory_space<vmem>>, vector<1x32xf32>
    %c22 = arith.constant 22 : index
    %c0_82 = arith.constant 0 : index
    %237 = vector.load %arg5[%c22, %c0_82] : memref<24x32xf32, #tpu.memory_space<vmem>>, vector<1x32xf32>
    %c23 = arith.constant 23 : index
    %c0_83 = arith.constant 0 : index
    %238 = vector.load %arg5[%c23, %c0_83] : memref<24x32xf32, #tpu.memory_space<vmem>>, vector<1x1xf32>
    %239 = vector.extract %238[0, 0] : f32 from vector<1x1xf32>
    %240 = vector.shape_cast %208 : vector<16x3xf32> to vector<16x1x3xf32>
    %241 = vector.shape_cast %208 : vector<16x3xf32> to vector<1x16x3xf32>
    %242 = vector.broadcast %240 : vector<16x1x3xf32> to vector<16x16x3xf32>
    %243 = vector.broadcast %241 : vector<1x16x3xf32> to vector<16x16x3xf32>
    %244 = arith.subf %242, %243 : vector<16x16x3xf32>
    %245 = arith.mulf %244, %244 : vector<16x16x3xf32>
    %cst_84 = arith.constant dense<0.000000e+00> : vector<16x16xf32>
    %246 = vector.multi_reduction <add>, %245, %cst_84 [2] : vector<16x16x3xf32> to vector<16x16xf32>
    %cst_85 = arith.constant dense<0.000000e+00> : vector<16x64xf32>
    %247 = tpu.matmul %225, %230, %cst_85 {dimension_numbers = #tpu.dot_dimension_numbers<[1], [0], [0], [1], [0, 0, 1, 1], [], []>} : vector<16x32xf32>, vector<32x64xf32>, vector<16x64xf32> -> vector<16x64xf32>
    %248 = vector.extract_strided_slice %247 {offsets = [0, 0], sizes = [16, 32], strides = [1, 1]} : vector<16x64xf32> to vector<16x32xf32>
    %249 = vector.extract_strided_slice %247 {offsets = [0, 32], sizes = [16, 32], strides = [1, 1]} : vector<16x64xf32> to vector<16x32xf32>
    %250 = vector.shape_cast %248 : vector<16x32xf32> to vector<16x1x32xf32>
    %251 = vector.shape_cast %249 : vector<16x32xf32> to vector<1x16x32xf32>
    %252 = vector.broadcast %250 : vector<16x1x32xf32> to vector<16x16x32xf32>
    %253 = vector.broadcast %251 : vector<1x16x32xf32> to vector<16x16x32xf32>
    %254 = arith.addf %252, %253 : vector<16x16x32xf32>
    %255 = vector.shape_cast %246 : vector<16x16xf32> to vector<16x16x1xf32>
    %256 = vector.shape_cast %231 : vector<1x32xf32> to vector<1x1x32xf32>
    %257 = vector.broadcast %255 : vector<16x16x1xf32> to vector<16x16x32xf32>
    %258 = vector.broadcast %256 : vector<1x1x32xf32> to vector<16x16x32xf32>
    %259 = arith.mulf %257, %258 : vector<16x16x32xf32>
    %260 = arith.addf %254, %259 : vector<16x16x32xf32>
    %261 = vector.shape_cast %232 : vector<1x32xf32> to vector<1x1x32xf32>
    %262 = vector.broadcast %261 : vector<1x1x32xf32> to vector<16x16x32xf32>
    %263 = arith.addf %260, %262 : vector<16x16x32xf32>
    %264 = arith.negf %263 : vector<16x16x32xf32>
    %265 = math.exp %264 : vector<16x16x32xf32>
    %cst_86 = arith.constant 1.000000e+00 : f32
    %266 = vector.broadcast %cst_86 : f32 to vector<16x16x32xf32>
    %267 = arith.addf %266, %265 : vector<16x16x32xf32>
    %268 = arith.divf %266, %267 : vector<16x16x32xf32>
    %269 = arith.mulf %263, %268 : vector<16x16x32xf32>
    %270 = vector.shape_cast %269 : vector<16x16x32xf32> to vector<256x32xf32>
    %cst_87 = arith.constant dense<0.000000e+00> : vector<256x32xf32>
    %271 = tpu.matmul %270, %226, %cst_87 {dimension_numbers = #tpu.dot_dimension_numbers<[1], [0], [0], [1], [0, 0, 1, 1], [], []>} : vector<256x32xf32>, vector<32x32xf32>, vector<256x32xf32> -> vector<256x32xf32>
    %272 = vector.broadcast %233 : vector<1x32xf32> to vector<256x32xf32>
    %273 = arith.addf %271, %272 : vector<256x32xf32>
    %274 = arith.negf %273 : vector<256x32xf32>
    %275 = math.exp %274 : vector<256x32xf32>
    %cst_88 = arith.constant 1.000000e+00 : f32
    %276 = vector.broadcast %cst_88 : f32 to vector<256x32xf32>
    %277 = arith.addf %276, %275 : vector<256x32xf32>
    %278 = arith.divf %276, %277 : vector<256x32xf32>
    %279 = arith.mulf %273, %278 : vector<256x32xf32>
    %280 = arith.addf %248, %249 : vector<16x32xf32>
    %281 = vector.broadcast %232 : vector<1x32xf32> to vector<16x32xf32>
    %282 = arith.addf %280, %281 : vector<16x32xf32>
    %283 = arith.negf %282 : vector<16x32xf32>
    %284 = math.exp %283 : vector<16x32xf32>
    %cst_89 = arith.constant 1.000000e+00 : f32
    %285 = vector.broadcast %cst_89 : f32 to vector<16x32xf32>
    %286 = arith.addf %285, %284 : vector<16x32xf32>
    %287 = arith.divf %285, %286 : vector<16x32xf32>
    %288 = arith.mulf %282, %287 : vector<16x32xf32>
    %cst_90 = arith.constant dense<0.000000e+00> : vector<16x32xf32>
    %289 = tpu.matmul %288, %226, %cst_90 {dimension_numbers = #tpu.dot_dimension_numbers<[1], [0], [0], [1], [0, 0, 1, 1], [], []>} : vector<16x32xf32>, vector<32x32xf32>, vector<16x32xf32> -> vector<16x32xf32>
    %290 = vector.broadcast %233 : vector<1x32xf32> to vector<16x32xf32>
    %291 = arith.addf %289, %290 : vector<16x32xf32>
    %292 = arith.negf %291 : vector<16x32xf32>
    %293 = math.exp %292 : vector<16x32xf32>
    %cst_91 = arith.constant 1.000000e+00 : f32
    %294 = vector.broadcast %cst_91 : f32 to vector<16x32xf32>
    %295 = arith.addf %294, %293 : vector<16x32xf32>
    %296 = arith.divf %294, %295 : vector<16x32xf32>
    %297 = arith.mulf %291, %296 : vector<16x32xf32>
    %cst_92 = arith.constant dense<0.000000e+00> : vector<256x32xf32>
    %298 = tpu.matmul %279, %227, %cst_92 {dimension_numbers = #tpu.dot_dimension_numbers<[1], [0], [0], [1], [0, 0, 1, 1], [], []>} : vector<256x32xf32>, vector<32x32xf32>, vector<256x32xf32> -> vector<256x32xf32>
    %299 = vector.broadcast %234 : vector<1x32xf32> to vector<256x32xf32>
    %300 = arith.addf %298, %299 : vector<256x32xf32>
    %301 = arith.negf %300 : vector<256x32xf32>
    %302 = math.exp %301 : vector<256x32xf32>
    %cst_93 = arith.constant 1.000000e+00 : f32
    %303 = vector.broadcast %cst_93 : f32 to vector<256x32xf32>
    %304 = arith.addf %303, %302 : vector<256x32xf32>
    %305 = arith.divf %303, %304 : vector<256x32xf32>
    %306 = arith.mulf %300, %305 : vector<256x32xf32>
    %cst_94 = arith.constant dense<0.000000e+00> : vector<256x1xf32>
    %307 = tpu.matmul %306, %235, %cst_94 {dimension_numbers = #tpu.dot_dimension_numbers<[1], [1], [0], [0], [0, 0, 1, 0], [], []>} : vector<256x32xf32>, vector<1x32xf32>, vector<256x1xf32> -> vector<256x1xf32>
    %308 = vector.shape_cast %307 : vector<256x1xf32> to vector<16x16xf32>
    %309 = vector.broadcast %239 : f32 to vector<16x16xf32>
    %310 = arith.addf %308, %309 : vector<16x16xf32>
    %cst_95 = arith.constant dense<0.000000e+00> : vector<16xf32>
    %311 = vector.multi_reduction <add>, %310, %cst_95 [1] : vector<16x16xf32> to vector<16xf32>
    %312 = vector.shape_cast %311 : vector<16xf32> to vector<16x1xf32>
    %313 = vector.broadcast %312 : vector<16x1xf32> to vector<16x3xf32>
    %314 = arith.mulf %208, %313 : vector<16x3xf32>
    %cst_96 = arith.constant dense<0.000000e+00> : vector<16x3xf32>
    %315 = tpu.matmul %310, %208, %cst_96 {dimension_numbers = #tpu.dot_dimension_numbers<[1], [0], [0], [1], [0, 0, 1, 1], [], []>} : vector<16x16xf32>, vector<16x3xf32>, vector<16x3xf32> -> vector<16x3xf32>
    %316 = arith.subf %314, %315 : vector<16x3xf32>
    %cst_97 = arith.constant 1.500000e+01 : f32
    %317 = vector.broadcast %cst_97 : f32 to vector<16x3xf32>
    %318 = arith.divf %316, %317 : vector<16x3xf32>
    %319 = arith.addf %208, %318 : vector<16x3xf32>
    %320 = vector.shape_cast %279 : vector<256x32xf32> to vector<16x16x32xf32>
    %cst_98 = arith.constant dense<0.000000e+00> : vector<16x32xf32>
    %321 = vector.multi_reduction <add>, %320, %cst_98 [1] : vector<16x16x32xf32> to vector<16x32xf32>
    %322 = arith.subf %321, %297 : vector<16x32xf32>
    %323 = tpu.concatenate %225, %322 in 1 : vector<16x32xf32>, vector<16x32xf32> -> vector<16x64xf32>
    %cst_99 = arith.constant dense<0.000000e+00> : vector<16x32xf32>
    %324 = tpu.matmul %323, %228, %cst_99 {dimension_numbers = #tpu.dot_dimension_numbers<[1], [0], [0], [1], [0, 0, 1, 1], [], []>} : vector<16x64xf32>, vector<64x32xf32>, vector<16x32xf32> -> vector<16x32xf32>
    %325 = vector.broadcast %236 : vector<1x32xf32> to vector<16x32xf32>
    %326 = arith.addf %324, %325 : vector<16x32xf32>
    %327 = arith.negf %326 : vector<16x32xf32>
    %328 = math.exp %327 : vector<16x32xf32>
    %cst_100 = arith.constant 1.000000e+00 : f32
    %329 = vector.broadcast %cst_100 : f32 to vector<16x32xf32>
    %330 = arith.addf %329, %328 : vector<16x32xf32>
    %331 = arith.divf %329, %330 : vector<16x32xf32>
    %332 = arith.mulf %326, %331 : vector<16x32xf32>
    %cst_101 = arith.constant dense<0.000000e+00> : vector<16x32xf32>
    %333 = tpu.matmul %332, %229, %cst_101 {dimension_numbers = #tpu.dot_dimension_numbers<[1], [0], [0], [1], [0, 0, 1, 1], [], []>} : vector<16x32xf32>, vector<32x32xf32>, vector<16x32xf32> -> vector<16x32xf32>
    %334 = arith.addf %225, %333 : vector<16x32xf32>
    %335 = vector.broadcast %237 : vector<1x32xf32> to vector<16x32xf32>
    %336 = arith.addf %334, %335 : vector<16x32xf32>
    %c0_102 = arith.constant 0 : index
    %c0_103 = arith.constant 0 : index
    %337 = vector.load %arg6[%c0_102, %c0_103] : memref<33x20xf32, #tpu.memory_space<vmem>>, vector<32x20xf32>
    %cst_104 = arith.constant dense<0.000000e+00> : vector<16x20xf32>
    %338 = tpu.matmul %336, %337, %cst_104 {dimension_numbers = #tpu.dot_dimension_numbers<[1], [0], [0], [1], [0, 0, 1, 1], [], []>} : vector<16x32xf32>, vector<32x20xf32>, vector<16x20xf32> -> vector<16x20xf32>
    %c32_105 = arith.constant 32 : index
    %c0_106 = arith.constant 0 : index
    %339 = vector.load %arg6[%c32_105, %c0_106] : memref<33x20xf32, #tpu.memory_space<vmem>>, vector<1x20xf32>
    %340 = vector.broadcast %339 : vector<1x20xf32> to vector<16x20xf32>
    %341 = arith.addf %338, %340 : vector<16x20xf32>
    %c0_107 = arith.constant 0 : index
    %c0_108 = arith.constant 0 : index
    %342 = vector.load %arg7[%c0_107, %c0_108] : memref<16x20xf32, #tpu.memory_space<vmem>>, vector<16x20xf32>
    tpu.vector_store %arg7[%c0_107, %c0_108], %341 {strides = array<i32>} : memref<16x20xf32, #tpu.memory_space<vmem>>, vector<16x20xf32>,
    %c0_109 = arith.constant 0 : index
    %c0_110 = arith.constant 0 : index
    %343 = vector.load %arg8[%c0_109, %c0_110] : memref<16x3xf32, #tpu.memory_space<vmem>>, vector<16x3xf32>
    tpu.vector_store %arg8[%c0_109, %c0_110], %319 {strides = array<i32>} : memref<16x3xf32, #tpu.memory_space<vmem>>, vector<16x3xf32>,
    return
  }
  func.func @transform_0(%arg0: i32) -> (i32, i32) {
    %c0_i32 = arith.constant 0 : i32
    %c0_i32_0 = arith.constant 0 : i32
    %c0_i32_1 = arith.constant 0 : i32
    return %c0_i32, %c0_i32_0 : i32, i32
  }
  func.func @transform_1(%arg0: i32) -> (i32, i32) {
    %c0_i32 = arith.constant 0 : i32
    %c0_i32_0 = arith.constant 0 : i32
    %c0_i32_1 = arith.constant 0 : i32
    return %c0_i32, %c0_i32_0 : i32, i32
  }
  func.func @transform_2(%arg0: i32) -> (i32, i32) {
    %c0_i32 = arith.constant 0 : i32
    %c0_i32_0 = arith.constant 0 : i32
    %c0_i32_1 = arith.constant 0 : i32
    return %c0_i32, %c0_i32_0 : i32, i32
  }
  func.func @transform_3(%arg0: i32) -> (i32, i32) {
    %c0_i32 = arith.constant 0 : i32
    %c0_i32_0 = arith.constant 0 : i32
    %c0_i32_1 = arith.constant 0 : i32
    return %c0_i32, %c0_i32_0 : i32, i32
  }
  func.func @transform_4(%arg0: i32) -> (i32, i32) {
    %c0_i32 = arith.constant 0 : i32
    %c0_i32_0 = arith.constant 0 : i32
    %c0_i32_1 = arith.constant 0 : i32
    return %c0_i32, %c0_i32_0 : i32, i32
  }
  func.func @transform_5(%arg0: i32) -> (i32, i32) {
    %c0_i32 = arith.constant 0 : i32
    %c0_i32_0 = arith.constant 0 : i32
    %c0_i32_1 = arith.constant 0 : i32
    return %c0_i32, %c0_i32_0 : i32, i32
  }
  func.func @transform_6(%arg0: i32) -> (i32, i32) {
    %c0_i32 = arith.constant 0 : i32
    %c0_i32_0 = arith.constant 0 : i32
    %c0_i32_1 = arith.constant 0 : i32
    return %c0_i32, %c0_i32_0 : i32, i32
  }
  func.func @transform_7(%arg0: i32) -> (i32, i32) {
    %c0_i32 = arith.constant 0 : i32
    %c0_i32_0 = arith.constant 0 : i32
    %c0_i32_1 = arith.constant 0 : i32
    return %c0_i32, %c0_i32_0 : i32, i32
  }
}

</mosaic_0001>

<bundles_post_ra>
// kernel: tpu_custom_call.1
= control target key start
LH: loop header
LB: loop body
LE: loop exit
PB: predicated region body
PF: predicated region fallthrough
CT: control target
= control target key end

     0   :  { %vm32_vm0 = vcmask 261120   ;;  %s16285_s0 = inlined_call_operand.vmem [shape: f32[16,32], index: 0, kind: input, shape index: {}]   ;;  %s16286_s1 = inlined_call_operand.vmem [shape: f32[16,3], index: 1, kind: input, shape index: {}]   ;;  %s16287_s2 = inlined_call_operand.vmem [shape: f32[512,32], index: 2, kind: input, shape index: {}]   ;;  %s16288_s3 = inlined_call_operand.vmem [shape: f32[96,64], index: 3, kind: input, shape index: {}]   ;;  %s16289_s4 = inlined_call_operand.vmem [shape: f32[24,32], index: 4, kind: input, shape index: {}]   ;;  %s16290_s5 = inlined_call_operand.vmem [shape: f32[33,20], index: 5, kind: input, shape index: {}]   ;;  %s16291_s6 = inlined_call_operand.hbm [shape: f32[16,20], index: 6, kind: output, shape index: {0}]   ;;  %s16292_s7 = inlined_call_operand.vmem [shape: f32[16,3], index: 7, kind: output, shape index: {1}]  }
   0x1   :  { %v28_v0 = vld [vmem:[%s16287_s2] sm:$0xff]  ;;  %v29_v1 = vld [vmem:[%s16287_s2 + $0x8] sm:$0xff]  ;;  %v30_v2 = vld [vmem:[%s16287_s2 + $0x10] sm:$0xff] }
   0x2   :  { %v10938_v3 = vpack.c.bf16 %v29_v1, %v28_v0  ;;  %v31_v4 = vld [vmem:[%s16287_s2 + $0x18] sm:$0xff]  ;;  %v26_v5 = vld [vmem:[%s16285_s0] sm:$0xff]  ;;  %v137_v8 = vld [vmem:[%s16288_s3 + $0x8] sm:$0xff] }
   0x3   :  { %v10942_v6 = vpack.c.bf16 %v31_v4, %v30_v2  ;;  %10411 = vmatprep.mubr.msk.f32.mxu0 %vm32_vm0, %v26_v5  ;;  %v136_v7 = vld [vmem:[%s16288_s3] sm:$0xff]  ;;  %v138_v9 = vld [vmem:[%s16288_s3 + $0x10] sm:$0xff]  ;;  %v139_v11 = vld [vmem:[%s16288_s3 + $0x18] sm:$0xff] }
   0x4   :  { %10939 = vmatprep.subr.bf16.mxu0 %v10938_v3  ;;  %v10946_v10 = vpack.c.bf16 %v137_v8, %v136_v7 }
   0x5   :  { %13 = vsyncpa [#allocation3], 0  ;;  %10941 = vmatpush3.bf16.msra.mxu0 %v10938_v3  ;;  %v10950_v12 = vpack.c.bf16 %v139_v11, %v138_v9  ;;  %v27_v13 = vld [vmem:[%s16285_s0 + $0x8] sm:$0xff]  ;;  %v155_v14 = vlaneseq  ;;  %v12398_v15 = vmov 1966171168   ;;  %v12482_v19 = vld [vmem:[%s16286_s1] sm:$0xff] }
   0x6   :  { %10943 = vmatprep.subr.bf16.mxu0 %v10942_v6  ;;  %10947 = vmatprep.subr.bf16.mxu1 %v10946_v10  ;;  %v153_v16 = vunpack.c.l.s4 %v12398_v15  ;;  %v151_v21 = vcombine.high %v12482_v19, %v12482_v19  ;;  %v12498_v26 = vld [vmem:[%s16286_s1 + $0x8] sm:$0xff]  ;;  %vm393_vm1 = vcmask 23552   ;;  %s12399_s9 = smov 96   ;;  %vm2673_vm2 = vcmask 1041409   ;;  %s12400_s8 = smov 32  }
   0x7   :  { %10949 = vmatpush3.bf16.msra.mxu1 %v10946_v10  ;;  %v12477_v17 = vshrl.u32 %v155_v14, 7  ;;  %vm2675_vm3 = vcmask 1042434   ;;  %vm2677_vm4 = vcmask 1043459   ;;  %vm2679_vm5 = vcmask 1044484  }
   0x8   :  { %10951 = vmatprep.subr.bf16.mxu1 %v10950_v12  ;;  %v154_v18 = vunpack.c.0.s8 %v153_v16  ;;  %vm2681_vm6 = vcmask 1045509   ;;  %vm2683_vm7 = vcmask 1046534   ;;  %vm2685_vm8 = vcmask 1047559  }
   0x9   :  { %10945 = vmatpush3.bf16.msra.mxu0 %v10942_v6  ;;  %v12492_v23 = vsub.s32 0, %v12477_v17  ;;  %vm3039_vm9 = vcmask 523264   ;;  %vm2536_vm10 = vcmask 130112   ;;  %vm2696_vm11 = vcmask 130048  }
   0xa   :  { %v12485_v20 = vsub.s32 %v154_v18, %v12477_v17  ;;  %vm9500_vm12 = vcmask 162816  }
   0xb   :  { %10953 = vmatpush3.bf16.msra.mxu1 %v10950_v12 }
   0xc   :  { %10412 = vmatmul.mubr.msk.f32.vlgmr.msra.gmra.mrb[0].mxu0 %vm32_vm0, %v27_v13  ;;  %v158_v22 = vrot.slane %v12482_v19, %v12485_v20  ;;  %v165_v27 = vrot.slane %v151_v21, %v12485_v20  ;;  %v12528_v2 = vrot.slane %v12498_v26, %v12485_v20 }
   0xe   :  { %v174_v24 = vrot.slane %v158_v22, %v12485_v20  ;;  %v166_v25 = vcombine.high %v158_v22, %v158_v22  ;;  %v181_v36 = vrot.slane %v165_v27, %v12485_v20  ;;  %v167_v37 = vcombine.high %v165_v27, %v165_v27 }
   0xf   :  { %v223_v10 = vrot.slane %v12528_v2, %v12485_v20 }
  0x10   :  { %v252_v28 = vrot.slane %v174_v24, %v12492_v23  ;;  %v188_v29 = vrot.slane %v166_v25, %v12485_v20  ;;  %v196_v30 = vcombine.high %v174_v24, %v174_v24  ;;  %v268_v48 = vrot.slane %v181_v36, %v12492_v23 }
  0x11   :  { %v195_v49 = vrot.slane %v167_v37, %v12485_v20  ;;  %v197_v61 = vcombine.high %v181_v36, %v181_v36  ;;  %v284_v27 = vrot.slane %v223_v10, %v12492_v23 }
  0x12   :  { %v329_v31 = vsub.f32 %v252_v28, %v12482_v19  ;;  %v330_v32 = vsub.f32 %v252_v28, %v12498_v26  ;;  %v256_v33 = vrot.slane %v188_v29, %v12492_v23  ;;  %v260_v34 = vrot.slane %v196_v30, %v12492_v23 }
  0x13   :  { %v198_v35 = vcombine.high %v188_v29, %v188_v29  ;;  %v338_v57 = vsub.f32 %v268_v48, %v12498_v26  ;;  %v272_v60 = vrot.slane %v195_v49, %v12492_v23  ;;  %v337_v0 = vsub.f32 %v268_v48, %v12482_v19 }
  0x14   :  { %v361_v38 = vmul.f32 %v329_v31, %v329_v31  ;;  %v362_v39 = vmul.f32 %v330_v32, %v330_v32  ;;  %v331_v40 = vsub.f32 %v256_v33, %v12482_v19  ;;  %v333_v41 = vsub.f32 %v260_v34, %v12482_v19 }
  0x15   :  { %v332_v42 = vsub.f32 %v256_v33, %v12498_v26  ;;  %v264_v43 = vrot.slane %v198_v35, %v12492_v23  ;;  %v334_v46 = vsub.f32 %v260_v34, %v12498_v26  ;;  %v370_v1 = vmul.f32 %v338_v57, %v338_v57 }
  0x16   :  { %v394_v44 = vsel %vm393_vm1, %v361_v38, 0.0  ;;  %v363_v45 = vmul.f32 %v331_v40, %v331_v40  ;;  %v397_v50 = vsel %vm393_vm1, %v362_v39, 0.0  ;;  %v365_v52 = vmul.f32 %v333_v41, %v333_v41  ;;  %v116_v39 = vld [vmem:[%s16287_s2 + $0x20] sm:$0xff]  ;;  %v117_v40 = vld [vmem:[%s16287_s2 + $0x28] sm:$0xff]  ;;  %v118_v41 = vld [vmem:[%s16287_s2 + $0x30] sm:$0xff] }
  0x17   :  { %395 = vadd.xlane.f32.xlu0 %v394_v44  ;;  %v364_v47 = vmul.f32 %v332_v42, %v332_v42  ;;  %v335_v53 = vsub.f32 %v264_v43, %v12482_v19  ;;  %v366_v55 = vmul.f32 %v334_v46, %v334_v46  ;;  %v336_v56 = vsub.f32 %v264_v43, %v12498_v26  ;;  %v119_v43 = vld [vmem:[%s16287_s2 + $0x38] sm:$0xff] }
  0x18   :  { %v400_v51 = vsel %vm393_vm1, %v363_v45, 0.0  ;;  %v406_v58 = vsel %vm393_vm1, %v365_v52, 0.0  ;;  %v339_v4 = vsub.f32 %v272_v60, %v12482_v19  ;;  %v276_v5 = vrot.slane %v197_v61, %v12492_v23 }
  0x19   :  { %401 = vadd.xlane.f32.xlu1 %v400_v51  ;;  %v403_v54 = vsel %vm393_vm1, %v364_v47, 0.0  ;;  %v367_v59 = vmul.f32 %v335_v53, %v335_v53  ;;  %v409_v62 = vsel %vm393_vm1, %v366_v55, 0.0  ;;  %v368_v63 = vmul.f32 %v336_v56, %v336_v56 }
  0x1a   :  { %v199_v6 = vcombine.high %v195_v49, %v195_v49  ;;  %v369_v8 = vmul.f32 %v337_v0, %v337_v0  ;;  %v340_v9 = vsub.f32 %v272_v60, %v12498_v26  ;;  %v421_v11 = vsel %vm393_vm1, %v370_v1, 0.0 }
  0x1b   :  { %398 = vadd.xlane.f32.xlu0 %v397_v50  ;;  %v412_v3 = vsel %vm393_vm1, %v367_v59, 0.0  ;;  %v415_v7 = vsel %vm393_vm1, %v368_v63, 0.0  ;;  %v371_v12 = vmul.f32 %v339_v4, %v339_v4  ;;  %v341_v13 = vsub.f32 %v276_v5, %v12482_v19 }
  0x1c   :  { %v280_v15 = vrot.slane %v199_v6, %v12492_v23  ;;  %v418_v16 = vsel %vm393_vm1, %v369_v8, 0.0  ;;  %v372_v18 = vmul.f32 %v340_v9, %v340_v9  ;;  %v342_v21 = vsub.f32 %v276_v5, %v12498_v26 }
  0x1d   :  { %404 = vadd.xlane.f32.xlu1 %v403_v54  ;;  %v424_v22 = vsel %vm393_vm1, %v371_v12, 0.0  ;;  %v373_v24 = vmul.f32 %v341_v13, %v341_v13  ;;  %v345_v32 = vsub.f32 %v284_v27, %v12482_v19  ;;  %v10954_v42 = vpack.c.bf16 %v117_v40, %v116_v39 }
  0x1e   :  { %v343_v25 = vsub.f32 %v280_v15, %v12482_v19  ;;  %v427_v28 = vsel %vm393_vm1, %v372_v18, 0.0  ;;  %v374_v29 = vmul.f32 %v342_v21, %v342_v21  ;;  %v10958_v44 = vpack.c.bf16 %v119_v43, %v118_v41 }
  0x1f   :  { %407 = vadd.xlane.f32.xlu0 %v406_v58  ;;  %v430_v30 = vsel %vm393_vm1, %v373_v24, 0.0  ;;  %v377_v35 = vmul.f32 %v345_v32, %v345_v32  ;;  %10963 = vmatprep.subr.bf16.mxu1 %v10954_v42  ;;  %v215_v47 = vcombine.high %v12528_v2, %v12528_v2  ;;  %v245_v50 = vcombine.high %v223_v10, %v223_v10 }
  0x20   :  { %v375_v31 = vmul.f32 %v343_v25, %v343_v25  ;;  %v433_v33 = vsel %vm393_vm1, %v374_v29, 0.0  ;;  %10955 = vmatprep.subr.bf16.mxu0 %v10954_v42  ;;  %v200_v51 = vcombine.high %v12498_v26, %v12498_v26  ;;  %v344_v56 = vsub.f32 %v280_v15, %v12498_v26 }
  0x21   :  { %410 = vadd.xlane.f32.xlu1 %v409_v62  ;;  %v442_v36 = vsel %vm393_vm1, %v377_v35, 0.0  ;;  %10957 = vmatpush3.bf16.msra.mxu0 %v10954_v42  ;;  %v237_v48 = vrot.slane %v215_v47, %v12485_v20  ;;  %v292_v54 = vrot.slane %v245_v50, %v12492_v23  ;;  %v346_v63 = vsub.f32 %v284_v27, %v12498_v26 }
  0x22   :  { %v436_v34 = vsel %vm393_vm1, %v375_v31, 0.0  ;;  %10959 = vmatprep.subr.bf16.mxu0 %v10958_v44  ;;  %v214_v55 = vrot.slane %v200_v51, %v12485_v20  ;;  %v376_v62 = vmul.f32 %v344_v56, %v344_v56 }
  0x23   :  { %413 = vadd.xlane.f32.xlu0 %v412_v3  ;;  %v288_v49 = vrot.slane %v237_v48, %v12492_v23  ;;  %v247_v52 = vcombine.high %v237_v48, %v237_v48  ;;  %v349_v59 = vsub.f32 %v292_v54, %v12482_v19  ;;  %v378_v6 = vmul.f32 %v346_v63, %v346_v63 }
  0x24   :  { %v230_v60 = vrot.slane %v214_v55, %v12485_v20  ;;  %v216_v61 = vcombine.high %v214_v55, %v214_v55  ;;  %v439_v5 = vsel %vm393_vm1, %v376_v62, 0.0  ;;  %v350_v18 = vsub.f32 %v292_v54, %v12498_v26 }
  0x25   :  { %416 = vadd.xlane.f32.xlu1 %v415_v7  ;;  %10961 = vmatpush3.bf16.msra.mxu0 %v10958_v44  ;;  %v347_v53 = vsub.f32 %v288_v49, %v12482_v19  ;;  %v296_v57 = vrot.slane %v247_v52, %v12492_v23  ;;  %v381_v2 = vmul.f32 %v349_v59, %v349_v59  ;;  %v445_v13 = vsel %vm393_vm1, %v378_v6, 0.0 }
  0x26   :  { %v300_v3 = vrot.slane %v230_v60, %v12492_v23  ;;  %v244_v4 = vrot.slane %v216_v61, %v12485_v20  ;;  %v348_v8 = vsub.f32 %v288_v49, %v12498_v26  ;;  %v246_v12 = vcombine.high %v230_v60, %v230_v60 }
  0x27   :  { %422 = vadd.xlane.f32.xlu0 %v421_v11  ;;  %v379_v58 = vmul.f32 %v347_v53, %v347_v53  ;;  %v351_v0 = vsub.f32 %v296_v57, %v12482_v19  ;;  %v454_v9 = vsel %vm393_vm1, %v381_v2, 0.0  ;;  %v352_v29 = vsub.f32 %v296_v57, %v12498_v26 }
  0x28   :  { %v353_v10 = vsub.f32 %v300_v3, %v12482_v19  ;;  %v304_v11 = vrot.slane %v244_v4, %v12492_v23  ;;  %v308_v24 = vrot.slane %v246_v12, %v12492_v23  ;;  %v248_v25 = vcombine.high %v244_v4, %v244_v4  ;;  %v12643_v12 = vld [vmem:[%s16289_s4] ss:$0 sm:$0xff] }
  0x29   :  { %419 = vadd.xlane.f32.xlu1 %v418_v16  ;;  %v448_v1 = vsel %vm393_vm1, %v379_v58, 0.0  ;;  %v383_v7 = vmul.f32 %v351_v0, %v351_v0  ;;  %v380_v16 = vmul.f32 %v348_v8, %v348_v8  ;;  %v384_v35 = vmul.f32 %v352_v29, %v352_v29 }
  0x2a   :  { %v385_v21 = vmul.f32 %v353_v10, %v353_v10  ;;  %v357_v32 = vsub.f32 %v308_v24, %v12482_v19  ;;  %v354_v40 = vsub.f32 %v300_v3, %v12498_v26  ;;  %v356_v48 = vsub.f32 %v304_v11, %v12498_v26 }
  0x2b   :  { %425 = vadd.xlane.f32.xlu0 %v424_v22  ;;  %v460_v15 = vsel %vm393_vm1, %v383_v7, 0.0  ;;  %v355_v22 = vsub.f32 %v304_v11, %v12482_v19  ;;  %v451_v27 = vsel %vm393_vm1, %v380_v16, 0.0  ;;  %v358_v52 = vsub.f32 %v308_v24, %v12498_v26 }
  0x2c   :  { %v389_v39 = vmul.f32 %v357_v32, %v357_v32  ;;  %v388_v51 = vmul.f32 %v356_v48, %v356_v48 }
  0x2d   :  { %428 = vadd.xlane.f32.xlu1 %v427_v28  ;;  %v382_v28 = vmul.f32 %v350_v18, %v350_v18  ;;  %v387_v31 = vmul.f32 %v355_v22, %v355_v22  ;;  %v390_v53 = vmul.f32 %v358_v52, %v358_v52 }
  0x2e   :  { %v478_v43 = vsel %vm393_vm1, %v389_v39, 0.0 }
  0x2f   :  { %431 = vadd.xlane.f32.xlu0 %v430_v30  ;;  %v466_v30 = vsel %vm393_vm1, %v385_v21, 0.0  ;;  %v481_v55 = vsel %vm393_vm1, %v390_v53, 0.0 }
  0x31   :  { %434 = vadd.xlane.f32.xlu1 %v433_v33  ;;  %v312_v33 = vrot.slane %v248_v25, %v12492_v23 }
  0x33   :  { %437 = vadd.xlane.f32.xlu0 %v436_v34  ;;  %v457_v34 = vsel %vm393_vm1, %v382_v28, 0.0  ;;  %v359_v41 = vsub.f32 %v312_v33, %v12482_v19  ;;  %v475_v19 = vsel %vm393_vm1, %v388_v51, 0.0  ;;  %v360_v54 = vsub.f32 %v312_v33, %v12498_v26 }
  0x35   :  { %v391_v47 = vmul.f32 %v359_v41, %v359_v41  ;;  %v392_v56 = vmul.f32 %v360_v54, %v360_v54 }
  0x37   :  { %443 = vadd.xlane.f32.xlu0 %v442_v36  ;;  %v472_v36 = vsel %vm393_vm1, %v387_v31, 0.0  ;;  %v484_v50 = vsel %vm393_vm1, %v391_v47, 0.0  ;;  %v487_v58 = vsel %vm393_vm1, %v392_v56, 0.0 }
  0xa4   :  { %v396_v57 = vpop.xlane.xlu0 %395 }
  0xa5   :  { %v793_v24 = vmul.f32 %v12643_v12, %v396_v57 }
  0xa6   :  { %v402_v60 = vpop.xlane.xlu1 %401 }
  0xa8   :  { %v399_v59 = vpop.xlane.xlu0 %398 }
  0xa9   :  { %v794_v25 = vmul.f32 %v12643_v12, %v399_v59 }
  0xaa   :  { %v405_v62 = vpop.xlane.xlu1 %404 }
  0xab   :  { %v796_v28 = vmul.f32 %v12643_v12, %v405_v62 }
  0xac   :  { %v408_v61 = vpop.xlane.xlu0 %407 }
  0xad   :  { %v797_v29 = vmul.f32 %v12643_v12, %v408_v61 }
  0xae   :  { %v411_v0 = vpop.xlane.xlu1 %410 }
  0xaf   :  { %v798_v31 = vmul.f32 %v12643_v12, %v411_v0 }
  0xb0   :  { %v414_v63 = vpop.xlane.xlu0 %413 }
  0xb2   :  { %v417_v2 = vpop.xlane.xlu1 %416 }
  0xb3   :  { %v800_v32 = vmul.f32 %v12643_v12, %v417_v2 }
  0xb6   :  { %v420_v26 = vpop.xlane.xlu1 %419 }
  0xba   :  { %v12634_v7 = vpop.xlane.xlu1 %428 }
  0xdf   :  { %v12551_v37 = vpop.f32.mrb[0].mxu0 }
  0xe0   :  { %v12553_v38 = vpop.f32.mrb[1].mxu0 }
  0xe1   :  { %10422 = vmatprep.mubr.msk.f32.mxu1 %vm32_vm0, %v12553_v38 }
  0xe2   :  { %10423 = vmatmul.mubr.msk.f32.vlgmr.msra.gmra.mrb[0].mxu1 %vm32_vm0, %v12551_v37 }
  0xe3   :  { %10965 = vmatpush3.bf16.msra.mxu1 %v10954_v42  ;;  %v463_v42 = vsel %vm393_vm1, %v384_v35, 0.0 }
  0xe4   :  { %10967 = vmatprep.subr.bf16.mxu1 %v10958_v44 }
  0xe7   :  { %10969 = vmatpush3.bf16.msra.mxu1 %v10958_v44  ;;  %v386_v44 = vmul.f32 %v354_v40, %v354_v40 }
  0xe9   :  { %v469_v49 = vsel %vm393_vm1, %v386_v44, 0.0  ;;  %v12678_v44 = vld [vmem:[%s16289_s4 + $0x1] ss:$0 sm:$0xff] }
 0x1b5   :  { %v12571_v45 = vpop.f32.mrb[0].mxu1 }
 0x1b6   :  { %753 = vrot.lane.b32.xlu1 %v12571_v45, %s12399_s9  ;;  %v12575_v46 = vpop.f32.mrb[1].mxu1 }
 0x1b7   :  { %751 = vrot.lane.b32.xlu0 %v12575_v46, %s12399_s9  ;;  %v573_v6 = vcombine.high %v12575_v46, %v12575_v46 }
 0x1b9   :  { %v587_v11 = vrot.slane %v573_v6, %v12485_v20 }
 0x1bb   :  { %v589_v21 = vcombine.high %v587_v11, %v587_v11  ;;  %v12651_v22 = vrot.slane %v587_v11, %v12485_v20 }
 0x1bd   :  { %v12668_v39 = vrot.slane %v589_v21, %v12485_v20  ;;  %v690_v41 = vrot.slane %v12651_v22, %v12492_v23 }
 0x1d6   :  { %449 = vadd.xlane.f32.xlu0 %v448_v1  ;;  %v423_v1 = vpop.xlane.xlu0 %422 }
 0x1da   :  { %440 = vadd.xlane.f32.xlu1 %v439_v5  ;;  %455 = vadd.xlane.f32.xlu0 %v454_v9  ;;  %v12626_v3 = vpop.xlane.xlu0 %425  ;;  %v580_v5 = vrot.slane %v12575_v46, %v12485_v20 }
 0x1dc   :  { %v588_v9 = vcombine.high %v580_v5, %v580_v5  ;;  %v596_v10 = vrot.slane %v580_v5, %v12485_v20 }
 0x1de   :  { %446 = vadd.xlane.f32.xlu1 %v445_v13  ;;  %461 = vadd.xlane.f32.xlu0 %v460_v15  ;;  %v12628_v4 = vpop.xlane.xlu0 %431  ;;  %v12645_v13 = vpop.xlane.xlu1 %434  ;;  %v610_v15 = vrot.slane %v588_v9, %v12485_v20  ;;  %v618_v16 = vcombine.high %v596_v10, %v596_v10  ;;  %v674_v33 = vrot.slane %v596_v10, %v12492_v23 }
 0x1e0   :  { %v682_v35 = vrot.slane %v618_v16, %v12492_v23  ;;  %v620_v40 = vcombine.high %v610_v15, %v610_v15 }
 0x1e2   :  { %452 = vadd.xlane.f32.xlu1 %v451_v27  ;;  %467 = vadd.xlane.f32.xlu0 %v466_v30  ;;  %v12636_v8 = vpop.xlane.xlu0 %437  ;;  %v795_v27 = vmul.f32 %v12643_v12, %v402_v60  ;;  %v799_v30 = vmul.f32 %v12643_v12, %v414_v63  ;;  %v686_v9 = vrot.slane %v620_v40, %v12492_v23 }
 0x1e3   :  { %v619_v40 = vcombine.high %v12651_v22, %v12651_v22 }
 0x1e6   :  { %458 = vadd.xlane.f32.xlu1 %v457_v34  ;;  %473 = vadd.xlane.f32.xlu0 %v472_v36  ;;  %v12648_v18 = vpop.xlane.xlu0 %443  ;;  %v678_v34 = vrot.slane %v610_v15, %v12492_v23  ;;  %v12665_v36 = vmul.f32 %v12643_v12, %v423_v1 }
 0x1ea   :  { %464 = vadd.xlane.f32.xlu1 %v463_v42  ;;  %479 = vadd.xlane.f32.xlu0 %v478_v43  ;;  %v801_v42 = vmul.f32 %v12643_v12, %v420_v26 }
 0x1ee   :  { %470 = vadd.xlane.f32.xlu1 %v469_v49  ;;  %485 = vadd.xlane.f32.xlu0 %v484_v50 }
 0x1f2   :  { %476 = vadd.xlane.f32.xlu1 %v475_v19 }
 0x1f6   :  { %482 = vadd.xlane.f32.xlu1 %v481_v55 }
 0x1fa   :  { %488 = vadd.xlane.f32.xlu1 %v487_v58 }
 0x228   :  { %v12673_v43 = vpop.permute.xlu1 %753 }
 0x229   :  { %v12680_v47 = vpop.permute.xlu0 %751  ;;  %v1667_v48 = vadd.f32 %v12571_v45, %v12673_v43  ;;  %v758_v49 = vadd.f32 %v12673_v43, %v674_v33  ;;  %v760_v50 = vadd.f32 %v12673_v43, %v678_v34  ;;  %v762_v51 = vadd.f32 %v12673_v43, %v682_v35 }
 0x22a   :  { %v1666_v52 = vadd.f32 %v12680_v47, %v12575_v46  ;;  %v757_v19 = vadd.f32 %v12680_v47, %v674_v33  ;;  %v759_v53 = vadd.f32 %v12680_v47, %v678_v34  ;;  %v761_v54 = vadd.f32 %v12680_v47, %v682_v35 }
 0x22b   :  { %v12693_v55 = vadd.f32 %v12678_v44, %v1667_v48  ;;  %v826_v56 = vadd.f32 %v794_v25, %v758_v49  ;;  %v828_v57 = vadd.f32 %v796_v28, %v760_v50  ;;  %v830_v58 = vadd.f32 %v798_v31, %v762_v51 }
 0x22c   :  { %v12696_v59 = vadd.f32 %v12678_v44, %v1666_v52  ;;  %v825_v60 = vadd.f32 %v793_v24, %v757_v19  ;;  %v827_v61 = vadd.f32 %v795_v27, %v759_v53  ;;  %v829_v62 = vadd.f32 %v797_v29, %v761_v54 }
 0x22d   :  { %v9629_v46 = vmul.f32 -1.442695, %v12693_v55  ;;  %v12700_v63 = vadd.f32 %v12678_v44, %v826_v56  ;;  %v12703_v0 = vadd.f32 %v12678_v44, %v828_v57  ;;  %v12706_v1 = vadd.f32 %v12678_v44, %v830_v58 }
 0x22e   :  { %v9628_v2 = vmul.f32 -1.442695, %v12696_v59  ;;  %v12710_v26 = vadd.f32 %v12678_v44, %v825_v60  ;;  %v12713_v5 = vadd.f32 %v12678_v44, %v827_v61  ;;  %v12716_v6 = vadd.f32 %v12678_v44, %v829_v62 }
 0x22f   :  { %11148 = vpow2.f32 %v9629_v46  ;;  %v9532_v10 = vmul.f32 -1.442695, %v12700_v63  ;;  %v9534_v11 = vmul.f32 -1.442695, %v12703_v0  ;;  %v763_v24 = vadd.f32 %v12680_v47, %v686_v9 }
 0x230   :  { %11150 = vpow2.f32 %v9628_v2  ;;  %v9531_v15 = vmul.f32 -1.442695, %v12710_v26  ;;  %v9533_v16 = vmul.f32 -1.442695, %v12713_v5  ;;  %v9535_v21 = vmul.f32 -1.442695, %v12716_v6 }
 0x231   :  { %11152 = vpow2.f32 %v9532_v10  ;;  %v764_v25 = vadd.f32 %v12673_v43, %v686_v9  ;;  %v765_v27 = vadd.f32 %v12680_v47, %v690_v41  ;;  %v694_v28 = vrot.slane %v12668_v39, %v12492_v23 }
 0x232   :  { %v803_v29 = vmul.f32 %v12643_v12, %v12626_v3  ;;  %11154 = vpow2.f32 %v9531_v15  ;;  %v9536_v31 = vmul.f32 -1.442695, %v12706_v1  ;;  %v831_v33 = vadd.f32 %v799_v30, %v763_v24 }
 0x233   :  { %11156 = vpow2.f32 %v9533_v16  ;;  %v832_v34 = vadd.f32 %v800_v32, %v764_v25  ;;  %v833_v35 = vadd.f32 %v801_v42, %v765_v27  ;;  %v766_v48 = vadd.f32 %v12673_v43, %v690_v41 }
 0x234   :  { %11158 = vpow2.f32 %v9534_v11  ;;  %v767_v49 = vadd.f32 %v12680_v47, %v694_v28  ;;  %v12737_v50 = vadd.f32 %v12678_v44, %v831_v33  ;;  %v621_v30 = vcombine.high %v12668_v39, %v12668_v39 }
 0x235   :  { %11160 = vpow2.f32 %v9535_v21  ;;  %v12740_v3 = vadd.f32 %v12678_v44, %v832_v34  ;;  %v12743_v51 = vadd.f32 %v12678_v44, %v833_v35  ;;  %v698_v42 = vrot.slane %v619_v40, %v12492_v23 }
 0x236   :  { %11162 = vpow2.f32 %v9536_v31  ;;  %v9537_v22 = vmul.f32 -1.442695, %v12737_v50  ;;  %v805_v52 = vmul.f32 %v12643_v12, %v12628_v4  ;;  %v804_v19 = vmul.f32 %v12643_v12, %v12634_v7 }
 0x237   :  { %v9538_v32 = vmul.f32 -1.442695, %v12740_v3  ;;  %v9539_v41 = vmul.f32 -1.442695, %v12743_v51  ;;  %v834_v53 = vadd.f32 %v12665_v36, %v766_v48  ;;  %v806_v39 = vmul.f32 %v12643_v12, %v12645_v13 }
 0x238   :  { %11164 = vpow2.f32 %v9537_v22  ;;  %v835_v56 = vadd.f32 %v803_v29, %v767_v49  ;;  %v768_v57 = vadd.f32 %v12673_v43, %v694_v28  ;;  %v769_v61 = vadd.f32 %v12680_v47, %v698_v42 }
 0x239   :  { %v11149_v54 = vpop.eup %11148  ;;  %11166 = vpow2.f32 %v9538_v32  ;;  %v12761_v4 = vrot.slane %v621_v30, %v12492_v23  ;;  %v807_v7 = vmul.f32 %v12643_v12, %v12636_v8  ;;  %v770_v13 = vadd.f32 %v12673_v43, %v698_v42 }
 0x23a   :  { %v11151_v58 = vpop.eup %11150  ;;  %v1677_v60 = vadd.f32 1.0, %v11149_v54  ;;  %11168 = vpow2.f32 %v9539_v41  ;;  %v12767_v9 = vadd.f32 %v12678_v44, %v834_v53  ;;  %v12772_v16 = vadd.f32 %v12678_v44, %v835_v56 }
 0x23b   :  { %v11153_v62 = vpop.eup %11152  ;;  %v1676_v36 = vadd.f32 1.0, %v11151_v58  ;;  %v771_v10 = vadd.f32 %v12680_v47, %v12761_v4  ;;  %v836_v8 = vadd.f32 %v804_v19, %v768_v57  ;;  %v837_v25 = vadd.f32 %v805_v52, %v769_v61 }
 0x23c   :  { %v11155_v46 = vpop.eup %11154  ;;  %11170 = vrcp.f32 %v1677_v60  ;;  %v990_v2 = vadd.f32 1.0, %v11153_v62  ;;  %v838_v29 = vadd.f32 %v806_v39, %v770_v13  ;;  %v9540_v34 = vmul.f32 -1.442695, %v12767_v9 }
 0x23d   :  { %v11157_v11 = vpop.eup %11156  ;;  %11172 = vrcp.f32 %v1676_v36  ;;  %v989_v15 = vadd.f32 1.0, %v11155_v46  ;;  %v839_v35 = vadd.f32 %v807_v7, %v771_v10  ;;  %v9541_v48 = vmul.f32 -1.442695, %v12772_v16 }
 0x23e   :  { %v11159_v21 = vpop.eup %11158  ;;  %11174 = vrcp.f32 %v990_v2  ;;  %v991_v24 = vadd.f32 1.0, %v11157_v11  ;;  %v12777_v49 = vadd.f32 %v12678_v44, %v836_v8  ;;  %v12780_v30 = vadd.f32 %v12678_v44, %v837_v25 }
 0x23f   :  { %v11161_v27 = vpop.eup %11160  ;;  %11176 = vrcp.f32 %v989_v15  ;;  %v992_v28 = vadd.f32 1.0, %v11159_v21  ;;  %v12783_v32 = vadd.f32 %v12678_v44, %v838_v29  ;;  %v12786_v52 = vadd.f32 %v12678_v44, %v839_v35 }
 0x240   :  { %v11163_v31 = vpop.eup %11162  ;;  %11178 = vrcp.f32 %v991_v24  ;;  %v993_v33 = vadd.f32 1.0, %v11161_v27  ;;  %v9542_v54 = vmul.f32 -1.442695, %v12777_v49  ;;  %v9543_v57 = vmul.f32 -1.442695, %v12780_v30 }
 0x241   :  { %11180 = vrcp.f32 %v992_v28  ;;  %v994_v40 = vadd.f32 1.0, %v11163_v31  ;;  %v9544_v60 = vmul.f32 -1.442695, %v12783_v32  ;;  %v9545_v7 = vmul.f32 -1.442695, %v12786_v52 }
 0x242   :  { %11182 = vrcp.f32 %v993_v33  ;;  %v11165_v22 = vpop.eup %11164 }
 0x243   :  { %11184 = vrcp.f32 %v994_v40  ;;  %v11167_v41 = vpop.eup %11166  ;;  %v995_v42 = vadd.f32 1.0, %v11165_v22 }
 0x244   :  { %11186 = vpow2.f32 %v9540_v34  ;;  %v11169_v19 = vpop.eup %11168  ;;  %v996_v53 = vadd.f32 1.0, %v11167_v41 }
 0x245   :  { %11188 = vpow2.f32 %v9541_v48  ;;  %v997_v56 = vadd.f32 1.0, %v11169_v19 }
 0x246   :  { %v11171_v39 = vpop.eup %11170  ;;  %11190 = vrcp.f32 %v995_v42 }
 0x247   :  { %v11173_v58 = vpop.eup %11172  ;;  %11192 = vrcp.f32 %v996_v53  ;;  %v1683_v13 = vmul.f32 %v11171_v39, %v12693_v55 }
 0x248   :  { %v11175_v61 = vpop.eup %11174  ;;  %v1682_v62 = vmul.f32 %v11173_v58, %v12696_v59  ;;  %11194 = vrcp.f32 %v997_v56 }
 0x249   :  { %v11177_v36 = vpop.eup %11176  ;;  %11196 = vpow2.f32 %v9542_v54  ;;  %v1086_v11 = vmul.f32 %v11175_v61, %v12700_v63  ;;  %v629_v63 = vrot.slane %v12571_v45, %v12485_v20  ;;  %v809_v54 = vmul.f32 %v12643_v12, %v12648_v18 }
 0x24a   :  { %v11179_v46 = vpop.eup %11178  ;;  %10489 = vmatprep.mubr.msk.f32.mxu1 %vm32_vm0, %v1682_v62  ;;  %v1085_v2 = vmul.f32 %v11177_v36, %v12710_v26  ;;  %11198 = vpow2.f32 %v9543_v57  ;;  %v622_v18 = vcombine.high %v12571_v45, %v12571_v45 }
 0x24b   :  { %v11181_v10 = vpop.eup %11180  ;;  %10490 = vmatmul.mubr.msk.f32.vlgmr.msra.gmra.mrb[2].mxu1 %vm32_vm0, %v1683_v13  ;;  %11200 = vpow2.f32 %v9544_v60  ;;  %v1087_v15 = vmul.f32 %v11179_v46, %v12713_v5  ;;  %v645_v34 = vrot.slane %v629_v63, %v12485_v20 }
 0x24c   :  { %v11183_v59 = vpop.eup %11182  ;;  %10433 = vmatprep.mubr.msk.f32.mxu0 %vm32_vm0, %v1085_v2  ;;  %11202 = vpow2.f32 %v9545_v7  ;;  %v1088_v21 = vmul.f32 %v11181_v10, %v12703_v0 }
 0x24d   :  { %v11185_v55 = vpop.eup %11184  ;;  %10434 = vmatmul.mubr.msk.f32.vlgmr.msra.gmra.mrb[2].mxu0 %vm32_vm0, %v1086_v11  ;;  %v1089_v27 = vmul.f32 %v11183_v59, %v12716_v6  ;;  %v706_v53 = vrot.slane %v645_v34, %v12492_v23 }
 0x24e   :  { %v11187_v8 = vpop.eup %11186  ;;  %10436 = vmatprep.mubr.msk.f32.mxu0 %vm32_vm0, %v1087_v15  ;;  %v1090_v33 = vmul.f32 %v11185_v55, %v12706_v1 }
 0x24f   :  { %v11189_v26 = vpop.eup %11188  ;;  %v998_v24 = vadd.f32 1.0, %v11187_v8  ;;  %v773_v39 = vadd.f32 %v12680_v47, %v706_v53 }
 0x250   :  { %v11191_v25 = vpop.eup %11190  ;;  %v999_v28 = vadd.f32 1.0, %v11189_v26 }
 0x251   :  { %v11193_v29 = vpop.eup %11192  ;;  %10437 = vmatmul.mubr.msk.f32.gmra.mrb[4].mxu0 %vm32_vm0, %v1088_v21  ;;  %11204 = vrcp.f32 %v998_v24  ;;  %v1091_v35 = vmul.f32 %v11191_v25, %v12737_v50  ;;  %v637_v50 = vcombine.high %v629_v63, %v629_v63  ;;  %v841_v60 = vadd.f32 %v809_v54, %v773_v39 }
 0x252   :  { %v11195_v5 = vpop.eup %11194  ;;  %10439 = vmatprep.mubr.msk.f32.mxu0 %vm32_vm0, %v1089_v27  ;;  %11206 = vrcp.f32 %v999_v28  ;;  %v1092_v42 = vmul.f32 %v11193_v29, %v12740_v3  ;;  %v772_v21 = vadd.f32 %v12673_v43, %v12761_v4 }
 0x253   :  { %v11197_v31 = vpop.eup %11196  ;;  %v1093_v1 = vmul.f32 %v11195_v5, %v12743_v51  ;;  %v659_v58 = vrot.slane %v637_v50, %v12485_v20  ;;  %v12832_v46 = vadd.f32 %v12678_v44, %v841_v60 }
 0x254   :  { %v11199_v0 = vpop.eup %11198  ;;  %v1000_v40 = vadd.f32 1.0, %v11197_v31 }
 0x255   :  { %v11201_v48 = vpop.eup %11200  ;;  %10440 = vmatmul.mubr.msk.f32.gmra.mrb[6].mxu0 %vm32_vm0, %v1090_v33  ;;  %v1001_v6 = vadd.f32 1.0, %v11199_v0  ;;  %v9547_v8 = vmul.f32 -1.442695, %v12832_v46  ;;  %v669_v25 = vcombine.high %v659_v58, %v659_v58  ;;  %v774_v0 = vadd.f32 %v12673_v43, %v706_v53 }
 0x256   :  { %v11203_v22 = vpop.eup %11202  ;;  %10442 = vmatprep.mubr.msk.f32.mxu0 %vm32_vm0, %v1091_v35  ;;  %11208 = vrcp.f32 %v1000_v40  ;;  %v1002_v41 = vadd.f32 1.0, %v11201_v48 }
 0x257   :  { %11210 = vrcp.f32 %v1001_v6  ;;  %v1003_v19 = vadd.f32 1.0, %v11203_v22 }
 0x258   :  { %11212 = vrcp.f32 %v1002_v41 }
 0x259   :  { %10443 = vmatmul.mubr.msk.f32.gmra.mrb[8].mxu0 %vm32_vm0, %v1092_v42  ;;  %11214 = vrcp.f32 %v1003_v19 }
 0x25a   :  { %10445 = vmatprep.mubr.msk.f32.mxu0 %vm32_vm0, %v1093_v1  ;;  %11216 = vpow2.f32 %v9547_v8 }
 0x25b   :  { %v11205_v56 = vpop.eup %11204 }
 0x25c   :  { %v11207_v3 = vpop.eup %11206  ;;  %v1094_v57 = vmul.f32 %v11205_v56, %v12767_v9  ;;  %v710_v9 = vrot.slane %v659_v58, %v12492_v23 }
 0x25d   :  { %v1095_v51 = vmul.f32 %v11207_v3, %v12772_v16  ;;  %v667_v16 = vcombine.high %v645_v34, %v645_v34  ;;  %v718_v34 = vrot.slane %v669_v25, %v12492_v23 }
 0x25e   :  { %10446 = vmatmul.mubr.msk.f32.gmra.mrb[10].mxu0 %vm32_vm0, %v1094_v57  ;;  %v775_v11 = vadd.f32 %v12680_v47, %v710_v9  ;;  %v776_v39 = vadd.f32 %v12673_v43, %v710_v9 }
 0x25f   :  { %10448 = vmatprep.mubr.msk.f32.mxu0 %vm32_vm0, %v1095_v51  ;;  %v714_v55 = vrot.slane %v667_v16, %v12492_v23  ;;  %v779_v22 = vadd.f32 %v12680_v47, %v718_v34 }
 0x260   :  { %v11209_v61 = vpop.eup %11208 }
 0x261   :  { %v11211_v62 = vpop.eup %11210  ;;  %v1096_v7 = vmul.f32 %v11209_v61, %v12777_v49  ;;  %v636_v49 = vrot.slane %v622_v18, %v12485_v20  ;;  %v778_v16 = vadd.f32 %v12673_v43, %v714_v55 }
 0x262   :  { %v11213_v36 = vpop.eup %11212  ;;  %v1097_v13 = vmul.f32 %v11211_v62, %v12780_v30 }
 0x263   :  { %v11215_v2 = vpop.eup %11214  ;;  %10449 = vmatmul.mubr.msk.f32.gmra.mrb[12].mxu0 %vm32_vm0, %v1096_v7  ;;  %v450_v10 = vpop.xlane.xlu0 %449  ;;  %v1098_v30 = vmul.f32 %v11213_v36, %v12783_v32  ;;  %v652_v28 = vrot.slane %v636_v49, %v12485_v20  ;;  %v638_v4 = vcombine.high %v636_v49, %v636_v49 }
 0x264   :  { %10451 = vmatprep.mubr.msk.f32.mxu0 %vm32_vm0, %v1097_v13  ;;  %v811_v45 = vmul.f32 %v12643_v12, %v450_v10  ;;  %v1099_v15 = vmul.f32 %v11215_v2, %v12786_v52  ;;  %v777_v52 = vadd.f32 %v12680_v47, %v714_v55 }
 0x265   :  { %v12867_v42 = vrot.slane %v652_v28, %v12492_v23  ;;  %v666_v57 = vrot.slane %v638_v4, %v12485_v20  ;;  %v668_v62 = vcombine.high %v652_v28, %v652_v28 }
 0x266   :  { %v843_v59 = vadd.f32 %v811_v45, %v775_v11  ;;  %v11217_v11 = vpop.eup %11216 }
 0x267   :  { %10452 = vmatmul.mubr.msk.f32.gmra.mrb[14].mxu0 %vm32_vm0, %v1098_v30  ;;  %v441_v26 = vpop.xlane.xlu1 %440  ;;  %v456_v24 = vpop.xlane.xlu0 %455  ;;  %v781_v56 = vadd.f32 %v12680_v47, %v12867_v42  ;;  %v726_v2 = vrot.slane %v666_v57, %v12492_v23  ;;  %v730_v8 = vrot.slane %v668_v62, %v12492_v23  ;;  %v670_v55 = vcombine.high %v666_v57, %v666_v57 }
 0x268   :  { %v12847_v63 = vadd.f32 %v12678_v44, %v843_v59  ;;  %10454 = vmatprep.mubr.msk.f32.mxu0 %vm32_vm0, %v1099_v15  ;;  %v808_v32 = vmul.f32 %v12643_v12, %v441_v26  ;;  %v813_v27 = vmul.f32 %v12643_v12, %v456_v24  ;;  %v782_v57 = vadd.f32 %v12673_v43, %v12867_v42 }
 0x269   :  { %v783_v59 = vadd.f32 %v12680_v47, %v726_v2  ;;  %v785_v28 = vadd.f32 %v12680_v47, %v730_v8 }
 0x26a   :  { %v9549_v29 = vmul.f32 -1.442695, %v12847_v63  ;;  %v840_v5 = vadd.f32 %v808_v32, %v772_v21  ;;  %v845_v31 = vadd.f32 %v813_v27, %v777_v52  ;;  %v780_v27 = vadd.f32 %v12673_v43, %v718_v34 }
 0x26b   :  { %v447_v33 = vpop.xlane.xlu1 %446  ;;  %v462_v35 = vpop.xlane.xlu0 %461 }
 0x26c   :  { %11218 = vpow2.f32 %v9549_v29  ;;  %v12858_v40 = vadd.f32 %v12678_v44, %v840_v5  ;;  %v12861_v48 = vadd.f32 %v12678_v44, %v845_v31  ;;  %v810_v6 = vmul.f32 %v12643_v12, %v447_v33 }
 0x26d   :  { %v815_v41 = vmul.f32 %v12643_v12, %v462_v35  ;;  %v1005_v5 = vadd.f32 1.0, %v11217_v11 }
 0x26e   :  { %v9546_v19 = vmul.f32 -1.442695, %v12858_v40  ;;  %v9551_v1 = vmul.f32 -1.442695, %v12861_v48  ;;  %v842_v53 = vadd.f32 %v810_v6, %v774_v0 }
 0x26f   :  { %v847_v50 = vadd.f32 %v815_v41, %v779_v22  ;;  %v453_v54 = vpop.xlane.xlu1 %452  ;;  %v468_v3 = vpop.xlane.xlu0 %467 }
 0x270   :  { %11220 = vpow2.f32 %v9546_v19  ;;  %v12876_v51 = vadd.f32 %v12678_v44, %v842_v53  ;;  %v812_v58 = vmul.f32 %v12643_v12, %v453_v54  ;;  %v817_v60 = vmul.f32 %v12643_v12, %v468_v3 }
 0x271   :  { %11222 = vpow2.f32 %v9551_v1  ;;  %v12881_v61 = vadd.f32 %v12678_v44, %v847_v50  ;;  %v734_v54 = vrot.slane %v670_v55, %v12492_v23 }
 0x272   :  { %v9548_v18 = vmul.f32 -1.442695, %v12876_v51  ;;  %v844_v7 = vadd.f32 %v812_v58, %v776_v39  ;;  %v849_v36 = vadd.f32 %v817_v60, %v781_v56 }
 0x273   :  { %v9553_v13 = vmul.f32 -1.442695, %v12881_v61  ;;  %v459_v9 = vpop.xlane.xlu1 %458  ;;  %v474_v10 = vpop.xlane.xlu0 %473  ;;  %v787_v60 = vadd.f32 %v12680_v47, %v734_v54 }
 0x274   :  { %11224 = vpow2.f32 %v9548_v18  ;;  %v12888_v45 = vadd.f32 %v12678_v44, %v844_v7  ;;  %v12891_v49 = vadd.f32 %v12678_v44, %v849_v36  ;;  %v814_v30 = vmul.f32 %v12643_v12, %v459_v9 }
 0x275   :  { %v819_v15 = vmul.f32 %v12643_v12, %v474_v10  ;;  %11226 = vpow2.f32 %v9553_v13 }
 0x276   :  { %v11219_v26 = vpop.eup %11218  ;;  %v9550_v21 = vmul.f32 -1.442695, %v12888_v45  ;;  %v9555_v24 = vmul.f32 -1.442695, %v12891_v49  ;;  %v846_v25 = vadd.f32 %v814_v30, %v778_v16  ;;  %v784_v30 = vadd.f32 %v12673_v43, %v726_v2 }
 0x277   :  { %v851_v32 = vadd.f32 %v819_v15, %v783_v59  ;;  %v465_v52 = vpop.xlane.xlu1 %464  ;;  %v480_v29 = vpop.xlane.xlu0 %479  ;;  %v1007_v0 = vadd.f32 1.0, %v11219_v26 }
 0x278   :  { %11228 = vpow2.f32 %v9550_v21  ;;  %v12902_v31 = vadd.f32 %v12678_v44, %v846_v25  ;;  %v816_v4 = vmul.f32 %v12643_v12, %v465_v52  ;;  %v821_v33 = vmul.f32 %v12643_v12, %v480_v29 }
 0x279   :  { %v12907_v35 = vadd.f32 %v12678_v44, %v851_v32  ;;  %11230 = vpow2.f32 %v9555_v24  ;;  %v786_v21 = vadd.f32 %v12673_v43, %v730_v8 }
 0x27a   :  { %v11221_v6 = vpop.eup %11220  ;;  %v9552_v34 = vmul.f32 -1.442695, %v12902_v31  ;;  %v848_v22 = vadd.f32 %v816_v4, %v780_v27  ;;  %v853_v41 = vadd.f32 %v821_v33, %v785_v28  ;;  %11232 = vrcp.f32 %v1005_v5 }
 0x27b   :  { %v11223_v19 = vpop.eup %11222  ;;  %v1004_v1 = vadd.f32 1.0, %v11221_v6  ;;  %v9557_v53 = vmul.f32 -1.442695, %v12907_v35  ;;  %v471_v50 = vpop.xlane.xlu1 %470 }
 0x27c   :  { %v486_v39 = vpop.xlane.xlu0 %485  ;;  %11234 = vpow2.f32 %v9552_v34  ;;  %v12913_v56 = vadd.f32 %v12678_v44, %v848_v22  ;;  %v12916_v3 = vadd.f32 %v12678_v44, %v853_v41  ;;  %v818_v58 = vmul.f32 %v12643_v12, %v471_v50 }
 0x27d   :  { %11236 = vrcp.f32 %v1004_v1  ;;  %v823_v62 = vmul.f32 %v12643_v12, %v486_v39  ;;  %v1009_v7 = vadd.f32 1.0, %v11223_v19  ;;  %v788_v41 = vadd.f32 %v12673_v43, %v734_v54 }
 0x27e   :  { %v11225_v18 = vpop.eup %11224  ;;  %11238 = vrcp.f32 %v1007_v0  ;;  %v9554_v36 = vmul.f32 -1.442695, %v12913_v56  ;;  %v850_v9 = vadd.f32 %v818_v58, %v782_v57  ;;  %v9559_v42 = vmul.f32 -1.442695, %v12916_v3 }
 0x27f   :  { %v1006_v13 = vadd.f32 1.0, %v11225_v18  ;;  %11240 = vpow2.f32 %v9557_v53  ;;  %v855_v16 = vadd.f32 %v823_v62, %v787_v60  ;;  %v477_v10 = vpop.xlane.xlu1 %476  ;;  %v11227_v11 = vpop.eup %11226 }
 0x280   :  { %11242 = vpow2.f32 %v9554_v36  ;;  %v820_v47 = vmul.f32 %v12643_v12, %v477_v10  ;;  %v12928_v59 = vadd.f32 %v12678_v44, %v850_v9  ;;  %v1011_v24 = vadd.f32 1.0, %v11227_v11 }
 0x281   :  { %11244 = vrcp.f32 %v1006_v13  ;;  %v12931_v15 = vadd.f32 %v12678_v44, %v855_v16 }
 0x282   :  { %v11229_v55 = vpop.eup %11228  ;;  %v852_v26 = vadd.f32 %v820_v47, %v784_v30  ;;  %11246 = vrcp.f32 %v1009_v7  ;;  %v9556_v32 = vmul.f32 -1.442695, %v12928_v59 }
 0x283   :  { %v1008_v25 = vadd.f32 1.0, %v11229_v55  ;;  %v483_v52 = vpop.xlane.xlu1 %482  ;;  %v11231_v2 = vpop.eup %11230  ;;  %11248 = vpow2.f32 %v9559_v42  ;;  %v9561_v27 = vmul.f32 -1.442695, %v12931_v15 }
 0x284   :  { %v12937_v28 = vadd.f32 %v12678_v44, %v852_v26  ;;  %v822_v29 = vmul.f32 %v12643_v12, %v483_v52  ;;  %v11233_v5 = vpop.eup %11232  ;;  %v1013_v6 = vadd.f32 1.0, %v11231_v2 }
 0x285   :  { %11250 = vrcp.f32 %v1008_v25  ;;  %v1101_v57 = vmul.f32 %v11233_v5, %v12832_v46 }
 0x286   :  { %v11235_v4 = vpop.eup %11234  ;;  %11252 = vpow2.f32 %v9556_v32  ;;  %v9558_v8 = vmul.f32 -1.442695, %v12937_v28  ;;  %v854_v33 = vadd.f32 %v822_v29, %v786_v21 }
 0x287   :  { %v11237_v0 = vpop.eup %11236  ;;  %11254 = vrcp.f32 %v1011_v24  ;;  %v1010_v34 = vadd.f32 1.0, %v11235_v4  ;;  %v489_v22 = vpop.xlane.xlu1 %488 }
 0x288   :  { %v11239_v19 = vpop.eup %11238  ;;  %11256 = vpow2.f32 %v9561_v27  ;;  %v12943_v1 = vadd.f32 %v12678_v44, %v854_v33  ;;  %v824_v53 = vmul.f32 %v12643_v12, %v489_v22  ;;  %v1100_v50 = vmul.f32 %v11237_v0, %v12858_v40 }
 0x289   :  { %v11241_v39 = vpop.eup %11240  ;;  %11258 = vrcp.f32 %v1010_v34  ;;  %v1103_v46 = vmul.f32 %v11239_v19, %v12847_v63  ;;  %v123_v19 = vld [vmem:[%s16287_s2 + $0x58] sm:$0xff] }
 0x28a   :  { %v11243_v58 = vpop.eup %11242  ;;  %11260 = vpow2.f32 %v9558_v8  ;;  %v9560_v60 = vmul.f32 -1.442695, %v12943_v1  ;;  %v856_v62 = vadd.f32 %v824_v53, %v788_v41  ;;  %10455 = vmatmul.mubr.msk.f32.gmra.mrb[16].mxu0 %vm32_vm0, %v1100_v50  ;;  %v1015_v36 = vadd.f32 1.0, %v11241_v39  ;;  %v13002_v39 = vld [vmem:[%s16289_s4 + $0x2] ss:$0 sm:$0xff] }
 0x28b   :  { %v11245_v43 = vpop.eup %11244  ;;  %v1012_v54 = vadd.f32 1.0, %v11243_v58  ;;  %10457 = vmatprep.mubr.msk.f32.mxu0 %vm32_vm0, %v1101_v57  ;;  %11262 = vrcp.f32 %v1013_v6 }
 0x28c   :  { %v12952_v12 = vadd.f32 %v12678_v44, %v856_v62  ;;  %v1102_v40 = vmul.f32 %v11245_v43, %v12876_v51  ;;  %v11247_v18 = vpop.eup %11246 }
 0x28d   :  { %11264 = vrcp.f32 %v1012_v54  ;;  %v11249_v7 = vpop.eup %11248  ;;  %v1105_v51 = vmul.f32 %v11247_v18, %v12861_v48 }
 0x28e   :  { %11266 = vpow2.f32 %v9560_v60  ;;  %v9562_v13 = vmul.f32 -1.442695, %v12952_v12  ;;  %10458 = vmatmul.mubr.msk.f32.gmra.mrb[18].mxu0 %vm32_vm0, %v1102_v40  ;;  %v1017_v63 = vadd.f32 1.0, %v11249_v7 }
 0x28f   :  { %v11251_v9 = vpop.eup %11250  ;;  %10460 = vmatprep.mubr.msk.f32.mxu0 %vm32_vm0, %v1103_v46 }
 0x290   :  { %v11253_v16 = vpop.eup %11252  ;;  %v1104_v44 = vmul.f32 %v11251_v9, %v12888_v45  ;;  %11268 = vpow2.f32 %v9562_v13 }
 0x291   :  { %v11255_v10 = vpop.eup %11254  ;;  %v1014_v11 = vadd.f32 1.0, %v11253_v16  ;;  %11270 = vrcp.f32 %v1015_v36 }
 0x292   :  { %v11257_v42 = vpop.eup %11256  ;;  %10461 = vmatmul.mubr.msk.f32.gmra.mrb[20].mxu0 %vm32_vm0, %v1104_v44  ;;  %v1107_v45 = vmul.f32 %v11255_v10, %v12881_v61 }
 0x293   :  { %v11259_v30 = vpop.eup %11258  ;;  %11272 = vrcp.f32 %v1014_v11  ;;  %10463 = vmatprep.mubr.msk.f32.mxu0 %vm32_vm0, %v1105_v51  ;;  %v1019_v24 = vadd.f32 1.0, %v11257_v42 }
 0x294   :  { %v11261_v47 = vpop.eup %11260  ;;  %v1106_v55 = vmul.f32 %v11259_v30, %v12902_v31  ;;  %11274 = vrcp.f32 %v1017_v63 }
 0x295   :  { %v1016_v26 = vadd.f32 1.0, %v11261_v47  ;;  %v11263_v21 = vpop.eup %11262 }
 0x296   :  { %10464 = vmatmul.mubr.msk.f32.gmra.mrb[22].mxu0 %vm32_vm0, %v1106_v55  ;;  %v1109_v2 = vmul.f32 %v11263_v21, %v12891_v49 }
 0x297   :  { %v11265_v48 = vpop.eup %11264  ;;  %11276 = vrcp.f32 %v1016_v26  ;;  %10466 = vmatprep.mubr.msk.f32.mxu0 %vm32_vm0, %v1107_v45 }
 0x298   :  { %v11267_v25 = vpop.eup %11266  ;;  %v1108_v32 = vmul.f32 %v11265_v48, %v12913_v56  ;;  %11278 = vrcp.f32 %v1019_v24 }
 0x299   :  { %v1018_v52 = vadd.f32 1.0, %v11267_v25 }
 0x29a   :  { %10467 = vmatmul.mubr.msk.f32.gmra.mrb[24].mxu0 %vm32_vm0, %v1108_v32  ;;  %v11269_v31 = vpop.eup %11268 }
 0x29b   :  { %11280 = vrcp.f32 %v1018_v52  ;;  %10469 = vmatprep.mubr.msk.f32.mxu0 %vm32_vm0, %v1109_v2  ;;  %v11271_v61 = vpop.eup %11270  ;;  %v1020_v27 = vadd.f32 1.0, %v11269_v31 }
 0x29c   :  { %v1111_v4 = vmul.f32 %v11271_v61, %v12907_v35 }
 0x29d   :  { %v11273_v29 = vpop.eup %11272  ;;  %11282 = vrcp.f32 %v1020_v27 }
 0x29e   :  { %v1110_v5 = vmul.f32 %v11273_v29, %v12928_v59  ;;  %v11275_v8 = vpop.eup %11274 }
 0x29f   :  { %v1113_v33 = vmul.f32 %v11275_v8, %v12916_v3  ;;  %v120_v3 = vld [vmem:[%s16287_s2 + $0x40] sm:$0xff]  ;;  %v125_v8 = vld [vmem:[%s16287_s2 + $0x68] sm:$0xff] }
 0x2a0   :  { %10470 = vmatmul.mubr.msk.f32.gmra.mrb[26].mxu0 %vm32_vm0, %v1110_v5 }
 0x2a1   :  { %v11277_v56 = vpop.eup %11276  ;;  %10472 = vmatprep.mubr.msk.f32.mxu0 %vm32_vm0, %v1111_v4  ;;  %v124_v4 = vld [vmem:[%s16287_s2 + $0x60] sm:$0xff] }
 0x2a2   :  { %v1112_v49 = vmul.f32 %v11277_v56, %v12937_v28  ;;  %v11279_v0 = vpop.eup %11278  ;;  %v121_v28 = vld [vmem:[%s16287_s2 + $0x48] sm:$0xff] }
 0x2a3   :  { %v1115_v35 = vmul.f32 %v11279_v0, %v12931_v15  ;;  %v10970_v41 = vpack.c.bf16 %v121_v28, %v120_v3  ;;  %v122_v15 = vld [vmem:[%s16287_s2 + $0x50] sm:$0xff] }
 0x2a4   :  { %10473 = vmatmul.mubr.msk.f32.gmra.mrb[28].mxu0 %vm32_vm0, %v1112_v49 }
 0x2a5   :  { %v11281_v6 = vpop.eup %11280  ;;  %10475 = vmatprep.mubr.msk.f32.mxu0 %vm32_vm0, %v1113_v33  ;;  %10971 = vmatprep.subr.bf16.mxu1 %v10970_v41  ;;  %v10982_v33 = vpack.c.bf16 %v125_v8, %v124_v4 }
 0x2a6   :  { %v1114_v59 = vmul.f32 %v11281_v6, %v12943_v1  ;;  %10973 = vmatpush3.bf16.msra.mxu1 %v10970_v41  ;;  %v10974_v1 = vpack.c.bf16 %v123_v19, %v122_v15 }
 0x2a7   :  { %v11283_v34 = vpop.eup %11282 }
 0x2a8   :  { %10476 = vmatmul.mubr.msk.f32.gmra.mrb[30].mxu0 %vm32_vm0, %v1114_v59  ;;  %v1116_v22 = vmul.f32 %v11283_v34, %v12952_v12  ;;  %10975 = vmatprep.subr.bf16.mxu1 %v10974_v1 }
 0x2a9   :  { %10478 = vmatprep.mubr.msk.f32.mxu0 %vm32_vm0, %v1115_v35 }
 0x2aa   :  { %10977 = vmatpush3.bf16.msra.mxu1 %v10974_v1 }
 0x2ab   :  { %10983 = vmatprep.subr.bf16.mxu1 %v10982_v33 }
 0x2ac   :  { %10479 = vmatmul.mubr.msk.f32.gmra.mrb[32].mxu0 %vm32_vm0, %v1116_v22 }
 0x31e   :  { %v12997_v53 = vpop.f32.mrb[2].mxu1 }
 0x31f   :  { %v1756_v50 = vpop.f32.mrb[3].mxu1 }
 0x320   :  { %v10435_v57 = vpop.f32.mrb[2].mxu0  ;;  %v13012_v54 = vadd.f32 %v13002_v39, %v1756_v50 }
 0x321   :  { %v13005_v58 = vadd.f32 %v10435_v57, %v13002_v39  ;;  %v1283_v60 = vpop.f32.mrb[3].mxu0 }
 0x322   :  { %v13008_v62 = vadd.f32 %v13002_v39, %v1283_v60  ;;  %v9632_v13 = vmul.f32 -1.442695, %v13012_v54 }
 0x323   :  { %v9597_v43 = vmul.f32 -1.442695, %v13005_v58 }
 0x324   :  { %v9596_v12 = vmul.f32 -1.442695, %v13008_v62  ;;  %v10438_v40 = vpop.f32.mrb[4].mxu0 }
 0x325   :  { %11284 = vpow2.f32 %v9597_v43  ;;  %v13016_v18 = vadd.f32 %v10438_v40, %v13002_v39  ;;  %v1293_v46 = vpop.f32.mrb[5].mxu0 }
 0x326   :  { %11286 = vpow2.f32 %v9596_v12  ;;  %v13019_v7 = vadd.f32 %v13002_v39, %v1293_v46 }
 0x327   :  { %v9599_v36 = vmul.f32 -1.442695, %v13016_v18 }
 0x328   :  { %v9598_v9 = vmul.f32 -1.442695, %v13019_v7  ;;  %v10441_v16 = vpop.f32.mrb[6].mxu0 }
 0x329   :  { %11288 = vpow2.f32 %v9599_v36  ;;  %v13025_v44 = vadd.f32 %v10441_v16, %v13002_v39  ;;  %v1303_v10 = vpop.f32.mrb[7].mxu0 }
 0x32a   :  { %11290 = vpow2.f32 %v9598_v9  ;;  %v13028_v11 = vadd.f32 %v13002_v39, %v1303_v10 }
 0x32b   :  { %v9601_v51 = vmul.f32 -1.442695, %v13025_v44  ;;  %11292 = vpow2.f32 %v9632_v13 }
 0x32c   :  { %v9600_v42 = vmul.f32 -1.442695, %v13028_v11  ;;  %v10444_v63 = vpop.f32.mrb[8].mxu0 }
 0x32d   :  { %11294 = vpow2.f32 %v9601_v51  ;;  %v13033_v30 = vadd.f32 %v10444_v63, %v13002_v39  ;;  %v1313_v47 = vpop.f32.mrb[9].mxu0 }
 0x32e   :  { %11296 = vpow2.f32 %v9600_v42  ;;  %v13036_v55 = vadd.f32 %v13002_v39, %v1313_v47 }
 0x32f   :  { %v11285_v26 = vpop.eup %11284  ;;  %v9603_v24 = vmul.f32 -1.442695, %v13033_v30 }
 0x330   :  { %v11287_v45 = vpop.eup %11286  ;;  %v1539_v21 = vadd.f32 1.0, %v11285_v26  ;;  %v9602_v25 = vmul.f32 -1.442695, %v13036_v55 }
 0x331   :  { %v1538_v48 = vadd.f32 1.0, %v11287_v45  ;;  %v10447_v32 = vpop.f32.mrb[10].mxu0 }
 0x332   :  { %11298 = vrcp.f32 %v1539_v21  ;;  %v13041_v52 = vadd.f32 %v10447_v32, %v13002_v39  ;;  %v1323_v2 = vpop.f32.mrb[11].mxu0 }
 0x333   :  { %v11289_v31 = vpop.eup %11288  ;;  %11300 = vrcp.f32 %v1538_v48  ;;  %v13044_v61 = vadd.f32 %v13002_v39, %v1323_v2 }
 0x334   :  { %v11291_v27 = vpop.eup %11290  ;;  %v1541_v29 = vadd.f32 1.0, %v11289_v31  ;;  %11302 = vpow2.f32 %v9603_v24  ;;  %v9605_v5 = vmul.f32 -1.442695, %v13041_v52 }
 0x335   :  { %v1540_v56 = vadd.f32 1.0, %v11291_v27  ;;  %11304 = vpow2.f32 %v9602_v25  ;;  %v9604_v49 = vmul.f32 -1.442695, %v13044_v61  ;;  %v11293_v0 = vpop.eup %11292 }
 0x336   :  { %11306 = vrcp.f32 %v1541_v29  ;;  %v10450_v6 = vpop.f32.mrb[12].mxu0  ;;  %v1771_v19 = vadd.f32 1.0, %v11293_v0 }
 0x337   :  { %v11295_v59 = vpop.eup %11294  ;;  %11308 = vrcp.f32 %v1540_v56  ;;  %v13055_v35 = vadd.f32 %v10450_v6, %v13002_v39  ;;  %v1333_v34 = vpop.f32.mrb[13].mxu0 }
 0x338   :  { %v11297_v22 = vpop.eup %11296  ;;  %v1543_v3 = vadd.f32 1.0, %v11295_v59  ;;  %11310 = vpow2.f32 %v9605_v5  ;;  %v13058_v28 = vadd.f32 %v13002_v39, %v1333_v34 }
 0x339   :  { %v1542_v41 = vadd.f32 1.0, %v11297_v22  ;;  %11312 = vpow2.f32 %v9604_v49  ;;  %v9607_v15 = vmul.f32 -1.442695, %v13055_v35 }
 0x33a   :  { %11314 = vrcp.f32 %v1543_v3  ;;  %v9606_v1 = vmul.f32 -1.442695, %v13058_v28  ;;  %v10453_v50 = vpop.f32.mrb[14].mxu0 }
 0x33b   :  { %11316 = vrcp.f32 %v1542_v41  ;;  %v13063_v57 = vadd.f32 %v10453_v50, %v13002_v39  ;;  %v1343_v60 = vpop.f32.mrb[15].mxu0 }
 0x33c   :  { %v11299_v43 = vpop.eup %11298  ;;  %11318 = vpow2.f32 %v9607_v15  ;;  %v13066_v12 = vadd.f32 %v13002_v39, %v1343_v60 }
 0x33d   :  { %v11301_v40 = vpop.eup %11300  ;;  %v1635_v46 = vmul.f32 %v11299_v43, %v13005_v58  ;;  %11320 = vpow2.f32 %v9606_v1  ;;  %v9609_v36 = vmul.f32 -1.442695, %v13063_v57 }
 0x33e   :  { %v11303_v13 = vpop.eup %11302  ;;  %11322 = vrcp.f32 %v1771_v19  ;;  %v1634_v9 = vmul.f32 %v11301_v40, %v13008_v62  ;;  %v9608_v42 = vmul.f32 -1.442695, %v13066_v12 }
 0x33f   :  { %v11305_v16 = vpop.eup %11304  ;;  %v2792_v10 = vsel %vm32_vm0, %v1635_v46, 0.0  ;;  %v1545_v51 = vadd.f32 1.0, %v11303_v13  ;;  %11324 = vpow2.f32 %v9609_v36 }
 0x340   :  { %v11307_v63 = vpop.eup %11306  ;;  %v2791_v47 = vsel %vm32_vm0, %v1634_v9, 0.0  ;;  %v1544_v26 = vadd.f32 1.0, %v11305_v16  ;;  %10500 = vmatprep.mubr.msk.f32.mxu1 %vm32_vm0, %v1634_v9 }
 0x341   :  { %v11309_v58 = vpop.eup %11308  ;;  %v2793_v45 = vadd.f32 %v2792_v10, %v2791_v47  ;;  %v1637_v21 = vmul.f32 %v11307_v63, %v13016_v18  ;;  %11326 = vrcp.f32 %v1545_v51  ;;  %10501 = vmatmul.mubr.msk.f32.vlgmr.msra.gmra.mrb[4].mxu1 %vm32_vm0, %v1635_v46 }
 0x342   :  { %v11311_v62 = vpop.eup %11310  ;;  %v1636_v24 = vmul.f32 %v11309_v58, %v13019_v7  ;;  %11328 = vrcp.f32 %v1544_v26  ;;  %10985 = vmatpush3.bf16.msra.mxu1 %v10982_v33 }
 0x343   :  { %v11313_v48 = vpop.eup %11312  ;;  %v2794_v25 = vrot.slane %v2793_v45, 4  ;;  %v2801_v32 = vsel %vm32_vm0, %v1637_v21, 0.0  ;;  %v1547_v2 = vadd.f32 1.0, %v11311_v62  ;;  %11330 = vpow2.f32 %v9608_v42 }
 0x344   :  { %v11315_v31 = vpop.eup %11314  ;;  %v2800_v27 = vsel %vm32_vm0, %v1636_v24, 0.0  ;;  %v1546_v29 = vadd.f32 1.0, %v11313_v48  ;;  %10503 = vmatprep.mubr.msk.f32.mxu1 %vm32_vm0, %v1636_v24 }
 0x345   :  { %v11317_v18 = vpop.eup %11316  ;;  %v2795_v5 = vadd.f32 %v2794_v25, %v2793_v45  ;;  %v2802_v4 = vadd.f32 %v2801_v32, %v2800_v27  ;;  %v1639_v8 = vmul.f32 %v11315_v31, %v13025_v44  ;;  %11332 = vrcp.f32 %v1547_v2  ;;  %10504 = vmatmul.mubr.msk.f32.gmra.mrb[6].mxu1 %vm32_vm0, %v1637_v21 }
 0x346   :  { %v11319_v7 = vpop.eup %11318  ;;  %v1638_v56 = vmul.f32 %v11317_v18, %v13028_v11  ;;  %11334 = vrcp.f32 %v1546_v29 }
 0x347   :  { %v11321_v49 = vpop.eup %11320  ;;  %v2796_v33 = vrot.slane %v2795_v5, 2  ;;  %v2803_v0 = vrot.slane %v2802_v4, 4  ;;  %v2810_v6 = vsel %vm32_vm0, %v1639_v8, 0.0  ;;  %v1549_v59 = vadd.f32 1.0, %v11319_v7 }
 0x348   :  { %v11323_v34 = vpop.eup %11322  ;;  %v2809_v22 = vsel %vm32_vm0, %v1638_v56, 0.0  ;;  %v1548_v3 = vadd.f32 1.0, %v11321_v49  ;;  %10506 = vmatprep.mubr.msk.f32.mxu1 %vm32_vm0, %v1638_v56 }
 0x349   :  { %v11325_v44 = vpop.eup %11324  ;;  %v2797_v41 = vadd.f32 %v2796_v33, %v2795_v5  ;;  %v2804_v15 = vadd.f32 %v2803_v0, %v2802_v4  ;;  %v2811_v19 = vadd.f32 %v2810_v6, %v2809_v22  ;;  %11336 = vrcp.f32 %v1549_v59  ;;  %10507 = vmatmul.mubr.msk.f32.gmra.mrb[8].mxu1 %vm32_vm0, %v1639_v8 }
 0x34a   :  { %11338 = vrcp.f32 %v1548_v3  ;;  %v1551_v11 = vadd.f32 1.0, %v11325_v44  ;;  %v13089_v46 = vmul.f32 %v11323_v34, %v13012_v54 }
 0x34b   :  { %v11327_v1 = vpop.eup %11326  ;;  %v2798_v50 = vrot.slane %v2797_v41, 1  ;;  %v2805_v60 = vrot.slane %v2804_v15, 2  ;;  %v2812_v43 = vrot.slane %v2811_v19, 4 }
 0x34c   :  { %v11329_v40 = vpop.eup %11328  ;;  %v1641_v36 = vmul.f32 %v11327_v1, %v13033_v30  ;;  %11340 = vrcp.f32 %v1551_v11  ;;  %v2937_v24 = vrot.slane %v13089_v46, 1  ;;  %v2938_v56 = vrot.slane %v13089_v46, 2 }
 0x34d   :  { %v11331_v13 = vpop.eup %11330  ;;  %v2799_v9 = vadd.f32 %v2798_v50, %v2797_v41  ;;  %v2806_v16 = vadd.f32 %v2805_v60, %v2804_v15  ;;  %v2813_v10 = vadd.f32 %v2812_v43, %v2811_v19  ;;  %v1640_v51 = vmul.f32 %v11329_v40, %v13036_v55 }
 0x34e   :  { %v2819_v42 = vsel %vm32_vm0, %v1641_v36, 0.0  ;;  %v1550_v63 = vadd.f32 1.0, %v11331_v13  ;;  %v13116_v60 = vadd.f32 %v12997_v53, %v13002_v39  ;;  %v2939_v13 = vrot.slane %v13089_v46, 3 }
 0x34f   :  { %v11333_v47 = vpop.eup %11332  ;;  %v2967_v26 = vsub.f32 %v2799_v9, %v13089_v46  ;;  %v2807_v58 = vrot.slane %v2806_v16, 1  ;;  %v2814_v45 = vrot.slane %v2813_v10, 2  ;;  %v2818_v54 = vsel %vm32_vm0, %v1640_v51, 0.0  ;;  %10509 = vmatprep.mubr.msk.f32.mxu1 %vm32_vm0, %v1640_v51 }
 0x350   :  { %v11335_v30 = vpop.eup %11334  ;;  %v2820_v21 = vadd.f32 %v2819_v42, %v2818_v54  ;;  %v1643_v62 = vmul.f32 %v11333_v47, %v13041_v52  ;;  %11342 = vrcp.f32 %v1550_v63  ;;  %10510 = vmatmul.mubr.msk.f32.gmra.mrb[10].mxu1 %vm32_vm0, %v1641_v36  ;;  %v2940_v54 = vrot.slane %v13089_v46, 4 }
 0x351   :  { %v2808_v55 = vadd.f32 %v2807_v58, %v2806_v16  ;;  %v2815_v48 = vadd.f32 %v2814_v45, %v2813_v10  ;;  %v1642_v25 = vmul.f32 %v11335_v30, %v13044_v61 }
 0x352   :  { %v2821_v32 = vrot.slane %v2820_v21, 4  ;;  %v2828_v2 = vsel %vm32_vm0, %v1643_v62, 0.0 }
 0x353   :  { %v11337_v31 = vpop.eup %11336  ;;  %v2968_v27 = vsub.f32 %v2808_v55, %v2937_v24  ;;  %v2816_v29 = vrot.slane %v2815_v48, 1  ;;  %v2827_v18 = vsel %vm32_vm0, %v1642_v25, 0.0  ;;  %10512 = vmatprep.mubr.msk.f32.mxu1 %vm32_vm0, %v1642_v25 }
 0x354   :  { %v11339_v52 = vpop.eup %11338  ;;  %v2822_v5 = vadd.f32 %v2821_v32, %v2820_v21  ;;  %v2829_v4 = vadd.f32 %v2828_v2, %v2827_v18  ;;  %v1645_v8 = vmul.f32 %v11337_v31, %v13055_v35  ;;  %10513 = vmatmul.mubr.msk.f32.gmra.mrb[12].mxu1 %vm32_vm0, %v1643_v62 }
 0x355   :  { %v2999_v7 = vrot.slane %v2968_v27, 7  ;;  %v2817_v61 = vadd.f32 %v2816_v29, %v2815_v48  ;;  %v1644_v49 = vmul.f32 %v11339_v52, %v13058_v28  ;;  %v2941_v52 = vrot.slane %v13089_v46, 5 }
 0x356   :  { %v11341_v33 = vpop.eup %11340  ;;  %v2823_v0 = vrot.slane %v2822_v5, 2  ;;  %v2830_v6 = vrot.slane %v2829_v4, 4  ;;  %v2837_v59 = vsel %vm32_vm0, %v1645_v8, 0.0 }
 0x357   :  { %v2969_v34 = vsub.f32 %v2817_v61, %v2938_v56  ;;  %v2836_v22 = vsel %vm32_vm0, %v1644_v49, 0.0  ;;  %v1647_v3 = vmul.f32 %v11341_v33, %v13063_v57  ;;  %10515 = vmatprep.mubr.msk.f32.mxu1 %vm32_vm0, %v1644_v49  ;;  %v3000_v35 = vsel %vm2673_vm2, %v2999_v7, %v2967_v26 }
 0x358   :  { %v2824_v44 = vadd.f32 %v2823_v0, %v2822_v5  ;;  %v2831_v41 = vadd.f32 %v2830_v6, %v2829_v4  ;;  %v2838_v15 = vadd.f32 %v2837_v59, %v2836_v22  ;;  %10516 = vmatmul.mubr.msk.f32.gmra.mrb[14].mxu1 %vm32_vm0, %v1645_v8  ;;  %v9633_v26 = vmul.f32 -1.442695, %v13116_v60 }
 0x359   :  { %v3001_v28 = vrot.slane %v2969_v34, 6  ;;  %v2846_v57 = vsel %vm32_vm0, %v1647_v3, 0.0 }
 0x35a   :  { %v11343_v19 = vpop.eup %11342  ;;  %v2825_v11 = vrot.slane %v2824_v44, 1  ;;  %v2832_v1 = vrot.slane %v2831_v41, 2  ;;  %v2839_v50 = vrot.slane %v2838_v15, 4 }
 0x35b   :  { %v1646_v43 = vmul.f32 %v11343_v19, %v13066_v12  ;;  %v3002_v40 = vsel %vm2675_vm3, %v3001_v28, %v3000_v35  ;;  %v2942_v28 = vrot.slane %v13089_v46, 6 }
 0x35c   :  { %v2826_v36 = vadd.f32 %v2825_v11, %v2824_v44  ;;  %v2833_v9 = vadd.f32 %v2832_v1, %v2831_v41  ;;  %v2840_v16 = vadd.f32 %v2839_v50, %v2838_v15 }
 0x35d   :  { %v2845_v10 = vsel %vm32_vm0, %v1646_v43, 0.0  ;;  %10518 = vmatprep.mubr.msk.f32.mxu1 %vm32_vm0, %v1646_v43  ;;  %v10456_v51 = vpop.f32.mrb[16].mxu0 }
 0x35e   :  { %v2970_v42 = vsub.f32 %v2826_v36, %v2939_v13  ;;  %v2834_v53 = vrot.slane %v2833_v9, 1  ;;  %v2841_v63 = vrot.slane %v2840_v16, 2  ;;  %v2847_v47 = vadd.f32 %v2846_v57, %v2845_v10  ;;  %10519 = vmatmul.mubr.msk.f32.gmra.mrb[16].mxu1 %vm32_vm0, %v1647_v3  ;;  %v1353_v12 = vpop.f32.mrb[17].mxu0 }
 0x35f   :  { %v13127_v58 = vadd.f32 %v10456_v51, %v13002_v39  ;;  %v13130_v45 = vadd.f32 %v13002_v39, %v1353_v12 }
 0x360   :  { %v3003_v30 = vrot.slane %v2970_v42, 5  ;;  %v2835_v21 = vadd.f32 %v2834_v53, %v2833_v9  ;;  %v2842_v62 = vadd.f32 %v2841_v63, %v2840_v16  ;;  %v2848_v55 = vrot.slane %v2847_v47, 4 }
 0x361   :  { %v9611_v24 = vmul.f32 -1.442695, %v13127_v58  ;;  %v9610_v48 = vmul.f32 -1.442695, %v13130_v45  ;;  %v10459_v25 = vpop.f32.mrb[18].mxu0 }
 0x362   :  { %v2843_v32 = vrot.slane %v2842_v62, 1  ;;  %v2849_v2 = vadd.f32 %v2848_v55, %v2847_v47  ;;  %v13136_v31 = vadd.f32 %v10459_v25, %v13002_v39  ;;  %v1363_v27 = vpop.f32.mrb[19].mxu0  ;;  %v2971_v29 = vsub.f32 %v2835_v21, %v2940_v54 }
 0x363   :  { %11344 = vpow2.f32 %v9611_v24  ;;  %v13139_v18 = vadd.f32 %v13002_v39, %v1363_v27  ;;  %v3004_v5 = vsel %vm2677_vm4, %v3003_v30, %v3002_v40 }
 0x364   :  { %v2844_v4 = vadd.f32 %v2843_v32, %v2842_v62  ;;  %v2850_v8 = vrot.slane %v2849_v2, 2  ;;  %11346 = vpow2.f32 %v9610_v48  ;;  %v9613_v7 = vmul.f32 -1.442695, %v13136_v31 }
 0x365   :  { %11348 = vpow2.f32 %v9633_v26  ;;  %v9612_v61 = vmul.f32 -1.442695, %v13139_v18  ;;  %v10462_v56 = vpop.f32.mrb[20].mxu0  ;;  %v3005_v49 = vrot.slane %v2971_v29, 4 }
 0x366   :  { %v2851_v33 = vadd.f32 %v2850_v8, %v2849_v2  ;;  %11350 = vpow2.f32 %v9613_v7  ;;  %v13146_v0 = vadd.f32 %v10462_v56, %v13002_v39  ;;  %v1373_v6 = vpop.f32.mrb[21].mxu0  ;;  %v2972_v59 = vsub.f32 %v2844_v4, %v2941_v52 }
 0x367   :  { %11352 = vpow2.f32 %v9612_v61  ;;  %v13149_v34 = vadd.f32 %v13002_v39, %v1373_v6  ;;  %v3006_v22 = vsel %vm2679_vm5, %v3005_v49, %v3004_v5 }
 0x368   :  { %v2852_v3 = vrot.slane %v2851_v33, 1  ;;  %v9615_v35 = vmul.f32 -1.442695, %v13146_v0  ;;  %v3007_v44 = vrot.slane %v2972_v59, 3 }
 0x369   :  { %v9614_v41 = vmul.f32 -1.442695, %v13149_v34  ;;  %v10465_v15 = vpop.f32.mrb[22].mxu0 }
 0x36a   :  { %11354 = vpow2.f32 %v9615_v35  ;;  %v13156_v19 = vadd.f32 %v10465_v15, %v13002_v39  ;;  %v1383_v11 = vpop.f32.mrb[23].mxu0  ;;  %v2853_v1 = vadd.f32 %v2852_v3, %v2851_v33  ;;  %v3008_v50 = vsel %vm2681_vm6, %v3007_v44, %v3006_v22 }
 0x36b   :  { %11356 = vpow2.f32 %v9614_v41  ;;  %v13160_v57 = vadd.f32 %v13002_v39, %v1383_v11 }
 0x36c   :  { %v9617_v43 = vmul.f32 -1.442695, %v13156_v19  ;;  %v2973_v40 = vsub.f32 %v2853_v1, %v2942_v28 }
 0x36d   :  { %v11345_v36 = vpop.eup %11344  ;;  %v9616_v13 = vmul.f32 -1.442695, %v13160_v57  ;;  %v10468_v9 = vpop.f32.mrb[24].mxu0 }
 0x36e   :  { %v11347_v16 = vpop.eup %11346  ;;  %v1553_v10 = vadd.f32 1.0, %v11345_v36  ;;  %11358 = vpow2.f32 %v9617_v43  ;;  %v13165_v51 = vadd.f32 %v10468_v9, %v13002_v39  ;;  %v1393_v42 = vpop.f32.mrb[25].mxu0  ;;  %v3009_v53 = vrot.slane %v2973_v40, 2 }
 0x36f   :  { %v11349_v63 = vpop.eup %11348  ;;  %v1552_v47 = vadd.f32 1.0, %v11347_v16  ;;  %11360 = vpow2.f32 %v9616_v13  ;;  %v13168_v12 = vadd.f32 %v13002_v39, %v1393_v42 }
 0x370   :  { %v11351_v26 = vpop.eup %11350  ;;  %11362 = vrcp.f32 %v1553_v10  ;;  %v9619_v54 = vmul.f32 -1.442695, %v13165_v51  ;;  %v13172_v30 = vsel %vm2683_vm7, %v3009_v53, %v3008_v50  ;;  %v1772_v24 = vadd.f32 1.0, %v11349_v63 }
 0x371   :  { %v11353_v21 = vpop.eup %11352  ;;  %11364 = vrcp.f32 %v1552_v47  ;;  %v1555_v62 = vadd.f32 1.0, %v11351_v26  ;;  %v9618_v55 = vmul.f32 -1.442695, %v13168_v12 }
 0x372   :  { %v1554_v48 = vadd.f32 1.0, %v11353_v21  ;;  %11366 = vpow2.f32 %v9619_v54 }
 0x373   :  { %11368 = vrcp.f32 %v1555_v62  ;;  %v10471_v25 = vpop.f32.mrb[26].mxu0 }
 0x374   :  { %v11355_v32 = vpop.eup %11354  ;;  %11370 = vrcp.f32 %v1554_v48  ;;  %v13176_v2 = vadd.f32 %v10471_v25, %v13002_v39  ;;  %v1403_v27 = vpop.f32.mrb[27].mxu0 }
 0x375   :  { %v11357_v29 = vpop.eup %11356  ;;  %v1557_v52 = vadd.f32 1.0, %v11355_v32  ;;  %11372 = vpow2.f32 %v9618_v55  ;;  %v13179_v5 = vadd.f32 %v13002_v39, %v1403_v27 }
 0x376   :  { %11374 = vrcp.f32 %v1772_v24  ;;  %v1556_v4 = vadd.f32 1.0, %v11357_v29  ;;  %v9621_v8 = vmul.f32 -1.442695, %v13176_v2 }
 0x377   :  { %11376 = vrcp.f32 %v1557_v52  ;;  %v9620_v7 = vmul.f32 -1.442695, %v13179_v5  ;;  %v10474_v61 = vpop.f32.mrb[28].mxu0 }
 0x378   :  { %v11359_v56 = vpop.eup %11358  ;;  %11378 = vrcp.f32 %v1556_v4  ;;  %v13184_v49 = vadd.f32 %v10474_v61, %v13002_v39  ;;  %v1413_v33 = vpop.f32.mrb[29].mxu0 }
 0x379   :  { %v11361_v6 = vpop.eup %11360  ;;  %v1559_v59 = vadd.f32 1.0, %v11359_v56  ;;  %11380 = vpow2.f32 %v9621_v8  ;;  %v13187_v22 = vadd.f32 %v13002_v39, %v1413_v33 }
 0x37a   :  { %v11363_v3 = vpop.eup %11362  ;;  %v1558_v35 = vadd.f32 1.0, %v11361_v6  ;;  %11382 = vpow2.f32 %v9620_v7  ;;  %v9623_v44 = vmul.f32 -1.442695, %v13184_v49 }
 0x37b   :  { %v11365_v41 = vpop.eup %11364  ;;  %v1649_v15 = vmul.f32 %v11363_v3, %v13127_v58  ;;  %11384 = vrcp.f32 %v1559_v59  ;;  %v9622_v28 = vmul.f32 -1.442695, %v13187_v22  ;;  %v10477_v11 = vpop.f32.mrb[30].mxu0 }
 0x37c   :  { %v11367_v1 = vpop.eup %11366  ;;  %v1648_v50 = vmul.f32 %v11365_v41, %v13130_v45  ;;  %11386 = vrcp.f32 %v1558_v35  ;;  %v13194_v43 = vadd.f32 %v10477_v11, %v13002_v39  ;;  %v1423_v40 = vpop.f32.mrb[31].mxu0  ;;  %v126_v11 = vld [vmem:[%s16287_s2 + $0x70] sm:$0xff] }
 0x37d   :  { %v11369_v36 = vpop.eup %11368  ;;  %v2855_v13 = vsel %vm32_vm0, %v1649_v15, 0.0  ;;  %v1561_v9 = vadd.f32 1.0, %v11367_v1  ;;  %11388 = vpow2.f32 %v9623_v44  ;;  %v13198_v16 = vadd.f32 %v13002_v39, %v1423_v40  ;;  %v127_v1 = vld [vmem:[%s16287_s2 + $0x78] sm:$0xff] }
 0x37e   :  { %v11371_v58 = vpop.eup %11370  ;;  %v2854_v10 = vsel %vm32_vm0, %v1648_v50, 0.0  ;;  %v1651_v42 = vmul.f32 %v11369_v36, %v13136_v31  ;;  %11390 = vpow2.f32 %v9622_v28  ;;  %v9625_v45 = vmul.f32 -1.442695, %v13194_v43  ;;  %10521 = vmatprep.mubr.msk.f32.mxu1 %vm32_vm0, %v1648_v50 }
 0x37f   :  { %v11373_v53 = vpop.eup %11372  ;;  %v2856_v63 = vadd.f32 %v2855_v13, %v2854_v10  ;;  %v1650_v47 = vmul.f32 %v11371_v58, %v13139_v18  ;;  %11392 = vrcp.f32 %v1561_v9  ;;  %v9624_v26 = vmul.f32 -1.442695, %v13198_v16  ;;  %v10480_v54 = vpop.f32.mrb[32].mxu0  ;;  %10522 = vmatmul.mubr.msk.f32.gmra.mrb[18].mxu1 %vm32_vm0, %v1649_v15 }
 0x380   :  { %v11375_v21 = vpop.eup %11374  ;;  %v2864_v62 = vsel %vm32_vm0, %v1651_v42, 0.0  ;;  %v1560_v55 = vadd.f32 1.0, %v11373_v53  ;;  %11394 = vpow2.f32 %v9625_v45  ;;  %v13209_v31 = vadd.f32 %v10480_v54, %v13002_v39  ;;  %v1433_v24 = vpop.f32.mrb[33].mxu0 }
 0x381   :  { %v11377_v48 = vpop.eup %11376  ;;  %v2857_v25 = vrot.slane %v2856_v63, 4  ;;  %v2863_v32 = vsel %vm32_vm0, %v1650_v47, 0.0  ;;  %11396 = vpow2.f32 %v9624_v26  ;;  %v13213_v18 = vadd.f32 %v13002_v39, %v1433_v24  ;;  %10524 = vmatprep.mubr.msk.f32.mxu1 %vm32_vm0, %v1650_v47 }
 0x382   :  { %v11379_v27 = vpop.eup %11378  ;;  %v2865_v29 = vadd.f32 %v2864_v62, %v2863_v32  ;;  %v1653_v52 = vmul.f32 %v11377_v48, %v13146_v0  ;;  %11398 = vrcp.f32 %v1560_v55  ;;  %v9627_v4 = vmul.f32 -1.442695, %v13209_v31 }
 0x383   :  { %v11381_v8 = vpop.eup %11380  ;;  %v13219_v7 = vmul.f32 %v11375_v21, %v13116_v60  ;;  %v2858_v61 = vadd.f32 %v2857_v25, %v2856_v63  ;;  %v1652_v56 = vmul.f32 %v11379_v27, %v13149_v34  ;;  %v9626_v33 = vmul.f32 -1.442695, %v13213_v18  ;;  %10525 = vmatmul.mubr.msk.f32.gmra.mrb[20].mxu1 %vm32_vm0, %v1651_v42 }
 0x384   :  { %v11383_v39 = vpop.eup %11382  ;;  %v2866_v6 = vrot.slane %v2865_v29, 4  ;;  %v2873_v59 = vsel %vm32_vm0, %v1653_v52, 0.0  ;;  %v1563_v3 = vadd.f32 1.0, %v11381_v8  ;;  %11400 = vpow2.f32 %v9627_v4 }
 0x385   :  { %v11385_v0 = vpop.eup %11384  ;;  %v2859_v35 = vrot.slane %v2858_v61, 2  ;;  %v2872_v44 = vsel %vm32_vm0, %v1652_v56, 0.0  ;;  %v1562_v41 = vadd.f32 1.0, %v11383_v39  ;;  %11402 = vpow2.f32 %v9626_v33  ;;  %10527 = vmatprep.mubr.msk.f32.mxu1 %vm32_vm0, %v1652_v56 }
 0x386   :  { %v11387_v60 = vpop.eup %11386  ;;  %v2867_v34 = vadd.f32 %v2866_v6, %v2865_v29  ;;  %v2874_v15 = vadd.f32 %v2873_v59, %v2872_v44  ;;  %v1655_v28 = vmul.f32 %v11385_v0, %v13156_v19  ;;  %11404 = vrcp.f32 %v1563_v3 }
 0x387   :  { %v11389_v50 = vpop.eup %11388  ;;  %v2860_v40 = vadd.f32 %v2859_v35, %v2858_v61  ;;  %v2944_v36 = vrot.slane %v13219_v7, 1  ;;  %v1654_v13 = vmul.f32 %v11387_v60, %v13160_v57  ;;  %11406 = vrcp.f32 %v1562_v41  ;;  %10528 = vmatmul.mubr.msk.f32.gmra.mrb[22].mxu1 %vm32_vm0, %v1653_v52 }
 0x388   :  { %v11391_v19 = vpop.eup %11390  ;;  %v2868_v9 = vrot.slane %v2867_v34, 2  ;;  %v2875_v58 = vrot.slane %v2874_v15, 4  ;;  %v2882_v10 = vsel %vm32_vm0, %v1655_v28, 0.0  ;;  %v1565_v42 = vadd.f32 1.0, %v11389_v50 }
 0x389   :  { %v11393_v45 = vpop.eup %11392  ;;  %v2881_v53 = vsel %vm32_vm0, %v1654_v13, 0.0  ;;  %v1564_v63 = vadd.f32 1.0, %v11391_v19  ;;  %10530 = vmatprep.mubr.msk.f32.mxu1 %vm32_vm0, %v1654_v13  ;;  %v2861_v47 = vrot.slane %v2860_v40, 1  ;;  %v10986_v26 = vpack.c.bf16 %v127_v1, %v126_v11 }
 0x38a   :  { %v11395_v54 = vpop.eup %11394  ;;  %v2869_v21 = vadd.f32 %v2868_v9, %v2867_v34  ;;  %v2876_v57 = vadd.f32 %v2875_v58, %v2874_v15  ;;  %v2883_v62 = vadd.f32 %v2882_v10, %v2881_v53  ;;  %v1657_v55 = vmul.f32 %v11393_v45, %v13165_v51 }
 0x38b   :  { %v11397_v24 = vpop.eup %11396  ;;  %11408 = vrcp.f32 %v1565_v42  ;;  %v1567_v48 = vadd.f32 1.0, %v11395_v54  ;;  %10531 = vmatmul.mubr.msk.f32.gmra.mrb[24].mxu1 %vm32_vm0, %v1655_v28  ;;  %v2862_v25 = vadd.f32 %v2861_v47, %v2860_v40  ;;  %v2943_v32 = vrot.slane %v13089_v46, 7  ;;  %10987 = vmatprep.subr.bf16.mxu1 %v10986_v26 }
 0x38c   :  { %v11399_v27 = vpop.eup %11398  ;;  %v2870_v29 = vrot.slane %v2869_v21, 1  ;;  %v2877_v52 = vrot.slane %v2876_v57, 2  ;;  %v2884_v4 = vrot.slane %v2883_v62, 4  ;;  %v2891_v8 = vsel %vm32_vm0, %v1657_v55, 0.0  ;;  %10989 = vmatpush3.bf16.msra.mxu1 %v10986_v26 }
 0x38d   :  { %v1656_v61 = vmul.f32 %v11399_v27, %v13168_v12  ;;  %11410 = vrcp.f32 %v1564_v63  ;;  %v1566_v51 = vadd.f32 1.0, %v11397_v24  ;;  %v2974_v56 = vsub.f32 %v2862_v25, %v2943_v32 }
 0x38e   :  { %v11401_v33 = vpop.eup %11400  ;;  %v2871_v39 = vadd.f32 %v2870_v29, %v2869_v21  ;;  %v2878_v6 = vadd.f32 %v2877_v52, %v2876_v57  ;;  %v2885_v59 = vadd.f32 %v2884_v4, %v2883_v62  ;;  %11412 = vrcp.f32 %v1567_v48 }
 0x38f   :  { %v11403_v3 = vpop.eup %11402  ;;  %v2890_v46 = vsel %vm32_vm0, %v1656_v61, 0.0  ;;  %11414 = vrcp.f32 %v1566_v51  ;;  %v1569_v0 = vadd.f32 1.0, %v11401_v33  ;;  %10533 = vmatprep.mubr.msk.f32.mxu1 %vm32_vm0, %v1656_v61  ;;  %v3011_v35 = vrot.slane %v2974_v56, 1 }
 0x390   :  { %v11405_v44 = vpop.eup %11404  ;;  %v2975_v41 = vsub.f32 %v2871_v39, %v13219_v7  ;;  %v2879_v12 = vrot.slane %v2878_v6, 1  ;;  %v2886_v60 = vrot.slane %v2885_v59, 2  ;;  %v2892_v34 = vadd.f32 %v2891_v8, %v2890_v46  ;;  %10534 = vmatmul.mubr.msk.f32.gmra.mrb[26].mxu1 %vm32_vm0, %v1657_v55 }
 0x391   :  { %v11407_v15 = vpop.eup %11406  ;;  %v1659_v28 = vmul.f32 %v11405_v44, %v13176_v2  ;;  %11416 = vrcp.f32 %v1569_v0  ;;  %v1568_v11 = vadd.f32 1.0, %v11403_v3  ;;  %v3012_v1 = vsel %vm2685_vm8, %v3011_v35, %v13172_v30 }
 0x392   :  { %v2880_v50 = vadd.f32 %v2879_v12, %v2878_v6  ;;  %v2887_v40 = vadd.f32 %v2886_v60, %v2885_v59  ;;  %v2893_v13 = vrot.slane %v2892_v34, 4  ;;  %v1658_v19 = vmul.f32 %v11407_v15, %v13179_v5  ;;  %3027 = vrot.lane.b32.xlu0 %v3012_v1, %s12400_s8 }
 0x393   :  { %v2900_v9 = vsel %vm32_vm0, %v1659_v28, 0.0  ;;  %11418 = vrcp.f32 %v1568_v11  ;;  %v2945_v45 = vrot.slane %v13219_v7, 2  ;;  %v2946_v61 = vrot.slane %v13219_v7, 3 }
 0x394   :  { %v2976_v58 = vsub.f32 %v2880_v50, %v2944_v36  ;;  %v2888_v2 = vrot.slane %v2887_v40, 1  ;;  %v2894_v10 = vadd.f32 %v2893_v13, %v2892_v34  ;;  %v2899_v42 = vsel %vm32_vm0, %v1658_v19, 0.0  ;;  %10536 = vmatprep.mubr.msk.f32.mxu1 %vm32_vm0, %v1658_v19 }
 0x395   :  { %v11409_v30 = vpop.eup %11408  ;;  %v2901_v53 = vadd.f32 %v2900_v9, %v2899_v42  ;;  %10537 = vmatmul.mubr.msk.f32.gmra.mrb[28].mxu1 %vm32_vm0, %v1659_v28  ;;  %v2947_v15 = vrot.slane %v13219_v7, 4 }
 0x396   :  { %v3013_v5 = vrot.slane %v2976_v58, 7  ;;  %v2889_v63 = vadd.f32 %v2888_v2, %v2887_v40  ;;  %v2895_v47 = vrot.slane %v2894_v10, 2  ;;  %v1661_v26 = vmul.f32 %v11409_v30, %v13184_v49 }
 0x397   :  { %v11411_v54 = vpop.eup %11410  ;;  %v2902_v21 = vrot.slane %v2901_v53, 4  ;;  %v2948_v30 = vrot.slane %v13219_v7, 5 }
 0x398   :  { %v11413_v36 = vpop.eup %11412  ;;  %v2977_v57 = vsub.f32 %v2889_v63, %v2945_v45  ;;  %v2896_v62 = vadd.f32 %v2895_v47, %v2894_v10  ;;  %v2909_v55 = vsel %vm32_vm0, %v1661_v26, 0.0  ;;  %v1660_v24 = vmul.f32 %v11411_v54, %v13187_v22 }
 0x399   :  { %v11415_v48 = vpop.eup %11414  ;;  %v2903_v25 = vadd.f32 %v2902_v21, %v2901_v53  ;;  %v1663_v32 = vmul.f32 %v11413_v36, %v13194_v43  ;;  %v3014_v27 = vsel %vm2673_vm2, %v3013_v5, %v2975_v41  ;;  %v2949_v54 = vrot.slane %v13219_v7, 6 }
 0x39a   :  { %v3015_v29 = vrot.slane %v2977_v57, 6  ;;  %v2897_v52 = vrot.slane %v2896_v62, 1  ;;  %v2908_v4 = vsel %vm32_vm0, %v1660_v24, 0.0  ;;  %v1662_v49 = vmul.f32 %v11415_v48, %v13198_v16  ;;  %10539 = vmatprep.mubr.msk.f32.mxu1 %vm32_vm0, %v1660_v24 }
 0x39b   :  { %v11417_v8 = vpop.eup %11416  ;;  %v2904_v51 = vrot.slane %v2903_v25, 2  ;;  %v2910_v56 = vadd.f32 %v2909_v55, %v2908_v4  ;;  %v2918_v22 = vsel %vm32_vm0, %v1663_v32, 0.0  ;;  %10540 = vmatmul.mubr.msk.f32.gmra.mrb[30].mxu1 %vm32_vm0, %v1661_v26  ;;  %v2950_v24 = vrot.slane %v13219_v7, 7  ;;  %v128_v4 = vld [vmem:[%s16287_s2 + $0x80] sm:$0xff] }
 0x39c   :  { %v2898_v43 = vadd.f32 %v2897_v52, %v2896_v62  ;;  %v2917_v33 = vsel %vm32_vm0, %v1662_v49, 0.0  ;;  %v1665_v39 = vmul.f32 %v11417_v8, %v13209_v31  ;;  %10542 = vmatprep.mubr.msk.f32.mxu1 %vm32_vm0, %v1662_v49  ;;  %v3016_v16 = vsel %vm2675_vm3, %v3015_v29, %v3014_v27  ;;  %v129_v49 = vld [vmem:[%s16287_s2 + $0x88] sm:$0xff]  ;;  %v130_v8 = vld [vmem:[%s16287_s2 + $0x90] sm:$0xff] }
 0x39d   :  { %v11419_v6 = vpop.eup %11418  ;;  %v2905_v59 = vadd.f32 %v2904_v51, %v2903_v25  ;;  %v2911_v3 = vrot.slane %v2910_v56, 4  ;;  %v2919_v46 = vadd.f32 %v2918_v22, %v2917_v33  ;;  %v10990_v7 = vpack.c.bf16 %v129_v49, %v128_v4 }
 0x39e   :  { %v2978_v0 = vsub.f32 %v2898_v43, %v2946_v61  ;;  %v2927_v35 = vsel %vm32_vm0, %v1665_v39, 0.0  ;;  %v1664_v44 = vmul.f32 %v11419_v6, %v13213_v18  ;;  %v131_v61 = vld [vmem:[%s16287_s2 + $0x98] sm:$0xff]  ;;  %v13310_v43 = vld [vmem:[%s16289_s4 + $0x3] ss:$0 sm:$0xff] }
 0x39f   :  { %v2906_v41 = vrot.slane %v2905_v59, 1  ;;  %v2912_v12 = vadd.f32 %v2911_v3, %v2910_v56  ;;  %v2920_v60 = vrot.slane %v2919_v46, 4  ;;  %10543 = vmatmul.mubr.msk.f32.gmra.mrb[32].mxu1 %vm32_vm0, %v1663_v32  ;;  %10991 = vmatprep.subr.bf16.mxu1 %v10990_v7  ;;  %v10994_v51 = vpack.c.bf16 %v131_v61, %v130_v8  ;;  %v147_v3 = vld [vmem:[%s16289_s4 + $0x7] sm:$0x1]  ;;  %v13369_v8 = vld [vmem:[%s16289_s4 + $0x4] ss:$0 sm:$0xff] }
 0x3a0   :  { %v3017_v34 = vrot.slane %v2978_v0, 5  ;;  %v2926_v31 = vsel %vm32_vm0, %v1664_v44, 0.0  ;;  %10545 = vmatprep.mubr.msk.f32.mxu1 %vm32_vm0, %v1664_v44  ;;  %10993 = vmatpush3.bf16.msra.mxu1 %v10990_v7  ;;  %11134 = vpush %v147_v3 }
 0x3a1   :  { %v2907_v28 = vadd.f32 %v2906_v41, %v2905_v59  ;;  %v2913_v11 = vrot.slane %v2912_v12, 2  ;;  %v2921_v1 = vadd.f32 %v2920_v60, %v2919_v46  ;;  %v2928_v50 = vadd.f32 %v2927_v35, %v2926_v31  ;;  %10995 = vmatprep.subr.bf16.mxu1 %v10994_v51 }
 0x3a2   :  { %v3018_v40 = vsel %vm2677_vm4, %v3017_v34, %v3016_v16 }
 0x3a3   :  { %v2914_v13 = vadd.f32 %v2913_v11, %v2912_v12  ;;  %v2922_v18 = vrot.slane %v2921_v1, 2  ;;  %v2929_v19 = vrot.slane %v2928_v50, 4  ;;  %10546 = vmatmul.mubr.msk.f32.gmra.mrb[34].mxu1 %vm32_vm0, %v1665_v39  ;;  %v2979_v9 = vsub.f32 %v2907_v28, %v2947_v15 }
 0x3a4   :  { %10997 = vmatpush3.bf16.msra.mxu1 %v10994_v51 }
 0x3a5   :  { %v2915_v58 = vrot.slane %v2914_v13, 1  ;;  %v2923_v2 = vadd.f32 %v2922_v18, %v2921_v1  ;;  %v2930_v10 = vadd.f32 %v2929_v19, %v2928_v50  ;;  %v3019_v42 = vrot.slane %v2979_v9, 4 }
 0x3a7   :  { %v2916_v45 = vadd.f32 %v2915_v58, %v2914_v13  ;;  %v2924_v53 = vrot.slane %v2923_v2, 1  ;;  %v2931_v5 = vrot.slane %v2930_v10, 2  ;;  %v3020_v63 = vsel %vm2679_vm5, %v3019_v42, %v3018_v40 }
 0x3a9   :  { %v2932_v47 = vadd.f32 %v2931_v5, %v2930_v10  ;;  %v2925_v26 = vadd.f32 %v2924_v53, %v2923_v2  ;;  %v2980_v21 = vsub.f32 %v2916_v45, %v2948_v30 }
 0x3ab   :  { %v2933_v36 = vrot.slane %v2932_v47, 1  ;;  %v2981_v57 = vsub.f32 %v2925_v26, %v2949_v54  ;;  %v3021_v62 = vrot.slane %v2980_v21, 3 }
 0x3ad   :  { %v2934_v55 = vadd.f32 %v2933_v36, %v2932_v47  ;;  %v3022_v48 = vsel %vm2681_vm6, %v3021_v62, %v3020_v63  ;;  %v3023_v25 = vrot.slane %v2981_v57, 2 }
 0x3af   :  { %v2982_v32 = vsub.f32 %v2934_v55, %v2950_v24  ;;  %v3024_v27 = vsel %vm2683_vm7, %v3023_v25, %v3022_v48 }
 0x3b1   :  { %v3025_v29 = vrot.slane %v2982_v32, 1 }
 0x3b3   :  { %v3026_v52 = vsel %vm2685_vm8, %v3025_v29, %v3024_v27 }
 0x3b4   :  { %3029 = vrot.lane.b32.xlu1 %v3026_v52, %s12400_s8 }
 0x3d1   :  { %s11135_s30 = spop %11134 }
 0x404   :  { %v3028_v56 = vpop.permute.xlu0 %3027 }
 0x405   :  { %v3033_v22 = vsel %vm32_vm0, %v12553_v38, %v3028_v56 }
 0x406   :  { %10571 = vmatprep.mubr.msk.f32.mxu1 %vm3039_vm9, %v3033_v22 }
 0x414   :  { %v10502_v33 = vpop.f32.mrb[4].mxu1 }
 0x415   :  { %v13313_v39 = vadd.f32 %v10502_v33, %v13310_v43  ;;  %v1945_v16 = vpop.f32.mrb[5].mxu1 }
 0x416   :  { %v13316_v6 = vadd.f32 %v13310_v43, %v1945_v16 }
 0x417   :  { %v9668_v59 = vmul.f32 -1.442695, %v13313_v39 }
 0x418   :  { %v9667_v46 = vmul.f32 -1.442695, %v13316_v6  ;;  %v10505_v0 = vpop.f32.mrb[6].mxu1 }
 0x419   :  { %11420 = vpow2.f32 %v9668_v59  ;;  %v13324_v35 = vadd.f32 %v10505_v0, %v13310_v43  ;;  %v1955_v44 = vpop.f32.mrb[7].mxu1 }
 0x41a   :  { %11422 = vpow2.f32 %v9667_v46  ;;  %v13327_v41 = vadd.f32 %v13310_v43, %v1955_v44 }
 0x41b   :  { %v9670_v12 = vmul.f32 -1.442695, %v13324_v35 }
 0x41c   :  { %v9669_v60 = vmul.f32 -1.442695, %v13327_v41  ;;  %v10508_v34 = vpop.f32.mrb[8].mxu1 }
 0x41d   :  { %11424 = vpow2.f32 %v9670_v12  ;;  %v13332_v31 = vadd.f32 %v10508_v34, %v13310_v43  ;;  %v1965_v15 = vpop.f32.mrb[9].mxu1 }
 0x41e   :  { %11426 = vpow2.f32 %v9669_v60  ;;  %v13335_v28 = vadd.f32 %v13310_v43, %v1965_v15 }
 0x41f   :  { %v9672_v11 = vmul.f32 -1.442695, %v13332_v31 }
 0x420   :  { %v9671_v1 = vmul.f32 -1.442695, %v13335_v28 }
 0x421   :  { %11428 = vpow2.f32 %v9672_v11 }
 0x422   :  { %11430 = vpow2.f32 %v9671_v1 }
 0x423   :  { %v11421_v50 = vpop.eup %11420  ;;  %v10511_v40 = vpop.f32.mrb[10].mxu1 }
 0x424   :  { %v11423_v13 = vpop.eup %11422  ;;  %v2201_v18 = vadd.f32 1.0, %v11421_v50  ;;  %v13340_v19 = vadd.f32 %v10511_v40, %v13310_v43  ;;  %v1975_v9 = vpop.f32.mrb[11].mxu1 }
 0x425   :  { %v2200_v58 = vadd.f32 1.0, %v11423_v13  ;;  %v13343_v2 = vadd.f32 %v13310_v43, %v1975_v9 }
 0x426   :  { %11432 = vrcp.f32 %v2201_v18  ;;  %v9674_v10 = vmul.f32 -1.442695, %v13340_v19  ;;  %v3030_v42 = vpop.permute.xlu1 %3029 }
 0x427   :  { %v11425_v30 = vpop.eup %11424  ;;  %11434 = vrcp.f32 %v2200_v58  ;;  %v9673_v45 = vmul.f32 -1.442695, %v13343_v2  ;;  %v3034_v53 = vsel %vm32_vm0, %v12551_v37, %v3030_v42  ;;  %v10514_v5 = vpop.f32.mrb[12].mxu1 }
 0x428   :  { %v11427_v63 = vpop.eup %11426  ;;  %v2203_v47 = vadd.f32 1.0, %v11425_v30  ;;  %11436 = vpow2.f32 %v9674_v10  ;;  %v13350_v26 = vadd.f32 %v10514_v5, %v13310_v43  ;;  %v1985_v54 = vpop.f32.mrb[13].mxu1  ;;  %10572 = vmatmul.mubr.msk.f32.vlgmr.msra.gmra.mrb[36].mxu1 %vm3039_vm9, %v3034_v53 }
 0x429   :  { %v2202_v21 = vadd.f32 1.0, %v11427_v63  ;;  %11438 = vpow2.f32 %v9673_v45  ;;  %v13354_v36 = vadd.f32 %v13310_v43, %v1985_v54 }
 0x42a   :  { %11440 = vrcp.f32 %v2203_v47  ;;  %v9676_v57 = vmul.f32 -1.442695, %v13350_v26 }
 0x42b   :  { %v11429_v62 = vpop.eup %11428  ;;  %11442 = vrcp.f32 %v2202_v21  ;;  %v9675_v55 = vmul.f32 -1.442695, %v13354_v36  ;;  %v10517_v24 = vpop.f32.mrb[14].mxu1 }
 0x42c   :  { %v11431_v48 = vpop.eup %11430  ;;  %v2205_v25 = vadd.f32 1.0, %v11429_v62  ;;  %11444 = vpow2.f32 %v9676_v57  ;;  %v13359_v32 = vadd.f32 %v10517_v24, %v13310_v43  ;;  %v1995_v27 = vpop.f32.mrb[15].mxu1 }
 0x42d   :  { %v2204_v29 = vadd.f32 1.0, %v11431_v48  ;;  %11446 = vpow2.f32 %v9675_v55  ;;  %v13362_v52 = vadd.f32 %v13310_v43, %v1995_v27 }
 0x42e   :  { %11448 = vrcp.f32 %v2205_v25  ;;  %v9678_v4 = vmul.f32 -1.442695, %v13359_v32 }
 0x42f   :  { %11450 = vrcp.f32 %v2204_v29  ;;  %v9677_v49 = vmul.f32 -1.442695, %v13362_v52 }
 0x430   :  { %v11433_v7 = vpop.eup %11432  ;;  %11452 = vpow2.f32 %v9678_v4 }
 0x431   :  { %v11435_v61 = vpop.eup %11434  ;;  %v2297_v51 = vmul.f32 %v11433_v7, %v13313_v39  ;;  %11454 = vpow2.f32 %v9677_v49  ;;  %v10520_v56 = vpop.f32.mrb[16].mxu1 }
 0x432   :  { %v11437_v22 = vpop.eup %11436  ;;  %v2296_v33 = vmul.f32 %v11435_v61, %v13316_v6  ;;  %v13374_v16 = vadd.f32 %v10520_v56, %v13310_v43  ;;  %v2005_v59 = vpop.f32.mrb[17].mxu1 }
 0x433   :  { %v11439_v3 = vpop.eup %11438  ;;  %v2207_v46 = vadd.f32 1.0, %v11437_v22  ;;  %v13377_v0 = vadd.f32 %v13310_v43, %v2005_v59  ;;  %v2333_v44 = vmul.f32 %v13369_v8, %v2297_v51 }
 0x434   :  { %v11441_v12 = vpop.eup %11440  ;;  %v2206_v60 = vadd.f32 1.0, %v11439_v3  ;;  %v9680_v39 = vmul.f32 -1.442695, %v13374_v16  ;;  %v2332_v34 = vmul.f32 %v13369_v8, %v2296_v33 }
 0x435   :  { %v11443_v15 = vpop.eup %11442  ;;  %v2299_v6 = vmul.f32 %v11441_v12, %v13324_v35  ;;  %11456 = vrcp.f32 %v2207_v46  ;;  %v9679_v11 = vmul.f32 -1.442695, %v13377_v0  ;;  %v2367_v1 = vsel %vm32_vm0, %v2333_v44, 0.0 }
 0x436   :  { %v11445_v50 = vpop.eup %11444  ;;  %v2298_v40 = vmul.f32 %v11443_v15, %v13327_v41  ;;  %11458 = vrcp.f32 %v2206_v60  ;;  %2368 = vadd.xlane.f32.xlu0 %v2367_v1  ;;  %v2364_v13 = vsel %vm32_vm0, %v2332_v34, 0.0 }
 0x437   :  { %v11447_v18 = vpop.eup %11446  ;;  %v2209_v9 = vadd.f32 1.0, %v11445_v50  ;;  %11460 = vpow2.f32 %v9680_v39  ;;  %2365 = vadd.xlane.f32.xlu1 %v2364_v13  ;;  %v2335_v58 = vmul.f32 %v13369_v8, %v2299_v6 }
 0x438   :  { %v11449_v10 = vpop.eup %11448  ;;  %v2208_v35 = vadd.f32 1.0, %v11447_v18  ;;  %11462 = vpow2.f32 %v9679_v11  ;;  %v2334_v42 = vmul.f32 %v13369_v8, %v2298_v40 }
 0x439   :  { %v11451_v30 = vpop.eup %11450  ;;  %v2301_v45 = vmul.f32 %v11449_v10, %v13332_v31  ;;  %11464 = vrcp.f32 %v2209_v9  ;;  %v2373_v41 = vsel %vm32_vm0, %v2335_v58, 0.0 }
 0x43a   :  { %v11453_v53 = vpop.eup %11452  ;;  %v2300_v5 = vmul.f32 %v11451_v30, %v13335_v28  ;;  %11466 = vrcp.f32 %v2208_v35  ;;  %v2370_v63 = vsel %vm32_vm0, %v2334_v42, 0.0 }
 0x43b   :  { %v11455_v47 = vpop.eup %11454  ;;  %v2211_v54 = vadd.f32 1.0, %v11453_v53  ;;  %2374 = vadd.xlane.f32.xlu1 %v2373_v41  ;;  %2371 = vadd.xlane.f32.xlu0 %v2370_v63  ;;  %v2337_v21 = vmul.f32 %v13369_v8, %v2301_v45 }
 0x43c   :  { %v2210_v57 = vadd.f32 1.0, %v11455_v47  ;;  %v2336_v62 = vmul.f32 %v13369_v8, %v2300_v5 }
 0x43d   :  { %11468 = vrcp.f32 %v2211_v54  ;;  %v2379_v31 = vsel %vm32_vm0, %v2337_v21, 0.0 }
 0x43e   :  { %11470 = vrcp.f32 %v2210_v57  ;;  %v2376_v55 = vsel %vm32_vm0, %v2336_v62, 0.0 }
 0x43f   :  { %v11457_v24 = vpop.eup %11456  ;;  %2380 = vadd.xlane.f32.xlu1 %v2379_v31  ;;  %2377 = vadd.xlane.f32.xlu0 %v2376_v55 }
 0x440   :  { %v11459_v28 = vpop.eup %11458  ;;  %v2303_v48 = vmul.f32 %v11457_v24, %v13340_v19 }
 0x441   :  { %v11461_v25 = vpop.eup %11460  ;;  %v2302_v27 = vmul.f32 %v11459_v28, %v13343_v2 }
 0x442   :  { %v11463_v29 = vpop.eup %11462  ;;  %v2213_v4 = vadd.f32 1.0, %v11461_v25  ;;  %v2339_v49 = vmul.f32 %v13369_v8, %v2303_v48 }
 0x443   :  { %v11465_v7 = vpop.eup %11464  ;;  %v2212_v61 = vadd.f32 1.0, %v11463_v29  ;;  %v2338_v51 = vmul.f32 %v13369_v8, %v2302_v27 }
 0x444   :  { %v11467_v56 = vpop.eup %11466  ;;  %v2305_v22 = vmul.f32 %v11465_v7, %v13350_v26  ;;  %11472 = vrcp.f32 %v2213_v4  ;;  %v2385_v33 = vsel %vm32_vm0, %v2339_v49, 0.0 }
 0x445   :  { %v2304_v59 = vmul.f32 %v11467_v56, %v13354_v36  ;;  %11474 = vrcp.f32 %v2212_v61  ;;  %2386 = vadd.xlane.f32.xlu1 %v2385_v33  ;;  %v2382_v19 = vsel %vm32_vm0, %v2338_v51, 0.0  ;;  %v13462_v33 = vld [vmem:[%s16286_s1] sm:$0xff] }
 0x446   :  { %2383 = vadd.xlane.f32.xlu0 %v2382_v19  ;;  %v2341_v2 = vmul.f32 %v13369_v8, %v2305_v22 }
 0x447   :  { %v11469_v3 = vpop.eup %11468  ;;  %v2340_v46 = vmul.f32 %v13369_v8, %v2304_v59  ;;  %v13467_v59 = vld [vmem:[%s16286_s1 + $0x8] sm:$0xff] }
 0x448   :  { %v11471_v44 = vpop.eup %11470  ;;  %v2307_v12 = vmul.f32 %v11469_v3, %v13359_v32  ;;  %v2391_v26 = vsel %vm32_vm0, %v2341_v2, 0.0  ;;  %v10978_v19 = vpack.c.bf16 %v13467_v59, %v13462_v33 }
 0x449   :  { %v2306_v60 = vmul.f32 %v11471_v44, %v13362_v52  ;;  %2392 = vadd.xlane.f32.xlu1 %v2391_v26  ;;  %v2388_v36 = vsel %vm32_vm0, %v2340_v46, 0.0 }
 0x44a   :  { %2389 = vadd.xlane.f32.xlu0 %v2388_v36  ;;  %v2343_v39 = vmul.f32 %v13369_v8, %v2307_v12  ;;  %10979 = vmatprep.subr.bf16.mxu0 %v10978_v19 }
 0x44b   :  { %v2342_v34 = vmul.f32 %v13369_v8, %v2306_v60  ;;  %10981 = vmatpush3.bf16.msra.mxu0 %v10978_v19 }
 0x44c   :  { %v2397_v15 = vsel %vm32_vm0, %v2343_v39, 0.0 }
 0x44d   :  { %2398 = vadd.xlane.f32.xlu1 %v2397_v15  ;;  %v2394_v6 = vsel %vm32_vm0, %v2342_v34, 0.0 }
 0x44e   :  { %v11473_v11 = vpop.eup %11472  ;;  %2395 = vadd.xlane.f32.xlu0 %v2394_v6 }
 0x44f   :  { %v11475_v32 = vpop.eup %11474  ;;  %v2309_v1 = vmul.f32 %v11473_v11, %v13374_v16 }
 0x450   :  { %v2308_v52 = vmul.f32 %v11475_v32, %v13377_v0 }
 0x451   :  { %v2345_v50 = vmul.f32 %v13369_v8, %v2309_v1 }
 0x452   :  { %v2344_v40 = vmul.f32 %v13369_v8, %v2308_v52  ;;  %v10523_v13 = vpop.f32.mrb[18].mxu1 }
 0x453   :  { %v2403_v18 = vsel %vm32_vm0, %v2345_v50, 0.0  ;;  %v13421_v9 = vadd.f32 %v10523_v13, %v13310_v43  ;;  %v2015_v58 = vpop.f32.mrb[19].mxu1 }
 0x454   :  { %2404 = vadd.xlane.f32.xlu1 %v2403_v18  ;;  %v2400_v10 = vsel %vm32_vm0, %v2344_v40, 0.0  ;;  %v13425_v35 = vadd.f32 %v13310_v43, %v2015_v58 }
 0x455   :  { %2401 = vadd.xlane.f32.xlu0 %v2400_v10  ;;  %v9682_v16 = vmul.f32 -1.442695, %v13421_v9 }
 0x456   :  { %v9681_v0 = vmul.f32 -1.442695, %v13425_v35  ;;  %v10526_v42 = vpop.f32.mrb[20].mxu1 }
 0x457   :  { %11476 = vpow2.f32 %v9682_v16  ;;  %v13430_v30 = vadd.f32 %v10526_v42, %v13310_v43  ;;  %v2025_v45 = vpop.f32.mrb[21].mxu1 }
 0x458   :  { %11478 = vpow2.f32 %v9681_v0  ;;  %v13433_v41 = vadd.f32 %v13310_v43, %v2025_v45 }
 0x459   :  { %v9684_v53 = vmul.f32 -1.442695, %v13430_v30 }
 0x45a   :  { %v9683_v5 = vmul.f32 -1.442695, %v13433_v41  ;;  %v10529_v63 = vpop.f32.mrb[22].mxu1 }
 0x45b   :  { %11480 = vpow2.f32 %v9684_v53  ;;  %v13438_v47 = vadd.f32 %v10529_v63, %v13310_v43  ;;  %v2035_v54 = vpop.f32.mrb[23].mxu1 }
 0x45c   :  { %11482 = vpow2.f32 %v9683_v5  ;;  %v13441_v21 = vadd.f32 %v13310_v43, %v2035_v54 }
 0x45d   :  { %v9686_v57 = vmul.f32 -1.442695, %v13438_v47 }
 0x45e   :  { %v9685_v62 = vmul.f32 -1.442695, %v13441_v21  ;;  %v10532_v31 = vpop.f32.mrb[24].mxu1 }
 0x45f   :  { %11484 = vpow2.f32 %v9686_v57  ;;  %v13446_v55 = vadd.f32 %v10532_v31, %v13310_v43  ;;  %v2045_v24 = vpop.f32.mrb[25].mxu1 }
 0x460   :  { %11486 = vpow2.f32 %v9685_v62  ;;  %v13449_v28 = vadd.f32 %v13310_v43, %v2045_v24 }
 0x461   :  { %v11477_v48 = vpop.eup %11476  ;;  %v9688_v25 = vmul.f32 -1.442695, %v13446_v55 }
 0x462   :  { %v11479_v27 = vpop.eup %11478  ;;  %v2215_v29 = vadd.f32 1.0, %v11477_v48  ;;  %v9687_v4 = vmul.f32 -1.442695, %v13449_v28 }
 0x463   :  { %v2214_v49 = vadd.f32 1.0, %v11479_v27  ;;  %11488 = vpow2.f32 %v9688_v25  ;;  %v10535_v7 = vpop.f32.mrb[26].mxu1 }
 0x464   :  { %11490 = vrcp.f32 %v2215_v29  ;;  %v13454_v61 = vadd.f32 %v10535_v7, %v13310_v43  ;;  %v2055_v51 = vpop.f32.mrb[27].mxu1 }
 0x465   :  { %v11481_v56 = vpop.eup %11480  ;;  %11492 = vrcp.f32 %v2214_v49  ;;  %v13457_v22 = vadd.f32 %v13310_v43, %v2055_v51 }
 0x466   :  { %v11483_v2 = vpop.eup %11482  ;;  %v2217_v3 = vadd.f32 1.0, %v11481_v56  ;;  %11494 = vpow2.f32 %v9687_v4  ;;  %v9690_v46 = vmul.f32 -1.442695, %v13454_v61 }
 0x467   :  { %v2216_v44 = vadd.f32 1.0, %v11483_v2  ;;  %v9689_v12 = vmul.f32 -1.442695, %v13457_v22 }
 0x468   :  { %11496 = vrcp.f32 %v2217_v3  ;;  %v10538_v26 = vpop.f32.mrb[28].mxu1 }
 0x469   :  { %v11485_v60 = vpop.eup %11484  ;;  %11498 = vrcp.f32 %v2216_v44  ;;  %v13474_v36 = vadd.f32 %v10538_v26, %v13310_v43  ;;  %v2065_v39 = vpop.f32.mrb[29].mxu1 }
 0x46a   :  { %v11487_v34 = vpop.eup %11486  ;;  %v2219_v15 = vadd.f32 1.0, %v11485_v60  ;;  %11500 = vpow2.f32 %v9690_v46  ;;  %v13477_v6 = vadd.f32 %v13310_v43, %v2065_v39 }
 0x46b   :  { %v2218_v11 = vadd.f32 1.0, %v11487_v34  ;;  %11502 = vpow2.f32 %v9689_v12  ;;  %v9692_v32 = vmul.f32 -1.442695, %v13474_v36 }
 0x46c   :  { %11504 = vrcp.f32 %v2219_v15  ;;  %v9691_v1 = vmul.f32 -1.442695, %v13477_v6 }
 0x46d   :  { %v11489_v52 = vpop.eup %11488  ;;  %11506 = vrcp.f32 %v2218_v11 }
 0x46e   :  { %v11491_v50 = vpop.eup %11490  ;;  %v2221_v40 = vadd.f32 1.0, %v11489_v52  ;;  %11508 = vpow2.f32 %v9692_v32  ;;  %v10541_v13 = vpop.f32.mrb[30].mxu1 }
 0x46f   :  { %v11493_v18 = vpop.eup %11492  ;;  %v2311_v58 = vmul.f32 %v11491_v50, %v13421_v9  ;;  %11510 = vpow2.f32 %v9691_v1  ;;  %v13483_v10 = vadd.f32 %v10541_v13, %v13310_v43  ;;  %v2075_v16 = vpop.f32.mrb[31].mxu1 }
 0x470   :  { %v11495_v0 = vpop.eup %11494  ;;  %v2310_v42 = vmul.f32 %v11493_v18, %v13425_v35  ;;  %11512 = vrcp.f32 %v2221_v40  ;;  %v13487_v45 = vadd.f32 %v13310_v43, %v2075_v16 }
 0x471   :  { %v2220_v53 = vadd.f32 1.0, %v11495_v0  ;;  %v9694_v5 = vmul.f32 -1.442695, %v13483_v10  ;;  %v2347_v63 = vmul.f32 %v13369_v8, %v2311_v58 }
 0x472   :  { %v11497_v54 = vpop.eup %11496  ;;  %v9693_v9 = vmul.f32 -1.442695, %v13487_v45  ;;  %v10544_v57 = vpop.f32.mrb[32].mxu1  ;;  %v2346_v62 = vmul.f32 %v13369_v8, %v2310_v42 }
 0x473   :  { %v11499_v31 = vpop.eup %11498  ;;  %v2313_v24 = vmul.f32 %v11497_v54, %v13430_v30  ;;  %11514 = vrcp.f32 %v2220_v53  ;;  %v13495_v35 = vadd.f32 %v10544_v57, %v13310_v43  ;;  %v2085_v48 = vpop.f32.mrb[33].mxu1  ;;  %v2409_v25 = vsel %vm32_vm0, %v2347_v63, 0.0 }
 0x474   :  { %v11501_v27 = vpop.eup %11500  ;;  %v2312_v29 = vmul.f32 %v11499_v31, %v13433_v41  ;;  %11516 = vpow2.f32 %v9694_v5  ;;  %v13500_v4 = vadd.f32 %v13310_v43, %v2085_v48  ;;  %2410 = vadd.xlane.f32.xlu1 %v2409_v25  ;;  %v2406_v49 = vsel %vm32_vm0, %v2346_v62, 0.0 }
 0x475   :  { %v11503_v7 = vpop.eup %11502  ;;  %v2223_v51 = vadd.f32 1.0, %v11501_v27  ;;  %11518 = vpow2.f32 %v9693_v9  ;;  %v9696_v30 = vmul.f32 -1.442695, %v13495_v35  ;;  %2407 = vadd.xlane.f32.xlu0 %v2406_v49  ;;  %v2349_v56 = vmul.f32 %v13369_v8, %v2313_v24 }
 0x476   :  { %v11505_v19 = vpop.eup %11504  ;;  %v2222_v2 = vadd.f32 1.0, %v11503_v7  ;;  %v9695_v3 = vmul.f32 -1.442695, %v13500_v4  ;;  %v10547_v41 = vpop.f32.mrb[34].mxu1  ;;  %v2348_v46 = vmul.f32 %v13369_v8, %v2312_v29 }
 0x477   :  { %v11507_v44 = vpop.eup %11506  ;;  %v2315_v12 = vmul.f32 %v11505_v19, %v13438_v47  ;;  %11520 = vrcp.f32 %v2223_v51  ;;  %v13509_v26 = vadd.f32 %v10547_v41, %v13310_v43  ;;  %v2095_v60 = vpop.f32.mrb[35].mxu1  ;;  %v2415_v39 = vsel %vm32_vm0, %v2349_v56, 0.0 }
 0x478   :  { %v11509_v34 = vpop.eup %11508  ;;  %v2314_v15 = vmul.f32 %v11507_v44, %v13441_v21  ;;  %11522 = vrcp.f32 %v2222_v2  ;;  %v13514_v11 = vadd.f32 %v13310_v43, %v2095_v60  ;;  %2416 = vadd.xlane.f32.xlu1 %v2415_v39  ;;  %v2412_v32 = vsel %vm32_vm0, %v2348_v46, 0.0 }
 0x479   :  { %v11511_v1 = vpop.eup %11510  ;;  %v2225_v52 = vadd.f32 1.0, %v11509_v34  ;;  %11524 = vpow2.f32 %v9696_v30  ;;  %v9698_v47 = vmul.f32 -1.442695, %v13509_v26  ;;  %2413 = vadd.xlane.f32.xlu0 %v2412_v32  ;;  %v2351_v50 = vmul.f32 %v13369_v8, %v2315_v12 }
 0x47a   :  { %v11513_v40 = vpop.eup %11512  ;;  %v2224_v13 = vadd.f32 1.0, %v11511_v1  ;;  %11526 = vpow2.f32 %v9695_v3  ;;  %v9697_v21 = vmul.f32 -1.442695, %v13514_v11  ;;  %v2350_v18 = vmul.f32 %v13369_v8, %v2314_v15 }
 0x47b   :  { %v2317_v43 = vmul.f32 %v11513_v40, %v13446_v55  ;;  %11528 = vrcp.f32 %v2225_v52  ;;  %v2421_v58 = vsel %vm32_vm0, %v2351_v50, 0.0 }
 0x47c   :  { %11530 = vrcp.f32 %v2224_v13  ;;  %2422 = vadd.xlane.f32.xlu1 %v2421_v58  ;;  %v2418_v16 = vsel %vm32_vm0, %v2350_v18, 0.0 }
 0x47d   :  { %v11515_v0 = vpop.eup %11514  ;;  %11532 = vpow2.f32 %v9698_v47  ;;  %2419 = vadd.xlane.f32.xlu0 %v2418_v16  ;;  %v2353_v42 = vmul.f32 %v13369_v8, %v2317_v43 }
 0x47e   :  { %v11517_v53 = vpop.eup %11516  ;;  %v2316_v5 = vmul.f32 %v11515_v0, %v13449_v28  ;;  %11534 = vpow2.f32 %v9697_v21 }
 0x47f   :  { %v11519_v63 = vpop.eup %11518  ;;  %v2227_v54 = vadd.f32 1.0, %v11517_v53  ;;  %v2427_v55 = vsel %vm32_vm0, %v2353_v42, 0.0 }
 0x480   :  { %v2226_v9 = vadd.f32 1.0, %v11519_v63  ;;  %2428 = vadd.xlane.f32.xlu1 %v2427_v55  ;;  %v2352_v57 = vmul.f32 %v13369_v8, %v2316_v5 }
 0x481   :  { %v11521_v62 = vpop.eup %11520  ;;  %11536 = vrcp.f32 %v2227_v54 }
 0x482   :  { %v11523_v31 = vpop.eup %11522  ;;  %v2319_v24 = vmul.f32 %v11521_v62, %v13454_v61  ;;  %11538 = vrcp.f32 %v2226_v9  ;;  %v2424_v48 = vsel %vm32_vm0, %v2352_v57, 0.0 }
 0x483   :  { %v11525_v25 = vpop.eup %11524  ;;  %v2318_v28 = vmul.f32 %v11523_v31, %v13457_v22  ;;  %2425 = vadd.xlane.f32.xlu0 %v2424_v48 }
 0x484   :  { %v11527_v27 = vpop.eup %11526  ;;  %v2229_v29 = vadd.f32 1.0, %v11525_v25  ;;  %v2355_v49 = vmul.f32 %v13369_v8, %v2319_v24 }
 0x485   :  { %v11529_v7 = vpop.eup %11528  ;;  %v2228_v51 = vadd.f32 1.0, %v11527_v27  ;;  %v2354_v30 = vmul.f32 %v13369_v8, %v2318_v28  ;;  %v2526_v27 = vand.u32 127, %v155_v14 }
 0x486   :  { %v11531_v56 = vpop.eup %11530  ;;  %v2321_v19 = vmul.f32 %v11529_v7, %v13474_v36  ;;  %11540 = vrcp.f32 %v2229_v29  ;;  %v2433_v61 = vsel %vm32_vm0, %v2355_v49, 0.0 }
 0x487   :  { %v11533_v2 = vpop.eup %11532  ;;  %v2320_v3 = vmul.f32 %v11531_v56, %v13477_v6  ;;  %11542 = vrcp.f32 %v2228_v51  ;;  %2434 = vadd.xlane.f32.xlu1 %v2433_v61  ;;  %v2430_v22 = vsel %vm32_vm0, %v2354_v30, 0.0  ;;  %v2531_v7 = vadd.s32 4294967288, %v2526_v27 }
 0x488   :  { %v11535_v41 = vpop.eup %11534  ;;  %v2231_v46 = vadd.f32 1.0, %v11533_v2  ;;  %2431 = vadd.xlane.f32.xlu0 %v2430_v22  ;;  %v2357_v44 = vmul.f32 %v13369_v8, %v2321_v19  ;;  %v13569_v51 = vstv %s11135_s30  ;;  %v13577_v61 = vsub.s32 %v2526_v27, %v12477_v17 }
 0x489   :  { %v2230_v12 = vadd.f32 1.0, %v11535_v41  ;;  %v2356_v60 = vmul.f32 %v13369_v8, %v2320_v3  ;;  %v13574_v19 = vsub.s32 %v2531_v7, %v12477_v17 }
 0x48a   :  { %11544 = vrcp.f32 %v2231_v46  ;;  %v2439_v36 = vsel %vm32_vm0, %v2357_v44, 0.0 }
 0x48b   :  { %v11537_v39 = vpop.eup %11536  ;;  %11546 = vrcp.f32 %v2230_v12  ;;  %2440 = vadd.xlane.f32.xlu1 %v2439_v36  ;;  %v2436_v6 = vsel %vm32_vm0, %v2356_v60, 0.0 }
 0x48c   :  { %v11539_v34 = vpop.eup %11538  ;;  %v2323_v15 = vmul.f32 %v11537_v39, %v13483_v10  ;;  %2437 = vadd.xlane.f32.xlu0 %v2436_v6 }
 0x48d   :  { %v2322_v32 = vmul.f32 %v11539_v34, %v13487_v45 }
 0x48e   :  { %v2359_v1 = vmul.f32 %v13369_v8, %v2323_v15 }
 0x48f   :  { %v2358_v52 = vmul.f32 %v13369_v8, %v2322_v32 }
 0x490   :  { %v11541_v47 = vpop.eup %11540  ;;  %v2445_v50 = vsel %vm32_vm0, %v2359_v1, 0.0 }
 0x491   :  { %v11543_v40 = vpop.eup %11542  ;;  %v2325_v13 = vmul.f32 %v11541_v47, %v13495_v35  ;;  %2446 = vadd.xlane.f32.xlu1 %v2445_v50  ;;  %v2442_v21 = vsel %vm32_vm0, %v2358_v52, 0.0 }
 0x492   :  { %v2324_v18 = vmul.f32 %v11543_v40, %v13500_v4  ;;  %2443 = vadd.xlane.f32.xlu0 %v2442_v21 }
 0x493   :  { %v2361_v10 = vmul.f32 %v13369_v8, %v2325_v13 }
 0x494   :  { %v11545_v43 = vpop.eup %11544  ;;  %v2360_v45 = vmul.f32 %v13369_v8, %v2324_v18 }
 0x495   :  { %v11547_v58 = vpop.eup %11546  ;;  %v2327_v16 = vmul.f32 %v11545_v43, %v13509_v26  ;;  %v2451_v0 = vsel %vm32_vm0, %v2361_v10, 0.0  ;;  %v132_v26 = vld [vmem:[%s16287_s2 + $0xa0] sm:$0xff] }
 0x496   :  { %v2326_v42 = vmul.f32 %v11547_v58, %v13514_v11  ;;  %2452 = vadd.xlane.f32.xlu1 %v2451_v0  ;;  %v2448_v35 = vsel %vm32_vm0, %v2360_v45, 0.0  ;;  %v133_v11 = vld [vmem:[%s16287_s2 + $0xa8] sm:$0xff] }
 0x497   :  { %2449 = vadd.xlane.f32.xlu0 %v2448_v35  ;;  %v2363_v53 = vmul.f32 %v13369_v8, %v2327_v16  ;;  %v13565_v54 = vpack.c.bf16 %v133_v11, %v132_v26 }
 0x498   :  { %v2362_v4 = vmul.f32 %v13369_v8, %v2326_v42 }
 0x499   :  { %v2457_v5 = vsel %vm32_vm0, %v2363_v53, 0.0  ;;  %10999 = vmatprep.subr.bf16.mxu0 %v13565_v54 }
 0x49a   :  { %2458 = vadd.xlane.f32.xlu1 %v2457_v5  ;;  %v2454_v63 = vsel %vm32_vm0, %v2362_v4, 0.0 }
 0x49b   :  { %2455 = vadd.xlane.f32.xlu0 %v2454_v63 }
 0x4c3   :  { %v2369_v55 = vpop.xlane.xlu0 %2368 }
 0x4c4   :  { %v2366_v8 = vpop.xlane.xlu1 %2365  ;;  %v2462_v3 = vadd.f32 %v13569_v51, %v2369_v55 }
 0x4c5   :  { %v2461_v22 = vadd.f32 %v13569_v51, %v2366_v8 }
 0x4c6   :  { %v2535_v40 = vrot.slane %v2462_v3, %v13574_v19 }
 0x4c7   :  { %v2530_v13 = vrot.slane %v2461_v22, %v13577_v61 }
 0x4c8   :  { %v2375_v9 = vpop.xlane.xlu1 %2374  ;;  %v2372_v57 = vpop.xlane.xlu0 %2371 }
 0x4c9   :  { %v2464_v30 = vadd.f32 %v13569_v51, %v2375_v9  ;;  %v2463_v56 = vadd.f32 %v13569_v51, %v2372_v57  ;;  %v2537_v53 = vsel %vm2536_vm10, %v2535_v40, %v2530_v13 }
 0x4cb   :  { %v2545_v17 = vrot.slane %v2464_v30, %v13574_v19  ;;  %v2541_v39 = vrot.slane %v2463_v56, %v13577_v61 }
 0x4cc   :  { %v2381_v62 = vpop.xlane.xlu1 %2380  ;;  %v2378_v31 = vpop.xlane.xlu0 %2377 }
 0x4cd   :  { %v2466_v2 = vadd.f32 %v13569_v51, %v2381_v62  ;;  %v2465_v14 = vadd.f32 %v13569_v51, %v2378_v31  ;;  %v2546_v45 = vsel %vm2536_vm10, %v2545_v17, %v2541_v39 }
 0x4ce   :  { %v2674_v63 = vsel %vm2673_vm2, %v2546_v45, %v2537_v53 }
 0x4cf   :  { %v2554_v32 = vrot.slane %v2466_v2, %v13574_v19  ;;  %v2550_v1 = vrot.slane %v2465_v14, %v13577_v61 }
 0x4d1   :  { %v2555_v0 = vsel %vm2536_vm10, %v2554_v32, %v2550_v1 }
 0x4d2   :  { %v2387_v24 = vpop.xlane.xlu1 %2386  ;;  %v2676_v8 = vsel %vm2675_vm3, %v2555_v0, %v2674_v63 }
 0x4d3   :  { %v2384_v48 = vpop.xlane.xlu0 %2383  ;;  %v2468_v41 = vadd.f32 %v13569_v51, %v2387_v24 }
 0x4d4   :  { %v2467_v46 = vadd.f32 %v13569_v51, %v2384_v48  ;;  %v9702_v48 = vld [vmem:[%s16289_s4 + $0x5] ss:$0 sm:$0xff] }
 0x4d5   :  { %v2563_v21 = vrot.slane %v2468_v41, %v13574_v19 }
 0x4d6   :  { %v2393_v25 = vpop.xlane.xlu1 %2392  ;;  %v2559_v18 = vrot.slane %v2467_v46, %v13577_v61 }
 0x4d7   :  { %v2390_v28 = vpop.xlane.xlu0 %2389  ;;  %v2470_v60 = vadd.f32 %v13569_v51, %v2393_v25 }
 0x4d8   :  { %v2469_v36 = vadd.f32 %v13569_v51, %v2390_v28  ;;  %v2564_v4 = vsel %vm2536_vm10, %v2563_v21, %v2559_v18 }
 0x4d9   :  { %v2572_v10 = vrot.slane %v2470_v60, %v13574_v19  ;;  %v2678_v62 = vsel %vm2677_vm4, %v2564_v4, %v2676_v8 }
 0x4da   :  { %v2399_v29 = vpop.xlane.xlu1 %2398  ;;  %v2568_v43 = vrot.slane %v2469_v36, %v13577_v61 }
 0x4db   :  { %v2396_v49 = vpop.xlane.xlu0 %2395  ;;  %v2472_v6 = vadd.f32 %v13569_v51, %v2399_v29 }
 0x4dc   :  { %v2471_v34 = vadd.f32 %v13569_v51, %v2396_v49  ;;  %v2573_v26 = vsel %vm2536_vm10, %v2572_v10, %v2568_v43 }
 0x4dd   :  { %v2581_v58 = vrot.slane %v2472_v6, %v13574_v19  ;;  %v2680_v27 = vsel %vm2679_vm5, %v2573_v26, %v2678_v62 }
 0x4de   :  { %v2577_v16 = vrot.slane %v2471_v34, %v13577_v61 }
 0x4e0   :  { %v2582_v9 = vsel %vm2536_vm10, %v2581_v58, %v2577_v16 }
 0x4e1   :  { %v2405_v44 = vpop.xlane.xlu1 %2404  ;;  %v2682_v49 = vsel %vm2681_vm6, %v2582_v9, %v2680_v27 }
 0x4e2   :  { %v2402_v12 = vpop.xlane.xlu0 %2401  ;;  %v2474_v52 = vadd.f32 %v13569_v51, %v2405_v44 }
 0x4e3   :  { %v2473_v47 = vadd.f32 %v13569_v51, %v2402_v12 }
 0x4e4   :  { %v2590_v42 = vrot.slane %v2474_v52, %v13574_v19 }
 0x4e5   :  { %v2586_v35 = vrot.slane %v2473_v47, %v13577_v61 }
 0x4e7   :  { %v2591_v24 = vsel %vm2536_vm10, %v2590_v42, %v2586_v35 }
 0x4e8   :  { %v2684_v30 = vsel %vm2683_vm7, %v2591_v24, %v2682_v49 }
 0x4fb   :  { %v10573_v15 = vpop.f32.mrb[36].mxu1 }
 0x4fc   :  { %v3112_v50 = vpop.f32.mrb[37].mxu1  ;;  %v13632_v44 = vadd.f32 %v10573_v15, %v9702_v48 }
 0x4fd   :  { %v13626_v56 = vadd.f32 %v9702_v48, %v3112_v50 }
 0x4fe   :  { %v9706_v60 = vmul.f32 -1.442695, %v13632_v44 }
 0x4ff   :  { %v9705_v41 = vmul.f32 -1.442695, %v13626_v56 }
 0x501   :  { %v2411_v5 = vpop.xlane.xlu1 %2410  ;;  %11548 = vpow2.f32 %v9705_v41 }
 0x502   :  { %v2476_v11 = vadd.f32 %v13569_v51, %v2411_v5  ;;  %v2408_v55 = vpop.xlane.xlu0 %2407  ;;  %11550 = vpow2.f32 %v9706_v60 }
 0x503   :  { %v2475_v57 = vadd.f32 %v13569_v51, %v2408_v55 }
 0x504   :  { %v2599_v31 = vrot.slane %v2476_v11, %v13574_v19 }
 0x505   :  { %v2595_v25 = vrot.slane %v2475_v57, %v13577_v61  ;;  %v2417_v28 = vpop.xlane.xlu1 %2416 }
 0x506   :  { %v2414_v29 = vpop.xlane.xlu0 %2413  ;;  %v2478_v40 = vadd.f32 %v13569_v51, %v2417_v28 }
 0x507   :  { %v2600_v7 = vsel %vm2536_vm10, %v2599_v31, %v2595_v25  ;;  %v2477_v13 = vadd.f32 %v13569_v51, %v2414_v29 }
 0x508   :  { %v2686_v2 = vsel %vm2685_vm8, %v2600_v7, %v2684_v30  ;;  %v2608_v5 = vrot.slane %v2478_v40, %v13574_v19 }
 0x509   :  { %v2423_v14 = vpop.xlane.xlu1 %2422  ;;  %10552 = vmatprep.mubr.msk.f32.mxu0 %vm2696_vm11, %v2686_v2  ;;  %v2697_v3 = vsel %vm2696_vm11, %v2686_v2, 0.0  ;;  %v2604_v63 = vrot.slane %v2477_v13, %v13577_v61 }
 0x50a   :  { %2698 = vadd.xlane.f32.xlu0 %v2697_v3  ;;  %v2420_v22 = vpop.xlane.xlu0 %2419  ;;  %v2480_v32 = vadd.f32 %v13569_v51, %v2423_v14 }
 0x50b   :  { %v11549_v34 = vpop.eup %11548  ;;  %v2479_v52 = vadd.f32 %v13569_v51, %v2420_v22  ;;  %v2609_v49 = vsel %vm2536_vm10, %v2608_v5, %v2604_v63 }
 0x50c   :  { %v3127_v1 = vadd.f32 1.0, %v11549_v34  ;;  %v2617_v43 = vrot.slane %v2480_v32, %v13574_v19  ;;  %v11551_v16 = vpop.eup %11550  ;;  %v135_v34 = vld [vmem:[%s16287_s2 + $0xb8] sm:$0xff] }
 0x50d   :  { %v2429_v46 = vpop.xlane.xlu1 %2428  ;;  %v2613_v0 = vrot.slane %v2479_v52, %v13577_v61  ;;  %v3128_v8 = vadd.f32 1.0, %v11551_v16 }
 0x50e   :  { %v2482_v47 = vadd.f32 %v13569_v51, %v2429_v46  ;;  %11552 = vrcp.f32 %v3127_v1 }
 0x50f   :  { %v2618_v24 = vsel %vm2536_vm10, %v2617_v43, %v2613_v0  ;;  %11554 = vrcp.f32 %v3128_v8  ;;  %v3245_v43 = vld [vmem:[%s16288_s3 + $0x28] sm:$0xff] }
 0x510   :  { %v2426_v12 = vpop.xlane.xlu0 %2425  ;;  %v2626_v53 = vrot.slane %v2482_v47, %v13574_v19  ;;  %v2687_v14 = vsel %vm2673_vm2, %v2618_v24, %v2609_v49 }
 0x511   :  { %v2481_v15 = vadd.f32 %v13569_v51, %v2426_v12 }
 0x513   :  { %v2622_v4 = vrot.slane %v2481_v15, %v13577_v61 }
 0x514   :  { %v2435_v36 = vpop.xlane.xlu1 %2434 }
 0x515   :  { %v2432_v17 = vpop.xlane.xlu0 %2431  ;;  %v2484_v21 = vadd.f32 %v13569_v51, %v2435_v36  ;;  %v2627_v27 = vsel %vm2536_vm10, %v2626_v53, %v2622_v4 }
 0x516   :  { %v2483_v18 = vadd.f32 %v13569_v51, %v2432_v17  ;;  %v2688_v46 = vsel %vm2675_vm3, %v2627_v27, %v2687_v14 }
 0x517   :  { %v2635_v26 = vrot.slane %v2484_v21, %v13574_v19 }
 0x518   :  { %v2441_v39 = vpop.xlane.xlu1 %2440  ;;  %v2631_v11 = vrot.slane %v2483_v18, %v13577_v61  ;;  %v11553_v32 = vpop.eup %11552 }
 0x519   :  { %v2438_v6 = vpop.xlane.xlu0 %2437  ;;  %v2486_v45 = vadd.f32 %v13569_v51, %v2441_v39  ;;  %v3133_v40 = vmul.f32 %v11553_v32, %v13626_v56  ;;  %v11555_v18 = vpop.eup %11554  ;;  %v3244_v56 = vld [vmem:[%s16288_s3 + $0x20] sm:$0xff] }
 0x51a   :  { %v2485_v58 = vadd.f32 %v13569_v51, %v2438_v6  ;;  %v2636_v7 = vsel %vm2536_vm10, %v2635_v26, %v2631_v11  ;;  %v134_v6 = vld [vmem:[%s16287_s2 + $0xb0] sm:$0xff] }
 0x51b   :  { %v2644_v9 = vrot.slane %v2486_v45, %v13574_v19  ;;  %v2689_v36 = vsel %vm2677_vm4, %v2636_v7, %v2688_v46  ;;  %v11006_v45 = vpack.c.bf16 %v3245_v43, %v3244_v56 }
 0x51c   :  { %v2640_v57 = vrot.slane %v2485_v58, %v13577_v61 }
 0x51e   :  { %v2447_v50 = vpop.xlane.xlu1 %2446  ;;  %v2645_v3 = vsel %vm2536_vm10, %v2644_v9, %v2640_v57 }
 0x51f   :  { %v2444_v10 = vpop.xlane.xlu0 %2443  ;;  %v2488_v42 = vadd.f32 %v13569_v51, %v2447_v50  ;;  %v2690_v1 = vsel %vm2679_vm5, %v2645_v3, %v2689_v36  ;;  %v11002_v50 = vpack.c.bf16 %v135_v34, %v134_v6 }
 0x520   :  { %v2487_v35 = vadd.f32 %v13569_v51, %v2444_v10  ;;  %v3134_v10 = vmul.f32 %v11555_v18, %v13632_v44  ;;  %v3247_v44 = vld [vmem:[%s16288_s3 + $0x38] sm:$0xff] }
 0x521   :  { %v2653_v48 = vrot.slane %v2488_v42, %v13574_v19 }
 0x522   :  { %v2649_v25 = vrot.slane %v2487_v35, %v13577_v61 }
 0x523   :  { %v2453_v55 = vpop.xlane.xlu1 %2452 }
 0x524   :  { %v2490_v62 = vadd.f32 %v13569_v51, %v2453_v55  ;;  %v2450_v31 = vpop.xlane.xlu0 %2449  ;;  %v2654_v12 = vsel %vm2536_vm10, %v2653_v48, %v2649_v25 }
 0x525   :  { %v2489_v28 = vadd.f32 %v13569_v51, %v2450_v31 }
 0x526   :  { %v2662_v29 = vrot.slane %v2490_v62, %v13574_v19  ;;  %v9709_v62 = vld [vmem:[%s16289_s4 + $0x6] ss:$0 sm:$0xff] }
 0x527   :  { %v2658_v30 = vrot.slane %v2489_v28, %v13577_v61  ;;  %v2459_v2 = vpop.xlane.xlu1 %2458 }
 0x528   :  { %v2492_v22 = vadd.f32 %v13569_v51, %v2459_v2  ;;  %v2456_v41 = vpop.xlane.xlu0 %2455 }
 0x529   :  { %v2491_v60 = vadd.f32 %v13569_v51, %v2456_v41  ;;  %v2663_v17 = vsel %vm2536_vm10, %v2662_v29, %v2658_v30  ;;  %v2691_v51 = vsel %vm2681_vm6, %v2654_v12, %v2690_v1 }
 0x52a   :  { %v2671_v39 = vrot.slane %v2492_v22, %v13574_v19  ;;  %v2692_v47 = vsel %vm2683_vm7, %v2663_v17, %v2691_v51 }
 0x52b   :  { %v2667_v52 = vrot.slane %v2491_v60, %v13577_v61 }
 0x52d   :  { %v2672_v15 = vsel %vm2536_vm10, %v2671_v39, %v2667_v52 }
 0x52e   :  { %v2693_v13 = vsel %vm2685_vm8, %v2672_v15, %v2692_v47 }
 0x52f   :  { %10553 = vmatmul.mubr.msk.f32.vlgmr.msra.gmra.mrb[34].mxu0 %vm2696_vm11, %v2693_v13  ;;  %v2700_v21 = vsel %vm2696_vm11, %v2693_v13, 0.0 }
 0x530   :  { %11001 = vmatpush3.bf16.msra.mxu0 %v13565_v54  ;;  %10582 = vmatprep.mubr.msk.f32.mxu0 %vm32_vm0, %v3133_v40  ;;  %v3246_v54 = vld [vmem:[%s16288_s3 + $0x30] sm:$0xff] }
 0x531   :  { %2701 = vadd.xlane.f32.xlu1 %v2700_v21  ;;  %11003 = vmatprep.subr.bf16.mxu0 %v11002_v50  ;;  %v11010_v58 = vpack.c.bf16 %v3247_v44, %v3246_v54 }
 0x534   :  { %11005 = vmatpush3.bf16.msra.mxu0 %v11002_v50 }
 0x535   :  { %11007 = vmatprep.subr.bf16.mxu0 %v11006_v45 }
 0x537   :  { %10583 = vmatmul.mubr.msk.f32.vlgmr.msra.gmra.mrb[36].mxu0 %vm32_vm0, %v3134_v10 }
 0x538   :  { %11009 = vmatpush3.bf16.msra.mxu0 %v11006_v45 }
 0x539   :  { %11011 = vmatprep.subr.bf16.mxu0 %v11010_v58 }
 0x53c   :  { %11013 = vmatpush3.bf16.msra.mxu0 %v11010_v58 }
 0x597   :  { %v2699_v16 = vpop.xlane.xlu0 %2698 }
 0x598   :  { %v2703_v42 = vmul.f32 %v13462_v33, %v2699_v16 }
 0x5be   :  { %v2702_v0 = vpop.xlane.xlu1 %2701 }
 0x5bf   :  { %v2704_v53 = vmul.f32 %v13467_v59, %v2702_v0 }
 0x602   :  { %v10554_v35 = vpop.f32.mrb[34].mxu0 }
 0x603   :  { %v2775_v4 = vpop.f32.mrb[35].mxu0  ;;  %v2785_v63 = vsub.f32 %v2704_v53, %v10554_v35 }
 0x604   :  { %v2784_v5 = vsub.f32 %v2703_v42, %v2775_v4 }
 0x605   :  { %v2788_v55 = vmul.f32 0.06666667, %v2785_v63 }
 0x606   :  { %v2787_v26 = vmul.f32 0.06666667, %v2784_v5 }
 0x607   :  { %v13724_v27 = vadd.f32 %v13467_v59, %v2788_v55 }
 0x608   :  { %v13710_v11 = vadd.f32 %v13462_v33, %v2787_v26 }
 0x609   :  { %v3315_v0 = vrot.slane %v13724_v27, %v12485_v20 }
 0x60a   :  { %v10584_v8 = vpop.f32.mrb[36].mxu0  ;;  %v3266_v9 = vrot.slane %v13710_v11, %v12485_v20  ;;  %v3259_v57 = vcombine.high %v13710_v11, %v13710_v11 }
 0x60b   :  { %v3217_v31 = vadd.f32 %v10584_v8, %v12551_v37  ;;  %v3207_v24 = vpop.f32.mrb[37].mxu0 }
 0x60c   :  { %v3216_v48 = vadd.f32 %v3207_v24, %v12553_v38  ;;  %v3282_v33 = vrot.slane %v3266_v9, %v12485_v20  ;;  %v3274_v25 = vcombine.high %v3266_v9, %v3266_v9  ;;  %v3273_v28 = vrot.slane %v3259_v57, %v12485_v20 }
 0x60d   :  { %v13730_v2 = vadd.f32 %v9709_v62, %v3217_v31 }
 0x60e   :  { %v13726_v29 = vadd.f32 %v9709_v62, %v3216_v48  ;;  %v3360_v49 = vrot.slane %v3282_v33, %v12492_v23  ;;  %v3296_v7 = vrot.slane %v3274_v25, %v12485_v20  ;;  %v3304_v30 = vcombine.high %v3282_v33, %v3282_v33 }
 0x60f   :  { %v3289_v37 = vrot.slane %v3273_v28, %v12485_v20  ;;  %v3275_v22 = vcombine.high %v3273_v28, %v3273_v28  ;;  %v3331_v62 = vrot.slane %v3315_v0, %v12485_v20 }
 0x610   :  { %10593 = vmatprep.mubr.msk.f32.mxu0 %vm32_vm0, %v13726_v29  ;;  %v3438_v38 = vsub.f32 %v3360_v49, %v13724_v27  ;;  %v3437_v14 = vsub.f32 %v3360_v49, %v13710_v11  ;;  %v3364_v59 = vrot.slane %v3296_v7, %v12492_v23  ;;  %v3368_v3 = vrot.slane %v3304_v30, %v12492_v23 }
 0x611   :  { %10594 = vmatmul.mubr.msk.f32.vlgmr.msra.gmra.mrb[38].mxu0 %vm32_vm0, %v13730_v2  ;;  %v3376_v39 = vrot.slane %v3289_v37, %v12492_v23  ;;  %v3306_v6 = vcombine.high %v3296_v7, %v3296_v7  ;;  %v3303_v50 = vrot.slane %v3275_v22, %v12485_v20  ;;  %v3305_v45 = vcombine.high %v3289_v37, %v3289_v37 }
 0x612   :  { %v3470_v41 = vmul.f32 %v3438_v38, %v3438_v38  ;;  %v3469_v46 = vmul.f32 %v3437_v14, %v3437_v14  ;;  %v3440_v12 = vsub.f32 %v3364_v59, %v13724_v27  ;;  %v3439_v60 = vsub.f32 %v3364_v59, %v13710_v11 }
 0x613   :  { %v3442_v36 = vsub.f32 %v3368_v3, %v13724_v27  ;;  %v3441_v17 = vsub.f32 %v3368_v3, %v13710_v11  ;;  %v3446_v47 = vsub.f32 %v3376_v39, %v13724_v27  ;;  %v3445_v15 = vsub.f32 %v3376_v39, %v13710_v11  ;;  %v3227_v39 = vld [vmem:[%s16287_s2 + $0xd8] sm:$0xff] }
 0x614   :  { %v3504_v34 = vsel %vm393_vm1, %v3470_v41, 0.0  ;;  %v3501_v32 = vsel %vm393_vm1, %v3469_v46, 0.0  ;;  %v3472_v1 = vmul.f32 %v3440_v12, %v3440_v12  ;;  %v3471_v52 = vmul.f32 %v3439_v60, %v3439_v60  ;;  %v3224_v12 = vld [vmem:[%s16287_s2 + $0xc0] sm:$0xff]  ;;  %v3225_v60 = vld [vmem:[%s16287_s2 + $0xc8] sm:$0xff] }
 0x615   :  { %3505 = vadd.xlane.f32.xlu1 %v3504_v34  ;;  %3502 = vadd.xlane.f32.xlu0 %v3501_v32  ;;  %v3474_v51 = vmul.f32 %v3442_v36, %v3442_v36  ;;  %v3473_v21 = vmul.f32 %v3441_v17, %v3441_v17  ;;  %v3372_v18 = vrot.slane %v3306_v6, %v12492_v23  ;;  %v3226_v36 = vld [vmem:[%s16287_s2 + $0xd0] sm:$0xff] }
 0x616   :  { %v3510_v40 = vsel %vm393_vm1, %v3472_v1, 0.0  ;;  %v3507_v13 = vsel %vm393_vm1, %v3471_v52, 0.0  ;;  %v3478_v10 = vmul.f32 %v3446_v47, %v3446_v47  ;;  %v3477_v56 = vmul.f32 %v3445_v15, %v3445_v15 }
 0x617   :  { %v3380_v43 = vrot.slane %v3303_v50, %v12492_v23  ;;  %v3516_v54 = vsel %vm393_vm1, %v3474_v51, 0.0  ;;  %v3513_v44 = vsel %vm393_vm1, %v3473_v21, 0.0  ;;  %v3443_v58 = vsub.f32 %v3372_v18, %v13710_v11 }
 0x618   :  { %v3444_v16 = vsub.f32 %v3372_v18, %v13724_v27  ;;  %v3528_v42 = vsel %vm393_vm1, %v3478_v10, 0.0  ;;  %v3525_v35 = vsel %vm393_vm1, %v3477_v56, 0.0  ;;  %v3384_v4 = vrot.slane %v3305_v45, %v12492_v23 }
 0x619   :  { %3511 = vadd.xlane.f32.xlu1 %v3510_v40  ;;  %3508 = vadd.xlane.f32.xlu0 %v3507_v13  ;;  %v3448_v53 = vsub.f32 %v3380_v43, %v13724_v27  ;;  %v3475_v5 = vmul.f32 %v3443_v58, %v3443_v58  ;;  %v3447_v26 = vsub.f32 %v3380_v43, %v13710_v11 }
 0x61a   :  { %v3476_v63 = vmul.f32 %v3444_v16, %v3444_v16  ;;  %v3307_v55 = vcombine.high %v3303_v50, %v3303_v50  ;;  %v3450_v9 = vsub.f32 %v3384_v4, %v13724_v27  ;;  %v3449_v57 = vsub.f32 %v3384_v4, %v13710_v11 }
 0x61b   :  { %v3480_v8 = vmul.f32 %v3448_v53, %v3448_v53  ;;  %v3519_v31 = vsel %vm393_vm1, %v3475_v5, 0.0  ;;  %v3479_v48 = vmul.f32 %v3447_v26, %v3447_v26  ;;  %v3392_v28 = vrot.slane %v3331_v62, %v12492_v23 }
 0x61c   :  { %v3522_v24 = vsel %vm393_vm1, %v3476_v63, 0.0  ;;  %v3388_v33 = vrot.slane %v3307_v55, %v12492_v23  ;;  %v3482_v25 = vmul.f32 %v3450_v9, %v3450_v9  ;;  %v3481_v30 = vmul.f32 %v3449_v57, %v3449_v57 }
 0x61d   :  { %3517 = vadd.xlane.f32.xlu1 %v3516_v54  ;;  %3514 = vadd.xlane.f32.xlu0 %v3513_v44  ;;  %v3534_v49 = vsel %vm393_vm1, %v3480_v8, 0.0  ;;  %v3531_v7 = vsel %vm393_vm1, %v3479_v48, 0.0  ;;  %v3453_v3 = vsub.f32 %v3392_v28, %v13710_v11  ;;  %v13790_v17 = vpack.c.bf16 %v3225_v60, %v3224_v12 }
 0x61e   :  { %v3451_v37 = vsub.f32 %v3388_v33, %v13710_v11  ;;  %v3540_v38 = vsel %vm393_vm1, %v3482_v25, 0.0  ;;  %v3537_v14 = vsel %vm393_vm1, %v3481_v30, 0.0  ;;  %v13795_v6 = vpack.c.bf16 %v3227_v39, %v3226_v36 }
 0x61f   :  { %v3485_v41 = vmul.f32 %v3453_v3, %v3453_v3  ;;  %11015 = vmatprep.subr.bf16.mxu1 %v13790_v17  ;;  %v3323_v1 = vcombine.high %v3315_v0, %v3315_v0  ;;  %v3308_v51 = vcombine.high %v13724_v27, %v13724_v27  ;;  %v3353_v15 = vcombine.high %v3331_v62, %v3331_v62 }
 0x620   :  { %v3483_v59 = vmul.f32 %v3451_v37, %v3451_v37  ;;  %11017 = vmatpush3.bf16.msra.mxu1 %v13790_v17  ;;  %v3452_v18 = vsub.f32 %v3388_v33, %v13724_v27  ;;  %v3454_v58 = vsub.f32 %v3392_v28, %v13724_v27 }
 0x621   :  { %3529 = vadd.xlane.f32.xlu0 %v3528_v42  ;;  %3526 = vadd.xlane.f32.xlu1 %v3525_v35  ;;  %v3549_v46 = vsel %vm393_vm1, %v3485_v41, 0.0  ;;  %v3345_v52 = vrot.slane %v3323_v1, %v12485_v20  ;;  %v3322_v50 = vrot.slane %v3308_v51, %v12485_v20  ;;  %v3400_v13 = vrot.slane %v3353_v15, %v12492_v23 }
 0x622   :  { %v3543_v22 = vsel %vm393_vm1, %v3483_v59, 0.0  ;;  %11019 = vmatprep.subr.bf16.mxu1 %v13795_v6  ;;  %v3484_v44 = vmul.f32 %v3452_v18, %v3452_v18  ;;  %v3486_v5 = vmul.f32 %v3454_v58, %v3454_v58 }
 0x623   :  { %v3396_v47 = vrot.slane %v3345_v52, %v12492_v23  ;;  %v3355_v21 = vcombine.high %v3345_v52, %v3345_v52  ;;  %v3338_v10 = vrot.slane %v3322_v50, %v12485_v20  ;;  %v3457_v43 = vsub.f32 %v3400_v13, %v13710_v11 }
 0x624   :  { %11021 = vmatpush3.bf16.msra.mxu1 %v13795_v6  ;;  %v3324_v54 = vcombine.high %v3322_v50, %v3322_v50  ;;  %v3546_v4 = vsel %vm393_vm1, %v3484_v44, 0.0  ;;  %v3552_v62 = vsel %vm393_vm1, %v3486_v5, 0.0  ;;  %v3458_v48 = vsub.f32 %v3400_v13, %v13724_v27 }
 0x625   :  { %3520 = vadd.xlane.f32.xlu0 %v3519_v31  ;;  %3523 = vadd.xlane.f32.xlu1 %v3522_v24  ;;  %v3455_v40 = vsub.f32 %v3396_v47, %v13710_v11  ;;  %v3404_v45 = vrot.slane %v3355_v21, %v12492_v23  ;;  %v3408_v16 = vrot.slane %v3338_v10, %v12492_v23 }
 0x626   :  { %11023 = vmatprep.subr.bf16.mxu1 %v13790_v17  ;;  %v3489_v42 = vmul.f32 %v3457_v43, %v3457_v43  ;;  %v3352_v53 = vrot.slane %v3324_v54, %v12485_v20  ;;  %v3456_v63 = vsub.f32 %v3396_v47, %v13724_v27  ;;  %v3354_v57 = vcombine.high %v3338_v10, %v3338_v10 }
 0x627   :  { %v3487_v56 = vmul.f32 %v3455_v40, %v3455_v40  ;;  %v3459_v35 = vsub.f32 %v3404_v45, %v13710_v11  ;;  %v3461_v26 = vsub.f32 %v3408_v16, %v13710_v11  ;;  %v3490_v30 = vmul.f32 %v3458_v48, %v3458_v48 }
 0x628   :  { %v3561_v55 = vsel %vm393_vm1, %v3489_v42, 0.0  ;;  %v3412_v9 = vrot.slane %v3352_v53, %v12492_v23  ;;  %v3488_v31 = vmul.f32 %v3456_v63, %v3456_v63  ;;  %v3416_v28 = vrot.slane %v3354_v57, %v12492_v23 }
 0x629   :  { %3535 = vadd.xlane.f32.xlu1 %v3534_v49  ;;  %3532 = vadd.xlane.f32.xlu0 %v3531_v7  ;;  %v3555_v0 = vsel %vm393_vm1, %v3487_v56, 0.0  ;;  %v3491_v8 = vmul.f32 %v3459_v35, %v3459_v35  ;;  %v3493_v24 = vmul.f32 %v3461_v26, %v3461_v26  ;;  %v3356_v49 = vcombine.high %v3352_v53, %v3352_v53 }
 0x62a   :  { %v3463_v25 = vsub.f32 %v3412_v9, %v13710_v11  ;;  %v3558_v7 = vsel %vm393_vm1, %v3488_v31, 0.0  ;;  %v3460_v37 = vsub.f32 %v3404_v45, %v13724_v27  ;;  %v3465_v59 = vsub.f32 %v3416_v28, %v13710_v11 }
 0x62b   :  { %v3567_v33 = vsel %vm393_vm1, %v3491_v8, 0.0  ;;  %v3420_v3 = vrot.slane %v3356_v49, %v12492_v23  ;;  %v3462_v41 = vsub.f32 %v3408_v16, %v13724_v27  ;;  %v3464_v47 = vsub.f32 %v3412_v9, %v13724_v27 }
 0x62c   :  { %v3497_v60 = vmul.f32 %v3465_v59, %v3465_v59  ;;  %v3466_v13 = vsub.f32 %v3416_v28, %v13724_v27 }
 0x62d   :  { %3541 = vadd.xlane.f32.xlu1 %v3540_v38  ;;  %3538 = vadd.xlane.f32.xlu0 %v3537_v14  ;;  %v3573_v38 = vsel %vm393_vm1, %v3493_v24, 0.0  ;;  %v3495_v14 = vmul.f32 %v3463_v25, %v3463_v25  ;;  %v3467_v36 = vsub.f32 %v3420_v3, %v13710_v11  ;;  %v3494_v52 = vmul.f32 %v3462_v41, %v3462_v41 }
 0x62e   :  { %v3585_v1 = vsel %vm393_vm1, %v3497_v60, 0.0  ;;  %v3496_v40 = vmul.f32 %v3464_v47, %v3464_v47  ;;  %v3498_v18 = vmul.f32 %v3466_v13, %v3466_v13  ;;  %v3468_v10 = vsub.f32 %v3420_v3, %v13724_v27 }
 0x62f   :  { %v3579_v12 = vsel %vm393_vm1, %v3495_v14, 0.0  ;;  %v3499_v51 = vmul.f32 %v3467_v36, %v3467_v36  ;;  %v3576_v15 = vsel %vm393_vm1, %v3494_v52, 0.0 }
 0x630   :  { %v3582_v21 = vsel %vm393_vm1, %v3496_v40, 0.0  ;;  %v3588_v43 = vsel %vm393_vm1, %v3498_v18, 0.0  ;;  %v3500_v45 = vmul.f32 %v3468_v10, %v3468_v10 }
 0x631   :  { %3544 = vadd.xlane.f32.xlu0 %v3543_v22  ;;  %v3492_v22 = vmul.f32 %v3460_v37, %v3460_v37  ;;  %v3591_v50 = vsel %vm393_vm1, %v3499_v51, 0.0 }
 0x632   :  { %v3594_v54 = vsel %vm393_vm1, %v3500_v45, 0.0 }
 0x633   :  { %v3570_v39 = vsel %vm393_vm1, %v3492_v22, 0.0 }
 0x635   :  { %3550 = vadd.xlane.f32.xlu0 %v3549_v46  ;;  %v3564_v46 = vsel %vm393_vm1, %v3490_v30, 0.0 }
 0x6a2   :  { %v3503_v56 = vpop.xlane.xlu0 %3502  ;;  %v3506_v58 = vpop.xlane.xlu1 %3505 }
 0x6a6   :  { %v3509_v44 = vpop.xlane.xlu0 %3508 }
 0x6aa   :  { %v3515_v16 = vpop.xlane.xlu0 %3514 }
 0x6ae   :  { %v3530_v42 = vpop.xlane.xlu0 %3529 }
 0x6b2   :  { %v3521_v53 = vpop.xlane.xlu0 %3520 }
 0x6b6   :  { %v3533_v5 = vpop.xlane.xlu0 %3532 }
 0x6ba   :  { %v3539_v8 = vpop.xlane.xlu0 %3538 }
 0x6be   :  { %v13860_v31 = vpop.xlane.xlu0 %3544 }
 0x6c2   :  { %v13883_v60 = vpop.xlane.xlu0 %3550 }
 0x6e4   :  { %v13802_v34 = vpop.f32.mrb[38].mxu0 }
 0x6e5   :  { %v13804_v32 = vpop.f32.mrb[39].mxu0  ;;  %3860 = vrot.lane.b32.xlu1 %v13802_v34, %s12399_s9 }
 0x6e6   :  { %3858 = vrot.lane.b32.xlu0 %v13804_v32, %s12399_s9  ;;  %v3687_v63 = vrot.slane %v13804_v32, %v12485_v20 }
 0x6e8   :  { %v3695_v9 = vcombine.high %v3687_v63, %v3687_v63  ;;  %v3703_v24 = vrot.slane %v3687_v63, %v12485_v20  ;;  %v13912_v63 = vld [vmem:[%s16289_s4 + $0x9] ss:$0 sm:$0xff] }
 0x6ea   :  { %v3717_v48 = vrot.slane %v3695_v9, %v12485_v20  ;;  %v3781_v51 = vrot.slane %v3703_v24, %v12492_v23 }
 0x6ec   :  { %v3727_v30 = vcombine.high %v3717_v48, %v3717_v48  ;;  %v3785_v47 = vrot.slane %v3717_v48, %v12492_v23 }
 0x705   :  { %3556 = vadd.xlane.f32.xlu0 %v3555_v0  ;;  %v3512_v0 = vpop.xlane.xlu1 %3511 }
 0x709   :  { %3547 = vadd.xlane.f32.xlu1 %v3546_v4  ;;  %3562 = vadd.xlane.f32.xlu0 %v3561_v55  ;;  %v3518_v35 = vpop.xlane.xlu1 %3517  ;;  %v3680_v55 = vcombine.high %v13804_v32, %v13804_v32 }
 0x70b   :  { %v3694_v57 = vrot.slane %v3680_v55, %v12485_v20 }
 0x70d   :  { %3553 = vadd.xlane.f32.xlu1 %v3552_v62  ;;  %3568 = vadd.xlane.f32.xlu0 %v3567_v33  ;;  %v3527_v4 = vpop.xlane.xlu1 %3526  ;;  %v13867_v33 = vld [vmem:[%s16289_s4 + $0x8] ss:$0 sm:$0xff]  ;;  %v3696_v25 = vcombine.high %v3694_v57, %v3694_v57  ;;  %v3710_v59 = vrot.slane %v3694_v57, %v12485_v20 }
 0x70e   :  { %v3901_v28 = vmul.f32 %v13867_v33, %v3506_v58  ;;  %v3900_v49 = vmul.f32 %v13867_v33, %v3503_v56  ;;  %v3903_v37 = vmul.f32 %v13867_v33, %v3512_v0  ;;  %v3905_v22 = vmul.f32 %v13867_v33, %v3518_v35 }
 0x70f   :  { %v13877_v3 = vrot.slane %v3696_v25, %v12485_v20  ;;  %v3904_v41 = vmul.f32 %v13867_v33, %v3515_v16  ;;  %v3906_v36 = vmul.f32 %v13867_v33, %v3521_v53  ;;  %v3910_v52 = vmul.f32 %v13867_v33, %v3533_v5 }
 0x710   :  { %v3912_v40 = vmul.f32 %v13867_v33, %v3539_v8  ;;  %v3726_v13 = vcombine.high %v3710_v59, %v3710_v59 }
 0x711   :  { %3559 = vadd.xlane.f32.xlu1 %v3558_v7  ;;  %3574 = vadd.xlane.f32.xlu0 %v3573_v38  ;;  %v3524_v26 = vpop.xlane.xlu1 %3523  ;;  %v3725_v7 = vcombine.high %v3703_v24, %v3703_v24  ;;  %v3902_v38 = vmul.f32 %v13867_v33, %v3509_v44  ;;  %v3801_v18 = vrot.slane %v13877_v3, %v12492_v23 }
 0x712   :  { %v3805_v57 = vrot.slane %v3726_v13, %v12492_v23 }
 0x715   :  { %3565 = vadd.xlane.f32.xlu1 %v3564_v46  ;;  %3580 = vadd.xlane.f32.xlu0 %v3579_v12  ;;  %v3536_v62 = vpop.xlane.xlu1 %3535  ;;  %v3909_v46 = vmul.f32 %v13867_v33, %v3530_v42  ;;  %v3908_v12 = vmul.f32 %v13867_v33, %v3527_v4 }
 0x719   :  { %3571 = vadd.xlane.f32.xlu1 %v3570_v39  ;;  %3586 = vadd.xlane.f32.xlu0 %v3585_v1  ;;  %v13873_v14 = vpop.xlane.xlu1 %3541  ;;  %v3907_v39 = vmul.f32 %v13867_v33, %v3524_v26  ;;  %v3911_v1 = vmul.f32 %v13867_v33, %v3536_v62 }
 0x71d   :  { %3577 = vadd.xlane.f32.xlu1 %v3576_v15  ;;  %3592 = vadd.xlane.f32.xlu0 %v3591_v50  ;;  %v3789_v15 = vrot.slane %v3725_v7, %v12492_v23  ;;  %v3793_v50 = vrot.slane %v3727_v30, %v12492_v23 }
 0x721   :  { %3583 = vadd.xlane.f32.xlu1 %v3582_v21  ;;  %v3797_v21 = vrot.slane %v3710_v59, %v12492_v23 }
 0x725   :  { %3589 = vadd.xlane.f32.xlu1 %v3588_v43 }
 0x729   :  { %3595 = vadd.xlane.f32.xlu1 %v3594_v54 }
 0x757   :  { %v13897_v10 = vpop.permute.xlu1 %3860 }
 0x758   :  { %v13899_v56 = vpop.permute.xlu0 %3858  ;;  %v3865_v43 = vadd.f32 %v13897_v10, %v3781_v51  ;;  %v3867_v45 = vadd.f32 %v13897_v10, %v3785_v47  ;;  %v3869_v54 = vadd.f32 %v13897_v10, %v3789_v15  ;;  %v3871_v44 = vadd.f32 %v13897_v10, %v3793_v50 }
 0x759   :  { %v3864_v58 = vadd.f32 %v13899_v56, %v3781_v51  ;;  %v3866_v16 = vadd.f32 %v13899_v56, %v3785_v47  ;;  %v3868_v0 = vadd.f32 %v13899_v56, %v3789_v15  ;;  %v3870_v42 = vadd.f32 %v13899_v56, %v3793_v50 }
 0x75a   :  { %v3933_v35 = vadd.f32 %v3901_v28, %v3865_v43  ;;  %v3935_v53 = vadd.f32 %v3903_v37, %v3867_v45  ;;  %v3937_v4 = vadd.f32 %v3905_v22, %v3869_v54  ;;  %v3939_v5 = vadd.f32 %v3907_v39, %v3871_v44 }
 0x75b   :  { %v3932_v26 = vadd.f32 %v3900_v49, %v3864_v58  ;;  %v3934_v55 = vadd.f32 %v3902_v38, %v3866_v16  ;;  %v3936_v8 = vadd.f32 %v3904_v41, %v3868_v0  ;;  %v3938_v9 = vadd.f32 %v3906_v36, %v3870_v42 }
 0x75c   :  { %v13916_v62 = vadd.f32 %v13912_v63, %v3933_v35  ;;  %v13919_v24 = vadd.f32 %v13912_v63, %v3935_v53  ;;  %v13922_v48 = vadd.f32 %v13912_v63, %v3937_v4  ;;  %v13939_v38 = vadd.f32 %v13912_v63, %v3939_v5 }
 0x75d   :  { %v13925_v25 = vadd.f32 %v13912_v63, %v3932_v26  ;;  %v13928_v28 = vadd.f32 %v13912_v63, %v3934_v55  ;;  %v13931_v49 = vadd.f32 %v13912_v63, %v3936_v8  ;;  %v13934_v7 = vadd.f32 %v13912_v63, %v3938_v9 }
 0x75e   :  { %v9715_v30 = vmul.f32 -1.442695, %v13916_v62  ;;  %v9717_v37 = vmul.f32 -1.442695, %v13919_v24  ;;  %v3872_v59 = vadd.f32 %v13899_v56, %v3797_v21  ;;  %v9719_v36 = vmul.f32 -1.442695, %v13922_v48 }
 0x75f   :  { %v9714_v22 = vmul.f32 -1.442695, %v13925_v25  ;;  %v9716_v41 = vmul.f32 -1.442695, %v13928_v28  ;;  %v3873_v39 = vadd.f32 %v13897_v10, %v3797_v21  ;;  %v9718_v51 = vmul.f32 -1.442695, %v13931_v49 }
 0x760   :  { %11556 = vpow2.f32 %v9715_v30  ;;  %v9720_v47 = vmul.f32 -1.442695, %v13934_v7  ;;  %v3940_v15 = vadd.f32 %v3908_v12, %v3872_v59  ;;  %v3874_v13 = vadd.f32 %v13899_v56, %v3801_v18 }
 0x761   :  { %11558 = vpow2.f32 %v9714_v22  ;;  %v3941_v50 = vadd.f32 %v3909_v46, %v3873_v39  ;;  %v3875_v43 = vadd.f32 %v13897_v10, %v3801_v18  ;;  %v9721_v45 = vmul.f32 -1.442695, %v13939_v38 }
 0x762   :  { %11560 = vpow2.f32 %v9716_v41  ;;  %v13952_v54 = vadd.f32 %v13912_v63, %v3940_v15  ;;  %v3876_v21 = vadd.f32 %v13899_v56, %v3805_v57  ;;  %v3942_v58 = vadd.f32 %v3910_v52, %v3874_v13 }
 0x763   :  { %11562 = vpow2.f32 %v9717_v37  ;;  %v13956_v44 = vadd.f32 %v13912_v63, %v3941_v50  ;;  %v3943_v12 = vadd.f32 %v3911_v1, %v3875_v43  ;;  %v3728_v18 = vcombine.high %v13877_v3, %v13877_v3 }
 0x764   :  { %11564 = vpow2.f32 %v9718_v51  ;;  %v9722_v46 = vmul.f32 -1.442695, %v13952_v54  ;;  %v3944_v16 = vadd.f32 %v3912_v40, %v3876_v21  ;;  %v13962_v0 = vadd.f32 %v13912_v63, %v3942_v58 }
 0x765   :  { %11566 = vpow2.f32 %v9719_v36  ;;  %v13965_v42 = vadd.f32 %v13912_v63, %v3943_v12  ;;  %v9723_v35 = vmul.f32 -1.442695, %v13956_v44  ;;  %v13974_v3 = vrot.slane %v3728_v18, %v12492_v23 }
 0x766   :  { %11568 = vpow2.f32 %v9720_v47  ;;  %v9724_v1 = vmul.f32 -1.442695, %v13962_v0  ;;  %v13971_v40 = vadd.f32 %v13912_v63, %v3944_v16  ;;  %v3877_v4 = vadd.f32 %v13897_v10, %v3805_v57 }
 0x767   :  { %11570 = vpow2.f32 %v9721_v45  ;;  %v9725_v52 = vmul.f32 -1.442695, %v13965_v42  ;;  %v3878_v55 = vadd.f32 %v13899_v56, %v13974_v3  ;;  %v3913_v9 = vmul.f32 %v13867_v33, %v13873_v14 }
 0x768   :  { %11572 = vpow2.f32 %v9722_v46  ;;  %v9726_v37 = vmul.f32 -1.442695, %v13971_v40  ;;  %v3914_v22 = vmul.f32 %v13867_v33, %v13860_v31 }
 0x769   :  { %11574 = vpow2.f32 %v9723_v35  ;;  %v3945_v39 = vadd.f32 %v3913_v9, %v3877_v4 }
 0x76a   :  { %v11557_v53 = vpop.eup %11556  ;;  %11576 = vpow2.f32 %v9724_v1  ;;  %v3946_v15 = vadd.f32 %v3914_v22, %v3878_v55 }
 0x76b   :  { %v11559_v5 = vpop.eup %11558  ;;  %v4097_v26 = vadd.f32 1.0, %v11557_v53  ;;  %11578 = vpow2.f32 %v9725_v52  ;;  %v13985_v31 = vadd.f32 %v13912_v63, %v3945_v39 }
 0x76c   :  { %v11561_v8 = vpop.eup %11560  ;;  %v4096_v30 = vadd.f32 1.0, %v11559_v5  ;;  %v13988_v21 = vadd.f32 %v13912_v63, %v3946_v15 }
 0x76d   :  { %v11563_v59 = vpop.eup %11562  ;;  %11580 = vrcp.f32 %v4097_v26  ;;  %v4098_v57 = vadd.f32 1.0, %v11561_v8  ;;  %v9727_v35 = vmul.f32 -1.442695, %v13985_v31 }
 0x76e   :  { %v11565_v41 = vpop.eup %11564  ;;  %11582 = vrcp.f32 %v4096_v30  ;;  %v4099_v36 = vadd.f32 1.0, %v11563_v59  ;;  %v9728_v52 = vmul.f32 -1.442695, %v13988_v21 }
 0x76f   :  { %v11567_v51 = vpop.eup %11566  ;;  %11584 = vrcp.f32 %v4098_v57  ;;  %v4100_v47 = vadd.f32 1.0, %v11565_v41 }
 0x770   :  { %v11569_v50 = vpop.eup %11568  ;;  %11586 = vpow2.f32 %v9726_v37  ;;  %v4101_v13 = vadd.f32 1.0, %v11567_v51 }
 0x771   :  { %v11571_v14 = vpop.eup %11570  ;;  %11588 = vrcp.f32 %v4099_v36  ;;  %v4102_v45 = vadd.f32 1.0, %v11569_v50 }
 0x772   :  { %v11573_v43 = vpop.eup %11572  ;;  %11590 = vrcp.f32 %v4100_v47  ;;  %v4103_v12 = vadd.f32 1.0, %v11571_v14 }
 0x773   :  { %v11575_v58 = vpop.eup %11574  ;;  %11592 = vrcp.f32 %v4101_v13  ;;  %v4104_v16 = vadd.f32 1.0, %v11573_v43 }
 0x774   :  { %v11577_v46 = vpop.eup %11576  ;;  %11594 = vrcp.f32 %v4102_v45  ;;  %v4105_v26 = vadd.f32 1.0, %v11575_v58 }
 0x775   :  { %v11579_v18 = vpop.eup %11578  ;;  %11596 = vrcp.f32 %v4103_v12  ;;  %v4106_v9 = vadd.f32 1.0, %v11577_v46 }
 0x776   :  { %11598 = vrcp.f32 %v4104_v16 }
 0x777   :  { %v11581_v1 = vpop.eup %11580  ;;  %11600 = vpow2.f32 %v9727_v35 }
 0x778   :  { %v11583_v53 = vpop.eup %11582  ;;  %v4193_v8 = vmul.f32 %v11581_v1, %v13916_v62  ;;  %11602 = vpow2.f32 %v9728_v52 }
 0x779   :  { %v11585_v4 = vpop.eup %11584  ;;  %v4192_v5 = vmul.f32 %v11583_v53, %v13925_v25  ;;  %11604 = vrcp.f32 %v4105_v26  ;;  %v4107_v25 = vadd.f32 1.0, %v11579_v18 }
 0x77a   :  { %v11587_v55 = vpop.eup %11586  ;;  %v4194_v37 = vmul.f32 %v11585_v4, %v13928_v28  ;;  %11606 = vrcp.f32 %v4106_v9  ;;  %v3736_v28 = vrot.slane %v13802_v34, %v12485_v20 }
 0x77b   :  { %v11589_v30 = vpop.eup %11588  ;;  %10604 = vmatprep.mubr.msk.f32.mxu1 %vm32_vm0, %v4192_v5  ;;  %v4108_v22 = vadd.f32 1.0, %v11587_v55  ;;  %11608 = vrcp.f32 %v4107_v25 }
 0x77c   :  { %v11591_v59 = vpop.eup %11590  ;;  %10605 = vmatmul.mubr.msk.f32.vlgmr.msra.gmra.mrb[38].mxu1 %vm32_vm0, %v4193_v8  ;;  %v4195_v62 = vmul.f32 %v11589_v30, %v13919_v24 }
 0x77d   :  { %11025 = vmatpush3.bf16.msra.mxu1 %v13790_v17  ;;  %10607 = vmatprep.mubr.msk.f32.mxu1 %vm32_vm0, %v4194_v37  ;;  %v11593_v57 = vpop.eup %11592  ;;  %v4196_v41 = vmul.f32 %v11591_v59, %v13931_v49  ;;  %v14007_v17 = vpack.c.bf16 %v13724_v27, %v13710_v11  ;;  %11610 = vrcp.f32 %v4108_v22  ;;  %v3752_v49 = vrot.slane %v3736_v28, %v12485_v20 }
 0x77e   :  { %11027 = vmatprep.subr.bf16.mxu1 %v13795_v6  ;;  %v11595_v36 = vpop.eup %11594  ;;  %v4197_v39 = vmul.f32 %v11593_v57, %v13922_v48 }
 0x77f   :  { %v11597_v24 = vpop.eup %11596  ;;  %v4198_v47 = vmul.f32 %v11595_v36, %v13934_v7  ;;  %v3813_v48 = vrot.slane %v3752_v49, %v12492_v23  ;;  %v3744_v7 = vcombine.high %v3736_v28, %v3736_v28  ;;  %v3774_v4 = vcombine.high %v3752_v49, %v3752_v49 }
 0x780   :  { %10608 = vmatmul.mubr.msk.f32.gmra.mrb[40].mxu1 %vm32_vm0, %v4195_v62  ;;  %v11599_v51 = vpop.eup %11598  ;;  %v4199_v14 = vmul.f32 %v11597_v24, %v13939_v38  ;;  %v3916_v38 = vmul.f32 %v13867_v33, %v13883_v60 }
 0x781   :  { %11029 = vmatpush3.bf16.msra.mxu1 %v13795_v6  ;;  %10610 = vmatprep.mubr.msk.f32.mxu1 %vm32_vm0, %v4196_v41  ;;  %v11601_v15 = vpop.eup %11600  ;;  %v4200_v45 = vmul.f32 %v11599_v51, %v13952_v54  ;;  %v3880_v12 = vadd.f32 %v13899_v56, %v3813_v48  ;;  %v3766_v35 = vrot.slane %v3744_v7, %v12485_v20 }
 0x782   :  { %11039 = vmatprep.subr.bf16.mxu1 %v14007_v17  ;;  %v11603_v50 = vpop.eup %11602  ;;  %v4109_v6 = vadd.f32 1.0, %v11601_v15  ;;  %v3821_v59 = vrot.slane %v3774_v4, %v12492_v23 }
 0x783   :  { %v4110_v13 = vadd.f32 1.0, %v11603_v50  ;;  %v11605_v43 = vpop.eup %11604  ;;  %v3948_v1 = vadd.f32 %v3916_v38, %v3880_v12  ;;  %v3776_v57 = vcombine.high %v3766_v35, %v3766_v35 }
 0x784   :  { %10611 = vmatmul.mubr.msk.f32.gmra.mrb[42].mxu1 %vm32_vm0, %v4197_v39  ;;  %11612 = vrcp.f32 %v4109_v6  ;;  %v11607_v58 = vpop.eup %11606  ;;  %v4201_v46 = vmul.f32 %v11605_v43, %v13956_v44  ;;  %v3729_v44 = vcombine.high %v13802_v34, %v13802_v34  ;;  %v3884_v41 = vadd.f32 %v13899_v56, %v3821_v59 }
 0x785   :  { %10613 = vmatprep.mubr.msk.f32.mxu1 %vm32_vm0, %v4198_v47  ;;  %11614 = vrcp.f32 %v4110_v13  ;;  %v11609_v16 = vpop.eup %11608  ;;  %v4202_v54 = vmul.f32 %v11607_v58, %v13962_v0  ;;  %v3817_v0 = vrot.slane %v3766_v35, %v12492_v23  ;;  %v14038_v5 = vadd.f32 %v13912_v63, %v3948_v1 }
 0x786   :  { %v4203_v52 = vmul.f32 %v11609_v16, %v13965_v42  ;;  %v3743_v30 = vrot.slane %v3729_v44, %v12485_v20  ;;  %v3881_v47 = vadd.f32 %v13897_v10, %v3813_v48  ;;  %v3825_v50 = vrot.slane %v3776_v57, %v12492_v23 }
 0x787   :  { %v11611_v18 = vpop.eup %11610  ;;  %v9730_v25 = vmul.f32 -1.442695, %v14038_v5  ;;  %v3883_v38 = vadd.f32 %v13897_v10, %v3817_v0 }
 0x788   :  { %10614 = vmatmul.mubr.msk.f32.gmra.mrb[44].mxu1 %vm32_vm0, %v4199_v14  ;;  %v4204_v53 = vmul.f32 %v11611_v18, %v13971_v40  ;;  %v3882_v40 = vadd.f32 %v13899_v56, %v3817_v0  ;;  %v3759_v24 = vrot.slane %v3743_v30, %v12485_v20 }
 0x789   :  { %10616 = vmatprep.mubr.msk.f32.mxu1 %vm32_vm0, %v4200_v45  ;;  %11616 = vpow2.f32 %v9730_v25  ;;  %v3886_v45 = vadd.f32 %v13899_v56, %v3825_v50 }
 0x78a   :  { %v14071_v7 = vrot.slane %v3759_v24, %v12492_v23  ;;  %v3775_v0 = vcombine.high %v3759_v24, %v3759_v24 }
 0x78c   :  { %10617 = vmatmul.mubr.msk.f32.gmra.mrb[46].mxu1 %vm32_vm0, %v4201_v46  ;;  %v3888_v18 = vadd.f32 %v13899_v56, %v14071_v7 }
 0x78d   :  { %10619 = vmatprep.mubr.msk.f32.mxu1 %vm32_vm0, %v4202_v54 }
 0x78e   :  { %v11613_v60 = vpop.eup %11612 }
 0x78f   :  { %v11615_v26 = vpop.eup %11614  ;;  %v4205_v42 = vmul.f32 %v11613_v60, %v13985_v31  ;;  %v3879_v31 = vadd.f32 %v13897_v10, %v13974_v3  ;;  %v3745_v3 = vcombine.high %v3743_v30, %v3743_v30 }
 0x790   :  { %10620 = vmatmul.mubr.msk.f32.gmra.mrb[48].mxu1 %vm32_vm0, %v4203_v52  ;;  %v4206_v9 = vmul.f32 %v11615_v26, %v13988_v21 }
 0x791   :  { %10622 = vmatprep.mubr.msk.f32.mxu1 %vm32_vm0, %v4204_v53  ;;  %v3773_v1 = vrot.slane %v3745_v3, %v12485_v20 }
 0x792   :  { %v3557_v55 = vpop.xlane.xlu0 %3556 }
 0x793   :  { %v3918_v8 = vmul.f32 %v13867_v33, %v3557_v55 }
 0x794   :  { %10623 = vmatmul.mubr.msk.f32.gmra.mrb[50].mxu1 %vm32_vm0, %v4205_v42 }
 0x795   :  { %v3950_v37 = vadd.f32 %v3918_v8, %v3882_v40  ;;  %10625 = vmatprep.mubr.msk.f32.mxu1 %vm32_vm0, %v4206_v9  ;;  %v3885_v40 = vadd.f32 %v13897_v10, %v3821_v59  ;;  %v3833_v9 = vrot.slane %v3773_v1, %v12492_v23  ;;  %v3837_v59 = vrot.slane %v3775_v0, %v12492_v23 }
 0x796   :  { %v3548_v62 = vpop.xlane.xlu1 %3547  ;;  %v3563_v22 = vpop.xlane.xlu0 %3562 }
 0x797   :  { %v14052_v28 = vadd.f32 %v13912_v63, %v3950_v37  ;;  %v3915_v21 = vmul.f32 %v13867_v33, %v3548_v62  ;;  %v3920_v36 = vmul.f32 %v13867_v33, %v3563_v22  ;;  %v11617_v37 = vpop.eup %11616  ;;  %v3890_v22 = vadd.f32 %v13899_v56, %v3833_v9 }
 0x799   :  { %v9732_v39 = vmul.f32 -1.442695, %v14052_v28  ;;  %v3947_v51 = vadd.f32 %v3915_v21, %v3879_v31  ;;  %v3952_v49 = vadd.f32 %v3920_v36, %v3884_v41  ;;  %v3777_v21 = vcombine.high %v3773_v1, %v3773_v1 }
 0x79a   :  { %v3554_v15 = vpop.xlane.xlu1 %3553  ;;  %v3569_v6 = vpop.xlane.xlu0 %3568 }
 0x79b   :  { %11618 = vpow2.f32 %v9732_v39  ;;  %v14062_v14 = vadd.f32 %v13912_v63, %v3947_v51  ;;  %v14065_v13 = vadd.f32 %v13912_v63, %v3952_v49  ;;  %v3917_v43 = vmul.f32 %v13867_v33, %v3554_v15 }
 0x79c   :  { %v3922_v58 = vmul.f32 %v13867_v33, %v3569_v6  ;;  %v3887_v49 = vadd.f32 %v13897_v10, %v3825_v50  ;;  %v4112_v6 = vadd.f32 1.0, %v11617_v37 }
 0x79d   :  { %v9729_v48 = vmul.f32 -1.442695, %v14062_v14  ;;  %v9734_v12 = vmul.f32 -1.442695, %v14065_v13  ;;  %v3949_v46 = vadd.f32 %v3917_v43, %v3881_v47  ;;  %v3892_v47 = vadd.f32 %v13899_v56, %v3837_v59 }
 0x79e   :  { %v3954_v16 = vadd.f32 %v3922_v58, %v3886_v45  ;;  %v3560_v54 = vpop.xlane.xlu1 %3559  ;;  %v3575_v35 = vpop.xlane.xlu0 %3574 }
 0x79f   :  { %11620 = vpow2.f32 %v9729_v48  ;;  %v14080_v52 = vadd.f32 %v13912_v63, %v3949_v46  ;;  %v3919_v53 = vmul.f32 %v13867_v33, %v3560_v54  ;;  %v3924_v44 = vmul.f32 %v13867_v33, %v3575_v35 }
 0x7a0   :  { %11622 = vpow2.f32 %v9734_v12  ;;  %v14085_v60 = vadd.f32 %v13912_v63, %v3954_v16 }
 0x7a1   :  { %v9731_v4 = vmul.f32 -1.442695, %v14080_v52  ;;  %v3951_v26 = vadd.f32 %v3919_v53, %v3883_v38  ;;  %v3956_v55 = vadd.f32 %v3924_v44, %v3888_v18  ;;  %v3841_v53 = vrot.slane %v3777_v21, %v12492_v23 }
 0x7a2   :  { %v9736_v42 = vmul.f32 -1.442695, %v14085_v60  ;;  %v3566_v8 = vpop.xlane.xlu1 %3565  ;;  %v3581_v30 = vpop.xlane.xlu0 %3580 }
 0x7a3   :  { %11624 = vpow2.f32 %v9731_v4  ;;  %v14092_v25 = vadd.f32 %v13912_v63, %v3951_v26  ;;  %v14095_v31 = vadd.f32 %v13912_v63, %v3956_v55  ;;  %v3921_v62 = vmul.f32 %v13867_v33, %v3566_v8 }
 0x7a4   :  { %v3926_v57 = vmul.f32 %v13867_v33, %v3581_v30  ;;  %11626 = vpow2.f32 %v9736_v42  ;;  %v3889_v26 = vadd.f32 %v13897_v10, %v14071_v7  ;;  %v3894_v42 = vadd.f32 %v13899_v56, %v3841_v53 }
 0x7a5   :  { %v11619_v41 = vpop.eup %11618  ;;  %v9733_v36 = vmul.f32 -1.442695, %v14092_v25  ;;  %v9738_v24 = vmul.f32 -1.442695, %v14095_v31  ;;  %v3953_v39 = vadd.f32 %v3921_v62, %v3885_v40  ;;  %v4773_v62 = vadd.f32 %v13899_v56, %v13804_v32 }
 0x7a6   :  { %v3958_v51 = vadd.f32 %v3926_v57, %v3890_v22  ;;  %v3572_v3 = vpop.xlane.xlu1 %3571  ;;  %v3587_v15 = vpop.xlane.xlu0 %3586  ;;  %v4114_v48 = vadd.f32 1.0, %v11619_v41 }
 0x7a7   :  { %11628 = vpow2.f32 %v9733_v36  ;;  %v14106_v43 = vadd.f32 %v13912_v63, %v3953_v39  ;;  %v3923_v45 = vmul.f32 %v13867_v33, %v3572_v3  ;;  %v3928_v58 = vmul.f32 %v13867_v33, %v3587_v15 }
 0x7a8   :  { %v14111_v12 = vadd.f32 %v13912_v63, %v3958_v51  ;;  %11630 = vpow2.f32 %v9738_v24  ;;  %v3891_v24 = vadd.f32 %v13897_v10, %v3833_v9  ;;  %v3893_v3 = vadd.f32 %v13897_v10, %v3837_v59 }
 0x7a9   :  { %v11621_v46 = vpop.eup %11620  ;;  %v9735_v50 = vmul.f32 -1.442695, %v14106_v43  ;;  %v3955_v16 = vadd.f32 %v3923_v45, %v3887_v49  ;;  %v3960_v38 = vadd.f32 %v3928_v58, %v3892_v47  ;;  %11632 = vrcp.f32 %v4112_v6 }
 0x7aa   :  { %v11623_v54 = vpop.eup %11622  ;;  %v4111_v18 = vadd.f32 1.0, %v11621_v46  ;;  %v9740_v35 = vmul.f32 -1.442695, %v14111_v12  ;;  %v3578_v1 = vpop.xlane.xlu1 %3577  ;;  %v14141_v47 = vadd.f32 %v13912_v63, %v4773_v62  ;;  %v4774_v15 = vadd.f32 %v13802_v34, %v13897_v10 }
 0x7ab   :  { %v3593_v44 = vpop.xlane.xlu0 %3592  ;;  %11634 = vpow2.f32 %v9735_v50  ;;  %v14117_v0 = vadd.f32 %v13912_v63, %v3955_v16  ;;  %v14120_v4 = vadd.f32 %v13912_v63, %v3960_v38  ;;  %v3925_v55 = vmul.f32 %v13867_v33, %v3578_v1 }
 0x7ac   :  { %11636 = vrcp.f32 %v4111_v18  ;;  %v3930_v40 = vmul.f32 %v13867_v33, %v3593_v44  ;;  %v4116_v30 = vadd.f32 1.0, %v11623_v54  ;;  %v3895_v38 = vadd.f32 %v13897_v10, %v3841_v53 }
 0x7ad   :  { %v11625_v8 = vpop.eup %11624  ;;  %11638 = vrcp.f32 %v4114_v48  ;;  %v9737_v37 = vmul.f32 -1.442695, %v14117_v0  ;;  %v3957_v57 = vadd.f32 %v3925_v55, %v3889_v26  ;;  %v9742_v36 = vmul.f32 -1.442695, %v14120_v4 }
 0x7ae   :  { %v4113_v22 = vadd.f32 1.0, %v11625_v8  ;;  %11640 = vpow2.f32 %v9740_v35  ;;  %v3962_v21 = vadd.f32 %v3930_v40, %v3894_v42  ;;  %v3584_v7 = vpop.xlane.xlu1 %3583  ;;  %v11627_v41 = vpop.eup %11626  ;;  %v14154_v35 = vadd.f32 %v13912_v63, %v4774_v15 }
 0x7af   :  { %11642 = vpow2.f32 %v9737_v37  ;;  %v3927_v39 = vmul.f32 %v13867_v33, %v3584_v7  ;;  %v14134_v51 = vadd.f32 %v13912_v63, %v3957_v57  ;;  %v4118_v9 = vadd.f32 1.0, %v11627_v41 }
 0x7b0   :  { %11644 = vrcp.f32 %v4113_v22  ;;  %v14137_v49 = vadd.f32 %v13912_v63, %v3962_v21  ;;  %v9811_v42 = vmul.f32 -1.442695, %v14141_v47 }
 0x7b1   :  { %v11629_v32 = vpop.eup %11628  ;;  %v3959_v56 = vadd.f32 %v3927_v39, %v3891_v24  ;;  %11646 = vrcp.f32 %v4116_v30  ;;  %v9739_v45 = vmul.f32 -1.442695, %v14134_v51 }
 0x7b2   :  { %v4115_v6 = vadd.f32 1.0, %v11629_v32  ;;  %v3590_v58 = vpop.xlane.xlu1 %3589  ;;  %v11631_v48 = vpop.eup %11630  ;;  %11648 = vpow2.f32 %v9742_v36  ;;  %v9744_v46 = vmul.f32 -1.442695, %v14137_v49 }
 0x7b3   :  { %v14148_v50 = vadd.f32 %v13912_v63, %v3959_v56  ;;  %v3929_v59 = vmul.f32 %v13867_v33, %v3590_v58  ;;  %v11633_v16 = vpop.eup %11632  ;;  %v4120_v44 = vadd.f32 1.0, %v11631_v48 }
 0x7b4   :  { %11650 = vrcp.f32 %v4115_v6  ;;  %v4208_v37 = vmul.f32 %v11633_v16, %v14038_v5  ;;  %v9812_v5 = vmul.f32 -1.442695, %v14154_v35 }
 0x7b5   :  { %v11635_v34 = vpop.eup %11634  ;;  %11652 = vpow2.f32 %v9739_v45  ;;  %v9741_v54 = vmul.f32 -1.442695, %v14148_v50  ;;  %v3961_v18 = vadd.f32 %v3929_v59, %v3893_v3 }
 0x7b6   :  { %v11637_v1 = vpop.eup %11636  ;;  %11654 = vrcp.f32 %v4118_v9  ;;  %v4117_v26 = vadd.f32 1.0, %v11635_v34  ;;  %v3596_v55 = vpop.xlane.xlu1 %3595 }
 0x7b7   :  { %v11639_v40 = vpop.eup %11638  ;;  %11656 = vpow2.f32 %v9744_v46  ;;  %v14158_v8 = vadd.f32 %v13912_v63, %v3961_v18  ;;  %v3931_v10 = vmul.f32 %v13867_v33, %v3596_v55  ;;  %v4207_v53 = vmul.f32 %v11637_v1, %v14062_v14 }
 0x7b8   :  { %v11641_v30 = vpop.eup %11640  ;;  %11658 = vrcp.f32 %v4117_v26  ;;  %v4210_v36 = vmul.f32 %v11639_v40, %v14052_v28 }
 0x7b9   :  { %v11643_v62 = vpop.eup %11642  ;;  %11660 = vpow2.f32 %v9741_v54  ;;  %v9743_v22 = vmul.f32 -1.442695, %v14158_v8  ;;  %v3963_v57 = vadd.f32 %v3931_v10, %v3895_v38  ;;  %10626 = vmatmul.mubr.msk.f32.gmra.mrb[52].mxu1 %vm32_vm0, %v4207_v53  ;;  %v4122_v39 = vadd.f32 1.0, %v11641_v30 }
 0x7ba   :  { %v11645_v21 = vpop.eup %11644  ;;  %v4119_v7 = vadd.f32 1.0, %v11643_v62  ;;  %10628 = vmatprep.mubr.msk.f32.mxu1 %vm32_vm0, %v4208_v37  ;;  %11662 = vpow2.f32 %v9811_v42 }
 0x7bb   :  { %11664 = vrcp.f32 %v4120_v44  ;;  %v14167_v33 = vadd.f32 %v13912_v63, %v3963_v57  ;;  %v4209_v14 = vmul.f32 %v11645_v21, %v14080_v52  ;;  %v11647_v41 = vpop.eup %11646 }
 0x7bc   :  { %11666 = vrcp.f32 %v4119_v7  ;;  %v11649_v24 = vpop.eup %11648  ;;  %v4212_v9 = vmul.f32 %v11647_v41, %v14065_v13 }
 0x7bd   :  { %11668 = vpow2.f32 %v9743_v22  ;;  %v9745_v32 = vmul.f32 -1.442695, %v14167_v33  ;;  %10629 = vmatmul.mubr.msk.f32.gmra.mrb[54].mxu1 %vm32_vm0, %v4209_v14  ;;  %v4124_v6 = vadd.f32 1.0, %v11649_v24 }
 0x7be   :  { %v11651_v56 = vpop.eup %11650  ;;  %10631 = vmatprep.mubr.msk.f32.mxu1 %vm32_vm0, %v4210_v36  ;;  %11670 = vpow2.f32 %v9812_v5  ;;  %v14221_v5 = vld [vmem:[%s16289_s4 + $0xa] ss:$0 sm:$0xff] }
 0x7bf   :  { %v11653_v63 = vpop.eup %11652  ;;  %v4211_v3 = vmul.f32 %v11651_v56, %v14092_v25  ;;  %11672 = vpow2.f32 %v9745_v32 }
 0x7c0   :  { %v11655_v52 = vpop.eup %11654  ;;  %v4121_v15 = vadd.f32 1.0, %v11653_v63  ;;  %11674 = vrcp.f32 %v4122_v39 }
 0x7c1   :  { %v11657_v28 = vpop.eup %11656  ;;  %10632 = vmatmul.mubr.msk.f32.gmra.mrb[56].mxu1 %vm32_vm0, %v4211_v3  ;;  %v4214_v59 = vmul.f32 %v11655_v52, %v14085_v60 }
 0x7c2   :  { %v11659_v45 = vpop.eup %11658  ;;  %11676 = vrcp.f32 %v4121_v15  ;;  %10634 = vmatprep.mubr.msk.f32.mxu1 %vm32_vm0, %v4212_v9  ;;  %v4126_v38 = vadd.f32 1.0, %v11657_v28 }
 0x7c3   :  { %v11661_v58 = vpop.eup %11660  ;;  %v4213_v48 = vmul.f32 %v11659_v45, %v14106_v43  ;;  %11678 = vrcp.f32 %v4124_v6 }
 0x7c4   :  { %v11663_v46 = vpop.eup %11662  ;;  %v4123_v25 = vadd.f32 1.0, %v11661_v58 }
 0x7c5   :  { %v11665_v16 = vpop.eup %11664  ;;  %10635 = vmatmul.mubr.msk.f32.gmra.mrb[58].mxu1 %vm32_vm0, %v4213_v48  ;;  %v4783_v43 = vadd.f32 1.0, %v11663_v46 }
 0x7c6   :  { %v11667_v13 = vpop.eup %11666  ;;  %11680 = vrcp.f32 %v4123_v25  ;;  %10637 = vmatprep.mubr.msk.f32.mxu1 %vm32_vm0, %v4214_v59  ;;  %v4216_v1 = vmul.f32 %v11665_v16, %v14095_v31 }
 0x7c7   :  { %v11669_v34 = vpop.eup %11668  ;;  %v4215_v54 = vmul.f32 %v11667_v13, %v14117_v0  ;;  %11682 = vrcp.f32 %v4126_v38 }
 0x7c8   :  { %v4125_v18 = vadd.f32 1.0, %v11669_v34  ;;  %v11671_v44 = vpop.eup %11670 }
 0x7c9   :  { %10638 = vmatmul.mubr.msk.f32.gmra.mrb[60].mxu1 %vm32_vm0, %v4215_v54  ;;  %v11673_v60 = vpop.eup %11672  ;;  %v4784_v40 = vadd.f32 1.0, %v11671_v44 }
 0x7ca   :  { %11684 = vrcp.f32 %v4125_v18  ;;  %10640 = vmatprep.mubr.msk.f32.mxu1 %vm32_vm0, %v4216_v1  ;;  %v11675_v26 = vpop.eup %11674  ;;  %v4127_v55 = vadd.f32 1.0, %v11673_v60 }
 0x7cb   :  { %11686 = vrcp.f32 %v4783_v43  ;;  %v4218_v10 = vmul.f32 %v11675_v26, %v14111_v12 }
 0x7cc   :  { %v11677_v42 = vpop.eup %11676  ;;  %11688 = vrcp.f32 %v4127_v55 }
 0x7cd   :  { %v4217_v0 = vmul.f32 %v11677_v42, %v14134_v51  ;;  %v11679_v31 = vpop.eup %11678  ;;  %11690 = vrcp.f32 %v4784_v40 }
 0x7ce   :  { %v4220_v37 = vmul.f32 %v11679_v31, %v14120_v4 }
 0x7cf   :  { %10641 = vmatmul.mubr.msk.f32.gmra.mrb[62].mxu1 %vm32_vm0, %v4217_v0 }
 0x7d0   :  { %v11681_v53 = vpop.eup %11680  ;;  %10643 = vmatprep.mubr.msk.f32.mxu1 %vm32_vm0, %v4218_v10 }
 0x7d1   :  { %v4219_v30 = vmul.f32 %v11681_v53, %v14148_v50  ;;  %v11683_v62 = vpop.eup %11682 }
 0x7d2   :  { %v4222_v57 = vmul.f32 %v11683_v62, %v14137_v49  ;;  %v3228_v49 = vld [vmem:[%s16287_s2 + $0xe0] sm:$0xff] }
 0x7d3   :  { %10644 = vmatmul.mubr.msk.f32.gmra.mrb[64].mxu1 %vm32_vm0, %v4219_v30 }
 0x7d4   :  { %v11685_v22 = vpop.eup %11684  ;;  %10646 = vmatprep.mubr.msk.f32.mxu1 %vm32_vm0, %v4220_v37 }
 0x7d5   :  { %v4221_v51 = vmul.f32 %v11685_v22, %v14158_v8  ;;  %v11687_v12 = vpop.eup %11686  ;;  %v3229_v8 = vld [vmem:[%s16287_s2 + $0xe8] sm:$0xff] }
 0x7d6   :  { %v11689_v21 = vpop.eup %11688  ;;  %v4789_v4 = vmul.f32 %v11687_v12, %v14141_v47  ;;  %v3230_v47 = vld [vmem:[%s16287_s2 + $0xf0] sm:$0xff] }
 0x7d7   :  { %10647 = vmatmul.mubr.msk.f32.gmra.mrb[66].mxu1 %vm32_vm0, %v4221_v51  ;;  %v4223_v50 = vmul.f32 %v11689_v21, %v14167_v33  ;;  %v11691_v7 = vpop.eup %11690  ;;  %v11030_v33 = vpack.c.bf16 %v3229_v8, %v3228_v49 }
 0x7d8   :  { %10649 = vmatprep.mubr.msk.f32.mxu1 %vm32_vm0, %v4222_v57  ;;  %v4790_v14 = vmul.f32 %v11691_v7, %v14154_v35  ;;  %v3231_v35 = vld [vmem:[%s16287_s2 + $0xf8] sm:$0xff] }
 0x7d9   :  { %11031 = vmatprep.subr.bf16.mxu0 %v11030_v33 }
 0x7da   :  { %11033 = vmatpush3.bf16.msra.mxu0 %v11030_v33 }
 0x7db   :  { %10650 = vmatmul.mubr.msk.f32.gmra.mrb[68].mxu1 %vm32_vm0, %v4223_v50 }
 0x7dc   :  { %10660 = vmatprep.mubr.msk.f32.mxu1 %vm32_vm0, %v4789_v4 }
 0x7df   :  { %10661 = vmatmul.mubr.msk.f32.vlgmr.msra.gmra.mrb[70].mxu1 %vm32_vm0, %v4790_v14 }
 0x7e0   :  { %11041 = vmatpush3.bf16.msra.mxu1 %v14007_v17  ;;  %v11034_v17 = vpack.c.bf16 %v3231_v35, %v3230_v47 }
 0x7e2   :  { %11035 = vmatprep.subr.bf16.mxu0 %v11034_v17 }
 0x7e3   :  { %11037 = vmatpush3.bf16.msra.mxu0 %v11034_v17 }
 0x84f   :  { %v10606_v41 = vpop.f32.mrb[38].mxu1 }
 0x850   :  { %v14224_v36 = vadd.f32 %v10606_v41, %v14221_v5  ;;  %v4390_v24 = vpop.f32.mrb[39].mxu1 }
 0x851   :  { %v14227_v39 = vadd.f32 %v14221_v5, %v4390_v24 }
 0x852   :  { %v9780_v32 = vmul.f32 -1.442695, %v14224_v36 }
 0x853   :  { %v9779_v56 = vmul.f32 -1.442695, %v14227_v39  ;;  %v10609_v63 = vpop.f32.mrb[40].mxu1 }
 0x854   :  { %11692 = vpow2.f32 %v9780_v32  ;;  %v14232_v3 = vadd.f32 %v10609_v63, %v14221_v5  ;;  %v4400_v52 = vpop.f32.mrb[41].mxu1 }
 0x855   :  { %11694 = vpow2.f32 %v9779_v56  ;;  %v14235_v15 = vadd.f32 %v14221_v5, %v4400_v52 }
 0x856   :  { %v9782_v9 = vmul.f32 -1.442695, %v14232_v3 }
 0x857   :  { %v9781_v28 = vmul.f32 -1.442695, %v14235_v15  ;;  %v10612_v6 = vpop.f32.mrb[42].mxu1 }
 0x858   :  { %11696 = vpow2.f32 %v9782_v9  ;;  %v14240_v45 = vadd.f32 %v10612_v6, %v14221_v5  ;;  %v4410_v58 = vpop.f32.mrb[43].mxu1 }
 0x859   :  { %11698 = vpow2.f32 %v9781_v28  ;;  %v14243_v48 = vadd.f32 %v14221_v5, %v4410_v58  ;;  %v3232_v58 = vld [vmem:[%s16287_s2 + $0x100] sm:$0xff] }
 0x85a   :  { %v9784_v46 = vmul.f32 -1.442695, %v14240_v45 }
 0x85b   :  { %v9783_v25 = vmul.f32 -1.442695, %v14243_v48  ;;  %v10615_v59 = vpop.f32.mrb[44].mxu1 }
 0x85c   :  { %11700 = vpow2.f32 %v9784_v46  ;;  %v14248_v16 = vadd.f32 %v10615_v59, %v14221_v5  ;;  %v4420_v38 = vpop.f32.mrb[45].mxu1  ;;  %v3233_v46 = vld [vmem:[%s16287_s2 + $0x108] sm:$0xff] }
 0x85d   :  { %11702 = vpow2.f32 %v9783_v25  ;;  %v14251_v13 = vadd.f32 %v14221_v5, %v4420_v38  ;;  %v11042_v38 = vpack.c.bf16 %v3233_v46, %v3232_v58 }
 0x85e   :  { %v11693_v34 = vpop.eup %11692  ;;  %v9786_v54 = vmul.f32 -1.442695, %v14248_v16 }
 0x85f   :  { %v11695_v18 = vpop.eup %11694  ;;  %v4646_v1 = vadd.f32 1.0, %v11693_v34  ;;  %v9785_v43 = vmul.f32 -1.442695, %v14251_v13  ;;  %v10618_v44 = vpop.f32.mrb[46].mxu1  ;;  %v3235_v34 = vld [vmem:[%s16287_s2 + $0x118] sm:$0xff]  ;;  %11043 = vmatprep.subr.bf16.mxu0 %v11042_v38 }
 0x860   :  { %v4645_v60 = vadd.f32 1.0, %v11695_v18  ;;  %11704 = vpow2.f32 %v9786_v54  ;;  %v14256_v26 = vadd.f32 %v10618_v44, %v14221_v5  ;;  %v4430_v55 = vpop.f32.mrb[47].mxu1 }
 0x861   :  { %11706 = vrcp.f32 %v4646_v1  ;;  %v14259_v42 = vadd.f32 %v14221_v5, %v4430_v55 }
 0x862   :  { %v11697_v40 = vpop.eup %11696  ;;  %11708 = vrcp.f32 %v4645_v60  ;;  %v9788_v0 = vmul.f32 -1.442695, %v14256_v26 }
 0x863   :  { %v11699_v10 = vpop.eup %11698  ;;  %v4648_v31 = vadd.f32 1.0, %v11697_v40  ;;  %11710 = vpow2.f32 %v9785_v43  ;;  %v9787_v53 = vmul.f32 -1.442695, %v14259_v42  ;;  %v10621_v30 = vpop.f32.mrb[48].mxu1 }
 0x864   :  { %v4647_v37 = vadd.f32 1.0, %v11699_v10  ;;  %11712 = vpow2.f32 %v9788_v0  ;;  %v14264_v62 = vadd.f32 %v10621_v30, %v14221_v5  ;;  %v4440_v22 = vpop.f32.mrb[49].mxu1 }
 0x865   :  { %11714 = vrcp.f32 %v4648_v31  ;;  %v14267_v51 = vadd.f32 %v14221_v5, %v4440_v22 }
 0x866   :  { %v11701_v12 = vpop.eup %11700  ;;  %11716 = vrcp.f32 %v4647_v37  ;;  %v9790_v57 = vmul.f32 -1.442695, %v14264_v62 }
 0x867   :  { %v11703_v21 = vpop.eup %11702  ;;  %v4650_v50 = vadd.f32 1.0, %v11701_v12  ;;  %11718 = vpow2.f32 %v9787_v53  ;;  %v9789_v7 = vmul.f32 -1.442695, %v14267_v51  ;;  %v10624_v4 = vpop.f32.mrb[50].mxu1 }
 0x868   :  { %v4649_v14 = vadd.f32 1.0, %v11703_v21  ;;  %11720 = vpow2.f32 %v9790_v57  ;;  %v14272_v49 = vadd.f32 %v10624_v4, %v14221_v5  ;;  %v4450_v8 = vpop.f32.mrb[51].mxu1 }
 0x869   :  { %11722 = vrcp.f32 %v4650_v50  ;;  %v14275_v33 = vadd.f32 %v14221_v5, %v4450_v8 }
 0x86a   :  { %v11705_v47 = vpop.eup %11704  ;;  %11724 = vrcp.f32 %v4649_v14  ;;  %v9792_v35 = vmul.f32 -1.442695, %v14272_v49 }
 0x86b   :  { %v11707_v17 = vpop.eup %11706  ;;  %v4652_v41 = vadd.f32 1.0, %v11705_v47  ;;  %11726 = vpow2.f32 %v9789_v7  ;;  %v9791_v24 = vmul.f32 -1.442695, %v14275_v33 }
 0x86c   :  { %v11709_v32 = vpop.eup %11708  ;;  %v4742_v56 = vmul.f32 %v11707_v17, %v14224_v36  ;;  %11728 = vpow2.f32 %v9792_v35  ;;  %v3234_v36 = vld [vmem:[%s16287_s2 + $0x110] sm:$0xff] }
 0x86d   :  { %v11711_v63 = vpop.eup %11710  ;;  %v4741_v52 = vmul.f32 %v11709_v32, %v14227_v39  ;;  %11730 = vrcp.f32 %v4652_v41  ;;  %v11046_v43 = vpack.c.bf16 %v3235_v34, %v3234_v36 }
 0x86e   :  { %v11713_v9 = vpop.eup %11712  ;;  %v5886_v28 = vsel %vm32_vm0, %v4742_v56, 0.0  ;;  %v4651_v6 = vadd.f32 1.0, %v11711_v63  ;;  %11732 = vpow2.f32 %v9791_v24 }
 0x86f   :  { %v11715_v25 = vpop.eup %11714  ;;  %v5885_v39 = vsel %vm32_vm0, %v4741_v52, 0.0  ;;  %v4654_v59 = vadd.f32 1.0, %v11713_v9  ;;  %10671 = vmatprep.mubr.msk.f32.mxu0 %vm32_vm0, %v4741_v52 }
 0x870   :  { %v11717_v54 = vpop.eup %11716  ;;  %v14296_v18 = vadd.f32 %v5886_v28, %v5885_v39  ;;  %v4744_v1 = vmul.f32 %v11715_v25, %v14232_v3  ;;  %11734 = vrcp.f32 %v4651_v6  ;;  %10672 = vmatmul.mubr.msk.f32.vlgmr.msra.gmra.mrb[40].mxu0 %vm32_vm0, %v4742_v56 }
 0x871   :  { %v11719_v44 = vpop.eup %11718  ;;  %v4743_v60 = vmul.f32 %v11717_v54, %v14235_v15  ;;  %11736 = vrcp.f32 %v4654_v59  ;;  %11045 = vmatpush3.bf16.msra.mxu0 %v11042_v38 }
 0x872   :  { %v11721_v55 = vpop.eup %11720  ;;  %v5895_v40 = vsel %vm32_vm0, %v4744_v1, 0.0  ;;  %v4653_v0 = vadd.f32 1.0, %v11719_v44  ;;  %11047 = vmatprep.subr.bf16.mxu0 %v11046_v43 }
 0x873   :  { %v11723_v10 = vpop.eup %11722  ;;  %v5894_v31 = vsel %vm32_vm0, %v4743_v60, 0.0  ;;  %v4656_v53 = vadd.f32 1.0, %v11721_v55  ;;  %10674 = vmatprep.mubr.msk.f32.mxu0 %vm32_vm0, %v4743_v60 }
 0x874   :  { %v11725_v3 = vpop.eup %11724  ;;  %v14304_v30 = vadd.f32 %v5895_v40, %v5894_v31  ;;  %v4746_v37 = vmul.f32 %v11723_v10, %v14240_v45  ;;  %11738 = vrcp.f32 %v4653_v0  ;;  %10675 = vmatmul.mubr.msk.f32.gmra.mrb[42].mxu0 %vm32_vm0, %v4744_v1 }
 0x875   :  { %v11727_v15 = vpop.eup %11726  ;;  %v4745_v22 = vmul.f32 %v11725_v3, %v14243_v48  ;;  %11740 = vrcp.f32 %v4656_v53  ;;  %11049 = vmatpush3.bf16.msra.mxu0 %v11046_v43 }
 0x876   :  { %v11729_v12 = vpop.eup %11728  ;;  %v5904_v57 = vsel %vm32_vm0, %v4746_v37, 0.0  ;;  %v4655_v21 = vadd.f32 1.0, %v11727_v15 }
 0x877   :  { %v11731_v50 = vpop.eup %11730  ;;  %v5903_v7 = vsel %vm32_vm0, %v4745_v22, 0.0  ;;  %v4658_v4 = vadd.f32 1.0, %v11729_v12  ;;  %10677 = vmatprep.mubr.msk.f32.mxu0 %vm32_vm0, %v4745_v22 }
 0x878   :  { %v11733_v14 = vpop.eup %11732  ;;  %v14312_v45 = vadd.f32 %v5904_v57, %v5903_v7  ;;  %v4748_v8 = vmul.f32 %v11731_v50, %v14248_v16  ;;  %10678 = vmatmul.mubr.msk.f32.gmra.mrb[44].mxu0 %vm32_vm0, %v4746_v37  ;;  %11742 = vrcp.f32 %v4655_v21 }
 0x879   :  { %v4657_v48 = vadd.f32 1.0, %v11733_v14  ;;  %11744 = vrcp.f32 %v4658_v4 }
 0x87a   :  { %v11735_v47 = vpop.eup %11734  ;;  %v5913_v17 = vsel %vm32_vm0, %v4748_v8, 0.0 }
 0x87b   :  { %v11737_v35 = vpop.eup %11736  ;;  %v4747_v41 = vmul.f32 %v11735_v47, %v14251_v13  ;;  %11746 = vrcp.f32 %v4657_v48 }
 0x87c   :  { %v4750_v24 = vmul.f32 %v11737_v35, %v14256_v26 }
 0x87d   :  { %v5912_v32 = vsel %vm32_vm0, %v4747_v41, 0.0  ;;  %10680 = vmatprep.mubr.msk.f32.mxu0 %vm32_vm0, %v4747_v41 }
 0x87e   :  { %v11739_v56 = vpop.eup %11738  ;;  %v14321_v16 = vadd.f32 %v5913_v17, %v5912_v32  ;;  %10681 = vmatmul.mubr.msk.f32.gmra.mrb[46].mxu0 %vm32_vm0, %v4748_v8  ;;  %v5922_v52 = vsel %vm32_vm0, %v4750_v24, 0.0 }
 0x87f   :  { %v11741_v63 = vpop.eup %11740  ;;  %v4749_v9 = vmul.f32 %v11739_v56, %v14259_v42 }
 0x880   :  { %v4752_v13 = vmul.f32 %v11741_v63, %v14264_v62 }
 0x881   :  { %v5921_v28 = vsel %vm32_vm0, %v4749_v9, 0.0  ;;  %10683 = vmatprep.mubr.msk.f32.mxu0 %vm32_vm0, %v4749_v9 }
 0x882   :  { %v14329_v26 = vadd.f32 %v5922_v52, %v5921_v28  ;;  %10684 = vmatmul.mubr.msk.f32.gmra.mrb[48].mxu0 %vm32_vm0, %v4750_v24  ;;  %v11743_v6 = vpop.eup %11742  ;;  %v5931_v58 = vsel %vm32_vm0, %v4752_v13, 0.0 }
 0x883   :  { %v4751_v46 = vmul.f32 %v11743_v6, %v14267_v51  ;;  %v11745_v36 = vpop.eup %11744 }
 0x884   :  { %v4754_v42 = vmul.f32 %v11745_v36, %v14272_v49 }
 0x885   :  { %v5930_v25 = vsel %vm32_vm0, %v4751_v46, 0.0  ;;  %10686 = vmatprep.mubr.msk.f32.mxu0 %vm32_vm0, %v4751_v46  ;;  %v11747_v62 = vpop.eup %11746 }
 0x886   :  { %v14337_v39 = vadd.f32 %v5931_v58, %v5930_v25  ;;  %10687 = vmatmul.mubr.msk.f32.gmra.mrb[50].mxu0 %vm32_vm0, %v4752_v13  ;;  %v5940_v59 = vsel %vm32_vm0, %v4754_v42, 0.0  ;;  %v4753_v38 = vmul.f32 %v11747_v62, %v14275_v33 }
 0x888   :  { %v5939_v34 = vsel %vm32_vm0, %v4753_v38, 0.0  ;;  %10689 = vmatprep.mubr.msk.f32.mxu0 %vm32_vm0, %v4753_v38 }
 0x889   :  { %v14344_v51 = vadd.f32 %v5940_v59, %v5939_v34  ;;  %v5888_v59 = vrot.slane %v14296_v18, 4 }
 0x88a   :  { %10690 = vmatmul.mubr.msk.f32.gmra.mrb[52].mxu0 %vm32_vm0, %v4754_v42 }
 0x88c   :  { %v10627_v49 = vpop.f32.mrb[52].mxu1 }
 0x88d   :  { %v14348_v54 = vadd.f32 %v10627_v49, %v14221_v5  ;;  %v4460_v1 = vpop.f32.mrb[53].mxu1 }
 0x88e   :  { %v14351_v43 = vadd.f32 %v14221_v5, %v4460_v1 }
 0x88f   :  { %v9794_v44 = vmul.f32 -1.442695, %v14348_v54 }
 0x890   :  { %v9793_v33 = vmul.f32 -1.442695, %v14351_v43  ;;  %v10630_v60 = vpop.f32.mrb[54].mxu1 }
 0x891   :  { %11748 = vpow2.f32 %v9794_v44  ;;  %v14356_v55 = vadd.f32 %v10630_v60, %v14221_v5  ;;  %v4470_v40 = vpop.f32.mrb[55].mxu1 }
 0x892   :  { %11750 = vpow2.f32 %v9793_v33  ;;  %v14359_v0 = vadd.f32 %v14221_v5, %v4470_v40 }
 0x893   :  { %v9796_v10 = vmul.f32 -1.442695, %v14356_v55 }
 0x894   :  { %v9795_v31 = vmul.f32 -1.442695, %v14359_v0  ;;  %v10633_v53 = vpop.f32.mrb[56].mxu1 }
 0x895   :  { %11752 = vpow2.f32 %v9796_v10  ;;  %v14364_v3 = vadd.f32 %v10633_v53, %v14221_v5  ;;  %v4480_v37 = vpop.f32.mrb[57].mxu1 }
 0x896   :  { %11754 = vpow2.f32 %v9795_v31  ;;  %v14367_v15 = vadd.f32 %v14221_v5, %v4480_v37  ;;  %v5889_v37 = vadd.f32 %v5888_v59, %v14296_v18 }
 0x897   :  { %v9798_v22 = vmul.f32 -1.442695, %v14364_v3 }
 0x898   :  { %v9797_v12 = vmul.f32 -1.442695, %v14367_v15  ;;  %v10636_v57 = vpop.f32.mrb[58].mxu1 }
 0x899   :  { %11756 = vpow2.f32 %v9798_v22  ;;  %v14372_v21 = vadd.f32 %v10636_v57, %v14221_v5  ;;  %v4490_v50 = vpop.f32.mrb[59].mxu1 }
 0x89a   :  { %11758 = vpow2.f32 %v9797_v12  ;;  %v14375_v7 = vadd.f32 %v14221_v5, %v4490_v50  ;;  %v5897_v50 = vrot.slane %v14304_v30, 4 }
 0x89b   :  { %v11749_v4 = vpop.eup %11748  ;;  %v9800_v14 = vmul.f32 -1.442695, %v14372_v21 }
 0x89c   :  { %v11751_v8 = vpop.eup %11750  ;;  %v4660_v48 = vadd.f32 1.0, %v11749_v4  ;;  %v9799_v47 = vmul.f32 -1.442695, %v14375_v7  ;;  %v10639_v35 = vpop.f32.mrb[60].mxu1 }
 0x89d   :  { %v4659_v17 = vadd.f32 1.0, %v11751_v8  ;;  %11760 = vpow2.f32 %v9800_v14  ;;  %v14380_v41 = vadd.f32 %v10639_v35, %v14221_v5  ;;  %v4500_v24 = vpop.f32.mrb[61].mxu1 }
 0x89e   :  { %11762 = vrcp.f32 %v4660_v48  ;;  %v14383_v32 = vadd.f32 %v14221_v5, %v4500_v24 }
 0x89f   :  { %v11753_v56 = vpop.eup %11752  ;;  %11764 = vrcp.f32 %v4659_v17  ;;  %v9802_v63 = vmul.f32 -1.442695, %v14380_v41 }
 0x8a0   :  { %v11755_v52 = vpop.eup %11754  ;;  %v4662_v9 = vadd.f32 1.0, %v11753_v56  ;;  %11766 = vpow2.f32 %v9799_v47  ;;  %v9801_v13 = vmul.f32 -1.442695, %v14383_v32 }
 0x8a1   :  { %v4661_v28 = vadd.f32 1.0, %v11755_v52  ;;  %11768 = vpow2.f32 %v9802_v63 }
 0x8a2   :  { %11770 = vrcp.f32 %v4662_v9  ;;  %v10642_v6 = vpop.f32.mrb[62].mxu1 }
 0x8a3   :  { %v11757_v58 = vpop.eup %11756  ;;  %11772 = vrcp.f32 %v4661_v28  ;;  %v14388_v46 = vadd.f32 %v10642_v6, %v14221_v5  ;;  %v4510_v36 = vpop.f32.mrb[63].mxu1  ;;  %v5890_v6 = vrot.slane %v5889_v37, 2 }
 0x8a4   :  { %v11759_v25 = vpop.eup %11758  ;;  %v4664_v42 = vadd.f32 1.0, %v11757_v58  ;;  %11774 = vpow2.f32 %v9801_v13  ;;  %v14391_v62 = vadd.f32 %v14221_v5, %v4510_v36 }
 0x8a5   :  { %v4663_v38 = vadd.f32 1.0, %v11759_v25  ;;  %v9804_v34 = vmul.f32 -1.442695, %v14388_v46 }
 0x8a6   :  { %11776 = vrcp.f32 %v4664_v42  ;;  %v9803_v49 = vmul.f32 -1.442695, %v14391_v62  ;;  %v10645_v1 = vpop.f32.mrb[64].mxu1  ;;  %v5898_v42 = vadd.f32 %v5897_v50, %v14304_v30 }
 0x8a7   :  { %v11761_v44 = vpop.eup %11760  ;;  %11778 = vrcp.f32 %v4663_v38  ;;  %v14397_v33 = vadd.f32 %v10645_v1, %v14221_v5  ;;  %v4520_v60 = vpop.f32.mrb[65].mxu1 }
 0x8a8   :  { %v11763_v40 = vpop.eup %11762  ;;  %v4666_v10 = vadd.f32 1.0, %v11761_v44  ;;  %11780 = vpow2.f32 %v9804_v34  ;;  %v14400_v31 = vadd.f32 %v14221_v5, %v4520_v60 }
 0x8a9   :  { %v11765_v53 = vpop.eup %11764  ;;  %v4756_v22 = vmul.f32 %v11763_v40, %v14348_v54  ;;  %11782 = vpow2.f32 %v9803_v49  ;;  %v9806_v12 = vmul.f32 -1.442695, %v14397_v33 }
 0x8aa   :  { %v11767_v57 = vpop.eup %11766  ;;  %v4755_v4 = vmul.f32 %v11765_v53, %v14351_v43  ;;  %11784 = vrcp.f32 %v4666_v10  ;;  %v9805_v14 = vmul.f32 -1.442695, %v14400_v31  ;;  %v10648_v8 = vpop.f32.mrb[66].mxu1 }
 0x8ab   :  { %v11769_v48 = vpop.eup %11768  ;;  %v5949_v47 = vsel %vm32_vm0, %v4756_v22, 0.0  ;;  %v4665_v35 = vadd.f32 1.0, %v11767_v57  ;;  %11786 = vpow2.f32 %v9806_v12  ;;  %v14410_v18 = vadd.f32 %v10648_v8, %v14221_v5  ;;  %v4530_v54 = vpop.f32.mrb[67].mxu1 }
 0x8ac   :  { %v11771_v17 = vpop.eup %11770  ;;  %v5948_v24 = vsel %vm32_vm0, %v4755_v4, 0.0  ;;  %v4668_v56 = vadd.f32 1.0, %v11769_v48  ;;  %11788 = vpow2.f32 %v9805_v14  ;;  %v14414_v43 = vadd.f32 %v14221_v5, %v4530_v54  ;;  %10692 = vmatprep.mubr.msk.f32.mxu0 %vm32_vm0, %v4755_v4 }
 0x8ad   :  { %v11773_v63 = vpop.eup %11772  ;;  %v14417_v52 = vadd.f32 %v5949_v47, %v5948_v24  ;;  %v4758_v9 = vmul.f32 %v11771_v17, %v14356_v55  ;;  %11790 = vrcp.f32 %v4665_v35  ;;  %v9808_v13 = vmul.f32 -1.442695, %v14410_v18  ;;  %10693 = vmatmul.mubr.msk.f32.gmra.mrb[54].mxu0 %vm32_vm0, %v4756_v22 }
 0x8ae   :  { %v11775_v28 = vpop.eup %11774  ;;  %v4757_v58 = vmul.f32 %v11773_v63, %v14359_v0  ;;  %11792 = vrcp.f32 %v4668_v56  ;;  %v9807_v36 = vmul.f32 -1.442695, %v14414_v43  ;;  %v10651_v25 = vpop.f32.mrb[68].mxu1  ;;  %v5891_v12 = vadd.f32 %v5890_v6, %v5889_v37 }
 0x8af   :  { %v5958_v59 = vsel %vm32_vm0, %v4758_v9, 0.0  ;;  %v4667_v38 = vadd.f32 1.0, %v11775_v28  ;;  %11794 = vpow2.f32 %v9808_v13  ;;  %v4540_v55 = vpop.f32.mrb[69].mxu1  ;;  %v14428_v1 = vadd.f32 %v10651_v25, %v14221_v5 }
 0x8b0   :  { %v11777_v34 = vpop.eup %11776  ;;  %v5957_v49 = vsel %vm32_vm0, %v4757_v58, 0.0  ;;  %11796 = vpow2.f32 %v9807_v36  ;;  %10695 = vmatprep.mubr.msk.f32.mxu0 %vm32_vm0, %v4757_v58  ;;  %v5899_v57 = vrot.slane %v5898_v42, 2  ;;  %v14445_v37 = vadd.f32 %v14221_v5, %v4540_v55 }
 0x8b1   :  { %v11779_v0 = vpop.eup %11778  ;;  %v14431_v44 = vadd.f32 %v5958_v59, %v5957_v49  ;;  %v4760_v60 = vmul.f32 %v11777_v34, %v14364_v3  ;;  %11798 = vrcp.f32 %v4667_v38  ;;  %10696 = vmatmul.mubr.msk.f32.gmra.mrb[56].mxu0 %vm32_vm0, %v4758_v9  ;;  %v9810_v10 = vmul.f32 -1.442695, %v14428_v1 }
 0x8b2   :  { %v11781_v30 = vpop.eup %11780  ;;  %v4759_v40 = vmul.f32 %v11779_v0, %v14367_v15  ;;  %v10662_v53 = vpop.f32.mrb[70].mxu1  ;;  %v5906_v15 = vrot.slane %v14312_v45, 4  ;;  %v5892_v63 = vrot.slane %v5891_v12, 1  ;;  %v14448_v9 = vadd.f32 %v5899_v57, %v5898_v42 }
 0x8b3   :  { %v11783_v22 = vpop.eup %11782  ;;  %v5967_v50 = vsel %vm32_vm0, %v4760_v60, 0.0  ;;  %v4670_v4 = vadd.f32 1.0, %v11781_v30  ;;  %v4863_v14 = vpop.f32.mrb[71].mxu1  ;;  %11800 = vpow2.f32 %v9810_v10  ;;  %v14451_v13 = vadd.f32 %v10662_v53, %v14221_v5 }
 0x8b4   :  { %v11785_v8 = vpop.eup %11784  ;;  %v5966_v48 = vsel %vm32_vm0, %v4759_v40, 0.0  ;;  %v4669_v3 = vadd.f32 1.0, %v11783_v22  ;;  %10698 = vmatprep.mubr.msk.f32.mxu0 %vm32_vm0, %v4759_v40  ;;  %v5907_v25 = vadd.f32 %v5906_v15, %v14312_v45  ;;  %v9809_v38 = vmul.f32 -1.442695, %v14445_v37 }
 0x8b5   :  { %v11787_v47 = vpop.eup %11786  ;;  %v14441_v35 = vadd.f32 %v5967_v50, %v5966_v48  ;;  %v4762_v54 = vmul.f32 %v11785_v8, %v14372_v21  ;;  %10699 = vmatmul.mubr.msk.f32.gmra.mrb[58].mxu0 %vm32_vm0, %v4760_v60  ;;  %11802 = vrcp.f32 %v4670_v4  ;;  %v5915_v55 = vrot.slane %v14321_v16, 4 }
 0x8b6   :  { %v11789_v17 = vpop.eup %11788  ;;  %v4672_v24 = vadd.f32 1.0, %v11787_v47  ;;  %11804 = vrcp.f32 %v4669_v3  ;;  %v5924_v0 = vrot.slane %v14329_v26, 4  ;;  %v9816_v45 = vmul.f32 -1.442695, %v14451_v13 }
 0x8b7   :  { %v11791_v56 = vpop.eup %11790  ;;  %v5976_v6 = vsel %vm32_vm0, %v4762_v54, 0.0  ;;  %v4671_v58 = vadd.f32 1.0, %v11789_v17  ;;  %v5908_v53 = vrot.slane %v5907_v25, 2  ;;  %v14470_v57 = vadd.f32 %v5915_v55, %v14321_v16 }
 0x8b8   :  { %v11793_v28 = vpop.eup %11792  ;;  %v4761_v21 = vmul.f32 %v11791_v56, %v14375_v7  ;;  %11806 = vrcp.f32 %v4672_v24  ;;  %v5901_v8 = vrot.slane %v14448_v9, 1  ;;  %v14479_v48 = vadd.f32 %v5924_v0, %v14329_v26 }
 0x8b9   :  { %v11795_v36 = vpop.eup %11794  ;;  %v4764_v59 = vmul.f32 %v11793_v28, %v14380_v41  ;;  %11808 = vrcp.f32 %v4671_v58  ;;  %v14464_v41 = vadd.f32 %v14221_v5, %v4863_v14  ;;  %v14474_v5 = vadd.f32 %v5892_v63, %v5891_v12 }
 0x8ba   :  { %v11797_v42 = vpop.eup %11796  ;;  %v5975_v34 = vsel %vm32_vm0, %v4761_v21, 0.0  ;;  %v4674_v49 = vadd.f32 1.0, %v11795_v36  ;;  %10701 = vmatprep.mubr.msk.f32.mxu0 %vm32_vm0, %v4761_v21  ;;  %v14482_v3 = vadd.f32 %v5908_v53, %v5907_v25  ;;  %v5933_v47 = vrot.slane %v14337_v39, 4 }
 0x8bb   :  { %v11799_v7 = vpop.eup %11798  ;;  %v5977_v60 = vadd.f32 %v5976_v6, %v5975_v34  ;;  %10702 = vmatmul.mubr.msk.f32.gmra.mrb[60].mxu0 %vm32_vm0, %v4762_v54  ;;  %v5985_v30 = vsel %vm32_vm0, %v4764_v59, 0.0  ;;  %v4673_v10 = vadd.f32 1.0, %v11797_v42  ;;  %v9815_v16 = vmul.f32 -1.442695, %v14464_v41 }
 0x8bc   :  { %v4763_v40 = vmul.f32 %v11799_v7, %v14383_v32  ;;  %11810 = vrcp.f32 %v4674_v49  ;;  %v5942_v12 = vrot.slane %v14344_v51, 4  ;;  %v5917_v17 = vrot.slane %v14470_v57, 2 }
 0x8bd   :  { %11812 = vpow2.f32 %v9809_v38  ;;  %v11801_v22 = vpop.eup %11800  ;;  %v5951_v24 = vrot.slane %v14417_v52, 4  ;;  %v5960_v56 = vrot.slane %v14431_v44, 4  ;;  %v5969_v26 = vrot.slane %v14441_v35, 4 }
 0x8be   :  { %v5984_v50 = vsel %vm32_vm0, %v4763_v40, 0.0  ;;  %11814 = vrcp.f32 %v4673_v10  ;;  %10704 = vmatprep.mubr.msk.f32.mxu0 %vm32_vm0, %v4763_v40  ;;  %v4676_v14 = vadd.f32 1.0, %v11801_v22  ;;  %v5978_v28 = vrot.slane %v5977_v60, 4 }
 0x8bf   :  { %v5986_v4 = vadd.f32 %v5985_v30, %v5984_v50  ;;  %10705 = vmatmul.mubr.msk.f32.gmra.mrb[62].mxu0 %vm32_vm0, %v4764_v59  ;;  %v11803_v32 = vpop.eup %11802  ;;  %11816 = vpow2.f32 %v9816_v45  ;;  %v5926_v36 = vrot.slane %v14479_v48, 2  ;;  %v5934_v59 = vadd.f32 %v5933_v47, %v14337_v39 }
 0x8c0   :  { %v4766_v15 = vmul.f32 %v11803_v32, %v14388_v46  ;;  %v11805_v54 = vpop.eup %11804  ;;  %11818 = vrcp.f32 %v4676_v14  ;;  %v5943_v38 = vadd.f32 %v5942_v12, %v14344_v51  ;;  %v5961_v49 = vadd.f32 %v5960_v56, %v14431_v44 }
 0x8c1   :  { %v4765_v21 = vmul.f32 %v11805_v54, %v14391_v62  ;;  %v5987_v46 = vrot.slane %v5986_v4, 4  ;;  %11820 = vpow2.f32 %v9815_v16  ;;  %v5952_v62 = vadd.f32 %v5951_v24, %v14417_v52 }
 0x8c2   :  { %v11807_v63 = vpop.eup %11806  ;;  %v5994_v6 = vsel %vm32_vm0, %v4766_v15, 0.0  ;;  %v5970_v39 = vadd.f32 %v5969_v26, %v14441_v35  ;;  %v5979_v51 = vadd.f32 %v5978_v28, %v5977_v60  ;;  %v5935_v53 = vrot.slane %v5934_v59, 2 }
 0x8c3   :  { %v11809_v58 = vpop.eup %11808  ;;  %v4768_v25 = vmul.f32 %v11807_v63, %v14397_v33  ;;  %v5993_v42 = vsel %vm32_vm0, %v4765_v21, 0.0  ;;  %10707 = vmatprep.mubr.msk.f32.mxu0 %vm32_vm0, %v4765_v21  ;;  %v5988_v40 = vadd.f32 %v5987_v46, %v5986_v4  ;;  %v5944_v22 = vrot.slane %v5943_v38, 2 }
 0x8c4   :  { %v4767_v55 = vmul.f32 %v11809_v58, %v14400_v31  ;;  %v5995_v7 = vadd.f32 %v5994_v6, %v5993_v42  ;;  %10708 = vmatmul.mubr.msk.f32.gmra.mrb[64].mxu0 %vm32_vm0, %v4766_v15  ;;  %v5953_v35 = vrot.slane %v5952_v62, 2  ;;  %v5971_v47 = vrot.slane %v5970_v39, 2 }
 0x8c5   :  { %v6003_v0 = vsel %vm32_vm0, %v4768_v25, 0.0  ;;  %v5980_v15 = vrot.slane %v5979_v51, 2  ;;  %v5989_v54 = vrot.slane %v5988_v40, 2  ;;  %v5918_v63 = vadd.f32 %v5917_v17, %v14470_v57 }
 0x8c6   :  { %v11811_v34 = vpop.eup %11810  ;;  %v6002_v45 = vsel %vm32_vm0, %v4767_v55, 0.0  ;;  %10710 = vmatprep.mubr.msk.f32.mxu0 %vm32_vm0, %v4767_v55  ;;  %v5996_v52 = vrot.slane %v5995_v7, 4  ;;  %v5927_v21 = vadd.f32 %v5926_v36, %v14479_v48  ;;  %v5936_v58 = vadd.f32 %v5935_v53, %v5934_v59 }
 0x8c7   :  { %v11813_v33 = vpop.eup %11812  ;;  %v4770_v31 = vmul.f32 %v11811_v34, %v14410_v18  ;;  %v6004_v10 = vadd.f32 %v6003_v0, %v6002_v45  ;;  %v5962_v18 = vrot.slane %v5961_v49, 2  ;;  %v5945_v42 = vadd.f32 %v5944_v22, %v5943_v38 }
 0x8c8   :  { %v11815_v30 = vpop.eup %11814  ;;  %v4675_v44 = vadd.f32 1.0, %v11813_v33  ;;  %v5997_v60 = vadd.f32 %v5996_v52, %v5995_v7  ;;  %10711 = vmatmul.mubr.msk.f32.gmra.mrb[66].mxu0 %vm32_vm0, %v4768_v25  ;;  %v5954_v55 = vadd.f32 %v5953_v35, %v5952_v62  ;;  %v5972_v0 = vadd.f32 %v5971_v47, %v5970_v39 }
 0x8c9   :  { %v6012_v50 = vsel %vm32_vm0, %v4770_v31, 0.0  ;;  %v4769_v14 = vmul.f32 %v11815_v30, %v14414_v43  ;;  %v11817_v32 = vpop.eup %11816  ;;  %v6005_v16 = vrot.slane %v6004_v10, 4  ;;  %v5910_v43 = vrot.slane %v14482_v3, 1 }
 0x8ca   :  { %11822 = vrcp.f32 %v4675_v44  ;;  %v4879_v12 = vadd.f32 1.0, %v11817_v32  ;;  %v11819_v26 = vpop.eup %11818  ;;  %v5998_v28 = vrot.slane %v5997_v60, 2  ;;  %v5963_v34 = vadd.f32 %v5962_v18, %v5961_v49 }
 0x8cb   :  { %v6011_v4 = vsel %vm32_vm0, %v4769_v14, 0.0  ;;  %10713 = vmatprep.mubr.msk.f32.mxu0 %vm32_vm0, %v4769_v14  ;;  %v6006_v24 = vadd.f32 %v6005_v16, %v6004_v10  ;;  %v11821_v6 = vpop.eup %11820  ;;  %v5981_v33 = vadd.f32 %v5980_v15, %v5979_v51  ;;  %v5990_v45 = vadd.f32 %v5989_v54, %v5988_v40 }
 0x8cc   :  { %v6013_v56 = vadd.f32 %v6012_v50, %v6011_v4  ;;  %11824 = vrcp.f32 %v4879_v12  ;;  %10714 = vmatmul.mubr.msk.f32.gmra.mrb[68].mxu0 %vm32_vm0, %v4770_v31  ;;  %v4878_v7 = vadd.f32 1.0, %v11821_v6  ;;  %v5999_v52 = vadd.f32 %v5998_v28, %v5997_v60 }
 0x8cd   :  { %v6007_v46 = vrot.slane %v6006_v24, 2  ;;  %v4772_v17 = vmul.f32 %v11819_v26, %v14428_v1  ;;  %v5919_v10 = vrot.slane %v5918_v63, 1  ;;  %v5928_v48 = vrot.slane %v5927_v21, 1 }
 0x8ce   :  { %v6014_v25 = vrot.slane %v6013_v56, 4  ;;  %11826 = vrcp.f32 %v4878_v7  ;;  %v5937_v36 = vrot.slane %v5936_v58, 1  ;;  %v5902_v38 = vadd.f32 %v5901_v8, %v14448_v9 }
 0x8cf   :  { %v6008_v57 = vadd.f32 %v6007_v46, %v6006_v24  ;;  %v5946_v62 = vrot.slane %v5945_v42, 1  ;;  %v5955_v49 = vrot.slane %v5954_v55, 1  ;;  %v5964_v31 = vrot.slane %v5963_v34, 1 }
 0x8d0   :  { %v6015_v30 = vadd.f32 %v6014_v25, %v6013_v56  ;;  %v5973_v51 = vrot.slane %v5972_v0, 1  ;;  %v5982_v40 = vrot.slane %v5981_v33, 1  ;;  %v5991_v44 = vrot.slane %v5990_v45, 1 }
 0x8d1   :  { %v6000_v22 = vrot.slane %v5999_v52, 1  ;;  %v6009_v50 = vrot.slane %v6008_v57, 1  ;;  %v6021_v1 = vsel %vm32_vm0, %v4772_v17, 0.0  ;;  %v5911_v32 = vadd.f32 %v5910_v43, %v14482_v3 }
 0x8d2   :  { %v6016_v59 = vrot.slane %v6015_v30, 2  ;;  %v5920_v35 = vadd.f32 %v5919_v10, %v5918_v63  ;;  %v5929_v60 = vadd.f32 %v5928_v48, %v5927_v21  ;;  %v5938_v16 = vadd.f32 %v5937_v36, %v5936_v58 }
 0x8d3   :  { %v5947_v8 = vadd.f32 %v5946_v62, %v5945_v42  ;;  %v5956_v4 = vadd.f32 %v5955_v49, %v5954_v55  ;;  %v14526_v12 = vadd.f32 %v5964_v31, %v5963_v34  ;;  %v5974_v15 = vadd.f32 %v5973_v51, %v5972_v0 }
 0x8d4   :  { %v11823_v39 = vpop.eup %11822  ;;  %v6017_v53 = vadd.f32 %v6016_v59, %v6015_v30  ;;  %v5992_v3 = vadd.f32 %v5991_v44, %v5990_v45  ;;  %v6001_v56 = vadd.f32 %v6000_v22, %v5999_v52  ;;  %v6010_v26 = vadd.f32 %v6009_v50, %v6008_v57 }
 0x8d5   :  { %v4771_v14 = vmul.f32 %v11823_v39, %v14445_v37  ;;  %v5983_v37 = vadd.f32 %v5982_v40, %v5981_v33 }
 0x8d6   :  { %v11825_v9 = vpop.eup %11824  ;;  %v6018_v18 = vrot.slane %v6017_v53, 1 }
 0x8d7   :  { %v6020_v47 = vsel %vm32_vm0, %v4771_v14, 0.0  ;;  %10716 = vmatprep.mubr.msk.f32.mxu0 %vm32_vm0, %v4771_v14  ;;  %v4885_v24 = vmul.f32 %v11825_v9, %v14451_v13 }
 0x8d8   :  { %v6022_v54 = vadd.f32 %v6021_v1, %v6020_v47  ;;  %10717 = vmatmul.mubr.msk.f32.gmra.mrb[70].mxu0 %vm32_vm0, %v4772_v17  ;;  %v11827_v21 = vpop.eup %11826  ;;  %v6019_v58 = vadd.f32 %v6018_v18, %v6017_v53 }
 0x8d9   :  { %v6038_v63 = vrot.slane %v4885_v24, 1  ;;  %v6039_v28 = vrot.slane %v4885_v24, 2  ;;  %v6040_v6 = vrot.slane %v4885_v24, 3  ;;  %v6041_v46 = vrot.slane %v4885_v24, 4 }
 0x8da   :  { %v6023_v43 = vrot.slane %v6022_v54, 4  ;;  %v6042_v25 = vrot.slane %v4885_v24, 5  ;;  %v6043_v42 = vrot.slane %v4885_v24, 6  ;;  %v4884_v34 = vmul.f32 %v11827_v21, %v14464_v41 }
 0x8db   :  { %v6069_v13 = vsub.f32 %v14526_v12, %v4885_v24  ;;  %v6070_v7 = vsub.f32 %v5974_v15, %v6038_v63  ;;  %v6071_v0 = vsub.f32 %v5983_v37, %v6039_v28  ;;  %v6072_v33 = vsub.f32 %v5992_v3, %v6040_v6 }
 0x8dc   :  { %v6024_v55 = vadd.f32 %v6023_v43, %v6022_v54  ;;  %v6073_v45 = vsub.f32 %v6001_v56, %v6041_v46  ;;  %v6074_v30 = vsub.f32 %v6010_v26, %v6042_v25  ;;  %v6031_v57 = vrot.slane %v4884_v34, 1 }
 0x8dd   :  { %v6032_v17 = vrot.slane %v4884_v34, 2  ;;  %v6033_v10 = vrot.slane %v4884_v34, 3  ;;  %v6034_v48 = vrot.slane %v4884_v34, 4  ;;  %v6035_v36 = vrot.slane %v4884_v34, 5 }
 0x8de   :  { %v6025_v52 = vrot.slane %v6024_v55, 2  ;;  %v6036_v59 = vrot.slane %v4884_v34, 6  ;;  %v6037_v62 = vrot.slane %v4884_v34, 7  ;;  %v6061_v31 = vsub.f32 %v14474_v5, %v4884_v34 }
 0x8df   :  { %v6062_v39 = vsub.f32 %v5902_v38, %v6031_v57  ;;  %v6063_v41 = vsub.f32 %v5911_v32, %v6032_v17  ;;  %v6064_v51 = vsub.f32 %v5920_v35, %v6033_v10  ;;  %v6065_v40 = vsub.f32 %v5929_v60, %v6034_v48  ;;  %v3236_v35 = vld [vmem:[%s16287_s2 + $0x120] sm:$0xff]  ;;  %v3237_v60 = vld [vmem:[%s16287_s2 + $0x128] sm:$0xff] }
 0x8e0   :  { %v6026_v49 = vadd.f32 %v6025_v52, %v6024_v55  ;;  %v6066_v44 = vsub.f32 %v5938_v16, %v6035_v36  ;;  %v6067_v53 = vsub.f32 %v5947_v8, %v6036_v59  ;;  %v6068_v50 = vsub.f32 %v5956_v4, %v6037_v62  ;;  %v14564_v52 = vld [vmem:[%s16289_s4 + $0xb] ss:$0 sm:$0xff] }
 0x8e1   :  { %v6093_v1 = vrot.slane %v6062_v39, 7  ;;  %v6095_v14 = vrot.slane %v6063_v41, 6  ;;  %v6097_v9 = vrot.slane %v6064_v51, 5  ;;  %v6044_v18 = vrot.slane %v4885_v24, 7 }
 0x8e2   :  { %v6027_v22 = vrot.slane %v6026_v49, 1  ;;  %v6099_v12 = vrot.slane %v6065_v40, 4  ;;  %v6075_v54 = vsub.f32 %v6019_v58, %v6043_v42  ;;  %v6101_v5 = vrot.slane %v6066_v44, 3  ;;  %v3255_v44 = vld [vmem:[%s16289_s4 + $0xf] sm:$0x1] }
 0x8e3   :  { %v6094_v47 = vsel %vm2673_vm2, %v6093_v1, %v6061_v31  ;;  %v6107_v38 = vrot.slane %v6070_v7, 7  ;;  %v6109_v32 = vrot.slane %v6071_v0, 6  ;;  %v6103_v8 = vrot.slane %v6067_v53, 2  ;;  %11136 = vpush %v3255_v44 }
 0x8e4   :  { %v6028_v15 = vadd.f32 %v6027_v22, %v6026_v49  ;;  %v6096_v37 = vsel %vm2675_vm3, %v6095_v14, %v6094_v47  ;;  %v6105_v4 = vrot.slane %v6068_v50, 1  ;;  %v6111_v26 = vrot.slane %v6072_v33, 5  ;;  %v3238_v33 = vld [vmem:[%s16287_s2 + $0x130] sm:$0xff] }
 0x8e5   :  { %v6098_v16 = vsel %vm2677_vm4, %v6097_v9, %v6096_v37  ;;  %v6108_v56 = vsel %vm2673_vm2, %v6107_v38, %v6069_v13  ;;  %v11050_v43 = vpack.c.bf16 %v3237_v60, %v3236_v35  ;;  %v6113_v6 = vrot.slane %v6073_v45, 4  ;;  %v3239_v45 = vld [vmem:[%s16287_s2 + $0x138] sm:$0xff] }
 0x8e6   :  { %v6076_v24 = vsub.f32 %v6028_v15, %v6044_v18  ;;  %v6100_v3 = vsel %vm2679_vm5, %v6099_v12, %v6098_v16  ;;  %v6110_v28 = vsel %vm2675_vm3, %v6109_v32, %v6108_v56  ;;  %v6117_v21 = vrot.slane %v6075_v54, 2 }
 0x8e7   :  { %v6102_v63 = vsel %vm2681_vm6, %v6101_v5, %v6100_v3  ;;  %v6112_v46 = vsel %vm2677_vm4, %v6111_v26, %v6110_v28  ;;  %v6115_v25 = vrot.slane %v6074_v30, 3  ;;  %11051 = vmatprep.subr.bf16.mxu0 %v11050_v43  ;;  %v11054_v30 = vpack.c.bf16 %v3239_v45, %v3238_v33 }
 0x8e8   :  { %v6104_v58 = vsel %vm2683_vm7, %v6103_v8, %v6102_v63  ;;  %v6119_v42 = vrot.slane %v6076_v24, 1  ;;  %v6114_v34 = vsel %vm2679_vm5, %v6113_v6, %v6112_v46  ;;  %11053 = vmatpush3.bf16.msra.mxu0 %v11050_v43 }
 0x8e9   :  { %v6106_v55 = vsel %vm2685_vm8, %v6105_v4, %v6104_v58  ;;  %v6116_v13 = vsel %vm2681_vm6, %v6115_v25, %v6114_v34  ;;  %11055 = vmatprep.subr.bf16.mxu0 %v11054_v30 }
 0x8ea   :  { %6121 = vrot.lane.b32.xlu0 %v6106_v55, %s12400_s8  ;;  %v6118_v7 = vsel %vm2683_vm7, %v6117_v21, %v6116_v13 }
 0x8eb   :  { %v6120_v0 = vsel %vm2685_vm8, %v6119_v42, %v6118_v7 }
 0x8ec   :  { %6123 = vrot.lane.b32.xlu1 %v6120_v0, %s12400_s8  ;;  %11057 = vmatpush3.bf16.msra.mxu0 %v11054_v30 }
 0x914   :  { %s11137_s1 = spop %11136 }
 0x943   :  { %v10673_v57 = vpop.f32.mrb[40].mxu0 }
 0x944   :  { %v14567_v17 = vadd.f32 %v10673_v57, %v14564_v52  ;;  %v5052_v10 = vpop.f32.mrb[41].mxu0  ;;  %v14626_v57 = vld [vmem:[%s16289_s4 + $0xc] ss:$0 sm:$0xff] }
 0x945   :  { %v14570_v48 = vadd.f32 %v14564_v52, %v5052_v10 }
 0x946   :  { %v9851_v36 = vmul.f32 -1.442695, %v14567_v17 }
 0x947   :  { %v9850_v59 = vmul.f32 -1.442695, %v14570_v48  ;;  %v10676_v62 = vpop.f32.mrb[42].mxu0 }
 0x948   :  { %11828 = vpow2.f32 %v9851_v36  ;;  %v14575_v49 = vadd.f32 %v10676_v62, %v14564_v52  ;;  %v5062_v31 = vpop.f32.mrb[43].mxu0 }
 0x949   :  { %11830 = vpow2.f32 %v9850_v59  ;;  %v14578_v39 = vadd.f32 %v14564_v52, %v5062_v31 }
 0x94a   :  { %v9853_v41 = vmul.f32 -1.442695, %v14575_v49 }
 0x94b   :  { %v9852_v51 = vmul.f32 -1.442695, %v14578_v39  ;;  %v10679_v40 = vpop.f32.mrb[44].mxu0 }
 0x94c   :  { %11832 = vpow2.f32 %v9853_v41  ;;  %v14586_v53 = vadd.f32 %v10679_v40, %v14564_v52  ;;  %v5072_v22 = vpop.f32.mrb[45].mxu0 }
 0x94d   :  { %11834 = vpow2.f32 %v9852_v51  ;;  %v14589_v50 = vadd.f32 %v14564_v52, %v5072_v22 }
 0x94e   :  { %v9855_v1 = vmul.f32 -1.442695, %v14586_v53 }
 0x94f   :  { %v9854_v14 = vmul.f32 -1.442695, %v14589_v50 }
 0x950   :  { %11836 = vpow2.f32 %v9855_v1 }
 0x951   :  { %11838 = vpow2.f32 %v9854_v14  ;;  %v10682_v9 = vpop.f32.mrb[46].mxu0 }
 0x952   :  { %v11829_v18 = vpop.eup %11828  ;;  %v14594_v47 = vadd.f32 %v10682_v9, %v14564_v52  ;;  %v5082_v12 = vpop.f32.mrb[47].mxu0 }
 0x953   :  { %v11831_v15 = vpop.eup %11830  ;;  %v5308_v54 = vadd.f32 1.0, %v11829_v18  ;;  %v14597_v37 = vadd.f32 %v14564_v52, %v5082_v12 }
 0x954   :  { %v5307_v5 = vadd.f32 1.0, %v11831_v15  ;;  %v9857_v38 = vmul.f32 -1.442695, %v14594_v47 }
 0x955   :  { %11840 = vrcp.f32 %v5308_v54  ;;  %v9856_v32 = vmul.f32 -1.442695, %v14597_v37  ;;  %v10685_v35 = vpop.f32.mrb[48].mxu0 }
 0x956   :  { %v11833_v60 = vpop.eup %11832  ;;  %11842 = vrcp.f32 %v5307_v5  ;;  %v14602_v16 = vadd.f32 %v10685_v35, %v14564_v52  ;;  %v5092_v8 = vpop.f32.mrb[49].mxu0 }
 0x957   :  { %v11835_v4 = vpop.eup %11834  ;;  %v5310_v24 = vadd.f32 1.0, %v11833_v60  ;;  %11844 = vpow2.f32 %v9857_v38  ;;  %v14605_v3 = vadd.f32 %v14564_v52, %v5092_v8 }
 0x958   :  { %v5309_v56 = vadd.f32 1.0, %v11835_v4  ;;  %11846 = vpow2.f32 %v9856_v32  ;;  %v9859_v26 = vmul.f32 -1.442695, %v14602_v16 }
 0x959   :  { %11848 = vrcp.f32 %v5310_v24  ;;  %v9858_v43 = vmul.f32 -1.442695, %v14605_v3  ;;  %v10688_v28 = vpop.f32.mrb[50].mxu0 }
 0x95a   :  { %v11837_v63 = vpop.eup %11836  ;;  %11850 = vrcp.f32 %v5309_v56  ;;  %v14610_v58 = vadd.f32 %v10688_v28, %v14564_v52  ;;  %v5102_v46 = vpop.f32.mrb[51].mxu0 }
 0x95b   :  { %v11839_v6 = vpop.eup %11838  ;;  %v5312_v21 = vadd.f32 1.0, %v11837_v63  ;;  %11852 = vpow2.f32 %v9859_v26  ;;  %v14613_v42 = vadd.f32 %v14564_v52, %v5102_v46 }
 0x95c   :  { %v5311_v25 = vadd.f32 1.0, %v11839_v6  ;;  %11854 = vpow2.f32 %v9858_v43  ;;  %v6122_v55 = vpop.permute.xlu0 %6121  ;;  %v9861_v34 = vmul.f32 -1.442695, %v14610_v58 }
 0x95d   :  { %11856 = vrcp.f32 %v5312_v21  ;;  %v6127_v13 = vsel %vm32_vm0, %v13726_v29, %v6122_v55  ;;  %v9860_v7 = vmul.f32 -1.442695, %v14613_v42  ;;  %v10691_v0 = vpop.f32.mrb[52].mxu0 }
 0x95e   :  { %11858 = vrcp.f32 %v5311_v25  ;;  %10742 = vmatprep.mubr.msk.f32.mxu0 %vm3039_vm9, %v6127_v13  ;;  %v14621_v45 = vadd.f32 %v10691_v0, %v14564_v52  ;;  %v5112_v30 = vpop.f32.mrb[53].mxu0  ;;  %v6124_v59 = vpop.permute.xlu1 %6123 }
 0x95f   :  { %v11841_v33 = vpop.eup %11840  ;;  %11860 = vpow2.f32 %v9861_v34  ;;  %v14630_v62 = vadd.f32 %v14564_v52, %v5112_v30  ;;  %v6128_v51 = vsel %vm32_vm0, %v13730_v2, %v6124_v59 }
 0x960   :  { %v11843_v10 = vpop.eup %11842  ;;  %v5404_v36 = vmul.f32 %v11841_v33, %v14567_v17  ;;  %11862 = vpow2.f32 %v9860_v7  ;;  %v9863_v40 = vmul.f32 -1.442695, %v14621_v45  ;;  %10743 = vmatmul.mubr.msk.f32.vlgmr.msra.gmra.mrb[72].mxu0 %vm3039_vm9, %v6128_v51 }
 0x961   :  { %v11845_v31 = vpop.eup %11844  ;;  %v5403_v41 = vmul.f32 %v11843_v10, %v14570_v48  ;;  %v9862_v1 = vmul.f32 -1.442695, %v14630_v62 }
 0x962   :  { %v11847_v44 = vpop.eup %11846  ;;  %v5314_v22 = vadd.f32 1.0, %v11845_v31  ;;  %v5440_v17 = vmul.f32 %v14626_v57, %v5404_v36  ;;  %11864 = vpow2.f32 %v9863_v40 }
 0x963   :  { %v11849_v14 = vpop.eup %11848  ;;  %v5313_v9 = vadd.f32 1.0, %v11847_v44  ;;  %v5439_v18 = vmul.f32 %v14626_v57, %v5403_v41 }
 0x964   :  { %v11851_v12 = vpop.eup %11850  ;;  %v5406_v48 = vmul.f32 %v11849_v14, %v14575_v49  ;;  %11866 = vrcp.f32 %v5314_v22  ;;  %v5474_v15 = vsel %vm32_vm0, %v5440_v17, 0.0 }
 0x965   :  { %v11853_v54 = vpop.eup %11852  ;;  %v5405_v5 = vmul.f32 %v11851_v12, %v14578_v39  ;;  %11868 = vrcp.f32 %v5313_v9  ;;  %5475 = vadd.xlane.f32.xlu0 %v5474_v15  ;;  %v5471_v38 = vsel %vm32_vm0, %v5439_v18, 0.0 }
 0x966   :  { %v11855_v32 = vpop.eup %11854  ;;  %v5316_v35 = vadd.f32 1.0, %v11853_v54  ;;  %11870 = vpow2.f32 %v9862_v1  ;;  %5472 = vadd.xlane.f32.xlu1 %v5471_v38  ;;  %v5442_v60 = vmul.f32 %v14626_v57, %v5406_v48 }
 0x967   :  { %v11857_v8 = vpop.eup %11856  ;;  %v5315_v4 = vadd.f32 1.0, %v11855_v32  ;;  %v5441_v49 = vmul.f32 %v14626_v57, %v5405_v5 }
 0x968   :  { %v11859_v24 = vpop.eup %11858  ;;  %v5408_v56 = vmul.f32 %v11857_v8, %v14586_v53  ;;  %11872 = vrcp.f32 %v5316_v35  ;;  %v5480_v39 = vsel %vm32_vm0, %v5442_v60, 0.0 }
 0x969   :  { %v11861_v26 = vpop.eup %11860  ;;  %v5407_v43 = vmul.f32 %v11859_v24, %v14589_v50  ;;  %11874 = vrcp.f32 %v5315_v4  ;;  %v5477_v63 = vsel %vm32_vm0, %v5441_v49, 0.0 }
 0x96a   :  { %v11863_v28 = vpop.eup %11862  ;;  %v5318_v6 = vadd.f32 1.0, %v11861_v26  ;;  %5478 = vadd.xlane.f32.xlu0 %v5477_v63  ;;  %5481 = vadd.xlane.f32.xlu1 %v5480_v39  ;;  %v5444_v21 = vmul.f32 %v14626_v57, %v5408_v56 }
 0x96b   :  { %v5317_v46 = vadd.f32 1.0, %v11863_v28  ;;  %v5443_v25 = vmul.f32 %v14626_v57, %v5407_v43 }
 0x96c   :  { %11876 = vrcp.f32 %v5318_v6  ;;  %v5486_v53 = vsel %vm32_vm0, %v5444_v21, 0.0  ;;  %v11865_v55 = vpop.eup %11864 }
 0x96d   :  { %11878 = vrcp.f32 %v5317_v46  ;;  %v5483_v34 = vsel %vm32_vm0, %v5443_v25, 0.0  ;;  %v5320_v13 = vadd.f32 1.0, %v11865_v55 }
 0x96e   :  { %v11867_v50 = vpop.eup %11866  ;;  %5484 = vadd.xlane.f32.xlu0 %v5483_v34  ;;  %5487 = vadd.xlane.f32.xlu1 %v5486_v53 }
 0x96f   :  { %v11869_v7 = vpop.eup %11868  ;;  %v5410_v0 = vmul.f32 %v11867_v50, %v14594_v47  ;;  %11880 = vrcp.f32 %v5320_v13 }
 0x970   :  { %v11871_v33 = vpop.eup %11870  ;;  %v5409_v30 = vmul.f32 %v11869_v7, %v14597_v37 }
 0x971   :  { %v5319_v10 = vadd.f32 1.0, %v11871_v33  ;;  %v5446_v36 = vmul.f32 %v14626_v57, %v5410_v0 }
 0x972   :  { %v11873_v59 = vpop.eup %11872  ;;  %v5445_v31 = vmul.f32 %v14626_v57, %v5409_v30 }
 0x973   :  { %v11875_v41 = vpop.eup %11874  ;;  %v5412_v51 = vmul.f32 %v11873_v59, %v14602_v16  ;;  %11882 = vrcp.f32 %v5319_v10  ;;  %v5492_v40 = vsel %vm32_vm0, %v5446_v36, 0.0 }
 0x974   :  { %v5411_v44 = vmul.f32 %v11875_v41, %v14605_v3  ;;  %v5489_v47 = vsel %vm32_vm0, %v5445_v31, 0.0  ;;  %5493 = vadd.xlane.f32.xlu1 %v5492_v40 }
 0x975   :  { %5490 = vadd.xlane.f32.xlu0 %v5489_v47  ;;  %v5448_v37 = vmul.f32 %v14626_v57, %v5412_v51 }
 0x976   :  { %v11877_v22 = vpop.eup %11876  ;;  %v5447_v1 = vmul.f32 %v14626_v57, %v5411_v44 }
 0x977   :  { %v11879_v17 = vpop.eup %11878  ;;  %v5414_v14 = vmul.f32 %v11877_v22, %v14610_v58  ;;  %v5498_v9 = vsel %vm32_vm0, %v5448_v37, 0.0 }
 0x978   :  { %v5413_v16 = vmul.f32 %v11879_v17, %v14613_v42  ;;  %v5495_v18 = vsel %vm32_vm0, %v5447_v1, 0.0  ;;  %5499 = vadd.xlane.f32.xlu1 %v5498_v9 }
 0x979   :  { %5496 = vadd.xlane.f32.xlu0 %v5495_v18  ;;  %v5450_v3 = vmul.f32 %v14626_v57, %v5414_v14  ;;  %v11881_v12 = vpop.eup %11880 }
 0x97a   :  { %v5449_v48 = vmul.f32 %v14626_v57, %v5413_v16  ;;  %v5416_v15 = vmul.f32 %v11881_v12, %v14621_v45 }
 0x97b   :  { %v5504_v54 = vsel %vm32_vm0, %v5450_v3, 0.0 }
 0x97c   :  { %v5501_v5 = vsel %vm32_vm0, %v5449_v48, 0.0  ;;  %5505 = vadd.xlane.f32.xlu1 %v5504_v54  ;;  %v5452_v42 = vmul.f32 %v14626_v57, %v5416_v15 }
 0x97d   :  { %v11883_v58 = vpop.eup %11882  ;;  %5502 = vadd.xlane.f32.xlu0 %v5501_v5 }
 0x97e   :  { %v5415_v38 = vmul.f32 %v11883_v58, %v14630_v62  ;;  %v5510_v32 = vsel %vm32_vm0, %v5452_v42, 0.0 }
 0x980   :  { %v5451_v35 = vmul.f32 %v14626_v57, %v5415_v38  ;;  %5511 = vadd.xlane.f32.xlu1 %v5510_v32  ;;  %v10694_v60 = vpop.f32.mrb[54].mxu0 }
 0x981   :  { %v14678_v8 = vadd.f32 %v10694_v60, %v14564_v52  ;;  %v5122_v45 = vpop.f32.mrb[55].mxu0 }
 0x982   :  { %v5507_v4 = vsel %vm32_vm0, %v5451_v35, 0.0  ;;  %v14682_v49 = vadd.f32 %v14564_v52, %v5122_v45 }
 0x983   :  { %5508 = vadd.xlane.f32.xlu0 %v5507_v4  ;;  %v9865_v24 = vmul.f32 -1.442695, %v14678_v8 }
 0x984   :  { %v9864_v62 = vmul.f32 -1.442695, %v14682_v49  ;;  %v10697_v56 = vpop.f32.mrb[56].mxu0 }
 0x985   :  { %11884 = vpow2.f32 %v9865_v24  ;;  %v14687_v39 = vadd.f32 %v10697_v56, %v14564_v52  ;;  %v5132_v26 = vpop.f32.mrb[57].mxu0 }
 0x986   :  { %11886 = vpow2.f32 %v9864_v62  ;;  %v14690_v43 = vadd.f32 %v14564_v52, %v5132_v26 }
 0x987   :  { %v9867_v63 = vmul.f32 -1.442695, %v14687_v39 }
 0x988   :  { %v9866_v28 = vmul.f32 -1.442695, %v14690_v43  ;;  %v10700_v6 = vpop.f32.mrb[58].mxu0 }
 0x989   :  { %11888 = vpow2.f32 %v9867_v63  ;;  %v14695_v21 = vadd.f32 %v10700_v6, %v14564_v52  ;;  %v5142_v46 = vpop.f32.mrb[59].mxu0 }
 0x98a   :  { %11890 = vpow2.f32 %v9866_v28  ;;  %v14698_v25 = vadd.f32 %v14564_v52, %v5142_v46 }
 0x98b   :  { %v9869_v53 = vmul.f32 -1.442695, %v14695_v21 }
 0x98c   :  { %v9868_v55 = vmul.f32 -1.442695, %v14698_v25 }
 0x98d   :  { %11892 = vpow2.f32 %v9869_v53 }
 0x98e   :  { %11894 = vpow2.f32 %v9868_v55  ;;  %v10703_v34 = vpop.f32.mrb[60].mxu0 }
 0x98f   :  { %v11885_v50 = vpop.eup %11884  ;;  %v14703_v13 = vadd.f32 %v10703_v34, %v14564_v52  ;;  %v5152_v7 = vpop.f32.mrb[61].mxu0 }
 0x990   :  { %v11887_v0 = vpop.eup %11886  ;;  %v5322_v33 = vadd.f32 1.0, %v11885_v50  ;;  %v14706_v30 = vadd.f32 %v14564_v52, %v5152_v7 }
 0x991   :  { %v5321_v10 = vadd.f32 1.0, %v11887_v0  ;;  %v9871_v36 = vmul.f32 -1.442695, %v14703_v13 }
 0x992   :  { %11896 = vrcp.f32 %v5322_v33  ;;  %v9870_v59 = vmul.f32 -1.442695, %v14706_v30  ;;  %v10706_v31 = vpop.f32.mrb[62].mxu0 }
 0x993   :  { %v11889_v41 = vpop.eup %11888  ;;  %11898 = vrcp.f32 %v5321_v10  ;;  %v14711_v51 = vadd.f32 %v10706_v31, %v14564_v52  ;;  %v5162_v40 = vpop.f32.mrb[63].mxu0 }
 0x994   :  { %v11891_v44 = vpop.eup %11890  ;;  %v5324_v47 = vadd.f32 1.0, %v11889_v41  ;;  %11900 = vpow2.f32 %v9871_v36  ;;  %v14714_v37 = vadd.f32 %v14564_v52, %v5162_v40 }
 0x995   :  { %v5323_v22 = vadd.f32 1.0, %v11891_v44  ;;  %11902 = vpow2.f32 %v9870_v59  ;;  %v9873_v1 = vmul.f32 -1.442695, %v14711_v51 }
 0x996   :  { %11904 = vrcp.f32 %v5324_v47  ;;  %v9872_v17 = vmul.f32 -1.442695, %v14714_v37 }
 0x997   :  { %v11893_v14 = vpop.eup %11892  ;;  %11906 = vrcp.f32 %v5323_v22  ;;  %v10709_v3 = vpop.f32.mrb[64].mxu0 }
 0x998   :  { %v11895_v9 = vpop.eup %11894  ;;  %v5326_v16 = vadd.f32 1.0, %v11893_v14  ;;  %11908 = vpow2.f32 %v9873_v1  ;;  %v14719_v12 = vadd.f32 %v10709_v3, %v14564_v52  ;;  %v5172_v48 = vpop.f32.mrb[65].mxu0 }
 0x999   :  { %v5325_v18 = vadd.f32 1.0, %v11895_v9  ;;  %11910 = vpow2.f32 %v9872_v17  ;;  %v14722_v15 = vadd.f32 %v14564_v52, %v5172_v48 }
 0x99a   :  { %11912 = vrcp.f32 %v5326_v16  ;;  %v9875_v5 = vmul.f32 -1.442695, %v14719_v12 }
 0x99b   :  { %11914 = vrcp.f32 %v5325_v18  ;;  %v9874_v38 = vmul.f32 -1.442695, %v14722_v15  ;;  %v10712_v32 = vpop.f32.mrb[66].mxu0 }
 0x99c   :  { %v11897_v54 = vpop.eup %11896  ;;  %11916 = vpow2.f32 %v9875_v5  ;;  %v14729_v45 = vadd.f32 %v10712_v32, %v14564_v52  ;;  %v5182_v4 = vpop.f32.mrb[67].mxu0 }
 0x99d   :  { %v11899_v58 = vpop.eup %11898  ;;  %v5418_v42 = vmul.f32 %v11897_v54, %v14678_v8  ;;  %11918 = vpow2.f32 %v9874_v38  ;;  %v14732_v56 = vadd.f32 %v14564_v52, %v5182_v4 }
 0x99e   :  { %v11901_v35 = vpop.eup %11900  ;;  %v5417_v60 = vmul.f32 %v11899_v58, %v14682_v49  ;;  %v9877_v28 = vmul.f32 -1.442695, %v14729_v45 }
 0x99f   :  { %v11903_v24 = vpop.eup %11902  ;;  %v5328_v62 = vadd.f32 1.0, %v11901_v35  ;;  %v5454_v26 = vmul.f32 %v14626_v57, %v5418_v42  ;;  %v9876_v53 = vmul.f32 -1.442695, %v14732_v56  ;;  %v10715_v55 = vpop.f32.mrb[68].mxu0 }
 0x9a0   :  { %v11905_v8 = vpop.eup %11904  ;;  %v5327_v63 = vadd.f32 1.0, %v11903_v24  ;;  %v5453_v6 = vmul.f32 %v14626_v57, %v5417_v60  ;;  %v14742_v0 = vadd.f32 %v10715_v55, %v14564_v52  ;;  %v5192_v33 = vpop.f32.mrb[69].mxu0 }
 0x9a1   :  { %v11907_v49 = vpop.eup %11906  ;;  %v5420_v46 = vmul.f32 %v11905_v8, %v14687_v39  ;;  %11920 = vrcp.f32 %v5328_v62  ;;  %v5516_v34 = vsel %vm32_vm0, %v5454_v26, 0.0  ;;  %v14746_v39 = vadd.f32 %v14564_v52, %v5192_v33 }
 0x9a2   :  { %v11909_v50 = vpop.eup %11908  ;;  %v5419_v7 = vmul.f32 %v11907_v49, %v14690_v43  ;;  %11922 = vrcp.f32 %v5327_v63  ;;  %5517 = vadd.xlane.f32.xlu1 %v5516_v34  ;;  %v5513_v10 = vsel %vm32_vm0, %v5453_v6, 0.0  ;;  %v9879_v43 = vmul.f32 -1.442695, %v14742_v0 }
 0x9a3   :  { %v11911_v36 = vpop.eup %11910  ;;  %v5330_v59 = vadd.f32 1.0, %v11909_v50  ;;  %11924 = vpow2.f32 %v9877_v28  ;;  %5514 = vadd.xlane.f32.xlu0 %v5513_v10  ;;  %v5456_v31 = vmul.f32 %v14626_v57, %v5420_v46  ;;  %v9878_v1 = vmul.f32 -1.442695, %v14746_v39 }
 0x9a4   :  { %v11913_v41 = vpop.eup %11912  ;;  %v5329_v40 = vadd.f32 1.0, %v11911_v36  ;;  %11926 = vpow2.f32 %v9876_v53  ;;  %v5455_v44 = vmul.f32 %v14626_v57, %v5419_v7 }
 0x9a5   :  { %v11915_v47 = vpop.eup %11914  ;;  %v5422_v22 = vmul.f32 %v11913_v41, %v14695_v21  ;;  %11928 = vrcp.f32 %v5330_v59  ;;  %v5522_v17 = vsel %vm32_vm0, %v5456_v31, 0.0 }
 0x9a6   :  { %v5421_v14 = vmul.f32 %v11915_v47, %v14698_v25  ;;  %11930 = vrcp.f32 %v5329_v40  ;;  %5523 = vadd.xlane.f32.xlu1 %v5522_v17  ;;  %v5519_v9 = vsel %vm32_vm0, %v5455_v44, 0.0  ;;  %v11917_v18 = vpop.eup %11916 }
 0x9a7   :  { %11932 = vpow2.f32 %v9879_v43  ;;  %5520 = vadd.xlane.f32.xlu0 %v5519_v9  ;;  %v5458_v16 = vmul.f32 %v14626_v57, %v5422_v22  ;;  %v11919_v21 = vpop.eup %11918  ;;  %v5332_v48 = vadd.f32 1.0, %v11917_v18 }
 0x9a8   :  { %11934 = vpow2.f32 %v9878_v1  ;;  %v5457_v3 = vmul.f32 %v14626_v57, %v5421_v14  ;;  %v5331_v5 = vadd.f32 1.0, %v11919_v21 }
 0x9a9   :  { %v5528_v54 = vsel %vm32_vm0, %v5458_v16, 0.0  ;;  %11936 = vrcp.f32 %v5332_v48 }
 0x9aa   :  { %5529 = vadd.xlane.f32.xlu1 %v5528_v54  ;;  %v5525_v25 = vsel %vm32_vm0, %v5457_v3, 0.0  ;;  %11938 = vrcp.f32 %v5331_v5 }
 0x9ab   :  { %v11921_v58 = vpop.eup %11920  ;;  %v10718_v42 = vpop.f32.mrb[70].mxu0  ;;  %5526 = vadd.xlane.f32.xlu0 %v5525_v25 }
 0x9ac   :  { %v11923_v38 = vpop.eup %11922  ;;  %v5424_v32 = vmul.f32 %v11921_v58, %v14703_v13  ;;  %v14762_v35 = vadd.f32 %v10718_v42, %v14564_v52  ;;  %v5202_v60 = vpop.f32.mrb[71].mxu0 }
 0x9ad   :  { %v11925_v4 = vpop.eup %11924  ;;  %v5423_v24 = vmul.f32 %v11923_v38, %v14706_v30  ;;  %v14766_v62 = vadd.f32 %v14564_v52, %v5202_v60 }
 0x9ae   :  { %v11927_v26 = vpop.eup %11926  ;;  %v5334_v8 = vadd.f32 1.0, %v11925_v4  ;;  %v9881_v63 = vmul.f32 -1.442695, %v14762_v35  ;;  %v5460_v28 = vmul.f32 %v14626_v57, %v5424_v32 }
 0x9af   :  { %v11929_v6 = vpop.eup %11928  ;;  %v5333_v49 = vadd.f32 1.0, %v11927_v26  ;;  %v9880_v13 = vmul.f32 -1.442695, %v14766_v62  ;;  %v5459_v46 = vmul.f32 %v14626_v57, %v5423_v24 }
 0x9b0   :  { %v11931_v53 = vpop.eup %11930  ;;  %v5426_v55 = vmul.f32 %v11929_v6, %v14711_v51  ;;  %11940 = vrcp.f32 %v5334_v8  ;;  %v5534_v30 = vsel %vm32_vm0, %v5460_v28, 0.0  ;;  %v3240_v6 = vld [vmem:[%s16287_s2 + $0x140] sm:$0xff] }
 0x9b1   :  { %v11933_v52 = vpop.eup %11932  ;;  %v5425_v34 = vmul.f32 %v11931_v53, %v14714_v37  ;;  %11942 = vrcp.f32 %v5333_v49  ;;  %5535 = vadd.xlane.f32.xlu1 %v5534_v30  ;;  %v5531_v50 = vsel %vm32_vm0, %v5459_v46, 0.0 }
 0x9b2   :  { %v11935_v7 = vpop.eup %11934  ;;  %v5336_v33 = vadd.f32 1.0, %v11933_v52  ;;  %11944 = vpow2.f32 %v9881_v63  ;;  %5532 = vadd.xlane.f32.xlu0 %v5531_v50  ;;  %v5462_v10 = vmul.f32 %v14626_v57, %v5426_v55 }
 0x9b3   :  { %v5335_v36 = vadd.f32 1.0, %v11935_v7  ;;  %11946 = vpow2.f32 %v9880_v13  ;;  %v5461_v51 = vmul.f32 %v14626_v57, %v5425_v34  ;;  %v11937_v31 = vpop.eup %11936 }
 0x9b4   :  { %11948 = vrcp.f32 %v5336_v33  ;;  %v5540_v59 = vsel %vm32_vm0, %v5462_v10, 0.0  ;;  %v11939_v41 = vpop.eup %11938  ;;  %v5428_v40 = vmul.f32 %v11937_v31, %v14719_v12  ;;  %v14813_v10 = vstv %s11137_s1 }
 0x9b5   :  { %11950 = vrcp.f32 %v5335_v36  ;;  %5541 = vadd.xlane.f32.xlu1 %v5540_v59  ;;  %v5537_v37 = vsel %vm32_vm0, %v5461_v51, 0.0  ;;  %v5427_v43 = vmul.f32 %v11939_v41, %v14722_v15 }
 0x9b6   :  { %5538 = vadd.xlane.f32.xlu0 %v5537_v37  ;;  %v5464_v44 = vmul.f32 %v14626_v57, %v5428_v40 }
 0x9b7   :  { %v5463_v47 = vmul.f32 %v14626_v57, %v5427_v43 }
 0x9b8   :  { %v5546_v1 = vsel %vm32_vm0, %v5464_v44, 0.0 }
 0x9b9   :  { %5547 = vadd.xlane.f32.xlu1 %v5546_v1  ;;  %v5543_v9 = vsel %vm32_vm0, %v5463_v47, 0.0 }
 0x9ba   :  { %v11941_v22 = vpop.eup %11940  ;;  %5544 = vadd.xlane.f32.xlu0 %v5543_v9 }
 0x9bb   :  { %v11943_v17 = vpop.eup %11942  ;;  %v5430_v14 = vmul.f32 %v11941_v22, %v14729_v45 }
 0x9bc   :  { %v11945_v16 = vpop.eup %11944  ;;  %v5429_v18 = vmul.f32 %v11943_v17, %v14732_v56 }
 0x9bd   :  { %v11947_v12 = vpop.eup %11946  ;;  %v5338_v3 = vadd.f32 1.0, %v11945_v16  ;;  %v5466_v15 = vmul.f32 %v14626_v57, %v5430_v14 }
 0x9be   :  { %v11949_v21 = vpop.eup %11948  ;;  %v5337_v48 = vadd.f32 1.0, %v11947_v12  ;;  %v5465_v54 = vmul.f32 %v14626_v57, %v5429_v18 }
 0x9bf   :  { %v11951_v5 = vpop.eup %11950  ;;  %v5432_v25 = vmul.f32 %v11949_v21, %v14742_v0  ;;  %11952 = vrcp.f32 %v5338_v3  ;;  %v5552_v45 = vsel %vm32_vm0, %v5466_v15, 0.0 }
 0x9c0   :  { %v5431_v58 = vmul.f32 %v11951_v5, %v14746_v39  ;;  %11954 = vrcp.f32 %v5337_v48  ;;  %5553 = vadd.xlane.f32.xlu1 %v5552_v45  ;;  %v5549_v56 = vsel %vm32_vm0, %v5465_v54, 0.0 }
 0x9c1   :  { %5550 = vadd.xlane.f32.xlu0 %v5549_v56  ;;  %v5468_v42 = vmul.f32 %v14626_v57, %v5432_v25 }
 0x9c2   :  { %v5467_v38 = vmul.f32 %v14626_v57, %v5431_v58 }
 0x9c3   :  { %v5558_v32 = vsel %vm32_vm0, %v5468_v42, 0.0 }
 0x9c4   :  { %5559 = vadd.xlane.f32.xlu1 %v5558_v32  ;;  %v5555_v60 = vsel %vm32_vm0, %v5467_v38, 0.0 }
 0x9c5   :  { %5556 = vadd.xlane.f32.xlu0 %v5555_v60 }
 0x9c9   :  { %v11953_v0 = vpop.eup %11952 }
 0x9ca   :  { %v11955_v4 = vpop.eup %11954  ;;  %v5434_v24 = vmul.f32 %v11953_v0, %v14762_v35  ;;  %v3241_v35 = vld [vmem:[%s16287_s2 + $0x148] sm:$0xff] }
 0x9cb   :  { %v5433_v39 = vmul.f32 %v11955_v4, %v14766_v62  ;;  %v14810_v49 = vpack.c.bf16 %v3241_v35, %v3240_v6 }
 0x9cc   :  { %v5470_v26 = vmul.f32 %v14626_v57, %v5434_v24 }
 0x9cd   :  { %v5469_v8 = vmul.f32 %v14626_v57, %v5433_v39  ;;  %11059 = vmatprep.subr.bf16.mxu1 %v14810_v49 }
 0x9ce   :  { %v5564_v63 = vsel %vm32_vm0, %v5470_v26, 0.0 }
 0x9cf   :  { %5565 = vadd.xlane.f32.xlu1 %v5564_v63  ;;  %v5561_v28 = vsel %vm32_vm0, %v5469_v8, 0.0 }
 0x9d0   :  { %5562 = vadd.xlane.f32.xlu0 %v5561_v28 }
 0x9f2   :  { %v5476_v62 = vpop.xlane.xlu0 %5475 }
 0x9f3   :  { %v5473_v57 = vpop.xlane.xlu1 %5472  ;;  %v5569_v37 = vadd.f32 %v14813_v10, %v5476_v62 }
 0x9f4   :  { %v5568_v41 = vadd.f32 %v14813_v10, %v5473_v57 }
 0x9f5   :  { %v5639_v21 = vrot.slane %v5569_v37, %v13574_v19  ;;  %v9885_v37 = vld [vmem:[%s16289_s4 + $0xd] ss:$0 sm:$0xff] }
 0x9f6   :  { %v5635_v48 = vrot.slane %v5568_v41, %v13577_v61 }
 0x9f7   :  { %v5479_v13 = vpop.xlane.xlu0 %5478  ;;  %v5482_v46 = vpop.xlane.xlu1 %5481 }
 0x9f8   :  { %v5570_v36 = vadd.f32 %v14813_v10, %v5479_v13  ;;  %v5571_v51 = vadd.f32 %v14813_v10, %v5482_v46  ;;  %v5640_v0 = vsel %vm2536_vm10, %v5639_v21, %v5635_v48 }
 0x9fa   :  { %v5644_v17 = vrot.slane %v5570_v36, %v13577_v61  ;;  %v5648_v14 = vrot.slane %v5571_v51, %v13574_v19 }
 0x9fb   :  { %v5485_v53 = vpop.xlane.xlu0 %5484  ;;  %v5488_v55 = vpop.xlane.xlu1 %5487 }
 0x9fc   :  { %v5572_v59 = vadd.f32 %v14813_v10, %v5485_v53  ;;  %v5573_v31 = vadd.f32 %v14813_v10, %v5488_v55  ;;  %v5649_v58 = vsel %vm2536_vm10, %v5648_v14, %v5644_v17 }
 0x9fd   :  { %v5776_v39 = vsel %vm2673_vm2, %v5649_v58, %v5640_v0 }
 0x9fe   :  { %v5653_v18 = vrot.slane %v5572_v59, %v13577_v61  ;;  %v5657_v12 = vrot.slane %v5573_v31, %v13574_v19 }
 0xa00   :  { %v5658_v38 = vsel %vm2536_vm10, %v5657_v12, %v5653_v18 }
 0xa01   :  { %v5494_v52 = vpop.xlane.xlu1 %5493  ;;  %v5777_v28 = vsel %vm2675_vm3, %v5658_v38, %v5776_v39 }
 0xa02   :  { %v5491_v30 = vpop.xlane.xlu0 %5490  ;;  %v5575_v43 = vadd.f32 %v14813_v10, %v5494_v52 }
 0xa03   :  { %v5574_v40 = vadd.f32 %v14813_v10, %v5491_v30 }
 0xa04   :  { %v5666_v5 = vrot.slane %v5575_v43, %v13574_v19 }
 0xa05   :  { %v5500_v50 = vpop.xlane.xlu1 %5499  ;;  %v5662_v54 = vrot.slane %v5574_v40, %v13577_v61 }
 0xa06   :  { %v5497_v34 = vpop.xlane.xlu0 %5496  ;;  %v5577_v1 = vadd.f32 %v14813_v10, %v5500_v50 }
 0xa07   :  { %v5576_v22 = vadd.f32 %v14813_v10, %v5497_v34  ;;  %v5667_v4 = vsel %vm2536_vm10, %v5666_v5, %v5662_v54 }
 0xa08   :  { %v5675_v45 = vrot.slane %v5577_v1, %v13574_v19  ;;  %v5778_v62 = vsel %vm2677_vm4, %v5667_v4, %v5777_v28 }
 0xa09   :  { %v5506_v33 = vpop.xlane.xlu1 %5505  ;;  %v5671_v25 = vrot.slane %v5576_v22, %v13577_v61 }
 0xa0a   :  { %v5503_v7 = vpop.xlane.xlu0 %5502  ;;  %v5579_v16 = vadd.f32 %v14813_v10, %v5506_v33 }
 0xa0b   :  { %v5578_v9 = vadd.f32 %v14813_v10, %v5503_v7  ;;  %v5676_v26 = vsel %vm2536_vm10, %v5675_v45, %v5671_v25 }
 0xa0c   :  { %v5684_v42 = vrot.slane %v5579_v16, %v13574_v19  ;;  %v5779_v46 = vsel %vm2679_vm5, %v5676_v26, %v5778_v62 }
 0xa0d   :  { %v5512_v47 = vpop.xlane.xlu1 %5511  ;;  %v5680_v56 = vrot.slane %v5578_v9, %v13577_v61 }
 0xa0e   :  { %v5581_v15 = vadd.f32 %v14813_v10, %v5512_v47 }
 0xa0f   :  { %v5685_v6 = vsel %vm2536_vm10, %v5684_v42, %v5680_v56 }
 0xa10   :  { %v5509_v44 = vpop.xlane.xlu0 %5508  ;;  %v5693_v60 = vrot.slane %v5581_v15, %v13574_v19  ;;  %v5780_v52 = vsel %vm2681_vm6, %v5685_v6, %v5779_v46 }
 0xa11   :  { %v5580_v3 = vadd.f32 %v14813_v10, %v5509_v44 }
 0xa13   :  { %v5689_v32 = vrot.slane %v5580_v3, %v13577_v61 }
 0xa15   :  { %v5694_v57 = vsel %vm2536_vm10, %v5693_v60, %v5689_v32 }
 0xa16   :  { %v5781_v7 = vsel %vm2683_vm7, %v5694_v57, %v5780_v52 }
 0xa2f   :  { %v5518_v24 = vpop.xlane.xlu1 %5517 }
 0xa30   :  { %v5583_v8 = vadd.f32 %v14813_v10, %v5518_v24  ;;  %v5515_v63 = vpop.xlane.xlu0 %5514 }
 0xa31   :  { %v5582_v35 = vadd.f32 %v14813_v10, %v5515_v63 }
 0xa32   :  { %v5702_v13 = vrot.slane %v5583_v8, %v13574_v19 }
 0xa33   :  { %v5698_v53 = vrot.slane %v5582_v35, %v13577_v61  ;;  %v5524_v55 = vpop.xlane.xlu1 %5523  ;;  %v10744_v34 = vpop.f32.mrb[72].mxu0 }
 0xa34   :  { %v5521_v30 = vpop.xlane.xlu0 %5520  ;;  %v6205_v33 = vpop.f32.mrb[73].mxu0  ;;  %v14870_v1 = vadd.f32 %v10744_v34, %v9885_v37  ;;  %v5585_v5 = vadd.f32 %v14813_v10, %v5524_v55 }
 0xa35   :  { %v5703_v50 = vsel %vm2536_vm10, %v5702_v13, %v5698_v53  ;;  %v14867_v41 = vadd.f32 %v9885_v37, %v6205_v33  ;;  %v5584_v25 = vadd.f32 %v14813_v10, %v5521_v30 }
 0xa36   :  { %v5782_v36 = vsel %vm2685_vm8, %v5703_v50, %v5781_v7  ;;  %v9889_v17 = vmul.f32 -1.442695, %v14870_v1  ;;  %v5711_v6 = vrot.slane %v5585_v5, %v13574_v19 }
 0xa37   :  { %10723 = vmatprep.mubr.msk.f32.mxu1 %vm2696_vm11, %v5782_v36  ;;  %v5792_v51 = vsel %vm2696_vm11, %v5782_v36, 0.0  ;;  %v5530_v59 = vpop.xlane.xlu1 %5529  ;;  %v9888_v44 = vmul.f32 -1.442695, %v14867_v41  ;;  %v5707_v35 = vrot.slane %v5584_v25, %v13577_v61 }
 0xa38   :  { %5793 = vadd.xlane.f32.xlu0 %v5792_v51  ;;  %v5527_v31 = vpop.xlane.xlu0 %5526  ;;  %v5587_v3 = vadd.f32 %v14813_v10, %v5530_v59 }
 0xa39   :  { %11956 = vpow2.f32 %v9888_v44  ;;  %v5586_v21 = vadd.f32 %v14813_v10, %v5527_v31  ;;  %v5712_v33 = vsel %vm2536_vm10, %v5711_v6, %v5707_v35 }
 0xa3a   :  { %11958 = vpow2.f32 %v9889_v17  ;;  %v5720_v38 = vrot.slane %v5587_v3, %v13574_v19 }
 0xa3b   :  { %v5716_v4 = vrot.slane %v5586_v21, %v13577_v61 }
 0xa3d   :  { %v5721_v55 = vsel %vm2536_vm10, %v5720_v38, %v5716_v4  ;;  %v6338_v38 = vld [vmem:[%s16288_s3 + $0x48] sm:$0xff] }
 0xa3e   :  { %v5536_v40 = vpop.xlane.xlu1 %5535  ;;  %v5783_v59 = vsel %vm2673_vm2, %v5721_v55, %v5712_v33 }
 0xa3f   :  { %v5533_v43 = vpop.xlane.xlu0 %5532  ;;  %v5589_v48 = vadd.f32 %v14813_v10, %v5536_v40 }
 0xa40   :  { %v5588_v54 = vadd.f32 %v14813_v10, %v5533_v43 }
 0xa41   :  { %v5729_v26 = vrot.slane %v5589_v48, %v13574_v19 }
 0xa42   :  { %v5542_v47 = vpop.xlane.xlu1 %5541  ;;  %v5725_v8 = vrot.slane %v5588_v54, %v13577_v61 }
 0xa43   :  { %v5539_v22 = vpop.xlane.xlu0 %5538  ;;  %v11957_v12 = vpop.eup %11956  ;;  %v5591_v45 = vadd.f32 %v14813_v10, %v5542_v47 }
 0xa44   :  { %v6220_v15 = vadd.f32 1.0, %v11957_v12  ;;  %v5590_v58 = vadd.f32 %v14813_v10, %v5539_v22  ;;  %v11959_v0 = vpop.eup %11958  ;;  %v5730_v34 = vsel %vm2536_vm10, %v5729_v26, %v5725_v8 }
 0xa45   :  { %v5738_v62 = vrot.slane %v5591_v45, %v13574_v19  ;;  %v6221_v13 = vadd.f32 1.0, %v11959_v0  ;;  %v5784_v43 = vsel %vm2675_vm3, %v5730_v34, %v5783_v59  ;;  %v6339_v0 = vld [vmem:[%s16288_s3 + $0x50] sm:$0xff] }
 0xa46   :  { %v5548_v14 = vpop.xlane.xlu1 %5547  ;;  %11960 = vrcp.f32 %v6220_v15  ;;  %v5734_v57 = vrot.slane %v5590_v58, %v13577_v61 }
 0xa47   :  { %v5545_v9 = vpop.xlane.xlu0 %5544  ;;  %v5593_v32 = vadd.f32 %v14813_v10, %v5548_v14  ;;  %11962 = vrcp.f32 %v6221_v13 }
 0xa48   :  { %v5592_v60 = vadd.f32 %v14813_v10, %v5545_v9  ;;  %v5739_v36 = vsel %vm2536_vm10, %v5738_v62, %v5734_v57  ;;  %v3242_v9 = vld [vmem:[%s16287_s2 + $0x150] sm:$0xff] }
 0xa49   :  { %v5747_v46 = vrot.slane %v5593_v32, %v13574_v19  ;;  %v5785_v22 = vsel %vm2677_vm4, %v5739_v36, %v5784_v43  ;;  %v6319_v32 = vld [vmem:[%s16287_s2 + $0x170] sm:$0xff] }
 0xa4a   :  { %v5743_v53 = vrot.slane %v5592_v60, %v13577_v61  ;;  %v6320_v60 = vld [vmem:[%s16287_s2 + $0x178] sm:$0xff] }
 0xa4b   :  { %v11078_v4 = vpack.c.bf16 %v6320_v60, %v6319_v32 }
 0xa4c   :  { %v5748_v31 = vsel %vm2536_vm10, %v5747_v46, %v5743_v53 }
 0xa4d   :  { %v5554_v16 = vpop.xlane.xlu1 %5553  ;;  %v5786_v12 = vsel %vm2679_vm5, %v5748_v31, %v5785_v22 }
 0xa4e   :  { %v5551_v18 = vpop.xlane.xlu0 %5550  ;;  %v5595_v24 = vadd.f32 %v14813_v10, %v5554_v16  ;;  %v3243_v16 = vld [vmem:[%s16287_s2 + $0x158] sm:$0xff] }
 0xa4f   :  { %v5594_v39 = vadd.f32 %v14813_v10, %v5551_v18  ;;  %v11062_v48 = vpack.c.bf16 %v3243_v16, %v3242_v9 }
 0xa50   :  { %v5756_v30 = vrot.slane %v5595_v24, %v13574_v19  ;;  %v11961_v18 = vpop.eup %11960  ;;  %v6340_v24 = vld [vmem:[%s16288_s3 + $0x58] sm:$0xff] }
 0xa51   :  { %v5560_v56 = vpop.xlane.xlu1 %5559  ;;  %v5752_v52 = vrot.slane %v5594_v39, %v13577_v61  ;;  %v6226_v54 = vmul.f32 %v11961_v18, %v14867_v41  ;;  %v11963_v45 = vpop.eup %11962  ;;  %v6317_v41 = vld [vmem:[%s16287_s2 + $0x160] sm:$0xff]  ;;  %v11070_v39 = vpack.c.bf16 %v6340_v24, %v6339_v0 }
 0xa52   :  { %v5557_v42 = vpop.xlane.xlu0 %5556  ;;  %v5597_v63 = vadd.f32 %v14813_v10, %v5560_v56  ;;  %v6227_v58 = vmul.f32 %v11963_v45, %v14870_v1  ;;  %v6318_v56 = vld [vmem:[%s16287_s2 + $0x168] sm:$0xff] }
 0xa53   :  { %v5596_v28 = vadd.f32 %v14813_v10, %v5557_v42  ;;  %v5757_v44 = vsel %vm2536_vm10, %v5756_v30, %v5752_v52  ;;  %v11074_v42 = vpack.c.bf16 %v6318_v56, %v6317_v41 }
 0xa54   :  { %v5765_v50 = vrot.slane %v5597_v63, %v13574_v19 }
 0xa55   :  { %v5761_v7 = vrot.slane %v5596_v28, %v13577_v61  ;;  %11075 = vmatprep.subr.bf16.mxu0 %v11074_v42 }
 0xa56   :  { %11077 = vmatpush3.bf16.msra.mxu0 %v11074_v42 }
 0xa57   :  { %v5766_v17 = vsel %vm2536_vm10, %v5765_v50, %v5761_v7  ;;  %11079 = vmatprep.subr.bf16.mxu0 %v11078_v4  ;;  %v9892_v7 = vld [vmem:[%s16289_s4 + $0xe] ss:$0 sm:$0xff] }
 0xa5a   :  { %11081 = vmatpush3.bf16.msra.mxu0 %v11078_v4 }
 0xa5c   :  { %v5566_v51 = vpop.xlane.xlu1 %5565 }
 0xa5d   :  { %v5599_v37 = vadd.f32 %v14813_v10, %v5566_v51  ;;  %v5563_v40 = vpop.xlane.xlu0 %5562 }
 0xa5e   :  { %v5598_v47 = vadd.f32 %v14813_v10, %v5563_v40  ;;  %v5787_v10 = vsel %vm2681_vm6, %v5757_v44, %v5786_v12 }
 0xa5f   :  { %v5774_v14 = vrot.slane %v5599_v37, %v13574_v19  ;;  %v5788_v21 = vsel %vm2683_vm7, %v5766_v17, %v5787_v10 }
 0xa60   :  { %v5770_v3 = vrot.slane %v5598_v47, %v13577_v61 }
 0xa62   :  { %v5775_v15 = vsel %vm2536_vm10, %v5774_v14, %v5770_v3 }
 0xa63   :  { %v5789_v5 = vsel %vm2685_vm8, %v5775_v15, %v5788_v21 }
 0xa64   :  { %10724 = vmatmul.mubr.msk.f32.vlgmr.msra.gmra.mrb[72].mxu1 %vm2696_vm11, %v5789_v5  ;;  %v5795_v25 = vsel %vm2696_vm11, %v5789_v5, 0.0 }
 0xa65   :  { %11061 = vmatpush3.bf16.msra.mxu1 %v14810_v49  ;;  %10753 = vmatprep.mubr.msk.f32.mxu1 %vm32_vm0, %v6226_v54  ;;  %v6337_v49 = vld [vmem:[%s16288_s3 + $0x40] sm:$0xff] }
 0xa66   :  { %5796 = vadd.xlane.f32.xlu1 %v5795_v25  ;;  %11063 = vmatprep.subr.bf16.mxu1 %v11062_v48  ;;  %v11066_v1 = vpack.c.bf16 %v6338_v38, %v6337_v49 }
 0xa69   :  { %11065 = vmatpush3.bf16.msra.mxu1 %v11062_v48 }
 0xa6a   :  { %11067 = vmatprep.subr.bf16.mxu1 %v11066_v1 }
 0xa6c   :  { %10754 = vmatmul.mubr.msk.f32.vlgmr.msra.gmra.mrb[74].mxu1 %vm32_vm0, %v6227_v58 }
 0xa6d   :  { %11069 = vmatpush3.bf16.msra.mxu1 %v11066_v1 }
 0xa6e   :  { %11071 = vmatprep.subr.bf16.mxu1 %v11070_v39 }
 0xa71   :  { %11073 = vmatpush3.bf16.msra.mxu1 %v11070_v39 }
 0xa72   :  { %11083 = vmatprep.subr.bf16.mxu1 %v11074_v42 }
 0xac5   :  { %v5794_v8 = vpop.xlane.xlu0 %5793 }
 0xac6   :  { %v5798_v28 = vmul.f32 %v5794_v8, %v13710_v11 }
 0xaf3   :  { %v5797_v26 = vpop.xlane.xlu1 %5796 }
 0xaf4   :  { %v5799_v63 = vmul.f32 %v5797_v26, %v13724_v27 }
 0xb37   :  { %v10725_v6 = vpop.f32.mrb[72].mxu1 }
 0xb38   :  { %v5880_v35 = vsub.f32 %v5799_v63, %v10725_v6  ;;  %v5870_v62 = vpop.f32.mrb[73].mxu1 }
 0xb39   :  { %v5879_v57 = vsub.f32 %v5798_v28, %v5870_v62 }
 0xb3a   :  { %v5882_v13 = vmul.f32 0.06666667, %v5880_v35 }
 0xb3b   :  { %v5881_v46 = vmul.f32 0.06666667, %v5879_v57 }
 0xb3c   :  { %v14960_v53 = vadd.f32 %v5882_v13, %v13724_v27 }
 0xb3d   :  { %v14963_v55 = vadd.f32 %v5881_v46, %v13710_v11 }
 0xb3e   :  { %v6408_v63 = vrot.slane %v14960_v53, %v12485_v20 }
 0xb3f   :  { %v10755_v30 = vpop.f32.mrb[74].mxu1  ;;  %v14967_v52 = vpack.c.bf16 %v14960_v53, %v14963_v55  ;;  %v6359_v34 = vrot.slane %v14963_v55, %v12485_v20  ;;  %v6352_v50 = vcombine.high %v14963_v55, %v14963_v55 }
 0xb40   :  { %v6310_v27 = vadd.f32 %v10755_v30, %v13730_v2  ;;  %v6300_v33 = vpop.f32.mrb[75].mxu1 }
 0xb41   :  { %v6309_v11 = vadd.f32 %v6300_v33, %v13726_v29  ;;  %11099 = vmatprep.subr.bf16.mxu0 %v14967_v52  ;;  %v6375_v36 = vrot.slane %v6359_v34, %v12485_v20  ;;  %v6367_v51 = vcombine.high %v6359_v34, %v6359_v34  ;;  %v6366_v59 = vrot.slane %v6352_v50, %v12485_v20 }
 0xb42   :  { %v14985_v44 = vadd.f32 %v9892_v7, %v6310_v27  ;;  %v6424_v27 = vrot.slane %v6408_v63, %v12485_v20 }
 0xb43   :  { %v14981_v31 = vadd.f32 %v9892_v7, %v6309_v11  ;;  %v6453_v37 = vrot.slane %v6375_v36, %v12492_v23  ;;  %v6389_v40 = vrot.slane %v6367_v51, %v12485_v20  ;;  %v6397_v43 = vcombine.high %v6375_v36, %v6375_v36 }
 0xb44   :  { %v6382_v2 = vrot.slane %v6366_v59, %v12485_v20  ;;  %v6368_v14 = vcombine.high %v6366_v59, %v6366_v59 }
 0xb45   :  { %10764 = vmatprep.mubr.msk.f32.mxu1 %vm32_vm0, %v14981_v31  ;;  %v6531_v29 = vsub.f32 %v6453_v37, %v14960_v53  ;;  %v6530_v47 = vsub.f32 %v6453_v37, %v14963_v55  ;;  %v6457_v22 = vrot.slane %v6389_v40, %v12492_v23  ;;  %v6461_v17 = vrot.slane %v6397_v43, %v12492_v23 }
 0xb46   :  { %10765 = vmatmul.mubr.msk.f32.vlgmr.msra.gmra.mrb[76].mxu1 %vm32_vm0, %v14985_v44  ;;  %v6469_v15 = vrot.slane %v6382_v2, %v12492_v23  ;;  %v6399_v21 = vcombine.high %v6389_v40, %v6389_v40  ;;  %v6396_v56 = vrot.slane %v6368_v14, %v12485_v20  ;;  %v6485_v37 = vrot.slane %v6424_v27, %v12492_v23 }
 0xb47   :  { %v6563_v9 = vmul.f32 %v6531_v29, %v6531_v29  ;;  %v6562_v16 = vmul.f32 %v6530_v47, %v6530_v47  ;;  %v6533_v18 = vsub.f32 %v6457_v22, %v14960_v53  ;;  %v6532_v12 = vsub.f32 %v6457_v22, %v14963_v55  ;;  %11085 = vmatpush3.bf16.msra.mxu1 %v11074_v42 }
 0xb48   :  { %v6535_v3 = vsub.f32 %v6461_v17, %v14960_v53  ;;  %v6534_v10 = vsub.f32 %v6461_v17, %v14963_v55  ;;  %11087 = vmatprep.subr.bf16.mxu1 %v11078_v4  ;;  %v6539_v58 = vsub.f32 %v6469_v15, %v14960_v53  ;;  %v6538_v41 = vsub.f32 %v6469_v15, %v14963_v55 }
 0xb49   :  { %v6597_v48 = vsel %vm393_vm1, %v6563_v9, 0.0  ;;  %v6594_v54 = vsel %vm393_vm1, %v6562_v16, 0.0  ;;  %v6565_v5 = vmul.f32 %v6533_v18, %v6533_v18  ;;  %v6564_v25 = vmul.f32 %v6532_v12, %v6532_v12 }
 0xb4a   :  { %6598 = vadd.xlane.f32.xlu1 %v6597_v48  ;;  %6595 = vadd.xlane.f32.xlu0 %v6594_v54  ;;  %v6567_v45 = vmul.f32 %v6535_v3, %v6535_v3  ;;  %v6566_v38 = vmul.f32 %v6534_v10, %v6534_v10  ;;  %v6465_v1 = vrot.slane %v6399_v21, %v12492_v23 }
 0xb4b   :  { %11089 = vmatpush3.bf16.msra.mxu1 %v11078_v4  ;;  %v6603_v49 = vsel %vm393_vm1, %v6565_v5, 0.0  ;;  %v6600_v42 = vsel %vm393_vm1, %v6564_v25, 0.0  ;;  %v6571_v32 = vmul.f32 %v6539_v58, %v6539_v58  ;;  %v6570_v60 = vmul.f32 %v6538_v41, %v6538_v41 }
 0xb4c   :  { %v6473_v0 = vrot.slane %v6396_v56, %v12492_v23  ;;  %v6398_v4 = vcombine.high %v6382_v2, %v6382_v2  ;;  %v6609_v24 = vsel %vm393_vm1, %v6567_v45, 0.0  ;;  %v6606_v39 = vsel %vm393_vm1, %v6566_v38, 0.0 }
 0xb4d   :  { %v6536_v26 = vsub.f32 %v6465_v1, %v14963_v55  ;;  %v6537_v8 = vsub.f32 %v6465_v1, %v14960_v53  ;;  %v6621_v28 = vsel %vm393_vm1, %v6571_v32, 0.0  ;;  %v6618_v6 = vsel %vm393_vm1, %v6570_v60, 0.0 }
 0xb4e   :  { %6604 = vadd.xlane.f32.xlu1 %v6603_v49  ;;  %6601 = vadd.xlane.f32.xlu0 %v6600_v42  ;;  %v6541_v35 = vsub.f32 %v6473_v0, %v14960_v53  ;;  %v6477_v62 = vrot.slane %v6398_v4, %v12492_v23  ;;  %v6540_v46 = vsub.f32 %v6473_v0, %v14963_v55 }
 0xb4f   :  { %v6568_v57 = vmul.f32 %v6536_v26, %v6536_v26  ;;  %v6569_v13 = vmul.f32 %v6537_v8, %v6537_v8  ;;  %v6400_v30 = vcombine.high %v6396_v56, %v6396_v56  ;;  %v6546_v14 = vsub.f32 %v6485_v37, %v14963_v55 }
 0xb50   :  { %v6573_v34 = vmul.f32 %v6541_v35, %v6541_v35  ;;  %v6543_v50 = vsub.f32 %v6477_v62, %v14960_v53  ;;  %v6542_v7 = vsub.f32 %v6477_v62, %v14963_v55  ;;  %v6572_v36 = vmul.f32 %v6540_v46, %v6540_v46 }
 0xb51   :  { %v6612_v33 = vsel %vm393_vm1, %v6568_v57, 0.0  ;;  %v6615_v11 = vsel %vm393_vm1, %v6569_v13, 0.0  ;;  %v6481_v51 = vrot.slane %v6400_v30, %v12492_v23  ;;  %v6578_v16 = vmul.f32 %v6546_v14, %v6546_v14 }
 0xb52   :  { %6610 = vadd.xlane.f32.xlu1 %v6609_v24  ;;  %6607 = vadd.xlane.f32.xlu0 %v6606_v39  ;;  %v6575_v59 = vmul.f32 %v6543_v50, %v6543_v50  ;;  %v6627_v40 = vsel %vm393_vm1, %v6573_v34, 0.0  ;;  %v6624_v43 = vsel %vm393_vm1, %v6572_v36, 0.0  ;;  %v6574_v2 = vmul.f32 %v6542_v7, %v6542_v7 }
 0xb53   :  { %v6544_v29 = vsub.f32 %v6481_v51, %v14963_v55  ;;  %v6642_v18 = vsel %vm393_vm1, %v6578_v16, 0.0  ;;  %v6416_v10 = vcombine.high %v6408_v63, %v6408_v63  ;;  %v6401_v21 = vcombine.high %v14960_v53, %v14960_v53 }
 0xb54   :  { %v6633_v47 = vsel %vm393_vm1, %v6575_v59, 0.0  ;;  %v6630_v22 = vsel %vm393_vm1, %v6574_v2, 0.0  ;;  %v6446_v54 = vcombine.high %v6424_v27, %v6424_v27  ;;  %v6545_v41 = vsub.f32 %v6481_v51, %v14960_v53 }
 0xb55   :  { %v6576_v17 = vmul.f32 %v6544_v29, %v6544_v29  ;;  %v6438_v15 = vrot.slane %v6416_v10, %v12485_v20  ;;  %v6415_v5 = vrot.slane %v6401_v21, %v12485_v20  ;;  %v6547_v60 = vsub.f32 %v6485_v37, %v14960_v53 }
 0xb56   :  { %6622 = vadd.xlane.f32.xlu0 %v6621_v28  ;;  %6619 = vadd.xlane.f32.xlu1 %v6618_v6  ;;  %v6493_v45 = vrot.slane %v6446_v54, %v12492_v23  ;;  %v6577_v32 = vmul.f32 %v6545_v41, %v6545_v41 }
 0xb57   :  { %v6636_v9 = vsel %vm393_vm1, %v6576_v17, 0.0  ;;  %v6489_v48 = vrot.slane %v6438_v15, %v12492_v23  ;;  %v6448_v58 = vcombine.high %v6438_v15, %v6438_v15  ;;  %v6431_v56 = vrot.slane %v6415_v5, %v12485_v20 }
 0xb58   :  { %v6550_v42 = vsub.f32 %v6493_v45, %v14963_v55  ;;  %v6417_v1 = vcombine.high %v6415_v5, %v6415_v5  ;;  %v6639_v8 = vsel %vm393_vm1, %v6577_v32, 0.0  ;;  %v6579_v63 = vmul.f32 %v6547_v60, %v6547_v60 }
 0xb59   :  { %v6548_v25 = vsub.f32 %v6489_v48, %v14963_v55  ;;  %v6497_v38 = vrot.slane %v6448_v58, %v12492_v23  ;;  %v6501_v0 = vrot.slane %v6431_v56, %v12492_v23  ;;  %v6549_v28 = vsub.f32 %v6489_v48, %v14960_v53 }
 0xb5a   :  { %6613 = vadd.xlane.f32.xlu0 %v6612_v33  ;;  %6616 = vadd.xlane.f32.xlu1 %v6615_v11  ;;  %v6582_v24 = vmul.f32 %v6550_v42, %v6550_v42  ;;  %v6445_v26 = vrot.slane %v6417_v1, %v12485_v20  ;;  %v6447_v13 = vcombine.high %v6431_v56, %v6431_v56  ;;  %v6645_v46 = vsel %vm393_vm1, %v6579_v63, 0.0 }
 0xb5b   :  { %v6580_v49 = vmul.f32 %v6548_v25, %v6548_v25  ;;  %v6552_v39 = vsub.f32 %v6497_v38, %v14963_v55  ;;  %v6554_v6 = vsub.f32 %v6501_v0, %v14963_v55  ;;  %v6581_v30 = vmul.f32 %v6549_v28, %v6549_v28 }
 0xb5c   :  { %v6654_v35 = vsel %vm393_vm1, %v6582_v24, 0.0  ;;  %v6505_v57 = vrot.slane %v6445_v26, %v12492_v23  ;;  %v6551_v50 = vsub.f32 %v6493_v45, %v14960_v53  ;;  %v6509_v33 = vrot.slane %v6447_v13, %v12492_v23  ;;  %v15098_v13 = vld [vmem:[%s16289_s4 + $0x10] ss:$0 sm:$0xff] }
 0xb5d   :  { %v6648_v4 = vsel %vm393_vm1, %v6580_v49, 0.0  ;;  %v6584_v62 = vmul.f32 %v6552_v39, %v6552_v39  ;;  %v6586_v34 = vmul.f32 %v6554_v6, %v6554_v6  ;;  %v6449_v11 = vcombine.high %v6445_v26, %v6445_v26 }
 0xb5e   :  { %6628 = vadd.xlane.f32.xlu1 %v6627_v40  ;;  %6625 = vadd.xlane.f32.xlu0 %v6624_v43  ;;  %v6556_v27 = vsub.f32 %v6505_v57, %v14963_v55  ;;  %v6651_v36 = vsel %vm393_vm1, %v6581_v30, 0.0  ;;  %v6583_v51 = vmul.f32 %v6551_v50, %v6551_v50  ;;  %v6553_v59 = vsub.f32 %v6497_v38, %v14960_v53 }
 0xb5f   :  { %v6660_v7 = vsel %vm393_vm1, %v6584_v62, 0.0  ;;  %v6666_v37 = vsel %vm393_vm1, %v6586_v34, 0.0  ;;  %v6558_v43 = vsub.f32 %v6509_v33, %v14963_v55  ;;  %v6513_v2 = vrot.slane %v6449_v11, %v12492_v23 }
 0xb60   :  { %v6588_v40 = vmul.f32 %v6556_v27, %v6556_v27  ;;  %v6585_v29 = vmul.f32 %v6553_v59, %v6553_v59  ;;  %v6557_v21 = vsub.f32 %v6505_v57, %v14960_v53  ;;  %v6559_v25 = vsub.f32 %v6509_v33, %v14960_v53 }
 0xb61   :  { %v6590_v14 = vmul.f32 %v6558_v43, %v6558_v43  ;;  %v6561_v41 = vsub.f32 %v6513_v2, %v14960_v53 }
 0xb62   :  { %6634 = vadd.xlane.f32.xlu1 %v6633_v47  ;;  %6631 = vadd.xlane.f32.xlu0 %v6630_v22  ;;  %v6555_v47 = vsub.f32 %v6501_v0, %v14960_v53  ;;  %v6657_v22 = vsel %vm393_vm1, %v6583_v51, 0.0  ;;  %v6672_v17 = vsel %vm393_vm1, %v6588_v40, 0.0  ;;  %v6663_v16 = vsel %vm393_vm1, %v6585_v29, 0.0 }
 0xb63   :  { %v6589_v5 = vmul.f32 %v6557_v21, %v6557_v21  ;;  %v6591_v58 = vmul.f32 %v6559_v25, %v6559_v25  ;;  %v6593_v42 = vmul.f32 %v6561_v41, %v6561_v41 }
 0xb64   :  { %v6587_v10 = vmul.f32 %v6555_v47, %v6555_v47 }
 0xb65   :  { %v6675_v45 = vsel %vm393_vm1, %v6589_v5, 0.0  ;;  %v6681_v49 = vsel %vm393_vm1, %v6591_v58, 0.0  ;;  %v6687_v1 = vsel %vm393_vm1, %v6593_v42, 0.0 }
 0xb66   :  { %6637 = vadd.xlane.f32.xlu0 %v6636_v9  ;;  %v6560_v9 = vsub.f32 %v6513_v2, %v14963_v55  ;;  %v6669_v48 = vsel %vm393_vm1, %v6587_v10, 0.0 }
 0xb68   :  { %v6592_v15 = vmul.f32 %v6560_v9, %v6560_v9 }
 0xb6a   :  { %6643 = vadd.xlane.f32.xlu0 %v6642_v18  ;;  %v6678_v18 = vsel %vm393_vm1, %v6590_v14, 0.0  ;;  %v6684_v54 = vsel %vm393_vm1, %v6592_v15, 0.0 }
 0xbd7   :  { %v6596_v56 = vpop.xlane.xlu0 %6595  ;;  %v6599_v32 = vpop.xlane.xlu1 %6598 }
 0xbd8   :  { %v6994_v27 = vmul.f32 %v15098_v13, %v6599_v32  ;;  %v15105_v33 = vmul.f32 %v15098_v13, %v6596_v56 }
 0xbdb   :  { %v6602_v38 = vpop.xlane.xlu0 %6601  ;;  %v6605_v0 = vpop.xlane.xlu1 %6604 }
 0xbdc   :  { %v6996_v11 = vmul.f32 %v15098_v13, %v6605_v0 }
 0xbdf   :  { %v6608_v60 = vpop.xlane.xlu0 %6607  ;;  %v6611_v24 = vpop.xlane.xlu1 %6610 }
 0xbe0   :  { %v6997_v47 = vmul.f32 %v15098_v13, %v6608_v60 }
 0xbe3   :  { %v6620_v26 = vpop.xlane.xlu1 %6619 }
 0xbe4   :  { %v15121_v9 = vmul.f32 %v15098_v13, %v6620_v26 }
 0xbe7   :  { %v6617_v63 = vpop.xlane.xlu1 %6616 }
 0xbeb   :  { %v6629_v57 = vpop.xlane.xlu1 %6628 }
 0xbec   :  { %v15130_v10 = vmul.f32 %v15098_v13, %v6629_v57  ;;  %v15182_v57 = vld [vmem:[%s16289_s4 + $0x11] ss:$0 sm:$0xff] }
 0xbef   :  { %v6635_v40 = vpop.xlane.xlu1 %6634 }
 0xbf0   :  { %v15136_v21 = vmul.f32 %v15098_v13, %v6635_v40 }
 0xc19   :  { %v15036_v12 = vpop.f32.mrb[76].mxu1 }
 0xc1a   :  { %v15038_v3 = vpop.f32.mrb[77].mxu1  ;;  %6953 = vrot.lane.b32.xlu1 %v15036_v12, %s12399_s9  ;;  %v6829_v6 = vrot.slane %v15036_v12, %v12485_v20 }
 0xc1b   :  { %6951 = vrot.lane.b32.xlu0 %v15038_v3, %s12399_s9  ;;  %v6780_v62 = vrot.slane %v15038_v3, %v12485_v20 }
 0xc1c   :  { %v6845_v51 = vrot.slane %v6829_v6, %v12485_v20 }
 0xc1d   :  { %v6788_v34 = vcombine.high %v6780_v62, %v6780_v62  ;;  %v6796_v59 = vrot.slane %v6780_v62, %v12485_v20 }
 0xc1e   :  { %v6867_v5 = vcombine.high %v6845_v51, %v6845_v51  ;;  %v15158_v0 = vrot.slane %v6845_v51, %v12492_v23 }
 0xc1f   :  { %v6810_v2 = vrot.slane %v6788_v34, %v12485_v20  ;;  %v6874_v32 = vrot.slane %v6796_v59, %v12492_v23 }
 0xc20   :  { %v15164_v26 = vrot.slane %v6867_v5, %v12492_v23 }
 0xc21   :  { %v6820_v58 = vcombine.high %v6810_v2, %v6810_v2 }
 0xc3a   :  { %6649 = vadd.xlane.f32.xlu0 %v6648_v4  ;;  %v6623_v4 = vpop.xlane.xlu0 %6622 }
 0xc3e   :  { %6640 = vadd.xlane.f32.xlu1 %v6639_v8  ;;  %6655 = vadd.xlane.f32.xlu0 %v6654_v35  ;;  %v6614_v39 = vpop.xlane.xlu0 %6613  ;;  %v6773_v35 = vcombine.high %v15038_v3, %v15038_v3 }
 0xc40   :  { %v6787_v30 = vrot.slane %v6773_v35, %v12485_v20 }
 0xc42   :  { %6646 = vadd.xlane.f32.xlu1 %v6645_v46  ;;  %6661 = vadd.xlane.f32.xlu0 %v6660_v7  ;;  %v6626_v8 = vpop.xlane.xlu0 %6625  ;;  %v6837_v46 = vcombine.high %v6829_v6, %v6829_v6  ;;  %v6822_v7 = vcombine.high %v15036_v12, %v15036_v12  ;;  %v6789_v43 = vcombine.high %v6787_v30, %v6787_v30 }
 0xc43   :  { %v6803_v14 = vrot.slane %v6787_v30, %v12485_v20  ;;  %v15133_v15 = vmul.f32 %v15098_v13, %v6626_v8 }
 0xc44   :  { %v6859_v29 = vrot.slane %v6837_v46, %v12485_v20 }
 0xc45   :  { %v6819_v42 = vcombine.high %v6803_v14, %v6803_v14 }
 0xc46   :  { %6652 = vadd.xlane.f32.xlu1 %v6651_v36  ;;  %6667 = vadd.xlane.f32.xlu0 %v6666_v37  ;;  %v6632_v28 = vpop.xlane.xlu0 %6631  ;;  %v6995_v36 = vmul.f32 %v15098_v13, %v6602_v38  ;;  %v6998_v37 = vmul.f32 %v15098_v13, %v6611_v24  ;;  %v6869_v41 = vcombine.high %v6859_v29, %v6859_v29 }
 0xc47   :  { %v15139_v25 = vmul.f32 %v15098_v13, %v6632_v28  ;;  %v15155_v60 = vrot.slane %v6859_v29, %v12492_v23  ;;  %v15175_v35 = vrot.slane %v6819_v42, %v12492_v23 }
 0xc48   :  { %v15172_v6 = vrot.slane %v6869_v41, %v12492_v23 }
 0xc4a   :  { %6658 = vadd.xlane.f32.xlu1 %v6657_v22  ;;  %6673 = vadd.xlane.f32.xlu0 %v6672_v17  ;;  %v6638_v50 = vpop.xlane.xlu0 %6637  ;;  %v15116_v22 = vmul.f32 %v15098_v13, %v6623_v4  ;;  %v6836_v17 = vrot.slane %v6822_v7, %v12485_v20  ;;  %v6878_v4 = vrot.slane %v6810_v2, %v12492_v23 }
 0xc4b   :  { %v15145_v56 = vmul.f32 %v15098_v13, %v6638_v50 }
 0xc4c   :  { %v15148_v38 = vrot.slane %v6836_v17, %v12485_v20 }
 0xc4e   :  { %6664 = vadd.xlane.f32.xlu1 %v6663_v16  ;;  %6679 = vadd.xlane.f32.xlu0 %v6678_v18  ;;  %v15124_v16 = vmul.f32 %v15098_v13, %v6614_v39  ;;  %v15127_v18 = vmul.f32 %v15098_v13, %v6617_v63  ;;  %v6890_v39 = vrot.slane %v6803_v14, %v12492_v23 }
 0xc4f   :  { %v6886_v63 = vrot.slane %v6820_v58, %v12492_v23  ;;  %v15186_v46 = vrot.slane %v15148_v38, %v12492_v23  ;;  %v6868_v34 = vcombine.high %v15148_v38, %v15148_v38 }
 0xc52   :  { %6670 = vadd.xlane.f32.xlu1 %v6669_v48  ;;  %6685 = vadd.xlane.f32.xlu0 %v6684_v54  ;;  %v6644_v48 = vpop.xlane.xlu0 %6643  ;;  %v6818_v54 = vcombine.high %v6796_v59, %v6796_v59 }
 0xc54   :  { %v6882_v24 = vrot.slane %v6818_v54, %v12492_v23 }
 0xc56   :  { %6676 = vadd.xlane.f32.xlu1 %v6675_v45  ;;  %v15142_v45 = vrot.slane %v6789_v43, %v12485_v20 }
 0xc58   :  { %v6821_v8 = vcombine.high %v15142_v45, %v15142_v45  ;;  %v6894_v28 = vrot.slane %v15142_v45, %v12492_v23 }
 0xc5a   :  { %6682 = vadd.xlane.f32.xlu1 %v6681_v49  ;;  %v6838_v49 = vcombine.high %v6836_v17, %v6836_v17 }
 0xc5c   :  { %v15189_v30 = vrot.slane %v6838_v49, %v12485_v20 }
 0xc5e   :  { %6688 = vadd.xlane.f32.xlu1 %v6687_v1  ;;  %v15151_v1 = vmul.f32 %v15098_v13, %v6644_v48 }
 0xc8c   :  { %v15177_v62 = vpop.permute.xlu1 %6953 }
 0xc8d   :  { %v15193_v50 = vpop.permute.xlu0 %6951  ;;  %v7867_v7 = vadd.f32 %v15036_v12, %v15177_v62  ;;  %v6958_v51 = vadd.f32 %v15177_v62, %v6874_v32  ;;  %v6960_v59 = vadd.f32 %v15177_v62, %v6878_v4  ;;  %v6962_v40 = vadd.f32 %v15177_v62, %v6882_v24 }
 0xc8e   :  { %v7866_v43 = vadd.f32 %v15193_v50, %v15038_v3  ;;  %v6957_v20 = vadd.f32 %v15193_v50, %v6874_v32  ;;  %v6959_v2 = vadd.f32 %v15193_v50, %v6878_v4  ;;  %v6961_v29 = vadd.f32 %v15193_v50, %v6882_v24 }
 0xc8f   :  { %v15206_v17 = vadd.f32 %v15182_v57, %v7867_v7  ;;  %v7026_v14 = vadd.f32 %v6994_v27, %v6958_v51  ;;  %v7028_v12 = vadd.f32 %v6996_v11, %v6960_v59  ;;  %v7030_v48 = vadd.f32 %v6998_v37, %v6962_v40 }
 0xc90   :  { %v15209_v54 = vadd.f32 %v15182_v57, %v7866_v43  ;;  %v7025_v5 = vadd.f32 %v15105_v33, %v6957_v20  ;;  %v7027_v58 = vadd.f32 %v6995_v36, %v6959_v2  ;;  %v7029_v41 = vadd.f32 %v6997_v47, %v6961_v29 }
 0xc91   :  { %v9995_v3 = vmul.f32 -1.442695, %v15206_v17  ;;  %v15214_v49 = vadd.f32 %v15182_v57, %v7026_v14  ;;  %v15217_v42 = vadd.f32 %v15182_v57, %v7028_v12  ;;  %v15220_v32 = vadd.f32 %v15182_v57, %v7030_v48 }
 0xc92   :  { %v9994_v27 = vmul.f32 -1.442695, %v15209_v54  ;;  %v15224_v11 = vadd.f32 %v15182_v57, %v7025_v5  ;;  %v15227_v33 = vadd.f32 %v15182_v57, %v7027_v58  ;;  %v15230_v36 = vadd.f32 %v15182_v57, %v7029_v41 }
 0xc93   :  { %11964 = vpow2.f32 %v9995_v3  ;;  %v9898_v37 = vmul.f32 -1.442695, %v15214_v49  ;;  %v9900_v47 = vmul.f32 -1.442695, %v15217_v42  ;;  %v9902_v4 = vmul.f32 -1.442695, %v15220_v32 }
 0xc94   :  { %11966 = vpow2.f32 %v9994_v27  ;;  %v9897_v24 = vmul.f32 -1.442695, %v15224_v11  ;;  %v9899_v7 = vmul.f32 -1.442695, %v15227_v33  ;;  %v9901_v51 = vmul.f32 -1.442695, %v15230_v36 }
 0xc95   :  { %11968 = vpow2.f32 %v9898_v37  ;;  %v6963_v59 = vadd.f32 %v15193_v50, %v6886_v63  ;;  %v6964_v40 = vadd.f32 %v15177_v62, %v6886_v63  ;;  %v6965_v43 = vadd.f32 %v15193_v50, %v6890_v39 }
 0xc96   :  { %11970 = vpow2.f32 %v9897_v24  ;;  %v6966_v20 = vadd.f32 %v15177_v62, %v6890_v39  ;;  %v6967_v2 = vadd.f32 %v15193_v50, %v6894_v28  ;;  %v6968_v29 = vadd.f32 %v15177_v62, %v6894_v28 }
 0xc97   :  { %11972 = vpow2.f32 %v9899_v7  ;;  %v7031_v14 = vadd.f32 %v15124_v16, %v6963_v59  ;;  %v7032_v12 = vadd.f32 %v15127_v18, %v6964_v40  ;;  %v7033_v48 = vadd.f32 %v15121_v9, %v6965_v43 }
 0xc98   :  { %11974 = vpow2.f32 %v9900_v47  ;;  %v7034_v5 = vadd.f32 %v15116_v22, %v6966_v20  ;;  %v7035_v63 = vadd.f32 %v15133_v15, %v6967_v2  ;;  %v6870_v58 = vcombine.high %v15189_v30, %v15189_v30 }
 0xc99   :  { %11976 = vpow2.f32 %v9901_v51  ;;  %v15252_v39 = vadd.f32 %v15182_v57, %v7031_v14  ;;  %v15255_v28 = vadd.f32 %v15182_v57, %v7032_v12  ;;  %v15258_v16 = vadd.f32 %v15182_v57, %v7033_v48 }
 0xc9a   :  { %11978 = vpow2.f32 %v9902_v4  ;;  %v7036_v9 = vadd.f32 %v15130_v10, %v6968_v29  ;;  %v15265_v22 = vrot.slane %v6821_v8, %v12492_v23  ;;  %v15269_v18 = vrot.slane %v15189_v30, %v12492_v23 }
 0xc9b   :  { %v9903_v15 = vmul.f32 -1.442695, %v15252_v39  ;;  %v9904_v41 = vmul.f32 -1.442695, %v15255_v28  ;;  %v9905_v3 = vmul.f32 -1.442695, %v15258_v16  ;;  %v6969_v27 = vadd.f32 %v15193_v50, %v15175_v35 }
 0xc9c   :  { %v15277_v10 = vadd.f32 %v15182_v57, %v7034_v5  ;;  %v15281_v45 = vadd.f32 %v15193_v50, %v15155_v60  ;;  %v6930_v8 = vrot.slane %v6868_v34, %v12492_v23  ;;  %v15288_v30 = vrot.slane %v6870_v58, %v12492_v23 }
 0xc9d   :  { %v11965_v37 = vpop.eup %11964  ;;  %11980 = vpow2.f32 %v9903_v15  ;;  %v15291_v47 = vadd.f32 %v15182_v57, %v7035_v63  ;;  %v6970_v4 = vadd.f32 %v15177_v62, %v15175_v35  ;;  %v6971_v24 = vadd.f32 %v15193_v50, %v15265_v22 }
 0xc9e   :  { %v11967_v7 = vpop.eup %11966  ;;  %v7877_v51 = vadd.f32 1.0, %v11965_v37  ;;  %11982 = vpow2.f32 %v9904_v41  ;;  %v7037_v38 = vadd.f32 %v15139_v25, %v6969_v27  ;;  %v15300_v23 = vadd.f32 %v15193_v50, %v15164_v26 }
 0xc9f   :  { %v11969_v34 = vpop.eup %11968  ;;  %v7876_v59 = vadd.f32 1.0, %v11967_v7  ;;  %11984 = vpow2.f32 %v9905_v3  ;;  %v15303_v40 = vadd.f32 %v15182_v57, %v7036_v9  ;;  %v7038_v35 = vadd.f32 %v15136_v21, %v6970_v4 }
 0xca0   :  { %v11971_v43 = vpop.eup %11970  ;;  %11986 = vrcp.f32 %v7877_v51  ;;  %v7190_v20 = vadd.f32 1.0, %v11969_v34  ;;  %v7039_v2 = vadd.f32 %v15145_v56, %v6971_v24  ;;  %v15309_v25 = vadd.f32 %v15177_v62, %v15158_v0 }
 0xca1   :  { %v11973_v29 = vpop.eup %11972  ;;  %11988 = vrcp.f32 %v7876_v59  ;;  %v7189_v14 = vadd.f32 1.0, %v11971_v43  ;;  %v9906_v12 = vmul.f32 -1.442695, %v15277_v10  ;;  %v9907_v48 = vmul.f32 -1.442695, %v15291_v47 }
 0xca2   :  { %v11975_v5 = vpop.eup %11974  ;;  %11990 = vrcp.f32 %v7190_v20  ;;  %v7191_v63 = vadd.f32 1.0, %v11973_v29  ;;  %v15314_v21 = vadd.f32 %v15182_v57, %v7037_v38  ;;  %v6973_v56 = vadd.f32 %v15193_v50, %v15158_v0 }
 0xca3   :  { %v11977_v58 = vpop.eup %11976  ;;  %11992 = vrcp.f32 %v7189_v14  ;;  %v7192_v9 = vadd.f32 1.0, %v11975_v5  ;;  %v15319_v15 = vadd.f32 %v15182_v57, %v7038_v35  ;;  %v15323_v41 = vadd.f32 %v15193_v50, %v15172_v6 }
 0xca4   :  { %v11979_v3 = vpop.eup %11978  ;;  %11994 = vrcp.f32 %v7191_v63  ;;  %v7193_v27 = vadd.f32 1.0, %v11977_v58  ;;  %v15326_v37 = vadd.f32 %v15182_v57, %v7039_v2  ;;  %v15329_v4 = vadd.f32 %v15151_v1, %v6973_v56 }
 0xca5   :  { %11996 = vrcp.f32 %v7192_v9  ;;  %v7194_v0 = vadd.f32 1.0, %v11979_v3  ;;  %v15333_v24 = vadd.f32 %v15177_v62, %v15155_v60  ;;  %v15337_v7 = vadd.f32 %v15193_v50, %v15186_v46 }
 0xca6   :  { %11998 = vrcp.f32 %v7193_v27  ;;  %v15341_v51 = vadd.f32 %v15177_v62, %v15164_v26  ;;  %v15345_v38 = vadd.f32 %v15193_v50, %v15269_v18  ;;  %v15349_v1 = vadd.f32 %v15177_v62, %v15172_v6 }
 0xca7   :  { %v11981_v34 = vpop.eup %11980  ;;  %12000 = vrcp.f32 %v7194_v0  ;;  %v15352_v60 = vadd.f32 %v15193_v50, %v6930_v8  ;;  %v15356_v59 = vadd.f32 %v15177_v62, %v15186_v46  ;;  %v15360_v26 = vadd.f32 %v15193_v50, %v15288_v30 }
 0xca8   :  { %v11983_v35 = vpop.eup %11982  ;;  %v7195_v43 = vadd.f32 1.0, %v11981_v34  ;;  %12002 = vpow2.f32 %v9906_v12  ;;  %v15364_v6 = vadd.f32 %v15177_v62, %v15269_v18  ;;  %v15367_v20 = vadd.f32 %v15177_v62, %v6930_v8 }
 0xca9   :  { %v11985_v2 = vpop.eup %11984  ;;  %v7196_v29 = vadd.f32 1.0, %v11983_v35  ;;  %12004 = vpow2.f32 %v9907_v48  ;;  %v9908_v46 = vmul.f32 -1.442695, %v15303_v40  ;;  %v15372_v14 = vadd.f32 %v15177_v62, %v15288_v30 }
 0xcaa   :  { %v11987_v50 = vpop.eup %11986  ;;  %12006 = vrcp.f32 %v7195_v43  ;;  %v7197_v5 = vadd.f32 1.0, %v11985_v2  ;;  %v9909_v12 = vmul.f32 -1.442695, %v15314_v21  ;;  %v9910_v18 = vmul.f32 -1.442695, %v15319_v15 }
 0xcab   :  { %v11989_v63 = vpop.eup %11988  ;;  %12008 = vrcp.f32 %v7196_v29  ;;  %v9911_v48 = vmul.f32 -1.442695, %v15326_v37  ;;  %v7883_v9 = vmul.f32 %v11987_v50, %v15206_v17 }
 0xcac   :  { %v11991_v8 = vpop.eup %11990  ;;  %v7882_v56 = vmul.f32 %v11989_v63, %v15209_v54  ;;  %12010 = vrcp.f32 %v7197_v5 }
 0xcad   :  { %v11993_v58 = vpop.eup %11992  ;;  %12012 = vpow2.f32 %v9908_v46  ;;  %v7286_v0 = vmul.f32 %v11991_v8, %v15214_v49 }
 0xcae   :  { %v11995_v30 = vpop.eup %11994  ;;  %10831 = vmatprep.mubr.msk.f32.mxu1 %vm32_vm0, %v7882_v56  ;;  %v7285_v3 = vmul.f32 %v11993_v58, %v15224_v11  ;;  %12014 = vpow2.f32 %v9909_v12 }
 0xcaf   :  { %v11997_v27 = vpop.eup %11996  ;;  %10832 = vmatmul.mubr.msk.f32.vlgmr.msra.gmra.mrb[78].mxu1 %vm32_vm0, %v7883_v9  ;;  %12016 = vpow2.f32 %v9910_v18  ;;  %v7287_v34 = vmul.f32 %v11995_v30, %v15227_v33 }
 0xcb0   :  { %v11999_v54 = vpop.eup %11998  ;;  %10775 = vmatprep.mubr.msk.f32.mxu0 %vm32_vm0, %v7285_v3  ;;  %12018 = vpow2.f32 %v9911_v48  ;;  %v7288_v43 = vmul.f32 %v11997_v27, %v15217_v42 }
 0xcb1   :  { %v12001_v17 = vpop.eup %12000  ;;  %10776 = vmatmul.mubr.msk.f32.vlgmr.msra.gmra.mrb[74].mxu0 %vm32_vm0, %v7286_v0  ;;  %v7289_v29 = vmul.f32 %v11999_v54, %v15230_v36 }
 0xcb2   :  { %v12003_v35 = vpop.eup %12002  ;;  %11101 = vmatpush3.bf16.msra.mxu0 %v14967_v52  ;;  %10778 = vmatprep.mubr.msk.f32.mxu0 %vm32_vm0, %v7287_v34  ;;  %v7290_v52 = vmul.f32 %v12001_v17, %v15220_v32  ;;  %v15408_v34 = vadd.f32 %v15182_v57, %v15329_v4 }
 0xcb3   :  { %v12005_v11 = vpop.eup %12004  ;;  %v7198_v2 = vadd.f32 1.0, %v12003_v35 }
 0xcb4   :  { %v12007_v49 = vpop.eup %12006  ;;  %v7199_v46 = vadd.f32 1.0, %v12005_v11 }
 0xcb5   :  { %v12009_v50 = vpop.eup %12008  ;;  %10779 = vmatmul.mubr.msk.f32.gmra.mrb[76].mxu0 %vm32_vm0, %v7288_v43  ;;  %12020 = vrcp.f32 %v7198_v2  ;;  %v7291_v63 = vmul.f32 %v12007_v49, %v15252_v39  ;;  %v6972_v49 = vadd.f32 %v15177_v62, %v15265_v22 }
 0xcb6   :  { %v12011_v33 = vpop.eup %12010  ;;  %10781 = vmatprep.mubr.msk.f32.mxu0 %vm32_vm0, %v7289_v29  ;;  %12022 = vrcp.f32 %v7199_v46  ;;  %v7292_v48 = vmul.f32 %v12009_v50, %v15255_v28 }
 0xcb7   :  { %v12013_v5 = vpop.eup %12012  ;;  %v7293_v9 = vmul.f32 %v12011_v33, %v15258_v16 }
 0xcb8   :  { %v12015_v12 = vpop.eup %12014  ;;  %v7200_v42 = vadd.f32 1.0, %v12013_v5 }
 0xcb9   :  { %v12017_v18 = vpop.eup %12016  ;;  %10782 = vmatmul.mubr.msk.f32.gmra.mrb[78].mxu0 %vm32_vm0, %v7290_v52  ;;  %v7201_v36 = vadd.f32 1.0, %v12015_v12 }
 0xcba   :  { %v12019_v8 = vpop.eup %12018  ;;  %10784 = vmatprep.mubr.msk.f32.mxu0 %vm32_vm0, %v7291_v63  ;;  %12024 = vrcp.f32 %v7200_v42  ;;  %v7202_v56 = vadd.f32 1.0, %v12017_v18 }
 0xcbb   :  { %12026 = vrcp.f32 %v7201_v36  ;;  %v7203_v58 = vadd.f32 1.0, %v12019_v8 }
 0xcbc   :  { %12028 = vrcp.f32 %v7202_v56 }
 0xcbd   :  { %10785 = vmatmul.mubr.msk.f32.gmra.mrb[80].mxu0 %vm32_vm0, %v7292_v48  ;;  %12030 = vrcp.f32 %v7203_v58 }
 0xcbe   :  { %10787 = vmatprep.mubr.msk.f32.mxu0 %vm32_vm0, %v7293_v9 }
 0xcbf   :  { %v12021_v32 = vpop.eup %12020 }
 0xcc0   :  { %v12023_v39 = vpop.eup %12022  ;;  %v7294_v30 = vmul.f32 %v12021_v32, %v15277_v10 }
 0xcc1   :  { %v7295_v3 = vmul.f32 %v12023_v39, %v15291_v47 }
 0xcc2   :  { %10788 = vmatmul.mubr.msk.f32.gmra.mrb[82].mxu0 %vm32_vm0, %v7294_v30 }
 0xcc3   :  { %10790 = vmatprep.mubr.msk.f32.mxu0 %vm32_vm0, %v7295_v3 }
 0xcc4   :  { %v12025_v28 = vpop.eup %12024 }
 0xcc5   :  { %v12027_v27 = vpop.eup %12026  ;;  %v7296_v16 = vmul.f32 %v12025_v28, %v15303_v40 }
 0xcc6   :  { %v12029_v0 = vpop.eup %12028  ;;  %v7297_v54 = vmul.f32 %v12027_v27, %v15314_v21  ;;  %v9913_v21 = vmul.f32 -1.442695, %v15408_v34 }
 0xcc7   :  { %v12031_v17 = vpop.eup %12030  ;;  %10791 = vmatmul.mubr.msk.f32.gmra.mrb[84].mxu0 %vm32_vm0, %v7296_v16  ;;  %v6650_v10 = vpop.xlane.xlu0 %6649  ;;  %v7298_v35 = vmul.f32 %v12029_v0, %v15319_v15 }
 0xcc8   :  { %10793 = vmatprep.mubr.msk.f32.mxu0 %vm32_vm0, %v7297_v54  ;;  %v7011_v47 = vmul.f32 %v15098_v13, %v6650_v10  ;;  %v7299_v40 = vmul.f32 %v12031_v17, %v15326_v37  ;;  %12032 = vpow2.f32 %v9913_v21 }
 0xcca   :  { %v7043_v11 = vadd.f32 %v7011_v47, %v15281_v45 }
 0xccb   :  { %10794 = vmatmul.mubr.msk.f32.gmra.mrb[86].mxu0 %vm32_vm0, %v7298_v35  ;;  %v6641_v4 = vpop.xlane.xlu1 %6640  ;;  %v6656_v43 = vpop.xlane.xlu0 %6655 }
 0xccc   :  { %v15419_v2 = vadd.f32 %v15182_v57, %v7043_v11  ;;  %10796 = vmatprep.mubr.msk.f32.mxu0 %vm32_vm0, %v7299_v40  ;;  %v7008_v15 = vmul.f32 %v15098_v13, %v6641_v4  ;;  %v7013_v45 = vmul.f32 %v15098_v13, %v6656_v43 }
 0xcce   :  { %v9915_v37 = vmul.f32 -1.442695, %v15419_v2  ;;  %v7040_v29 = vadd.f32 %v7008_v15, %v6972_v49  ;;  %v7045_v46 = vadd.f32 %v7013_v45, %v15300_v23 }
 0xccf   :  { %v6647_v50 = vpop.xlane.xlu1 %6646  ;;  %v6662_v33 = vpop.xlane.xlu0 %6661 }
 0xcd0   :  { %12034 = vpow2.f32 %v9915_v37  ;;  %v15429_v5 = vadd.f32 %v15182_v57, %v7040_v29  ;;  %v15432_v52 = vadd.f32 %v15182_v57, %v7045_v46  ;;  %v7010_v62 = vmul.f32 %v15098_v13, %v6647_v50 }
 0xcd1   :  { %v7015_v22 = vmul.f32 %v15098_v13, %v6662_v33 }
 0xcd2   :  { %v9912_v12 = vmul.f32 -1.442695, %v15429_v5  ;;  %v9917_v63 = vmul.f32 -1.442695, %v15432_v52  ;;  %v7042_v23 = vadd.f32 %v7010_v62, %v15309_v25  ;;  %v12033_v3 = vpop.eup %12032 }
 0xcd3   :  { %v7047_v42 = vadd.f32 %v7015_v22, %v15323_v41  ;;  %v6653_v18 = vpop.xlane.xlu1 %6652  ;;  %v6668_v36 = vpop.xlane.xlu0 %6667  ;;  %v7205_v11 = vadd.f32 1.0, %v12033_v3 }
 0xcd4   :  { %12036 = vpow2.f32 %v9912_v12  ;;  %v15441_v8 = vadd.f32 %v15182_v57, %v7042_v23  ;;  %v7012_v56 = vmul.f32 %v15098_v13, %v6653_v18  ;;  %v7017_v48 = vmul.f32 %v15098_v13, %v6668_v36 }
 0xcd5   :  { %12038 = vpow2.f32 %v9917_v63  ;;  %v15446_v58 = vadd.f32 %v15182_v57, %v7047_v42 }
 0xcd6   :  { %v9914_v9 = vmul.f32 -1.442695, %v15441_v8  ;;  %v7044_v25 = vadd.f32 %v7012_v56, %v15333_v24  ;;  %v7049_v41 = vadd.f32 %v7017_v48, %v15337_v7 }
 0xcd7   :  { %v9919_v32 = vmul.f32 -1.442695, %v15446_v58  ;;  %v6659_v39 = vpop.xlane.xlu1 %6658  ;;  %v6674_v30 = vpop.xlane.xlu0 %6673 }
 0xcd8   :  { %12040 = vpow2.f32 %v9914_v9  ;;  %v15453_v28 = vadd.f32 %v15182_v57, %v7044_v25  ;;  %v15456_v27 = vadd.f32 %v15182_v57, %v7049_v41  ;;  %v7014_v16 = vmul.f32 %v15098_v13, %v6659_v39 }
 0xcd9   :  { %v7019_v0 = vmul.f32 %v15098_v13, %v6674_v30  ;;  %12042 = vpow2.f32 %v9919_v32 }
 0xcda   :  { %v12035_v54 = vpop.eup %12034  ;;  %v9916_v24 = vmul.f32 -1.442695, %v15453_v28  ;;  %v9921_v7 = vmul.f32 -1.442695, %v15456_v27  ;;  %v7046_v17 = vadd.f32 %v7014_v16, %v15341_v51 }
 0xcdb   :  { %v7051_v10 = vadd.f32 %v7019_v0, %v15345_v38  ;;  %v6665_v47 = vpop.xlane.xlu1 %6664  ;;  %v6680_v35 = vpop.xlane.xlu0 %6679  ;;  %v7207_v43 = vadd.f32 1.0, %v12035_v54 }
 0xcdc   :  { %12044 = vpow2.f32 %v9916_v24  ;;  %v15465_v40 = vadd.f32 %v15182_v57, %v7046_v17  ;;  %v7016_v21 = vmul.f32 %v15098_v13, %v6665_v47  ;;  %v7021_v4 = vmul.f32 %v15098_v13, %v6680_v35 }
 0xcdd   :  { %v15470_v49 = vadd.f32 %v15182_v57, %v7051_v10  ;;  %12046 = vpow2.f32 %v9921_v7 }
 0xcde   :  { %v12037_v15 = vpop.eup %12036  ;;  %v9918_v51 = vmul.f32 -1.442695, %v15465_v40  ;;  %v7048_v38 = vadd.f32 %v7016_v21, %v15349_v1  ;;  %v7053_v45 = vadd.f32 %v7021_v4, %v15352_v60  ;;  %12048 = vrcp.f32 %v7205_v11 }
 0xcdf   :  { %v12039_v37 = vpop.eup %12038  ;;  %v7204_v29 = vadd.f32 1.0, %v12037_v15  ;;  %v9923_v46 = vmul.f32 -1.442695, %v15470_v49  ;;  %v6671_v50 = vpop.xlane.xlu1 %6670 }
 0xce0   :  { %v6686_v33 = vpop.xlane.xlu0 %6685  ;;  %12050 = vpow2.f32 %v9918_v51  ;;  %v15477_v62 = vadd.f32 %v15182_v57, %v7048_v38  ;;  %v15480_v22 = vadd.f32 %v15182_v57, %v7053_v45  ;;  %v7018_v12 = vmul.f32 %v15098_v13, %v6671_v50 }
 0xce1   :  { %12052 = vrcp.f32 %v7204_v29  ;;  %v7023_v1 = vmul.f32 %v15098_v13, %v6686_v33  ;;  %v7209_v63 = vadd.f32 1.0, %v12039_v37 }
 0xce2   :  { %v12041_v60 = vpop.eup %12040  ;;  %12054 = vrcp.f32 %v7207_v43  ;;  %v9920_v23 = vmul.f32 -1.442695, %v15477_v62  ;;  %v7050_v18 = vadd.f32 %v7018_v12, %v15356_v59  ;;  %v9925_v9 = vmul.f32 -1.442695, %v15480_v22 }
 0xce3   :  { %v7206_v42 = vadd.f32 1.0, %v12041_v60  ;;  %12056 = vpow2.f32 %v9923_v46  ;;  %v7055_v36 = vadd.f32 %v7023_v1, %v15360_v26  ;;  %v6677_v56 = vpop.xlane.xlu1 %6676  ;;  %v12043_v48 = vpop.eup %12042 }
 0xce4   :  { %12058 = vpow2.f32 %v9920_v23  ;;  %v7020_v25 = vmul.f32 %v15098_v13, %v6677_v56  ;;  %v15490_v41 = vadd.f32 %v15182_v57, %v7050_v18  ;;  %v7211_v59 = vadd.f32 1.0, %v12043_v48 }
 0xce5   :  { %12060 = vrcp.f32 %v7206_v42  ;;  %v15493_v32 = vadd.f32 %v15182_v57, %v7055_v36 }
 0xce6   :  { %v12045_v39 = vpop.eup %12044  ;;  %v7052_v30 = vadd.f32 %v7020_v25, %v15364_v6  ;;  %12062 = vrcp.f32 %v7209_v63  ;;  %v9922_v3 = vmul.f32 -1.442695, %v15490_v41 }
 0xce7   :  { %v7208_v26 = vadd.f32 1.0, %v12045_v39  ;;  %v6683_v16 = vpop.xlane.xlu1 %6682  ;;  %v12047_v0 = vpop.eup %12046  ;;  %12064 = vpow2.f32 %v9925_v9  ;;  %v9927_v54 = vmul.f32 -1.442695, %v15493_v32 }
 0xce8   :  { %v15499_v24 = vadd.f32 %v15182_v57, %v7052_v30  ;;  %v7022_v7 = vmul.f32 %v15098_v13, %v6683_v16  ;;  %v12049_v17 = vpop.eup %12048  ;;  %v7213_v11 = vadd.f32 1.0, %v12047_v0 }
 0xce9   :  { %12066 = vrcp.f32 %v7208_v26  ;;  %v7301_v37 = vmul.f32 %v12049_v17, %v15408_v34 }
 0xcea   :  { %v12051_v10 = vpop.eup %12050  ;;  %12068 = vpow2.f32 %v9922_v3  ;;  %v9924_v6 = vmul.f32 -1.442695, %v15499_v24  ;;  %v7054_v47 = vadd.f32 %v7022_v7, %v15367_v20 }
 0xceb   :  { %v12053_v35 = vpop.eup %12052  ;;  %12070 = vrcp.f32 %v7211_v59  ;;  %v7210_v21 = vadd.f32 1.0, %v12051_v10  ;;  %v6689_v4 = vpop.xlane.xlu1 %6688 }
 0xcec   :  { %v12055_v43 = vpop.eup %12054  ;;  %v7300_v15 = vmul.f32 %v12053_v35, %v15429_v5  ;;  %12072 = vpow2.f32 %v9927_v54  ;;  %v15506_v51 = vadd.f32 %v15182_v57, %v7054_v47  ;;  %v7024_v38 = vmul.f32 %v15098_v13, %v6689_v4 }
 0xced   :  { %v12057_v45 = vpop.eup %12056  ;;  %12074 = vrcp.f32 %v7210_v21  ;;  %v7303_v34 = vmul.f32 %v12055_v43, %v15419_v2  ;;  %v6324_v43 = vld [vmem:[%s16287_s2 + $0x198] sm:$0xff] }
 0xcee   :  { %v12059_v29 = vpop.eup %12058  ;;  %12076 = vpow2.f32 %v9924_v6  ;;  %v9926_v20 = vmul.f32 -1.442695, %v15506_v51  ;;  %v7056_v46 = vadd.f32 %v7024_v38, %v15372_v14  ;;  %10797 = vmatmul.mubr.msk.f32.gmra.mrb[88].mxu0 %vm32_vm0, %v7300_v15  ;;  %v7215_v60 = vadd.f32 1.0, %v12057_v45  ;;  %v15565_v45 = vld [vmem:[%s16289_s4 + $0x12] ss:$0 sm:$0xff] }
 0xcef   :  { %v12061_v50 = vpop.eup %12060  ;;  %v7212_v5 = vadd.f32 1.0, %v12059_v29  ;;  %10799 = vmatprep.mubr.msk.f32.mxu0 %vm32_vm0, %v7301_v37  ;;  %12078 = vrcp.f32 %v7213_v11 }
 0xcf0   :  { %v7302_v33 = vmul.f32 %v12061_v50, %v15441_v8  ;;  %v15516_v13 = vadd.f32 %v15182_v57, %v7056_v46  ;;  %v12063_v12 = vpop.eup %12062 }
 0xcf1   :  { %12080 = vrcp.f32 %v7212_v5  ;;  %v12065_v1 = vpop.eup %12064  ;;  %v7305_v57 = vmul.f32 %v12063_v12, %v15432_v52 }
 0xcf2   :  { %12082 = vpow2.f32 %v9926_v20  ;;  %v9928_v14 = vmul.f32 -1.442695, %v15516_v13  ;;  %10800 = vmatmul.mubr.msk.f32.gmra.mrb[90].mxu0 %vm32_vm0, %v7302_v33  ;;  %v7217_v36 = vadd.f32 1.0, %v12065_v1 }
 0xcf3   :  { %v12067_v63 = vpop.eup %12066  ;;  %10802 = vmatprep.mubr.msk.f32.mxu0 %vm32_vm0, %v7303_v34 }
 0xcf4   :  { %v12069_v23 = vpop.eup %12068  ;;  %v7304_v8 = vmul.f32 %v12067_v63, %v15453_v28  ;;  %12084 = vpow2.f32 %v9928_v14 }
 0xcf5   :  { %v12071_v42 = vpop.eup %12070  ;;  %v7214_v18 = vadd.f32 1.0, %v12069_v23  ;;  %12086 = vrcp.f32 %v7215_v60 }
 0xcf6   :  { %v12073_v2 = vpop.eup %12072  ;;  %10803 = vmatmul.mubr.msk.f32.gmra.mrb[92].mxu0 %vm32_vm0, %v7304_v8  ;;  %v7307_v25 = vmul.f32 %v12071_v42, %v15446_v58 }
 0xcf7   :  { %v12075_v56 = vpop.eup %12074  ;;  %12088 = vrcp.f32 %v7214_v18  ;;  %10805 = vmatprep.mubr.msk.f32.mxu0 %vm32_vm0, %v7305_v57  ;;  %v7219_v52 = vadd.f32 1.0, %v12073_v2 }
 0xcf8   :  { %v12077_v48 = vpop.eup %12076  ;;  %v7306_v9 = vmul.f32 %v12075_v56, %v15465_v40  ;;  %12090 = vrcp.f32 %v7217_v36 }
 0xcf9   :  { %v7216_v28 = vadd.f32 1.0, %v12077_v48  ;;  %v12079_v39 = vpop.eup %12078 }
 0xcfa   :  { %10806 = vmatmul.mubr.msk.f32.gmra.mrb[94].mxu0 %vm32_vm0, %v7306_v9  ;;  %v7309_v3 = vmul.f32 %v12079_v39, %v15456_v27 }
 0xcfb   :  { %v12081_v30 = vpop.eup %12080  ;;  %12092 = vrcp.f32 %v7216_v28  ;;  %10808 = vmatprep.mubr.msk.f32.mxu0 %vm32_vm0, %v7307_v25 }
 0xcfc   :  { %v12083_v59 = vpop.eup %12082  ;;  %v7308_v26 = vmul.f32 %v12081_v30, %v15477_v62  ;;  %12094 = vrcp.f32 %v7219_v52 }
 0xcfd   :  { %v7218_v16 = vadd.f32 1.0, %v12083_v59 }
 0xcfe   :  { %10809 = vmatmul.mubr.msk.f32.gmra.mrb[96].mxu0 %vm32_vm0, %v7308_v26  ;;  %v12085_v58 = vpop.eup %12084 }
 0xcff   :  { %12096 = vrcp.f32 %v7218_v16  ;;  %10811 = vmatprep.mubr.msk.f32.mxu0 %vm32_vm0, %v7309_v3  ;;  %v12087_v40 = vpop.eup %12086  ;;  %v7220_v0 = vadd.f32 1.0, %v12085_v58 }
 0xd00   :  { %v7311_v17 = vmul.f32 %v12087_v40, %v15470_v49 }
 0xd01   :  { %v12089_v54 = vpop.eup %12088  ;;  %12098 = vrcp.f32 %v7220_v0 }
 0xd02   :  { %v7310_v7 = vmul.f32 %v12089_v54, %v15490_v41  ;;  %v12091_v10 = vpop.eup %12090 }
 0xd03   :  { %v7313_v6 = vmul.f32 %v12091_v10, %v15480_v22  ;;  %v6321_v22 = vld [vmem:[%s16287_s2 + $0x180] sm:$0xff] }
 0xd04   :  { %10812 = vmatmul.mubr.msk.f32.gmra.mrb[98].mxu0 %vm32_vm0, %v7310_v7 }
 0xd05   :  { %v12093_v27 = vpop.eup %12092  ;;  %10814 = vmatprep.mubr.msk.f32.mxu0 %vm32_vm0, %v7311_v17 }
 0xd06   :  { %v7312_v62 = vmul.f32 %v12093_v27, %v15499_v24  ;;  %v12095_v47 = vpop.eup %12094  ;;  %v6322_v24 = vld [vmem:[%s16287_s2 + $0x188] sm:$0xff] }
 0xd07   :  { %v7315_v49 = vmul.f32 %v12095_v47, %v15493_v32  ;;  %v11090_v4 = vpack.c.bf16 %v6322_v24, %v6321_v22  ;;  %v6323_v32 = vld [vmem:[%s16287_s2 + $0x190] sm:$0xff]  ;;  %v6326_v47 = vld [vmem:[%s16287_s2 + $0x1a8] sm:$0xff] }
 0xd08   :  { %10815 = vmatmul.mubr.msk.f32.gmra.mrb[100].mxu0 %vm32_vm0, %v7312_v62  ;;  %v11094_v15 = vpack.c.bf16 %v6324_v43, %v6323_v32 }
 0xd09   :  { %v12097_v35 = vpop.eup %12096  ;;  %10817 = vmatprep.mubr.msk.f32.mxu0 %vm32_vm0, %v7313_v6  ;;  %11091 = vmatprep.subr.bf16.mxu1 %v11090_v4  ;;  %v6325_v6 = vld [vmem:[%s16287_s2 + $0x1a0] sm:$0xff] }
 0xd0a   :  { %v7314_v41 = vmul.f32 %v12097_v35, %v15506_v51  ;;  %11093 = vmatpush3.bf16.msra.mxu1 %v11090_v4 }
 0xd0b   :  { %v12099_v11 = vpop.eup %12098  ;;  %11095 = vmatprep.subr.bf16.mxu1 %v11094_v15 }
 0xd0c   :  { %10818 = vmatmul.mubr.msk.f32.gmra.mrb[102].mxu0 %vm32_vm0, %v7314_v41  ;;  %v7316_v21 = vmul.f32 %v12099_v11, %v15516_v13  ;;  %v11102_v11 = vpack.c.bf16 %v6326_v47, %v6325_v6 }
 0xd0d   :  { %10820 = vmatprep.mubr.msk.f32.mxu0 %vm32_vm0, %v7315_v49 }
 0xd0e   :  { %11097 = vmatpush3.bf16.msra.mxu1 %v11094_v15 }
 0xd0f   :  { %11103 = vmatprep.subr.bf16.mxu1 %v11102_v11 }
 0xd10   :  { %10821 = vmatmul.mubr.msk.f32.gmra.mrb[104].mxu0 %vm32_vm0, %v7316_v21 }
 0xd82   :  { %v15560_v51 = vpop.f32.mrb[78].mxu1 }
 0xd83   :  { %v7956_v38 = vpop.f32.mrb[79].mxu1 }
 0xd84   :  { %v10777_v37 = vpop.f32.mrb[74].mxu0  ;;  %v15575_v5 = vadd.f32 %v15565_v45, %v7956_v38 }
 0xd85   :  { %v15568_v29 = vadd.f32 %v10777_v37, %v15565_v45  ;;  %v7483_v20 = vpop.f32.mrb[75].mxu0 }
 0xd86   :  { %v15571_v46 = vadd.f32 %v15565_v45, %v7483_v20  ;;  %v9998_v14 = vmul.f32 -1.442695, %v15575_v5 }
 0xd87   :  { %v9963_v50 = vmul.f32 -1.442695, %v15568_v29 }
 0xd88   :  { %v9962_v33 = vmul.f32 -1.442695, %v15571_v46  ;;  %v10780_v13 = vpop.f32.mrb[76].mxu0 }
 0xd89   :  { %12100 = vpow2.f32 %v9963_v50  ;;  %v15579_v12 = vadd.f32 %v10780_v13, %v15565_v45  ;;  %v7493_v34 = vpop.f32.mrb[77].mxu0 }
 0xd8a   :  { %12102 = vpow2.f32 %v9962_v33  ;;  %v15582_v1 = vadd.f32 %v15565_v45, %v7493_v34 }
 0xd8b   :  { %v9965_v60 = vmul.f32 -1.442695, %v15579_v12 }
 0xd8c   :  { %v9964_v63 = vmul.f32 -1.442695, %v15582_v1  ;;  %v10783_v23 = vpop.f32.mrb[78].mxu0 }
 0xd8d   :  { %12104 = vpow2.f32 %v9965_v60  ;;  %v15588_v8 = vadd.f32 %v10783_v23, %v15565_v45  ;;  %v7503_v42 = vpop.f32.mrb[79].mxu0 }
 0xd8e   :  { %12106 = vpow2.f32 %v9964_v63  ;;  %v15591_v57 = vadd.f32 %v15565_v45, %v7503_v42 }
 0xd8f   :  { %v9967_v18 = vmul.f32 -1.442695, %v15588_v8  ;;  %12108 = vpow2.f32 %v9998_v14 }
 0xd90   :  { %v9966_v2 = vmul.f32 -1.442695, %v15591_v57  ;;  %v10786_v36 = vpop.f32.mrb[80].mxu0 }
 0xd91   :  { %12110 = vpow2.f32 %v9967_v18  ;;  %v15596_v56 = vadd.f32 %v10786_v36, %v15565_v45  ;;  %v7513_v48 = vpop.f32.mrb[81].mxu0 }
 0xd92   :  { %12112 = vpow2.f32 %v9966_v2  ;;  %v15599_v9 = vadd.f32 %v15565_v45, %v7513_v48 }
 0xd93   :  { %v12101_v25 = vpop.eup %12100  ;;  %v9969_v52 = vmul.f32 -1.442695, %v15596_v56 }
 0xd94   :  { %v12103_v28 = vpop.eup %12102  ;;  %v7739_v39 = vadd.f32 1.0, %v12101_v25  ;;  %v9968_v59 = vmul.f32 -1.442695, %v15599_v9 }
 0xd95   :  { %v7738_v30 = vadd.f32 1.0, %v12103_v28  ;;  %v10789_v26 = vpop.f32.mrb[82].mxu0 }
 0xd96   :  { %12114 = vrcp.f32 %v7739_v39  ;;  %v15604_v3 = vadd.f32 %v10789_v26, %v15565_v45  ;;  %v7523_v16 = vpop.f32.mrb[83].mxu0 }
 0xd97   :  { %v12105_v58 = vpop.eup %12104  ;;  %12116 = vrcp.f32 %v7738_v30  ;;  %v15607_v40 = vadd.f32 %v15565_v45, %v7523_v16 }
 0xd98   :  { %v12107_v0 = vpop.eup %12106  ;;  %v7741_v54 = vadd.f32 1.0, %v12105_v58  ;;  %12118 = vpow2.f32 %v9969_v52  ;;  %v9971_v7 = vmul.f32 -1.442695, %v15604_v3 }
 0xd99   :  { %v7740_v17 = vadd.f32 1.0, %v12107_v0  ;;  %12120 = vpow2.f32 %v9968_v59  ;;  %v9970_v10 = vmul.f32 -1.442695, %v15607_v40  ;;  %v12109_v27 = vpop.eup %12108 }
 0xd9a   :  { %12122 = vrcp.f32 %v7741_v54  ;;  %v10792_v62 = vpop.f32.mrb[84].mxu0  ;;  %v7971_v43 = vadd.f32 1.0, %v12109_v27 }
 0xd9b   :  { %v12111_v35 = vpop.eup %12110  ;;  %12124 = vrcp.f32 %v7740_v17  ;;  %v15618_v41 = vadd.f32 %v10792_v62, %v15565_v45  ;;  %v7533_v49 = vpop.f32.mrb[85].mxu0 }
 0xd9c   :  { %v12113_v21 = vpop.eup %12112  ;;  %v7743_v22 = vadd.f32 1.0, %v12111_v35  ;;  %12126 = vpow2.f32 %v9971_v7  ;;  %v15621_v24 = vadd.f32 %v15565_v45, %v7533_v49 }
 0xd9d   :  { %v7742_v4 = vadd.f32 1.0, %v12113_v21  ;;  %12128 = vpow2.f32 %v9970_v10  ;;  %v9973_v32 = vmul.f32 -1.442695, %v15618_v41 }
 0xd9e   :  { %12130 = vrcp.f32 %v7743_v22  ;;  %v9972_v15 = vmul.f32 -1.442695, %v15621_v24  ;;  %v10795_v38 = vpop.f32.mrb[86].mxu0 }
 0xd9f   :  { %12132 = vrcp.f32 %v7742_v4  ;;  %v15626_v37 = vadd.f32 %v10795_v38, %v15565_v45  ;;  %v7543_v20 = vpop.f32.mrb[87].mxu0 }
 0xda0   :  { %v12115_v50 = vpop.eup %12114  ;;  %12134 = vpow2.f32 %v9973_v32  ;;  %v15629_v33 = vadd.f32 %v15565_v45, %v7543_v20 }
 0xda1   :  { %v12117_v13 = vpop.eup %12116  ;;  %v7835_v34 = vmul.f32 %v12115_v50, %v15568_v29  ;;  %12136 = vpow2.f32 %v9972_v15  ;;  %v9975_v60 = vmul.f32 -1.442695, %v15626_v37 }
 0xda2   :  { %v12119_v14 = vpop.eup %12118  ;;  %12138 = vrcp.f32 %v7971_v43  ;;  %v7834_v63 = vmul.f32 %v12117_v13, %v15571_v46  ;;  %v9974_v25 = vmul.f32 -1.442695, %v15629_v33 }
 0xda3   :  { %v12121_v23 = vpop.eup %12120  ;;  %v8979_v42 = vsel %vm32_vm0, %v7835_v34, 0.0  ;;  %v7745_v18 = vadd.f32 1.0, %v12119_v14  ;;  %12140 = vpow2.f32 %v9975_v60 }
 0xda4   :  { %v12123_v2 = vpop.eup %12122  ;;  %v8978_v36 = vsel %vm32_vm0, %v7834_v63, 0.0  ;;  %v7744_v48 = vadd.f32 1.0, %v12121_v23  ;;  %10842 = vmatprep.mubr.msk.f32.mxu1 %vm32_vm0, %v7834_v63 }
 0xda5   :  { %v12125_v29 = vpop.eup %12124  ;;  %v8980_v28 = vadd.f32 %v8979_v42, %v8978_v36  ;;  %v7837_v39 = vmul.f32 %v12123_v2, %v15579_v12  ;;  %12142 = vrcp.f32 %v7745_v18  ;;  %10843 = vmatmul.mubr.msk.f32.vlgmr.msra.gmra.mrb[80].mxu1 %vm32_vm0, %v7835_v34 }
 0xda6   :  { %v12127_v46 = vpop.eup %12126  ;;  %v7836_v52 = vmul.f32 %v12125_v29, %v15582_v1  ;;  %12144 = vrcp.f32 %v7744_v48  ;;  %11105 = vmatpush3.bf16.msra.mxu1 %v11102_v11 }
 0xda7   :  { %v12129_v30 = vpop.eup %12128  ;;  %v8981_v59 = vrot.slane %v8980_v28, 4  ;;  %v8988_v26 = vsel %vm32_vm0, %v7837_v39, 0.0  ;;  %v7747_v16 = vadd.f32 1.0, %v12127_v46  ;;  %12146 = vpow2.f32 %v9974_v25 }
 0xda8   :  { %v12131_v58 = vpop.eup %12130  ;;  %v8987_v0 = vsel %vm32_vm0, %v7836_v52, 0.0  ;;  %v7746_v54 = vadd.f32 1.0, %v12129_v30  ;;  %10845 = vmatprep.mubr.msk.f32.mxu1 %vm32_vm0, %v7836_v52 }
 0xda9   :  { %v12133_v12 = vpop.eup %12132  ;;  %v8982_v7 = vadd.f32 %v8981_v59, %v8980_v28  ;;  %v8989_v17 = vadd.f32 %v8988_v26, %v8987_v0  ;;  %v7839_v10 = vmul.f32 %v12131_v58, %v15588_v8  ;;  %12148 = vrcp.f32 %v7747_v16  ;;  %10846 = vmatmul.mubr.msk.f32.gmra.mrb[82].mxu1 %vm32_vm0, %v7837_v39 }
 0xdaa   :  { %v12135_v1 = vpop.eup %12134  ;;  %v7838_v27 = vmul.f32 %v12133_v12, %v15591_v57  ;;  %12150 = vrcp.f32 %v7746_v54  ;;  %v15666_v26 = vadd.f32 %v15560_v51, %v15565_v45 }
 0xdab   :  { %v12137_v62 = vpop.eup %12136  ;;  %v8983_v6 = vrot.slane %v8982_v7, 2  ;;  %v8990_v47 = vrot.slane %v8989_v17, 4  ;;  %v8997_v35 = vsel %vm32_vm0, %v7839_v10, 0.0  ;;  %v7749_v49 = vadd.f32 1.0, %v12135_v1 }
 0xdac   :  { %v12139_v11 = vpop.eup %12138  ;;  %v8996_v21 = vsel %vm32_vm0, %v7838_v27, 0.0  ;;  %v7748_v22 = vadd.f32 1.0, %v12137_v62  ;;  %10848 = vmatprep.mubr.msk.f32.mxu1 %vm32_vm0, %v7838_v27 }
 0xdad   :  { %v12141_v8 = vpop.eup %12140  ;;  %v8984_v4 = vadd.f32 %v8983_v6, %v8982_v7  ;;  %v8991_v32 = vadd.f32 %v8990_v47, %v8989_v17  ;;  %v8998_v43 = vadd.f32 %v8997_v35, %v8996_v21  ;;  %12152 = vrcp.f32 %v7749_v49  ;;  %10849 = vmatmul.mubr.msk.f32.gmra.mrb[84].mxu1 %vm32_vm0, %v7839_v10 }
 0xdae   :  { %12154 = vrcp.f32 %v7748_v22  ;;  %v7751_v57 = vadd.f32 1.0, %v12141_v8  ;;  %v15652_v34 = vmul.f32 %v12139_v11, %v15575_v5  ;;  %v9999_v47 = vmul.f32 -1.442695, %v15666_v26 }
 0xdaf   :  { %v12143_v15 = vpop.eup %12142  ;;  %v8985_v38 = vrot.slane %v8984_v4, 1  ;;  %v8992_v20 = vrot.slane %v8991_v32, 2  ;;  %v8999_v50 = vrot.slane %v8998_v43, 4 }
 0xdb0   :  { %v12145_v13 = vpop.eup %12144  ;;  %v7841_v60 = vmul.f32 %v12143_v15, %v15596_v56  ;;  %12156 = vrcp.f32 %v7751_v57  ;;  %v9124_v52 = vrot.slane %v15652_v34, 1  ;;  %v9125_v27 = vrot.slane %v15652_v34, 2 }
 0xdb1   :  { %v12147_v14 = vpop.eup %12146  ;;  %v8986_v63 = vadd.f32 %v8985_v38, %v8984_v4  ;;  %v8993_v23 = vadd.f32 %v8992_v20, %v8991_v32  ;;  %v9000_v42 = vadd.f32 %v8999_v50, %v8998_v43  ;;  %v7840_v18 = vmul.f32 %v12145_v13, %v15599_v9 }
 0xdb2   :  { %v9006_v2 = vsel %vm32_vm0, %v7841_v60, 0.0  ;;  %v7750_v36 = vadd.f32 1.0, %v12147_v14  ;;  %v9126_v14 = vrot.slane %v15652_v34, 3 }
 0xdb3   :  { %v12149_v48 = vpop.eup %12148  ;;  %v9154_v25 = vsub.f32 %v8986_v63, %v15652_v34  ;;  %v8994_v29 = vrot.slane %v8993_v23, 1  ;;  %v9001_v28 = vrot.slane %v9000_v42, 2  ;;  %v9005_v5 = vsel %vm32_vm0, %v7840_v18, 0.0  ;;  %10851 = vmatprep.mubr.msk.f32.mxu1 %vm32_vm0, %v7840_v18 }
 0xdb4   :  { %v12151_v56 = vpop.eup %12150  ;;  %v9007_v39 = vadd.f32 %v9006_v2, %v9005_v5  ;;  %v7843_v46 = vmul.f32 %v12149_v48, %v15604_v3  ;;  %12158 = vrcp.f32 %v7750_v36  ;;  %10852 = vmatmul.mubr.msk.f32.gmra.mrb[86].mxu1 %vm32_vm0, %v7841_v60 }
 0xdb5   :  { %v8995_v9 = vadd.f32 %v8994_v29, %v8993_v23  ;;  %v9002_v30 = vadd.f32 %v9001_v28, %v9000_v42  ;;  %v7842_v59 = vmul.f32 %v12151_v56, %v15607_v40  ;;  %12160 = vpow2.f32 %v9999_v47 }
 0xdb6   :  { %v9008_v16 = vrot.slane %v9007_v39, 4  ;;  %v9015_v58 = vsel %vm32_vm0, %v7843_v46, 0.0 }
 0xdb7   :  { %v12153_v0 = vpop.eup %12152  ;;  %v9155_v54 = vsub.f32 %v8995_v9, %v9124_v52  ;;  %v9003_v12 = vrot.slane %v9002_v30, 1  ;;  %v9014_v3 = vsel %vm32_vm0, %v7842_v59, 0.0  ;;  %10854 = vmatprep.mubr.msk.f32.mxu1 %vm32_vm0, %v7842_v59 }
 0xdb8   :  { %v12155_v7 = vpop.eup %12154  ;;  %v9009_v17 = vadd.f32 %v9008_v16, %v9007_v39  ;;  %v9016_v10 = vadd.f32 %v9015_v58, %v9014_v3  ;;  %v7845_v1 = vmul.f32 %v12153_v0, %v15618_v41  ;;  %10855 = vmatmul.mubr.msk.f32.gmra.mrb[88].mxu1 %vm32_vm0, %v7843_v46 }
 0xdb9   :  { %v9186_v40 = vrot.slane %v9155_v54, 7  ;;  %v9004_v51 = vadd.f32 %v9003_v12, %v9002_v30  ;;  %v7844_v62 = vmul.f32 %v12155_v7, %v15621_v24  ;;  %v9128_v7 = vrot.slane %v15652_v34, 5 }
 0xdba   :  { %v12157_v6 = vpop.eup %12156  ;;  %v9010_v35 = vrot.slane %v9009_v17, 2  ;;  %v9017_v49 = vrot.slane %v9016_v10, 4  ;;  %v9024_v11 = vsel %vm32_vm0, %v7845_v1, 0.0 }
 0xdbb   :  { %v9156_v21 = vsub.f32 %v9004_v51, %v9125_v27  ;;  %v9023_v22 = vsel %vm32_vm0, %v7844_v62, 0.0  ;;  %v7847_v41 = vmul.f32 %v12157_v6, %v15626_v37  ;;  %10857 = vmatprep.mubr.msk.f32.mxu1 %vm32_vm0, %v7844_v62  ;;  %v9187_v8 = vsel %vm2673_vm2, %v9186_v40, %v9154_v25 }
 0xdbc   :  { %v9011_v4 = vadd.f32 %v9010_v35, %v9009_v17  ;;  %v9018_v32 = vadd.f32 %v9017_v49, %v9016_v10  ;;  %v9025_v43 = vadd.f32 %v9024_v11, %v9023_v22  ;;  %10858 = vmatmul.mubr.msk.f32.gmra.mrb[90].mxu1 %vm32_vm0, %v7845_v1 }
 0xdbd   :  { %v9188_v24 = vrot.slane %v9156_v21, 6  ;;  %v9033_v50 = vsel %vm32_vm0, %v7847_v41, 0.0 }
 0xdbe   :  { %v12159_v57 = vpop.eup %12158  ;;  %v9012_v15 = vrot.slane %v9011_v4, 1  ;;  %v9019_v38 = vrot.slane %v9018_v32, 2  ;;  %v9026_v20 = vrot.slane %v9025_v43, 4 }
 0xdbf   :  { %v7846_v13 = vmul.f32 %v12159_v57, %v15629_v33  ;;  %v9189_v37 = vsel %vm2675_vm3, %v9188_v24, %v9187_v8  ;;  %v9127_v33 = vrot.slane %v15652_v34, 4  ;;  %v12161_v51 = vpop.eup %12160  ;;  %v9129_v57 = vrot.slane %v15652_v34, 6 }
 0xdc0   :  { %v9013_v60 = vadd.f32 %v9012_v15, %v9011_v4  ;;  %v9020_v63 = vadd.f32 %v9019_v38, %v9018_v32  ;;  %v9027_v23 = vadd.f32 %v9026_v20, %v9025_v43  ;;  %v7972_v32 = vadd.f32 1.0, %v12161_v51 }
 0xdc1   :  { %v9032_v42 = vsel %vm32_vm0, %v7846_v13, 0.0  ;;  %10860 = vmatprep.mubr.msk.f32.mxu1 %vm32_vm0, %v7846_v13  ;;  %v10798_v18 = vpop.f32.mrb[88].mxu0 }
 0xdc2   :  { %v9157_v2 = vsub.f32 %v9013_v60, %v9126_v14  ;;  %v9021_v36 = vrot.slane %v9020_v63, 1  ;;  %v9028_v48 = vrot.slane %v9027_v23, 2  ;;  %v9034_v25 = vadd.f32 %v9033_v50, %v9032_v42  ;;  %10861 = vmatmul.mubr.msk.f32.gmra.mrb[92].mxu1 %vm32_vm0, %v7847_v41  ;;  %v7553_v29 = vpop.f32.mrb[89].mxu0 }
 0xdc3   :  { %v15691_v28 = vadd.f32 %v10798_v18, %v15565_v45  ;;  %v15694_v5 = vadd.f32 %v15565_v45, %v7553_v29 }
 0xdc4   :  { %v9190_v56 = vrot.slane %v9157_v2, 5  ;;  %v9022_v39 = vadd.f32 %v9021_v36, %v9020_v63  ;;  %v9029_v46 = vadd.f32 %v9028_v48, %v9027_v23  ;;  %v9035_v9 = vrot.slane %v9034_v25, 4 }
 0xdc5   :  { %v9977_v52 = vmul.f32 -1.442695, %v15691_v28  ;;  %v9976_v30 = vmul.f32 -1.442695, %v15694_v5  ;;  %v10801_v59 = vpop.f32.mrb[90].mxu0 }
 0xdc6   :  { %v9158_v16 = vsub.f32 %v9022_v39, %v9127_v33  ;;  %v9030_v58 = vrot.slane %v9029_v46, 1  ;;  %v9036_v0 = vadd.f32 %v9035_v9, %v9034_v25  ;;  %v15699_v54 = vadd.f32 %v10801_v59, %v15565_v45  ;;  %v7563_v12 = vpop.f32.mrb[91].mxu0 }
 0xdc7   :  { %12162 = vpow2.f32 %v9977_v52  ;;  %v15702_v3 = vadd.f32 %v15565_v45, %v7563_v12  ;;  %v9191_v17 = vsel %vm2677_vm4, %v9190_v56, %v9189_v37 }
 0xdc8   :  { %v9192_v10 = vrot.slane %v9158_v16, 4  ;;  %v9031_v1 = vadd.f32 %v9030_v58, %v9029_v46  ;;  %v9037_v40 = vrot.slane %v9036_v0, 2  ;;  %12164 = vpow2.f32 %v9976_v30 }
 0xdc9   :  { %v9979_v27 = vmul.f32 -1.442695, %v15699_v54  ;;  %v9978_v62 = vmul.f32 -1.442695, %v15702_v3  ;;  %v10804_v6 = vpop.f32.mrb[92].mxu0 }
 0xdca   :  { %v9038_v47 = vadd.f32 %v9037_v40, %v9036_v0  ;;  %v15709_v35 = vadd.f32 %v10804_v6, %v15565_v45  ;;  %v7573_v49 = vpop.f32.mrb[93].mxu0  ;;  %v9159_v11 = vsub.f32 %v9031_v1, %v9128_v7  ;;  %v9193_v21 = vsel %vm2679_vm5, %v9192_v10, %v9191_v17 }
 0xdcb   :  { %12166 = vpow2.f32 %v9979_v27  ;;  %v15713_v22 = vadd.f32 %v15565_v45, %v7573_v49 }
 0xdcc   :  { %v9039_v41 = vrot.slane %v9038_v47, 1  ;;  %12168 = vpow2.f32 %v9978_v62  ;;  %v9981_v8 = vmul.f32 -1.442695, %v15709_v35  ;;  %v9194_v4 = vrot.slane %v9159_v11, 3 }
 0xdcd   :  { %v9980_v43 = vmul.f32 -1.442695, %v15713_v22  ;;  %v10807_v24 = vpop.f32.mrb[94].mxu0 }
 0xdce   :  { %v9040_v15 = vadd.f32 %v9039_v41, %v9038_v47  ;;  %12170 = vpow2.f32 %v9981_v8  ;;  %v15719_v38 = vadd.f32 %v10807_v24, %v15565_v45  ;;  %v7583_v20 = vpop.f32.mrb[95].mxu0  ;;  %v9195_v50 = vsel %vm2681_vm6, %v9194_v4, %v9193_v21 }
 0xdcf   :  { %12172 = vpow2.f32 %v9980_v43  ;;  %v15723_v13 = vadd.f32 %v15565_v45, %v7583_v20 }
 0xdd0   :  { %v9983_v37 = vmul.f32 -1.442695, %v15719_v38  ;;  %v9160_v60 = vsub.f32 %v9040_v15, %v9129_v57  ;;  %12174 = vrcp.f32 %v7972_v32 }
 0xdd1   :  { %v12163_v14 = vpop.eup %12162  ;;  %v9982_v63 = vmul.f32 -1.442695, %v15723_v13  ;;  %v10810_v23 = vpop.f32.mrb[96].mxu0 }
 0xdd2   :  { %v12165_v42 = vpop.eup %12164  ;;  %v7753_v18 = vadd.f32 1.0, %v12163_v14  ;;  %12176 = vpow2.f32 %v9983_v37  ;;  %v15728_v2 = vadd.f32 %v10810_v23, %v15565_v45  ;;  %v7593_v36 = vpop.f32.mrb[97].mxu0  ;;  %v9196_v48 = vrot.slane %v9160_v60, 2 }
 0xdd3   :  { %v7752_v25 = vadd.f32 1.0, %v12165_v42  ;;  %12178 = vpow2.f32 %v9982_v63  ;;  %v15731_v29 = vadd.f32 %v15565_v45, %v7593_v36 }
 0xdd4   :  { %12180 = vrcp.f32 %v7753_v18  ;;  %v9985_v33 = vmul.f32 -1.442695, %v15728_v2  ;;  %v15735_v56 = vsel %vm2683_vm7, %v9196_v48, %v9195_v50 }
 0xdd5   :  { %v12167_v39 = vpop.eup %12166  ;;  %12182 = vrcp.f32 %v7752_v25  ;;  %v9984_v46 = vmul.f32 -1.442695, %v15731_v29 }
 0xdd6   :  { %v12169_v9 = vpop.eup %12168  ;;  %v7755_v52 = vadd.f32 1.0, %v12167_v39  ;;  %12184 = vpow2.f32 %v9985_v33 }
 0xdd7   :  { %v7754_v30 = vadd.f32 1.0, %v12169_v9  ;;  %12186 = vpow2.f32 %v9984_v46  ;;  %v10813_v59 = vpop.f32.mrb[98].mxu0 }
 0xdd8   :  { %v12171_v16 = vpop.eup %12170  ;;  %12188 = vrcp.f32 %v7755_v52  ;;  %v15739_v58 = vadd.f32 %v10813_v59, %v15565_v45  ;;  %v7603_v0 = vpop.f32.mrb[99].mxu0 }
 0xdd9   :  { %v12173_v12 = vpop.eup %12172  ;;  %12190 = vrcp.f32 %v7754_v30  ;;  %v7757_v7 = vadd.f32 1.0, %v12171_v16  ;;  %v15742_v17 = vadd.f32 %v15565_v45, %v7603_v0 }
 0xdda   :  { %v7756_v10 = vadd.f32 1.0, %v12173_v12  ;;  %v9987_v1 = vmul.f32 -1.442695, %v15739_v58  ;;  %v12175_v40 = vpop.eup %12174 }
 0xddb   :  { %12192 = vrcp.f32 %v7757_v7  ;;  %v9986_v51 = vmul.f32 -1.442695, %v15742_v17  ;;  %v10816_v27 = vpop.f32.mrb[100].mxu0  ;;  %v15756_v20 = vmul.f32 %v12175_v40, %v15666_v26 }
 0xddc   :  { %v12177_v62 = vpop.eup %12176  ;;  %12194 = vrcp.f32 %v7756_v10  ;;  %v15747_v6 = vadd.f32 %v10816_v27, %v15565_v45  ;;  %v7613_v47 = vpop.f32.mrb[101].mxu0 }
 0xddd   :  { %v12179_v49 = vpop.eup %12178  ;;  %v7759_v11 = vadd.f32 1.0, %v12177_v62  ;;  %12196 = vpow2.f32 %v9987_v1  ;;  %v15750_v21 = vadd.f32 %v15565_v45, %v7613_v47  ;;  %v9131_v27 = vrot.slane %v15756_v20, 1 }
 0xdde   :  { %v12181_v41 = vpop.eup %12180  ;;  %v7758_v8 = vadd.f32 1.0, %v12179_v49  ;;  %12198 = vpow2.f32 %v9986_v51  ;;  %v9989_v4 = vmul.f32 -1.442695, %v15747_v6 }
 0xddf   :  { %v12183_v32 = vpop.eup %12182  ;;  %v7849_v43 = vmul.f32 %v12181_v41, %v15691_v28  ;;  %12200 = vrcp.f32 %v7759_v11  ;;  %v9988_v24 = vmul.f32 -1.442695, %v15750_v21  ;;  %v10819_v57 = vpop.f32.mrb[102].mxu0 }
 0xde0   :  { %v12185_v15 = vpop.eup %12184  ;;  %v7848_v50 = vmul.f32 %v12183_v32, %v15694_v5  ;;  %12202 = vrcp.f32 %v7758_v8  ;;  %v15760_v37 = vadd.f32 %v10819_v57, %v15565_v45  ;;  %v7623_v60 = vpop.f32.mrb[103].mxu0 }
 0xde1   :  { %v12187_v14 = vpop.eup %12186  ;;  %v9042_v63 = vsel %vm32_vm0, %v7849_v43, 0.0  ;;  %v7761_v23 = vadd.f32 1.0, %v12185_v15  ;;  %12204 = vpow2.f32 %v9989_v4  ;;  %v15764_v28 = vadd.f32 %v15565_v45, %v7623_v60 }
 0xde2   :  { %v12189_v42 = vpop.eup %12188  ;;  %v9041_v18 = vsel %vm32_vm0, %v7848_v50, 0.0  ;;  %v7760_v26 = vadd.f32 1.0, %v12187_v14  ;;  %12206 = vpow2.f32 %v9988_v24  ;;  %v9991_v5 = vmul.f32 -1.442695, %v15760_v37  ;;  %10863 = vmatprep.mubr.msk.f32.mxu1 %vm32_vm0, %v7848_v50 }
 0xde3   :  { %v12191_v36 = vpop.eup %12190  ;;  %v9043_v48 = vadd.f32 %v9042_v63, %v9041_v18  ;;  %v7851_v25 = vmul.f32 %v12189_v42, %v15699_v54  ;;  %12208 = vrcp.f32 %v7761_v23  ;;  %v9990_v33 = vmul.f32 -1.442695, %v15764_v28  ;;  %v10822_v39 = vpop.f32.mrb[104].mxu0  ;;  %10864 = vmatmul.mubr.msk.f32.gmra.mrb[94].mxu1 %vm32_vm0, %v7849_v43 }
 0xde4   :  { %v7850_v46 = vmul.f32 %v12191_v36, %v15702_v3  ;;  %12210 = vrcp.f32 %v7760_v26  ;;  %v15774_v9 = vadd.f32 %v10822_v39, %v15565_v45  ;;  %v7633_v52 = vpop.f32.mrb[105].mxu0  ;;  %v9130_v24 = vrot.slane %v15652_v34, 7 }
 0xde5   :  { %v12193_v30 = vpop.eup %12192  ;;  %v9044_v59 = vrot.slane %v9043_v48, 4  ;;  %v9051_v16 = vsel %vm32_vm0, %v7851_v25, 0.0  ;;  %12212 = vpow2.f32 %v9991_v5  ;;  %v15778_v54 = vadd.f32 %v15565_v45, %v7633_v52 }
 0xde6   :  { %v12195_v0 = vpop.eup %12194  ;;  %v9050_v12 = vsel %vm32_vm0, %v7850_v46, 0.0  ;;  %v7853_v7 = vmul.f32 %v12193_v30, %v15709_v35  ;;  %12214 = vpow2.f32 %v9990_v33  ;;  %v9993_v3 = vmul.f32 -1.442695, %v15774_v9  ;;  %10866 = vmatprep.mubr.msk.f32.mxu1 %vm32_vm0, %v7850_v46 }
 0xde7   :  { %v12197_v10 = vpop.eup %12196  ;;  %v9045_v1 = vadd.f32 %v9044_v59, %v9043_v48  ;;  %v9052_v40 = vadd.f32 %v9051_v16, %v9050_v12  ;;  %v7852_v51 = vmul.f32 %v12195_v0, %v15713_v22  ;;  %10867 = vmatmul.mubr.msk.f32.gmra.mrb[96].mxu1 %vm32_vm0, %v7851_v25  ;;  %v9992_v35 = vmul.f32 -1.442695, %v15778_v54 }
 0xde8   :  { %v12199_v45 = vpop.eup %12198  ;;  %v9060_v62 = vsel %vm32_vm0, %v7853_v7, 0.0  ;;  %v7763_v47 = vadd.f32 1.0, %v12197_v10  ;;  %12216 = vpow2.f32 %v9993_v3 }
 0xde9   :  { %v12201_v49 = vpop.eup %12200  ;;  %v9046_v11 = vrot.slane %v9045_v1, 2  ;;  %v9053_v41 = vrot.slane %v9052_v40, 4  ;;  %v9059_v8 = vsel %vm32_vm0, %v7852_v51, 0.0  ;;  %v7762_v4 = vadd.f32 1.0, %v12199_v45  ;;  %10869 = vmatprep.mubr.msk.f32.mxu1 %vm32_vm0, %v7852_v51 }
 0xdea   :  { %v12203_v22 = vpop.eup %12202  ;;  %v9061_v32 = vadd.f32 %v9060_v62, %v9059_v8  ;;  %v7855_v43 = vmul.f32 %v12201_v49, %v15719_v38  ;;  %12218 = vrcp.f32 %v7763_v47 }
 0xdeb   :  { %v12205_v57 = vpop.eup %12204  ;;  %v9047_v15 = vadd.f32 %v9046_v11, %v9045_v1  ;;  %v9054_v50 = vadd.f32 %v9053_v41, %v9052_v40  ;;  %v7854_v60 = vmul.f32 %v12203_v22, %v15723_v13  ;;  %12220 = vrcp.f32 %v7762_v4  ;;  %10870 = vmatmul.mubr.msk.f32.gmra.mrb[98].mxu1 %vm32_vm0, %v7853_v7  ;;  %v6328_v1 = vld [vmem:[%s16287_s2 + $0x1b8] sm:$0xff] }
 0xdec   :  { %v12207_v14 = vpop.eup %12206  ;;  %v9062_v63 = vrot.slane %v9061_v32, 4  ;;  %v9069_v23 = vsel %vm32_vm0, %v7855_v43, 0.0  ;;  %v7765_v42 = vadd.f32 1.0, %v12205_v57  ;;  %12222 = vpow2.f32 %v9992_v35 }
 0xded   :  { %v12209_v18 = vpop.eup %12208  ;;  %v9048_v26 = vrot.slane %v9047_v15, 1  ;;  %v9055_v38 = vrot.slane %v9054_v50, 2  ;;  %v9068_v5 = vsel %vm32_vm0, %v7854_v60, 0.0  ;;  %v7764_v34 = vadd.f32 1.0, %v12207_v14  ;;  %10872 = vmatprep.mubr.msk.f32.mxu1 %vm32_vm0, %v7854_v60 }
 0xdee   :  { %v12211_v36 = vpop.eup %12210  ;;  %v9063_v48 = vadd.f32 %v9062_v63, %v9061_v32  ;;  %v9070_v13 = vadd.f32 %v9069_v23, %v9068_v5  ;;  %v7857_v25 = vmul.f32 %v12209_v18, %v15728_v2  ;;  %12224 = vrcp.f32 %v7765_v42 }
 0xdef   :  { %v12213_v33 = vpop.eup %12212  ;;  %v9056_v39 = vadd.f32 %v9055_v38, %v9054_v50  ;;  %v7856_v46 = vmul.f32 %v12211_v36, %v15731_v29  ;;  %12226 = vrcp.f32 %v7764_v34  ;;  %10873 = vmatmul.mubr.msk.f32.gmra.mrb[100].mxu1 %vm32_vm0, %v7855_v43  ;;  %v9049_v52 = vadd.f32 %v9048_v26, %v9047_v15  ;;  %v6327_v29 = vld [vmem:[%s16287_s2 + $0x1b0] sm:$0xff] }
 0xdf0   :  { %v12215_v30 = vpop.eup %12214  ;;  %v9064_v59 = vrot.slane %v9063_v48, 2  ;;  %v9071_v16 = vrot.slane %v9070_v13, 4  ;;  %v9078_v0 = vsel %vm32_vm0, %v7857_v25, 0.0  ;;  %v7767_v12 = vadd.f32 1.0, %v12213_v33 }
 0xdf1   :  { %v9057_v7 = vrot.slane %v9056_v39, 1  ;;  %v9077_v3 = vsel %vm32_vm0, %v7856_v46, 0.0  ;;  %v7766_v10 = vadd.f32 1.0, %v12215_v30  ;;  %10875 = vmatprep.mubr.msk.f32.mxu1 %vm32_vm0, %v7856_v46  ;;  %v9161_v2 = vsub.f32 %v9049_v52, %v9130_v24 }
 0xdf2   :  { %v12217_v40 = vpop.eup %12216  ;;  %v9065_v51 = vadd.f32 %v9064_v59, %v9063_v48  ;;  %v9072_v45 = vadd.f32 %v9071_v16, %v9070_v13  ;;  %v9079_v62 = vadd.f32 %v9078_v0, %v9077_v3  ;;  %12228 = vrcp.f32 %v7767_v12 }
 0xdf3   :  { %v9058_v47 = vadd.f32 %v9057_v7, %v9056_v39  ;;  %12230 = vrcp.f32 %v7766_v10  ;;  %v7769_v35 = vadd.f32 1.0, %v12217_v40  ;;  %10876 = vmatmul.mubr.msk.f32.gmra.mrb[102].mxu1 %vm32_vm0, %v7857_v25  ;;  %v9198_v49 = vrot.slane %v9161_v2, 1 }
 0xdf4   :  { %v12219_v11 = vpop.eup %12218  ;;  %v9066_v41 = vrot.slane %v9065_v51, 1  ;;  %v9073_v8 = vrot.slane %v9072_v45, 2  ;;  %v9080_v4 = vrot.slane %v9079_v62, 4  ;;  %v11106_v22 = vpack.c.bf16 %v6328_v1, %v6327_v29 }
 0xdf5   :  { %v12221_v32 = vpop.eup %12220  ;;  %v9162_v43 = vsub.f32 %v9058_v47, %v15756_v20  ;;  %v7859_v24 = vmul.f32 %v12219_v11, %v15739_v58  ;;  %12232 = vrcp.f32 %v7769_v35  ;;  %v9199_v57 = vsel %vm2685_vm8, %v9198_v49, %v15735_v56 }
 0xdf6   :  { %v12223_v15 = vpop.eup %12222  ;;  %v9067_v50 = vadd.f32 %v9066_v41, %v9065_v51  ;;  %v9074_v60 = vadd.f32 %v9073_v8, %v9072_v45  ;;  %v9081_v14 = vadd.f32 %v9080_v4, %v9079_v62  ;;  %v7858_v63 = vmul.f32 %v12221_v32, %v15742_v17  ;;  %9214 = vrot.lane.b32.xlu0 %v9199_v57, %s12400_s8 }
 0xdf7   :  { %v9087_v23 = vsel %vm32_vm0, %v7859_v24, 0.0  ;;  %v7768_v42 = vadd.f32 1.0, %v12223_v15  ;;  %11107 = vmatprep.subr.bf16.mxu1 %v11106_v22  ;;  %v9132_v17 = vrot.slane %v15756_v20, 2  ;;  %v9133_v10 = vrot.slane %v15756_v20, 3 }
 0xdf8   :  { %v12225_v18 = vpop.eup %12224  ;;  %v9163_v58 = vsub.f32 %v9067_v50, %v9131_v27  ;;  %v9075_v26 = vrot.slane %v9074_v60, 1  ;;  %v9082_v38 = vrot.slane %v9081_v14, 2  ;;  %v9086_v56 = vsel %vm32_vm0, %v7858_v63, 0.0  ;;  %10878 = vmatprep.mubr.msk.f32.mxu1 %vm32_vm0, %v7858_v63  ;;  %11109 = vmatpush3.bf16.msra.mxu1 %v11106_v22 }
 0xdf9   :  { %v12227_v5 = vpop.eup %12226  ;;  %v9088_v34 = vadd.f32 %v9087_v23, %v9086_v56  ;;  %v7861_v36 = vmul.f32 %v12225_v18, %v15747_v6  ;;  %12234 = vrcp.f32 %v7768_v42  ;;  %10879 = vmatmul.mubr.msk.f32.gmra.mrb[104].mxu1 %vm32_vm0, %v7859_v24  ;;  %v9134_v57 = vrot.slane %v15756_v20, 4 }
 0xdfa   :  { %v9200_v48 = vrot.slane %v9163_v58, 7  ;;  %v9076_v13 = vadd.f32 %v9075_v26, %v9074_v60  ;;  %v9083_v25 = vadd.f32 %v9082_v38, %v9081_v14  ;;  %v7860_v27 = vmul.f32 %v12227_v5, %v15750_v21 }
 0xdfb   :  { %v9089_v33 = vrot.slane %v9088_v34, 4  ;;  %v9096_v39 = vsel %vm32_vm0, %v7861_v36, 0.0  ;;  %v9135_v18 = vrot.slane %v15756_v20, 5 }
 0xdfc   :  { %v12229_v46 = vpop.eup %12228  ;;  %v9164_v52 = vsub.f32 %v9076_v13, %v9132_v17  ;;  %v9084_v30 = vrot.slane %v9083_v25, 1  ;;  %v9095_v59 = vsel %vm32_vm0, %v7860_v27, 0.0  ;;  %10881 = vmatprep.mubr.msk.f32.mxu1 %vm32_vm0, %v7860_v27  ;;  %v9201_v6 = vsel %vm2673_vm2, %v9200_v48, %v9162_v43 }
 0xdfd   :  { %v12231_v16 = vpop.eup %12230  ;;  %v9090_v0 = vadd.f32 %v9089_v33, %v9088_v34  ;;  %v9097_v12 = vadd.f32 %v9096_v39, %v9095_v59  ;;  %v7863_v7 = vmul.f32 %v12229_v46, %v15760_v37  ;;  %10882 = vmatmul.mubr.msk.f32.gmra.mrb[106].mxu1 %vm32_vm0, %v7861_v36  ;;  %v9136_v13 = vrot.slane %v15756_v20, 6 }
 0xdfe   :  { %v9202_v21 = vrot.slane %v9164_v52, 6  ;;  %v9085_v3 = vadd.f32 %v9084_v30, %v9083_v25  ;;  %v7862_v2 = vmul.f32 %v12231_v16, %v15764_v28  ;;  %v9137_v59 = vrot.slane %v15756_v20, 7  ;;  %v6331_v20 = vld [vmem:[%s16287_s2 + $0x1d0] sm:$0xff] }
 0xdff   :  { %v12233_v29 = vpop.eup %12232  ;;  %v9091_v1 = vrot.slane %v9090_v0, 2  ;;  %v9098_v40 = vrot.slane %v9097_v12, 4  ;;  %v9105_v51 = vsel %vm32_vm0, %v7863_v7, 0.0 }
 0xe00   :  { %v9165_v45 = vsub.f32 %v9085_v3, %v9133_v10  ;;  %v9104_v62 = vsel %vm32_vm0, %v7862_v2, 0.0  ;;  %v7865_v47 = vmul.f32 %v12233_v29, %v15774_v9  ;;  %10884 = vmatprep.mubr.msk.f32.mxu1 %vm32_vm0, %v7862_v2  ;;  %v9203_v37 = vsel %vm2675_vm3, %v9202_v21, %v9201_v6  ;;  %v6330_v21 = vld [vmem:[%s16287_s2 + $0x1c8] sm:$0xff]  ;;  %v6332_v10 = vld [vmem:[%s16287_s2 + $0x1d8] sm:$0xff] }
 0xe01   :  { %v9092_v35 = vadd.f32 %v9091_v1, %v9090_v0  ;;  %v9099_v49 = vadd.f32 %v9098_v40, %v9097_v12  ;;  %v9106_v11 = vadd.f32 %v9105_v51, %v9104_v62  ;;  %10885 = vmatmul.mubr.msk.f32.gmra.mrb[108].mxu1 %vm32_vm0, %v7863_v7  ;;  %v6329_v7 = vld [vmem:[%s16287_s2 + $0x1c0] sm:$0xff]  ;;  %v11114_v2 = vpack.c.bf16 %v6332_v10, %v6331_v20  ;;  %v15873_v40 = vld [vmem:[%s16289_s4 + $0x13] ss:$0 sm:$0xff]  ;;  %v15932_v20 = vld [vmem:[%s16289_s4 + $0x14] ss:$0 sm:$0xff] }
 0xe02   :  { %v9204_v28 = vrot.slane %v9165_v45, 5  ;;  %v9114_v32 = vsel %vm32_vm0, %v7865_v47, 0.0  ;;  %v11110_v3 = vpack.c.bf16 %v6330_v21, %v6329_v7 }
 0xe03   :  { %v12235_v41 = vpop.eup %12234  ;;  %v9093_v8 = vrot.slane %v9092_v35, 1  ;;  %v9100_v4 = vrot.slane %v9099_v49, 2  ;;  %v9107_v22 = vrot.slane %v9106_v11, 4 }
 0xe04   :  { %v7864_v43 = vmul.f32 %v12235_v41, %v15778_v54  ;;  %v9205_v9 = vsel %vm2677_vm4, %v9204_v28, %v9203_v37  ;;  %11111 = vmatprep.subr.bf16.mxu1 %v11110_v3 }
 0xe05   :  { %v9094_v24 = vadd.f32 %v9093_v8, %v9092_v35  ;;  %v9101_v15 = vadd.f32 %v9100_v4, %v9099_v49  ;;  %v9108_v50 = vadd.f32 %v9107_v22, %v9106_v11  ;;  %11113 = vmatpush3.bf16.msra.mxu1 %v11110_v3  ;;  %v6348_v11 = vld [vmem:[%s16289_s4 + $0x17] sm:$0x1] }
 0xe06   :  { %v9113_v60 = vsel %vm32_vm0, %v7864_v43, 0.0  ;;  %10887 = vmatprep.mubr.msk.f32.mxu1 %vm32_vm0, %v7864_v43  ;;  %11115 = vmatprep.subr.bf16.mxu1 %v11114_v2  ;;  %11138 = vpush %v6348_v11 }
 0xe07   :  { %v9166_v14 = vsub.f32 %v9094_v24, %v9134_v57  ;;  %v9102_v63 = vrot.slane %v9101_v15, 1  ;;  %v9109_v23 = vrot.slane %v9108_v50, 2  ;;  %v9115_v42 = vadd.f32 %v9114_v32, %v9113_v60  ;;  %10888 = vmatmul.mubr.msk.f32.gmra.mrb[110].mxu1 %vm32_vm0, %v7865_v47 }
 0xe09   :  { %v9206_v54 = vrot.slane %v9166_v14, 4  ;;  %v9103_v58 = vadd.f32 %v9102_v63, %v9101_v15  ;;  %v9110_v26 = vadd.f32 %v9109_v23, %v9108_v50  ;;  %v9116_v38 = vrot.slane %v9115_v42, 4  ;;  %11117 = vmatpush3.bf16.msra.mxu1 %v11114_v2 }
 0xe0b   :  { %v9111_v56 = vrot.slane %v9110_v26, 1  ;;  %v9117_v5 = vadd.f32 %v9116_v38, %v9115_v42  ;;  %v9167_v17 = vsub.f32 %v9103_v58, %v9135_v18  ;;  %v9207_v34 = vsel %vm2679_vm5, %v9206_v54, %v9205_v9 }
 0xe0d   :  { %v9112_v36 = vadd.f32 %v9111_v56, %v9110_v26  ;;  %v9118_v48 = vrot.slane %v9117_v5, 2  ;;  %v9208_v25 = vrot.slane %v9167_v17, 3 }
 0xe0f   :  { %v9119_v27 = vadd.f32 %v9118_v48, %v9117_v5  ;;  %v9168_v33 = vsub.f32 %v9112_v36, %v9136_v13  ;;  %v9209_v39 = vsel %vm2681_vm6, %v9208_v25, %v9207_v34 }
 0xe11   :  { %v9120_v46 = vrot.slane %v9119_v27, 1  ;;  %v9210_v52 = vrot.slane %v9168_v33, 2 }
 0xe13   :  { %v9121_v30 = vadd.f32 %v9120_v46, %v9119_v27  ;;  %v9211_v6 = vsel %vm2683_vm7, %v9210_v52, %v9209_v39 }
 0xe15   :  { %v9169_v16 = vsub.f32 %v9121_v30, %v9137_v59 }
 0xe17   :  { %v9212_v0 = vrot.slane %v9169_v16, 1 }
 0xe19   :  { %v9213_v12 = vsel %vm2685_vm8, %v9212_v0, %v9211_v6 }
 0xe1a   :  { %9216 = vrot.lane.b32.xlu1 %v9213_v12, %s12400_s8 }
 0xe37   :  { %s11139_s19 = spop %11138 }
 0xe68   :  { %v9215_v29 = vpop.permute.xlu0 %9214 }
 0xe69   :  { %v9220_v1 = vsel %vm32_vm0, %v14981_v31, %v9215_v29 }
 0xe6a   :  { %10913 = vmatprep.mubr.msk.f32.mxu1 %vm3039_vm9, %v9220_v1 }
 0xe78   :  { %v10844_v51 = vpop.f32.mrb[80].mxu1 }
 0xe79   :  { %v15876_v45 = vadd.f32 %v10844_v51, %v15873_v40  ;;  %v8145_v62 = vpop.f32.mrb[81].mxu1 }
 0xe7a   :  { %v15879_v47 = vadd.f32 %v15873_v40, %v8145_v62 }
 0xe7b   :  { %v10034_v37 = vmul.f32 -1.442695, %v15876_v45 }
 0xe7c   :  { %v10033_v35 = vmul.f32 -1.442695, %v15879_v47  ;;  %v10847_v49 = vpop.f32.mrb[82].mxu1 }
 0xe7d   :  { %12236 = vpow2.f32 %v10034_v37  ;;  %v15887_v28 = vadd.f32 %v10847_v49, %v15873_v40  ;;  %v8155_v41 = vpop.f32.mrb[83].mxu1 }
 0xe7e   :  { %12238 = vpow2.f32 %v10033_v35  ;;  %v15890_v8 = vadd.f32 %v15873_v40, %v8155_v41 }
 0xe7f   :  { %v10036_v4 = vmul.f32 -1.442695, %v15887_v28 }
 0xe80   :  { %v10035_v22 = vmul.f32 -1.442695, %v15890_v8  ;;  %v10850_v32 = vpop.f32.mrb[84].mxu1 }
 0xe81   :  { %12240 = vpow2.f32 %v10036_v4  ;;  %v15895_v43 = vadd.f32 %v10850_v32, %v15873_v40  ;;  %v8165_v9 = vpop.f32.mrb[85].mxu1 }
 0xe82   :  { %12242 = vpow2.f32 %v10035_v22  ;;  %v15898_v24 = vadd.f32 %v15873_v40, %v8165_v9 }
 0xe83   :  { %v10038_v57 = vmul.f32 -1.442695, %v15895_v43 }
 0xe84   :  { %v10037_v15 = vmul.f32 -1.442695, %v15898_v24 }
 0xe85   :  { %12244 = vpow2.f32 %v10038_v57 }
 0xe86   :  { %12246 = vpow2.f32 %v10037_v15 }
 0xe87   :  { %v12237_v50 = vpop.eup %12236  ;;  %v10853_v60 = vpop.f32.mrb[86].mxu1 }
 0xe88   :  { %v12239_v14 = vpop.eup %12238  ;;  %v8401_v63 = vadd.f32 1.0, %v12237_v50  ;;  %v15903_v23 = vadd.f32 %v10853_v60, %v15873_v40  ;;  %v8175_v42 = vpop.f32.mrb[87].mxu1 }
 0xe89   :  { %v8400_v18 = vadd.f32 1.0, %v12239_v14  ;;  %v15906_v54 = vadd.f32 %v15873_v40, %v8175_v42 }
 0xe8a   :  { %12248 = vrcp.f32 %v8401_v63  ;;  %v10040_v58 = vmul.f32 -1.442695, %v15903_v23 }
 0xe8b   :  { %v12241_v26 = vpop.eup %12240  ;;  %12250 = vrcp.f32 %v8400_v18  ;;  %v10039_v38 = vmul.f32 -1.442695, %v15906_v54  ;;  %v10856_v56 = vpop.f32.mrb[88].mxu1 }
 0xe8c   :  { %v12243_v5 = vpop.eup %12242  ;;  %v8403_v17 = vadd.f32 1.0, %v12241_v26  ;;  %12252 = vpow2.f32 %v10040_v58  ;;  %v9217_v34 = vpop.permute.xlu1 %9216  ;;  %v15911_v36 = vadd.f32 %v10856_v56, %v15873_v40 }
 0xe8d   :  { %v8185_v48 = vpop.f32.mrb[89].mxu1  ;;  %v8402_v13 = vadd.f32 1.0, %v12243_v5  ;;  %12254 = vpow2.f32 %v10039_v38  ;;  %v9221_v25 = vsel %vm32_vm0, %v14985_v44, %v9217_v34 }
 0xe8e   :  { %v15916_v27 = vadd.f32 %v15873_v40, %v8185_v48  ;;  %12256 = vrcp.f32 %v8403_v17  ;;  %v10042_v33 = vmul.f32 -1.442695, %v15911_v36  ;;  %10914 = vmatmul.mubr.msk.f32.vlgmr.msra.gmra.mrb[112].mxu1 %vm3039_vm9, %v9221_v25 }
 0xe8f   :  { %v12245_v39 = vpop.eup %12244  ;;  %12258 = vrcp.f32 %v8402_v13  ;;  %v10859_v52 = vpop.f32.mrb[90].mxu1 }
 0xe90   :  { %v10041_v46 = vmul.f32 -1.442695, %v15916_v27  ;;  %v12247_v30 = vpop.eup %12246  ;;  %v8405_v59 = vadd.f32 1.0, %v12245_v39  ;;  %12260 = vpow2.f32 %v10042_v33  ;;  %v15922_v6 = vadd.f32 %v10859_v52, %v15873_v40  ;;  %v8195_v16 = vpop.f32.mrb[91].mxu1 }
 0xe91   :  { %v8404_v0 = vadd.f32 1.0, %v12247_v30  ;;  %v15925_v12 = vadd.f32 %v15873_v40, %v8195_v16 }
 0xe92   :  { %12262 = vpow2.f32 %v10041_v46  ;;  %v10044_v7 = vmul.f32 -1.442695, %v15922_v6 }
 0xe93   :  { %12264 = vrcp.f32 %v8405_v59  ;;  %v10043_v21 = vmul.f32 -1.442695, %v15925_v12 }
 0xe94   :  { %12266 = vrcp.f32 %v8404_v0  ;;  %v12249_v3 = vpop.eup %12248 }
 0xe95   :  { %12268 = vpow2.f32 %v10044_v7  ;;  %v12251_v10 = vpop.eup %12250  ;;  %v8497_v2 = vmul.f32 %v12249_v3, %v15876_v45  ;;  %v10862_v29 = vpop.f32.mrb[92].mxu1 }
 0xe96   :  { %12270 = vpow2.f32 %v10043_v21  ;;  %v12253_v1 = vpop.eup %12252  ;;  %v8496_v51 = vmul.f32 %v12251_v10, %v15879_v47  ;;  %v15937_v62 = vadd.f32 %v10862_v29, %v15873_v40  ;;  %v8205_v37 = vpop.f32.mrb[93].mxu1 }
 0xe97   :  { %v12255_v35 = vpop.eup %12254  ;;  %v8407_v49 = vadd.f32 1.0, %v12253_v1  ;;  %v15940_v11 = vadd.f32 %v15873_v40, %v8205_v37  ;;  %v8533_v41 = vmul.f32 %v15932_v20, %v8497_v2 }
 0xe98   :  { %v12257_v4 = vpop.eup %12256  ;;  %v8406_v22 = vadd.f32 1.0, %v12255_v35  ;;  %v10046_v45 = vmul.f32 -1.442695, %v15937_v62  ;;  %v8532_v32 = vmul.f32 %v15932_v20, %v8496_v51 }
 0xe99   :  { %v12259_v9 = vpop.eup %12258  ;;  %v8499_v47 = vmul.f32 %v12257_v4, %v15887_v28  ;;  %12272 = vrcp.f32 %v8407_v49  ;;  %v10045_v57 = vmul.f32 -1.442695, %v15940_v11  ;;  %v8567_v15 = vsel %vm32_vm0, %v8533_v41, 0.0 }
 0xe9a   :  { %v12261_v50 = vpop.eup %12260  ;;  %v8498_v60 = vmul.f32 %v12259_v9, %v15890_v8  ;;  %12274 = vrcp.f32 %v8406_v22  ;;  %8568 = vadd.xlane.f32.xlu0 %v8567_v15  ;;  %v8564_v14 = vsel %vm32_vm0, %v8532_v32, 0.0 }
 0xe9b   :  { %v8409_v42 = vadd.f32 1.0, %v12261_v50  ;;  %12276 = vpow2.f32 %v10046_v45  ;;  %8565 = vadd.xlane.f32.xlu1 %v8564_v14  ;;  %v8535_v18 = vmul.f32 %v15932_v20, %v8499_v47 }
 0xe9c   :  { %v12263_v63 = vpop.eup %12262  ;;  %12278 = vpow2.f32 %v10045_v57  ;;  %v8534_v26 = vmul.f32 %v15932_v20, %v8498_v60 }
 0xe9d   :  { %v12265_v58 = vpop.eup %12264  ;;  %v8408_v28 = vadd.f32 1.0, %v12263_v63  ;;  %12280 = vrcp.f32 %v8409_v42  ;;  %v8573_v8 = vsel %vm32_vm0, %v8535_v18, 0.0 }
 0xe9e   :  { %v12267_v38 = vpop.eup %12266  ;;  %v8501_v56 = vmul.f32 %v12265_v58, %v15895_v43  ;;  %v8570_v34 = vsel %vm32_vm0, %v8534_v26, 0.0 }
 0xe9f   :  { %v12269_v5 = vpop.eup %12268  ;;  %v8500_v17 = vmul.f32 %v12267_v38, %v15898_v24  ;;  %12282 = vrcp.f32 %v8408_v28  ;;  %8571 = vadd.xlane.f32.xlu0 %v8570_v34  ;;  %8574 = vadd.xlane.f32.xlu1 %v8573_v8 }
 0xea0   :  { %v12271_v48 = vpop.eup %12270  ;;  %v8411_v13 = vadd.f32 1.0, %v12269_v5  ;;  %v8537_v25 = vmul.f32 %v15932_v20, %v8501_v56 }
 0xea1   :  { %v8410_v33 = vadd.f32 1.0, %v12271_v48  ;;  %v8536_v39 = vmul.f32 %v15932_v20, %v8500_v17 }
 0xea2   :  { %12284 = vrcp.f32 %v8411_v13  ;;  %v8579_v43 = vsel %vm32_vm0, %v8537_v25, 0.0 }
 0xea3   :  { %12286 = vrcp.f32 %v8410_v33  ;;  %v8576_v46 = vsel %vm32_vm0, %v8536_v39, 0.0  ;;  %v12273_v52 = vpop.eup %12272  ;;  %8580 = vadd.xlane.f32.xlu1 %v8579_v43 }
 0xea4   :  { %8577 = vadd.xlane.f32.xlu0 %v8576_v46  ;;  %v12275_v24 = vpop.eup %12274  ;;  %v8503_v30 = vmul.f32 %v12273_v52, %v15903_v23 }
 0xea5   :  { %v12277_v59 = vpop.eup %12276  ;;  %v8502_v16 = vmul.f32 %v12275_v24, %v15906_v54 }
 0xea6   :  { %v12279_v0 = vpop.eup %12278  ;;  %v8413_v7 = vadd.f32 1.0, %v12277_v59  ;;  %v8539_v21 = vmul.f32 %v15932_v20, %v8503_v30 }
 0xea7   :  { %v12281_v3 = vpop.eup %12280  ;;  %v8412_v10 = vadd.f32 1.0, %v12279_v0  ;;  %v8538_v2 = vmul.f32 %v15932_v20, %v8502_v16 }
 0xea8   :  { %v8505_v1 = vmul.f32 %v12281_v3, %v15911_v36  ;;  %12288 = vrcp.f32 %v8413_v7  ;;  %v8585_v51 = vsel %vm32_vm0, %v8539_v21, 0.0 }
 0xea9   :  { %v12283_v29 = vpop.eup %12282  ;;  %12290 = vrcp.f32 %v8412_v10  ;;  %v8582_v23 = vsel %vm32_vm0, %v8538_v2, 0.0  ;;  %8586 = vadd.xlane.f32.xlu1 %v8585_v51 }
 0xeaa   :  { %v8504_v37 = vmul.f32 %v12283_v29, %v15916_v27  ;;  %8583 = vadd.xlane.f32.xlu0 %v8582_v23  ;;  %v8541_v54 = vmul.f32 %v15932_v20, %v8505_v1 }
 0xeac   :  { %v12285_v35 = vpop.eup %12284  ;;  %v8540_v49 = vmul.f32 %v15932_v20, %v8504_v37  ;;  %v8591_v36 = vsel %vm32_vm0, %v8541_v54, 0.0 }
 0xead   :  { %v12287_v41 = vpop.eup %12286  ;;  %v8507_v4 = vmul.f32 %v12285_v35, %v15922_v6  ;;  %8592 = vadd.xlane.f32.xlu1 %v8591_v36 }
 0xeae   :  { %v8506_v22 = vmul.f32 %v12287_v41, %v15925_v12  ;;  %v8588_v45 = vsel %vm32_vm0, %v8540_v49, 0.0 }
 0xeaf   :  { %8589 = vadd.xlane.f32.xlu0 %v8588_v45  ;;  %v8543_v27 = vmul.f32 %v15932_v20, %v8507_v4 }
 0xeb0   :  { %v8542_v32 = vmul.f32 %v15932_v20, %v8506_v22 }
 0xeb1   :  { %v8597_v9 = vsel %vm32_vm0, %v8543_v27, 0.0 }
 0xeb2   :  { %v8594_v47 = vsel %vm32_vm0, %v8542_v32, 0.0  ;;  %8598 = vadd.xlane.f32.xlu1 %v8597_v9  ;;  %v12289_v57 = vpop.eup %12288 }
 0xeb3   :  { %8595 = vadd.xlane.f32.xlu0 %v8594_v47  ;;  %v12291_v6 = vpop.eup %12290  ;;  %v8509_v15 = vmul.f32 %v12289_v57, %v15937_v62 }
 0xeb4   :  { %v8508_v12 = vmul.f32 %v12291_v6, %v15940_v11 }
 0xeb5   :  { %v8545_v50 = vmul.f32 %v15932_v20, %v8509_v15 }
 0xeb6   :  { %v8544_v60 = vmul.f32 %v15932_v20, %v8508_v12  ;;  %v10865_v14 = vpop.f32.mrb[94].mxu1 }
 0xeb7   :  { %v8603_v63 = vsel %vm32_vm0, %v8545_v50, 0.0  ;;  %v15984_v42 = vadd.f32 %v10865_v14, %v15873_v40  ;;  %v8215_v18 = vpop.f32.mrb[95].mxu1 }
 0xeb8   :  { %v8600_v58 = vsel %vm32_vm0, %v8544_v60, 0.0  ;;  %8604 = vadd.xlane.f32.xlu1 %v8603_v63  ;;  %v15988_v28 = vadd.f32 %v15873_v40, %v8215_v18 }
 0xeb9   :  { %8601 = vadd.xlane.f32.xlu0 %v8600_v58  ;;  %v10048_v62 = vmul.f32 -1.442695, %v15984_v42 }
 0xeba   :  { %v10047_v11 = vmul.f32 -1.442695, %v15988_v28  ;;  %v10868_v26 = vpop.f32.mrb[96].mxu1 }
 0xebb   :  { %12292 = vpow2.f32 %v10048_v62  ;;  %v15993_v38 = vadd.f32 %v10868_v26, %v15873_v40  ;;  %v8225_v56 = vpop.f32.mrb[97].mxu1 }
 0xebc   :  { %12294 = vpow2.f32 %v10047_v11  ;;  %v15996_v8 = vadd.f32 %v15873_v40, %v8225_v56 }
 0xebd   :  { %v10050_v5 = vmul.f32 -1.442695, %v15993_v38 }
 0xebe   :  { %v10049_v17 = vmul.f32 -1.442695, %v15996_v8  ;;  %v10871_v34 = vpop.f32.mrb[98].mxu1 }
 0xebf   :  { %12296 = vpow2.f32 %v10050_v5  ;;  %v16001_v48 = vadd.f32 %v10871_v34, %v15873_v40  ;;  %v8235_v13 = vpop.f32.mrb[99].mxu1 }
 0xec0   :  { %12298 = vpow2.f32 %v10049_v17  ;;  %v16004_v25 = vadd.f32 %v15873_v40, %v8235_v13 }
 0xec1   :  { %v10052_v33 = vmul.f32 -1.442695, %v16001_v48 }
 0xec2   :  { %v10051_v39 = vmul.f32 -1.442695, %v16004_v25  ;;  %v10874_v43 = vpop.f32.mrb[100].mxu1 }
 0xec3   :  { %12300 = vpow2.f32 %v10052_v33  ;;  %v16009_v46 = vadd.f32 %v10874_v43, %v15873_v40  ;;  %v8245_v52 = vpop.f32.mrb[101].mxu1 }
 0xec4   :  { %12302 = vpow2.f32 %v10051_v39  ;;  %v16012_v24 = vadd.f32 %v15873_v40, %v8245_v52 }
 0xec5   :  { %v12293_v30 = vpop.eup %12292  ;;  %v10054_v59 = vmul.f32 -1.442695, %v16009_v46 }
 0xec6   :  { %v12295_v16 = vpop.eup %12294  ;;  %v8415_v0 = vadd.f32 1.0, %v12293_v30  ;;  %v10053_v7 = vmul.f32 -1.442695, %v16012_v24  ;;  %v10877_v21 = vpop.f32.mrb[102].mxu1 }
 0xec7   :  { %v8414_v3 = vadd.f32 1.0, %v12295_v16  ;;  %12304 = vpow2.f32 %v10054_v59  ;;  %v16017_v10 = vadd.f32 %v10877_v21, %v15873_v40  ;;  %v8255_v2 = vpop.f32.mrb[103].mxu1 }
 0xec8   :  { %12306 = vrcp.f32 %v8415_v0  ;;  %v16020_v29 = vadd.f32 %v15873_v40, %v8255_v2 }
 0xec9   :  { %v12297_v1 = vpop.eup %12296  ;;  %12308 = vrcp.f32 %v8414_v3  ;;  %v10056_v51 = vmul.f32 -1.442695, %v16017_v10 }
 0xeca   :  { %v12299_v37 = vpop.eup %12298  ;;  %v8417_v23 = vadd.f32 1.0, %v12297_v1  ;;  %12310 = vpow2.f32 %v10053_v7  ;;  %v10055_v54 = vmul.f32 -1.442695, %v16020_v29 }
 0xecb   :  { %v8416_v35 = vadd.f32 1.0, %v12299_v37  ;;  %12312 = vpow2.f32 %v10056_v51 }
 0xecc   :  { %12314 = vrcp.f32 %v8417_v23  ;;  %v10880_v49 = vpop.f32.mrb[104].mxu1 }
 0xecd   :  { %v12301_v41 = vpop.eup %12300  ;;  %12316 = vrcp.f32 %v8416_v35  ;;  %v16025_v4 = vadd.f32 %v10880_v49, %v15873_v40  ;;  %v8265_v36 = vpop.f32.mrb[105].mxu1 }
 0xece   :  { %v12303_v22 = vpop.eup %12302  ;;  %v8419_v45 = vadd.f32 1.0, %v12301_v41  ;;  %12318 = vpow2.f32 %v10055_v54  ;;  %v16028_v27 = vadd.f32 %v15873_v40, %v8265_v36 }
 0xecf   :  { %v8418_v32 = vadd.f32 1.0, %v12303_v22  ;;  %v10058_v9 = vmul.f32 -1.442695, %v16025_v4 }
 0xed0   :  { %12320 = vrcp.f32 %v8419_v45  ;;  %v10057_v47 = vmul.f32 -1.442695, %v16028_v27  ;;  %v10883_v57 = vpop.f32.mrb[106].mxu1 }
 0xed1   :  { %v12305_v6 = vpop.eup %12304  ;;  %12322 = vrcp.f32 %v8418_v32  ;;  %v16033_v15 = vadd.f32 %v10883_v57, %v15873_v40  ;;  %v8275_v12 = vpop.f32.mrb[107].mxu1 }
 0xed2   :  { %v12307_v50 = vpop.eup %12306  ;;  %v8421_v60 = vadd.f32 1.0, %v12305_v6  ;;  %12324 = vpow2.f32 %v10058_v9  ;;  %v16036_v14 = vadd.f32 %v15873_v40, %v8275_v12 }
 0xed3   :  { %v12309_v63 = vpop.eup %12308  ;;  %v8511_v18 = vmul.f32 %v12307_v50, %v15984_v42  ;;  %12326 = vpow2.f32 %v10057_v47  ;;  %v10060_v58 = vmul.f32 -1.442695, %v16033_v15 }
 0xed4   :  { %v12311_v62 = vpop.eup %12310  ;;  %v8510_v11 = vmul.f32 %v12309_v63, %v15988_v28  ;;  %12328 = vrcp.f32 %v8421_v60  ;;  %v10059_v26 = vmul.f32 -1.442695, %v16036_v14  ;;  %v10886_v56 = vpop.f32.mrb[108].mxu1 }
 0xed5   :  { %v12313_v5 = vpop.eup %12312  ;;  %v8420_v17 = vadd.f32 1.0, %v12311_v62  ;;  %12330 = vpow2.f32 %v10060_v58  ;;  %v16043_v34 = vadd.f32 %v10886_v56, %v15873_v40  ;;  %v8285_v13 = vpop.f32.mrb[109].mxu1  ;;  %v8547_v33 = vmul.f32 %v15932_v20, %v8511_v18 }
 0xed6   :  { %v12315_v42 = vpop.eup %12314  ;;  %v8423_v39 = vadd.f32 1.0, %v12313_v5  ;;  %12332 = vpow2.f32 %v10059_v26  ;;  %v16047_v43 = vadd.f32 %v15873_v40, %v8285_v13  ;;  %v8546_v28 = vmul.f32 %v15932_v20, %v8510_v11 }
 0xed7   :  { %v12317_v52 = vpop.eup %12316  ;;  %v8513_v30 = vmul.f32 %v12315_v42, %v15993_v38  ;;  %12334 = vrcp.f32 %v8420_v17  ;;  %v10062_v59 = vmul.f32 -1.442695, %v16043_v34  ;;  %v8609_v16 = vsel %vm32_vm0, %v8547_v33, 0.0 }
 0xed8   :  { %v12319_v0 = vpop.eup %12318  ;;  %v8512_v7 = vmul.f32 %v12317_v52, %v15996_v8  ;;  %12336 = vrcp.f32 %v8423_v39  ;;  %v10061_v21 = vmul.f32 -1.442695, %v16047_v43  ;;  %8610 = vadd.xlane.f32.xlu1 %v8609_v16  ;;  %v8606_v3 = vsel %vm32_vm0, %v8546_v28, 0.0 }
 0xed9   :  { %v8422_v2 = vadd.f32 1.0, %v12319_v0  ;;  %12338 = vpow2.f32 %v10062_v59  ;;  %8607 = vadd.xlane.f32.xlu0 %v8606_v3  ;;  %v8549_v1 = vmul.f32 %v15932_v20, %v8513_v30 }
 0xeda   :  { %v12321_v38 = vpop.eup %12320  ;;  %12340 = vpow2.f32 %v10061_v21  ;;  %v10889_v51 = vpop.f32.mrb[110].mxu1  ;;  %v8548_v37 = vmul.f32 %v15932_v20, %v8512_v7 }
 0xedb   :  { %v12323_v23 = vpop.eup %12322  ;;  %v8515_v54 = vmul.f32 %v12321_v38, %v16001_v48  ;;  %12342 = vrcp.f32 %v8422_v2  ;;  %v16060_v8 = vadd.f32 %v10889_v51, %v15873_v40  ;;  %v8295_v35 = vpop.f32.mrb[111].mxu1  ;;  %v8615_v49 = vsel %vm32_vm0, %v8549_v1, 0.0 }
 0xedc   :  { %v12325_v41 = vpop.eup %12324  ;;  %v8514_v36 = vmul.f32 %v12323_v23, %v16004_v25  ;;  %v16065_v22 = vadd.f32 %v15873_v40, %v8295_v35  ;;  %8616 = vadd.xlane.f32.xlu1 %v8615_v49  ;;  %v8612_v45 = vsel %vm32_vm0, %v8548_v37, 0.0 }
 0xedd   :  { %v12327_v32 = vpop.eup %12326  ;;  %v8425_v9 = vadd.f32 1.0, %v12325_v41  ;;  %v10064_v48 = vmul.f32 -1.442695, %v16060_v8  ;;  %8613 = vadd.xlane.f32.xlu0 %v8612_v45  ;;  %v8551_v47 = vmul.f32 %v15932_v20, %v8515_v54 }
 0xede   :  { %v12329_v57 = vpop.eup %12328  ;;  %v8424_v6 = vadd.f32 1.0, %v12327_v32  ;;  %v8550_v12 = vmul.f32 %v15932_v20, %v8514_v36  ;;  %v10063_v18 = vmul.f32 -1.442695, %v16065_v22 }
 0xedf   :  { %v12331_v50 = vpop.eup %12330  ;;  %v8517_v25 = vmul.f32 %v12329_v57, %v16009_v46  ;;  %12344 = vrcp.f32 %v8425_v9  ;;  %v8621_v40 = vsel %vm32_vm0, %v8551_v47, 0.0 }
 0xee0   :  { %v12333_v60 = vpop.eup %12332  ;;  %12346 = vrcp.f32 %v8424_v6  ;;  %v8427_v63 = vadd.f32 1.0, %v12331_v50  ;;  %8622 = vadd.xlane.f32.xlu1 %v8621_v40  ;;  %v8618_v58 = vsel %vm32_vm0, %v8550_v12, 0.0 }
 0xee1   :  { %v12335_v62 = vpop.eup %12334  ;;  %v8426_v11 = vadd.f32 1.0, %v12333_v60  ;;  %12348 = vpow2.f32 %v10064_v48  ;;  %8619 = vadd.xlane.f32.xlu0 %v8618_v58  ;;  %v8553_v26 = vmul.f32 %v15932_v20, %v8517_v25 }
 0xee2   :  { %v12337_v56 = vpop.eup %12336  ;;  %v8516_v46 = vmul.f32 %v12335_v62, %v16012_v24  ;;  %12350 = vrcp.f32 %v8427_v63  ;;  %v6333_v62 = vld [vmem:[%s16287_s2 + $0x1e0] sm:$0xff] }
 0xee3   :  { %v12339_v5 = vpop.eup %12338  ;;  %v8519_v17 = vmul.f32 %v12337_v56, %v16017_v10  ;;  %12352 = vrcp.f32 %v8426_v11  ;;  %v8627_v13 = vsel %vm32_vm0, %v8553_v26, 0.0 }
 0xee4   :  { %v12341_v33 = vpop.eup %12340  ;;  %v8429_v42 = vadd.f32 1.0, %v12339_v5  ;;  %12354 = vpow2.f32 %v10063_v18  ;;  %8628 = vadd.xlane.f32.xlu1 %v8627_v13  ;;  %v8552_v39 = vmul.f32 %v15932_v20, %v8516_v46 }
 0xee5   :  { %v12343_v28 = vpop.eup %12342  ;;  %v8428_v52 = vadd.f32 1.0, %v12341_v33  ;;  %v8555_v30 = vmul.f32 %v15932_v20, %v8519_v17 }
 0xee6   :  { %v8518_v59 = vmul.f32 %v12343_v28, %v16020_v29  ;;  %12356 = vrcp.f32 %v8429_v42  ;;  %v8624_v24 = vsel %vm32_vm0, %v8552_v39, 0.0 }
 0xee7   :  { %12358 = vrcp.f32 %v8428_v52  ;;  %8625 = vadd.xlane.f32.xlu0 %v8624_v24  ;;  %v8633_v10 = vsel %vm32_vm0, %v8555_v30, 0.0  ;;  %v16119_v52 = vstv %s11139_s19 }
 0xee8   :  { %8634 = vadd.xlane.f32.xlu1 %v8633_v10  ;;  %v8554_v16 = vmul.f32 %v15932_v20, %v8518_v59 }
 0xee9   :  { %v12345_v0 = vpop.eup %12344 }
 0xeea   :  { %v12347_v7 = vpop.eup %12346  ;;  %v8521_v21 = vmul.f32 %v12345_v0, %v16025_v4  ;;  %v8630_v3 = vsel %vm32_vm0, %v8554_v16, 0.0 }
 0xeeb   :  { %v12349_v2 = vpop.eup %12348  ;;  %v8520_v1 = vmul.f32 %v12347_v7, %v16028_v27  ;;  %8631 = vadd.xlane.f32.xlu0 %v8630_v3 }
 0xeec   :  { %v12351_v29 = vpop.eup %12350  ;;  %v8431_v38 = vadd.f32 1.0, %v12349_v2  ;;  %v8557_v51 = vmul.f32 %v15932_v20, %v8521_v21 }
 0xeed   :  { %v12353_v37 = vpop.eup %12352  ;;  %v8523_v23 = vmul.f32 %v12351_v29, %v16033_v15  ;;  %v8556_v54 = vmul.f32 %v15932_v20, %v8520_v1 }
 0xeee   :  { %v12355_v35 = vpop.eup %12354  ;;  %v8522_v49 = vmul.f32 %v12353_v37, %v16036_v14  ;;  %12360 = vrcp.f32 %v8431_v38  ;;  %v8639_v4 = vsel %vm32_vm0, %v8557_v51, 0.0 }
 0xeef   :  { %v8430_v41 = vadd.f32 1.0, %v12355_v35  ;;  %8640 = vadd.xlane.f32.xlu1 %v8639_v4  ;;  %v8636_v27 = vsel %vm32_vm0, %v8556_v54, 0.0  ;;  %v8559_v36 = vmul.f32 %v15932_v20, %v8523_v23 }
 0xef0   :  { %v12357_v45 = vpop.eup %12356  ;;  %8637 = vadd.xlane.f32.xlu0 %v8636_v27  ;;  %v8558_v32 = vmul.f32 %v15932_v20, %v8522_v49 }
 0xef1   :  { %v12359_v9 = vpop.eup %12358  ;;  %v8525_v15 = vmul.f32 %v12357_v45, %v16043_v34  ;;  %12362 = vrcp.f32 %v8430_v41  ;;  %v8645_v48 = vsel %vm32_vm0, %v8559_v36, 0.0 }
 0xef2   :  { %v8524_v14 = vmul.f32 %v12359_v9, %v16047_v43  ;;  %v8642_v47 = vsel %vm32_vm0, %v8558_v32, 0.0 }
 0xef3   :  { %8646 = vadd.xlane.f32.xlu1 %v8645_v48  ;;  %v8561_v57 = vmul.f32 %v15932_v20, %v8525_v15 }
 0xef4   :  { %8643 = vadd.xlane.f32.xlu0 %v8642_v47  ;;  %v8560_v6 = vmul.f32 %v15932_v20, %v8524_v14 }
 0xef5   :  { %v8651_v12 = vsel %vm32_vm0, %v8561_v57, 0.0 }
 0xef6   :  { %v8648_v50 = vsel %vm32_vm0, %v8560_v6, 0.0 }
 0xef7   :  { %8652 = vadd.xlane.f32.xlu1 %v8651_v12 }
 0xef8   :  { %v12361_v25 = vpop.eup %12360  ;;  %8649 = vadd.xlane.f32.xlu0 %v8648_v50 }
 0xef9   :  { %v8527_v34 = vmul.f32 %v12361_v25, %v16060_v8  ;;  %v6334_v8 = vld [vmem:[%s16287_s2 + $0x1e8] sm:$0xff] }
 0xefa   :  { %v16116_v11 = vpack.c.bf16 %v6334_v8, %v6333_v62 }
 0xefb   :  { %v12363_v40 = vpop.eup %12362  ;;  %v8563_v43 = vmul.f32 %v15932_v20, %v8527_v34 }
 0xefc   :  { %v8526_v60 = vmul.f32 %v12363_v40, %v16065_v22  ;;  %11119 = vmatprep.subr.bf16.mxu0 %v16116_v11 }
 0xefd   :  { %v8657_v63 = vsel %vm32_vm0, %v8563_v43, 0.0 }
 0xefe   :  { %8658 = vadd.xlane.f32.xlu1 %v8657_v63  ;;  %v8562_v18 = vmul.f32 %v15932_v20, %v8526_v60 }
 0xf00   :  { %v8654_v58 = vsel %vm32_vm0, %v8562_v18, 0.0 }
 0xf01   :  { %8655 = vadd.xlane.f32.xlu0 %v8654_v58 }
 0xf27   :  { %v8569_v22 = vpop.xlane.xlu0 %8568 }
 0xf28   :  { %v8566_v26 = vpop.xlane.xlu1 %8565  ;;  %v8662_v16 = vadd.f32 %v16119_v52, %v8569_v22 }
 0xf29   :  { %v8661_v0 = vadd.f32 %v16119_v52, %v8566_v26 }
 0xf2a   :  { %v8732_v41 = vrot.slane %v8662_v16, %v13574_v19 }
 0xf2b   :  { %v8728_v27 = vrot.slane %v8661_v0, %v13577_v61 }
 0xf2c   :  { %v8575_v56 = vpop.xlane.xlu1 %8574  ;;  %v8572_v46 = vpop.xlane.xlu0 %8571 }
 0xf2d   :  { %v8664_v30 = vadd.f32 %v16119_v52, %v8575_v56  ;;  %v8663_v59 = vadd.f32 %v16119_v52, %v8572_v46  ;;  %v8733_v25 = vsel %vm2536_vm10, %v8732_v41, %v8728_v27 }
 0xf2f   :  { %v8741_v38 = vrot.slane %v8664_v30, %v13574_v19  ;;  %v8737_v51 = vrot.slane %v8663_v59, %v13577_v61 }
 0xf30   :  { %v8581_v20 = vpop.xlane.xlu1 %8580 }
 0xf31   :  { %v8578_v5 = vpop.xlane.xlu0 %8577  ;;  %v8666_v24 = vadd.f32 %v16119_v52, %v8581_v20  ;;  %v8742_v14 = vsel %vm2536_vm10, %v8741_v38, %v8737_v51 }
 0xf32   :  { %v8665_v10 = vadd.f32 %v16119_v52, %v8578_v5  ;;  %v8869_v43 = vsel %vm2673_vm2, %v8742_v14, %v8733_v25 }
 0xf33   :  { %v8750_v54 = vrot.slane %v8666_v24, %v13574_v19 }
 0xf34   :  { %v8746_v35 = vrot.slane %v8665_v10, %v13577_v61 }
 0xf36   :  { %v8587_v17 = vpop.xlane.xlu1 %8586  ;;  %v8751_v6 = vsel %vm2536_vm10, %v8750_v54, %v8746_v35 }
 0xf37   :  { %v8584_v13 = vpop.xlane.xlu0 %8583  ;;  %v8668_v7 = vadd.f32 %v16119_v52, %v8587_v17  ;;  %v8870_v58 = vsel %vm2675_vm3, %v8751_v6, %v8869_v43 }
 0xf38   :  { %v8667_v21 = vadd.f32 %v16119_v52, %v8584_v13 }
 0xf39   :  { %v8759_v36 = vrot.slane %v8668_v7, %v13574_v19 }
 0xf3a   :  { %v8593_v33 = vpop.xlane.xlu1 %8592  ;;  %v8755_v45 = vrot.slane %v8667_v21, %v13577_v61 }
 0xf3b   :  { %v8670_v1 = vadd.f32 %v16119_v52, %v8593_v33  ;;  %v10068_v33 = vld [vmem:[%s16289_s4 + $0x15] ss:$0 sm:$0xff] }
 0xf3c   :  { %v8590_v42 = vpop.xlane.xlu0 %8589  ;;  %v8760_v34 = vsel %vm2536_vm10, %v8759_v36, %v8755_v45 }
 0xf3d   :  { %v8669_v29 = vadd.f32 %v16119_v52, %v8590_v42  ;;  %v8768_v9 = vrot.slane %v8670_v1, %v13574_v19  ;;  %v8871_v22 = vsel %vm2677_vm4, %v8760_v34, %v8870_v58 }
 0xf3f   :  { %v8599_v39 = vpop.xlane.xlu1 %8598  ;;  %v8764_v15 = vrot.slane %v8669_v29, %v13577_v61 }
 0xf40   :  { %v8596_v28 = vpop.xlane.xlu0 %8595  ;;  %v8672_v37 = vadd.f32 %v16119_v52, %v8599_v39 }
 0xf41   :  { %v8671_v23 = vadd.f32 %v16119_v52, %v8596_v28  ;;  %v8769_v60 = vsel %vm2536_vm10, %v8768_v9, %v8764_v15 }
 0xf42   :  { %v8777_v47 = vrot.slane %v8672_v37, %v13574_v19  ;;  %v8872_v46 = vsel %vm2679_vm5, %v8769_v60, %v8871_v22 }
 0xf43   :  { %v8773_v57 = vrot.slane %v8671_v23, %v13577_v61 }
 0xf45   :  { %v8605_v3 = vpop.xlane.xlu1 %8604  ;;  %v8778_v62 = vsel %vm2536_vm10, %v8777_v47, %v8773_v57 }
 0xf46   :  { %v8602_v2 = vpop.xlane.xlu0 %8601  ;;  %v8674_v49 = vadd.f32 %v16119_v52, %v8605_v3  ;;  %v8873_v13 = vsel %vm2681_vm6, %v8778_v62, %v8872_v46 }
 0xf47   :  { %v8673_v4 = vadd.f32 %v16119_v52, %v8602_v2 }
 0xf48   :  { %v8786_v12 = vrot.slane %v8674_v49, %v13574_v19 }
 0xf49   :  { %v8782_v50 = vrot.slane %v8673_v4, %v13577_v61 }
 0xf4b   :  { %v8787_v26 = vsel %vm2536_vm10, %v8786_v12, %v8782_v50 }
 0xf4c   :  { %v8874_v39 = vsel %vm2683_vm7, %v8787_v26, %v8873_v13 }
 0xf61   :  { %v10915_v32 = vpop.f32.mrb[112].mxu1 }
 0xf62   :  { %v9298_v48 = vpop.f32.mrb[113].mxu1  ;;  %v16176_v21 = vadd.f32 %v10915_v32, %v10068_v33 }
 0xf63   :  { %v16173_v24 = vadd.f32 %v10068_v33, %v9298_v48 }
 0xf64   :  { %v10072_v1 = vmul.f32 -1.442695, %v16176_v21 }
 0xf65   :  { %v8611_v40 = vpop.xlane.xlu1 %8610  ;;  %v10071_v0 = vmul.f32 -1.442695, %v16173_v24 }
 0xf66   :  { %v8676_v63 = vadd.f32 %v16119_v52, %v8611_v40  ;;  %v8608_v18 = vpop.xlane.xlu0 %8607 }
 0xf67   :  { %v8675_v8 = vadd.f32 %v16119_v52, %v8608_v18  ;;  %12364 = vpow2.f32 %v10071_v0 }
 0xf68   :  { %v8795_v56 = vrot.slane %v8676_v63, %v13574_v19  ;;  %12366 = vpow2.f32 %v10072_v1  ;;  %v6335_v1 = vld [vmem:[%s16287_s2 + $0x1f0] sm:$0xff] }
 0xf69   :  { %v8791_v20 = vrot.slane %v8675_v8, %v13577_v61  ;;  %v8617_v5 = vpop.xlane.xlu1 %8616 }
 0xf6a   :  { %v8614_v17 = vpop.xlane.xlu0 %8613  ;;  %v8678_v27 = vadd.f32 %v16119_v52, %v8617_v5 }
 0xf6b   :  { %v8796_v42 = vsel %vm2536_vm10, %v8795_v56, %v8791_v20  ;;  %v8677_v36 = vadd.f32 %v16119_v52, %v8614_v17 }
 0xf6c   :  { %v8875_v28 = vsel %vm2685_vm8, %v8796_v42, %v8874_v39  ;;  %v8804_v60 = vrot.slane %v8678_v27, %v13574_v19  ;;  %v9411_v27 = vld [vmem:[%s16290_s5 + $0x8] sm:$0xff] }
 0xf6d   :  { %v8623_v30 = vpop.xlane.xlu1 %8622  ;;  %10894 = vmatprep.mubr.msk.f32.mxu0 %vm2696_vm11, %v8875_v28  ;;  %v8885_v59 = vsel %vm2696_vm11, %v8875_v28, 0.0  ;;  %v8800_v63 = vrot.slane %v8677_v36, %v13577_v61 }
 0xf6e   :  { %8886 = vadd.xlane.f32.xlu0 %v8885_v59  ;;  %v8620_v10 = vpop.xlane.xlu0 %8619  ;;  %v8680_v54 = vadd.f32 %v16119_v52, %v8623_v30 }
 0xf6f   :  { %v8679_v49 = vadd.f32 %v16119_v52, %v8620_v10  ;;  %v8805_v42 = vsel %vm2536_vm10, %v8804_v60, %v8800_v63 }
 0xf70   :  { %v8813_v48 = vrot.slane %v8680_v54, %v13574_v19 }
 0xf71   :  { %v8629_v16 = vpop.xlane.xlu1 %8628  ;;  %v12365_v51 = vpop.eup %12364  ;;  %v8809_v6 = vrot.slane %v8679_v49, %v13577_v61 }
 0xf72   :  { %v9313_v35 = vadd.f32 1.0, %v12365_v51  ;;  %v8682_v4 = vadd.f32 %v16119_v52, %v8629_v16  ;;  %v12367_v57 = vpop.eup %12366 }
 0xf73   :  { %v9314_v62 = vadd.f32 1.0, %v12367_v57  ;;  %v8814_v26 = vsel %vm2536_vm10, %v8813_v48, %v8809_v6 }
 0xf74   :  { %v8626_v7 = vpop.xlane.xlu0 %8625  ;;  %12368 = vrcp.f32 %v9313_v35  ;;  %v8822_v25 = vrot.slane %v8682_v4, %v13574_v19  ;;  %v8876_v28 = vsel %vm2673_vm2, %v8814_v26, %v8805_v42 }
 0xf75   :  { %v8635_v3 = vpop.xlane.xlu1 %8634  ;;  %v8681_v41 = vadd.f32 %v16119_v52, %v8626_v7  ;;  %12370 = vrcp.f32 %v9314_v62 }
 0xf76   :  { %v8684_v45 = vadd.f32 %v16119_v52, %v8635_v3 }
 0xf77   :  { %v8818_v34 = vrot.slane %v8681_v41, %v13577_v61 }
 0xf78   :  { %v8632_v2 = vpop.xlane.xlu0 %8631  ;;  %v8831_v18 = vrot.slane %v8684_v45, %v13574_v19 }
 0xf79   :  { %v8683_v32 = vadd.f32 %v16119_v52, %v8632_v2  ;;  %v8823_v5 = vsel %vm2536_vm10, %v8822_v25, %v8818_v34 }
 0xf7a   :  { %v8877_v10 = vsel %vm2675_vm3, %v8823_v5, %v8876_v28 }
 0xf7b   :  { %v8827_v58 = vrot.slane %v8683_v32, %v13577_v61 }
 0xf7c   :  { %v8641_v29 = vpop.xlane.xlu1 %8640 }
 0xf7d   :  { %v8638_v38 = vpop.xlane.xlu0 %8637  ;;  %v8686_v14 = vadd.f32 %v16119_v52, %v8641_v29  ;;  %v8832_v39 = vsel %vm2536_vm10, %v8831_v18, %v8827_v58  ;;  %v6336_v29 = vld [vmem:[%s16287_s2 + $0x1f8] sm:$0xff]  ;;  %v10076_v58 = vld [vmem:[%s16290_s5 + $0x20] ss:$0 sm:$0xff] }
 0xf7e   :  { %v8685_v47 = vadd.f32 %v16119_v52, %v8638_v38  ;;  %v8878_v3 = vsel %vm2677_vm4, %v8832_v39, %v8877_v10  ;;  %v12369_v38 = vpop.eup %12368  ;;  %v11122_v54 = vpack.c.bf16 %v6336_v29, %v6335_v1 }
 0xf7f   :  { %v8840_v8 = vrot.slane %v8686_v14, %v13574_v19  ;;  %v9319_v35 = vmul.f32 %v12369_v38, %v16173_v24  ;;  %v9410_v24 = vld [vmem:[%s16290_s5] sm:$0xff] }
 0xf80   :  { %v8647_v37 = vpop.xlane.xlu1 %8646  ;;  %v8836_v22 = vrot.slane %v8685_v47, %v13577_v61  ;;  %v11126_v36 = vpack.c.bf16 %v9411_v27, %v9410_v24 }
 0xf81   :  { %v8644_v23 = vpop.xlane.xlu0 %8643  ;;  %v8688_v12 = vadd.f32 %v16119_v52, %v8647_v37 }
 0xf82   :  { %v8687_v50 = vadd.f32 %v16119_v52, %v8644_v23  ;;  %v8841_v30 = vsel %vm2536_vm10, %v8840_v8, %v8836_v22 }
 0xf83   :  { %v8849_v56 = vrot.slane %v8688_v12, %v13574_v19  ;;  %v8879_v51 = vsel %vm2679_vm5, %v8841_v30, %v8878_v3 }
 0xf84   :  { %v8653_v9 = vpop.xlane.xlu1 %8652  ;;  %v8845_v46 = vrot.slane %v8687_v50, %v13577_v61 }
 0xf85   :  { %v8650_v15 = vpop.xlane.xlu0 %8649  ;;  %v8690_v40 = vadd.f32 %v16119_v52, %v8653_v9 }
 0xf86   :  { %v8689_v43 = vadd.f32 %v16119_v52, %v8650_v15  ;;  %v8850_v16 = vsel %vm2536_vm10, %v8849_v56, %v8845_v46 }
 0xf87   :  { %v8858_v17 = vrot.slane %v8690_v40, %v13574_v19 }
 0xf88   :  { %v8854_v13 = vrot.slane %v8689_v43, %v13577_v61  ;;  %v10075_v43 = vld [vmem:[%s16289_s4 + $0x16] ss:$0 sm:$0xff] }
 0xf8a   :  { %v8859_v2 = vsel %vm2536_vm10, %v8858_v17, %v8854_v13 }
 0xf8b   :  { %v8659_v20 = vpop.xlane.xlu1 %8658 }
 0xf8c   :  { %v8692_v33 = vadd.f32 %v16119_v52, %v8659_v20 }
 0xf8e   :  { %v8656_v59 = vpop.xlane.xlu0 %8655  ;;  %v8867_v0 = vrot.slane %v8692_v33, %v13574_v19  ;;  %v8880_v19 = vsel %vm2681_vm6, %v8850_v16, %v8879_v51 }
 0xf8f   :  { %v8691_v7 = vadd.f32 %v16119_v52, %v8656_v59  ;;  %v8881_v52 = vsel %vm2683_vm7, %v8859_v2, %v8880_v19 }
 0xf91   :  { %v8863_v37 = vrot.slane %v8691_v7, %v13577_v61  ;;  %v12371_v61 = vpop.eup %12370 }
 0xf92   :  { %v9320_v41 = vmul.f32 %v12371_v61, %v16176_v21  ;;  %v9413_v21 = vld [vmem:[%s16290_s5 + $0x18] sm:$0xff] }
 0xf93   :  { %v8868_v23 = vsel %vm2536_vm10, %v8867_v0, %v8863_v37 }
 0xf94   :  { %v8882_v49 = vsel %vm2685_vm8, %v8868_v23, %v8881_v52 }
 0xf95   :  { %10895 = vmatmul.mubr.msk.f32.vlgmr.msra.gmra.mrb[106].mxu0 %vm2696_vm11, %v8882_v49  ;;  %v8888_v4 = vsel %vm2696_vm11, %v8882_v49, 0.0 }
 0xf96   :  { %11121 = vmatpush3.bf16.msra.mxu0 %v16116_v11  ;;  %10924 = vmatprep.mubr.msk.f32.mxu0 %vm32_vm0, %v9319_v35  ;;  %v9412_v11 = vld [vmem:[%s16290_s5 + $0x10] sm:$0xff] }
 0xf97   :  { %8889 = vadd.xlane.f32.xlu1 %v8888_v4  ;;  %11123 = vmatprep.subr.bf16.mxu0 %v11122_v54  ;;  %v11130_v45 = vpack.c.bf16 %v9413_v21, %v9412_v11 }
 0xf9a   :  { %11125 = vmatpush3.bf16.msra.mxu0 %v11122_v54 }
 0xf9b   :  { %11127 = vmatprep.subr.bf16.mxu0 %v11126_v36 }
 0xf9d   :  { %10925 = vmatmul.mubr.msk.f32.vlgmr.msra.gmra.mrb[108].mxu0 %vm32_vm0, %v9320_v41 }
 0xf9e   :  { %11129 = vmatpush3.bf16.msra.mxu0 %v11126_v36 }
 0xf9f   :  { %11131 = vmatprep.subr.bf16.mxu0 %v11130_v45 }
 0xfa2   :  { %11133 = vmatpush3.bf16.msra.mxu0 %v11130_v45 }
 0xffb   :  { %v8887_v9 = vpop.xlane.xlu0 %8886 }
 0xffc   :  { %v8891_v48 = vmul.f32 %v8887_v9, %v14963_v55 }
0x1024   :  { %v8890_v32 = vpop.xlane.xlu1 %8889 }
0x1025   :  { %v8892_v15 = vmul.f32 %v8890_v32, %v14960_v53 }
0x1068   :  { %v10896_v14 = vpop.f32.mrb[106].mxu0 }
0x1069   :  { %v8973_v47 = vsub.f32 %v8892_v15, %v10896_v14  ;;  %v8963_v57 = vpop.f32.mrb[107].mxu0 }
0x106a   :  { %v8972_v6 = vsub.f32 %v8891_v48, %v8963_v57 }
0x106b   :  { %v8975_v12 = vmul.f32 0.06666667, %v8973_v47 }
0x106c   :  { %v8974_v50 = vmul.f32 0.06666667, %v8972_v6 }
0x106d   :  { %v8977_v25 = vadd.f32 %v8975_v12, %v14960_v53 }
0x106e   :  { %v8976_v34 = vadd.f32 %v8974_v50, %v14963_v55 }
0x106f   :  { %9504 = vst.msk [vmem:[%s16292_s7 + $0x8] sm:$0xff] %vm393_vm1, %v8977_v25 }
0x1070   :  { %9503 = vst.msk [vmem:[%s16292_s7] sm:$0xff] %vm393_vm1, %v8976_v34  ;;  %v10926_v40 = vpop.f32.mrb[108].mxu0  ;;  %s12401_s7 = smov [#allocation2]  }
0x1071   :  { %v9403_v60 = vadd.f32 %v10926_v40, %v14985_v44  ;;  %v9393_v53 = vpop.f32.mrb[109].mxu0  ;;  %s9510_s15 = sshll.u32 %s12401_s7, 4  ;;  %s9511_s15 = int_to_ptr.vmem [resolvable:$true] %s9510_s15 }
0x1072   :  { %v9402_v55 = vadd.f32 %v9393_v53, %v14981_v31  ;;  %s12374_s4 = scalar_lea.vmem %s9511_s15, 256  ;;  %p12379_p1 = scmp.lt.s32.totalorder %s9511_s15, %s9511_s15 }
0x1073   :  { %v9409_v18 = vadd.f32 %v10075_v43, %v9403_v60  ;;  %p12375_p0 = scmp.ne.s32.totalorder %s9511_s15, %s12374_s4  ;;  %p12380_p2 = scmp.lt.s32.totalorder %s12374_s4, %s12374_s4 }
0x1074   :  { %v9408_v63 = vadd.f32 %v10075_v43, %v9402_v55 }
0x1075   :  { %p12381_p3 = por %p12380_p2, %p12379_p1 }
0x1076   :  { %10935 = vmatprep.mubr.msk.f32.mxu0 %vm32_vm0, %v9408_v63 }
0x1077   :  { %10936 = vmatmul.mubr.msk.f32.vlgmr.msra.gmra.mrb[110].mxu0 %vm32_vm0, %v9409_v18  ;;  %p12382_p4 = pnand %p12381_p3, %p12375_p0 }
0x114a   :  { %v10937_v62 = vpop.f32.mrb[110].mxu0 }
0x114b   :  { %v9497_v8 = vadd.f32 %v10937_v62, %v10076_v58  ;;  %v9491_v22 = vpop.f32.mrb[111].mxu0 }
0x114c   :  { %v9492_v44 = vadd.f32 %v10076_v58, %v9491_v22 }
0x114d   :  { %9502 = vst.msk [vmem:[#allocation2 + $0x8] sm:$0xff] %vm9500_vm12, %v9497_v8 }
0x114e   :  { %9501 = vst.msk [vmem:[#allocation2] sm:$0xff] %vm9500_vm12, %v9492_v44 }
0x114f   :  { %12385 = shalt.err (!%p12382_p4)
}
0x1150   :  { %s12386_s5 = scalar_lea.hbm %s16291_s6, 256 }
0x1151   :  { %p12387_p5 = scmp.ne.s32.totalorder %s16291_s6, %s12386_s5  ;;  %p12390_p6 = scmp.lt.u32.totalorder %s12386_s5, %s16291_s6 }
0x1153   :  { %p12392_p7 = pnand %p12390_p6, %p12387_p5 }
0x1155   :  { %12395 = shalt.err (!%p12392_p7)
}
0x1156   :  { %s12402_s22 = smov 128   ;;  %s12403_s0 = smov 8  }
0x1157   :  { %9516 = dma.vmem_to_hbm [thread:$0]  %s9511_s15, 256, %s16291_s6, [#allocation3], %s12402_s22, %s12402_s22, %s12403_s0  }
0x1158   :  { %12396 = dma.done.wait [#allocation3], 256  }
0x1159   :  { %12397 = vsyncadd [#allocation3], 4294967040 }
0x115a   :  { %9524 = vsyncpa [#allocation3], 1 }

</bundles_post_ra>
